<compile_context>
chip_gen: v7x
topology: tpu7x:2x2x1
jax: 0.10.0
libtpu: 0.0.40
codegen_flags: <defaults>
</compile_context>

<pallas_src>
import jax
import jax.numpy as jnp
from jax import lax
from jax.experimental import pallas as pl
from jax.experimental.pallas import tpu as pltpu


_XL = 8  # left column pad of the spatially padded scratches (f32 sublane aligned)


# -----------------------------------------------------------------------------
# Fused kernel: one batch element per grid step, everything stays in VMEM.
# Activations are kept as 4 parity components P[ry*2+rx] of shape (HW, Cout),
# representing y[2*i+ry, 2*j+rx, :] = P[ry*2+rx][i*W+j, :], stored in-place in the
# output block.
# -----------------------------------------------------------------------------
def _decoder_block_kernel(x_ref, wt_ref, bt_ref,
                          w3a_ref, b3a_ref, w1a_ref, b1a_ref,
                          w3b_ref, b3b_ref, w1b_ref, b1b_ref,
                          out_ref, xpad_ref, ppad_ref):
    H, W, Cin = x_ref.shape[1], x_ref.shape[2], x_ref.shape[3]
    C = bt_ref.shape[1]
    HW = H * W
    Wp = xpad_ref.shape[1]           # == _XL + W + 1
    cdt = wt_ref.dtype               # MXU-input dtype (f32 or bf16)

    # ---- zero ONLY the halo border strips that shifted tap reads can touch; the
    # interiors are fully rewritten below.  Done per grid step (not under
    # pl.when(program_id == 0)) so a megacore split of the "parallel" batch axis,
    # where each TensorCore has its own scratch, stays correct.
    xpad_ref[0:1, :, :] = jnp.zeros((1, Wp, Cin), jnp.float32)
    xpad_ref[H + 1:H + 2, :, :] = jnp.zeros((1, Wp, Cin), jnp.float32)
    xpad_ref[:, _XL - 1:_XL, :] = jnp.zeros((H + 2, 1, Cin), jnp.float32)
    xpad_ref[:, _XL + W:_XL + W + 1, :] = jnp.zeros((H + 2, 1, Cin), jnp.float32)

    ppad_ref[:, 0:1, :, :] = jnp.zeros((4, 1, Wp, C), jnp.float32)
    ppad_ref[:, H + 1:H + 2, :, :] = jnp.zeros((4, 1, Wp, C), jnp.float32)
    ppad_ref[:, :, _XL - 1:_XL, :] = jnp.zeros((4, H + 2, 1, C), jnp.float32)
    ppad_ref[:, :, _XL + W:_XL + W + 1, :] = jnp.zeros((4, H + 2, 1, C), jnp.float32)

    # Sublane-aligned interior store of the input; the 1-pixel logical halo lives
    # at columns _XL-1 / _XL+W and rows 0 / H+1 (zeroed above).
    xpad_ref[1:H + 1, _XL:_XL + W, :] = x_ref[0]

    bt = bt_ref[...]

    # ---- stage 1: ConvTranspose2d(k=4, s=2, p=1) in sub-pixel (polyphase) form.
    # Output parity (ry, rx) (full-res pixel (2*i+ry, 2*j+rx)) reads a 2x2 window of
    # the 1-padded input; each of its 4 taps is one MXU matmul accumulated in f32
    # (no zero-inserted tensor, no im2col concat temporary).
    for ry in range(2):
        for rx in range(2):
            p = ry * 2 + rx
            acc = jnp.zeros((HW, C), jnp.float32)
            for dy in range(2):
                for dx in range(2):
                    win = xpad_ref[ry + dy:ry + dy + H,
                                   _XL - 1 + rx + dx:_XL - 1 + rx + dx + W,
                                   :].reshape(HW, Cin)
                    acc = acc + jnp.dot(win.astype(cdt),
                                        wt_ref[p * 4 + dy * 2 + dx],
                                        preferred_element_type=jnp.float32)
            out_ref[0, p] = acc + bt

    # ---- stages 2 & 3: two ResBlocks evaluated directly in the parity basis, in
    # place on the VMEM output block (the interleaved (2H, 2W, C) tensor is never
    # materialized inside the kernel).
    def resblock(w3_ref, b3_ref, w1_ref, b1_ref):
        b3 = b3_ref[...]
        b1 = b1_ref[...]
        w1 = w1_ref[...]
        # relu(x) of every parity, stored (sublane-aligned) into the zero-bordered
        # scratch: the zero halo reproduces the 3x3 conv's zero padding of the
        # full-resolution grid (relu(0) == 0, so padding after relu is fine).
        for k in range(4):
            ppad_ref[k, 1:H + 1, _XL:_XL + W, :] = (
                jnp.maximum(out_ref[0, k], 0.0).reshape(H, W, C))
        for ry in range(2):
            for rx in range(2):
                k = ry * 2 + rx
                h = jnp.zeros((HW, C), jnp.float32)
                # 3x3 conv as 9 tap-accumulated matmuls (K = C each).
                for dy in range(3):
                    py = (ry + dy - 1) % 2         # source parity (row)
                    sy = (ry + dy - 1 - py) // 2   # source parity-row shift
                    for dx in range(3):
                        px = (rx + dx - 1) % 2
                        sx = (rx + dx - 1 - px) // 2
                        tap = ppad_ref[py * 2 + px,
                                       1 + sy:1 + sy + H,
                                       _XL + sx:_XL + sx + W, :].reshape(HW, C)
                        h = h + jnp.dot(tap.astype(cdt), w3_ref[dy * 3 + dx],
                                        preferred_element_type=jnp.float32)
                h = jnp.maximum(h + b3, 0.0)
                out_ref[0, k] = (out_ref[0, k]
                                 + jnp.dot(h.astype(cdt), w1,
                                           preferred_element_type=jnp.float32)
                                 + b1)

    resblock(w3a_ref, b3a_ref, w1a_ref, b1a_ref)
    resblock(w3b_ref, b3b_ref, w1b_ref, b1b_ref)


# -----------------------------------------------------------------------------
# One-time weight re-layout (hoisted out of the forward path).
# PyTorch layouts:  wt (Cin, Cout, 4, 4) [ConvTranspose2d],
#                   w3 (C, C, 3, 3), w1 (C, C, 1, 1) [Conv2d].
# compute_dtype is the MXU-input dtype (use jnp.bfloat16 for full-rate MXU on
# v5e/v6e/v7x); accumulation / bias / residual math stays f32.
# -----------------------------------------------------------------------------
def prepare_params(params, compute_dtype=jnp.float32):
    wt = jnp.asarray(params["wt"], jnp.float32)
    bt = jnp.asarray(params["bt"], jnp.float32)

    # Sub-pixel taps: output parity (ry, rx), window offset (dy, dx) over the
    # 1-padded input uses ConvTranspose2d weight tap (3-2dy-ry, 3-2dx-rx).
    taps = []
    for ry in range(2):
        for rx in range(2):
            for dy in range(2):
                for dx in range(2):
                    taps.append(wt[:, :, 3 - 2 * dy - ry, 3 - 2 * dx - rx])
    wt_sub = jnp.stack(taps, axis=0).astype(compute_dtype)        # (16, Cin, Cout)

    def prep_res(p):
        w3 = jnp.asarray(p["w3"], jnp.float32)                    # (C, C, 3, 3)
        w1 = jnp.asarray(p["w1"], jnp.float32)                    # (C, C, 1, 1)
        w3r = jnp.stack([w3[:, :, dy, dx].T                       # (Cin, Cout)
                         for dy in range(3) for dx in range(3)],
                        axis=0).astype(compute_dtype)             # (9, C, C)
        return dict(w3=w3r,
                    b3=jnp.asarray(p["b3"], jnp.float32).reshape(1, -1),
                    w1=w1[:, :, 0, 0].T.astype(compute_dtype),
                    b1=jnp.asarray(p["b1"], jnp.float32).reshape(1, -1))

    return dict(wt=wt_sub, bt=bt.reshape(1, -1),
                res1=prep_res(params["res1"]), res2=prep_res(params["res2"]))


def _default_vmem_limit_bytes():
    # Explicit scoped-VMEM budget (defaults are only 16/32 MiB): ~100 MiB on
    # v5e/v6e (128 MiB physical), ~56 MiB on v7x (64 MiB physical).
    cap = 128 * 1024 * 1024
    try:
        cap = int(pltpu.get_tpu_info().vmem_capacity_bytes)
    except Exception:
        pass
    return max(32 * 1024 * 1024, min(100 * 1024 * 1024, cap - 8 * 1024 * 1024))


# -----------------------------------------------------------------------------
# DecoderBlock forward (NCHW in, NCHW out), single fused pallas_call.
# NOTE: the NCHW->NHWC entry transpose and the parity->NCHW exit interleave are
# full-tensor HBM passes; drop them if the surrounding network can stay in
# NHWC / parity layout between blocks.
# -----------------------------------------------------------------------------
def decoder_block(x_nchw, prep):
    cdt = prep["wt"].dtype
    x = jnp.transpose(x_nchw, (0, 2, 3, 1)).astype(jnp.float32)   # NCHW -> NHWC
    N, H, W, Cin = x.shape
    Cout = prep["bt"].shape[-1]
    HW = H * W
    Wp = _XL + W + 1
    r1, r2 = prep["res1"], prep["res2"]

    out = pl.pallas_call(
        _decoder_block_kernel,
        out_shape=jax.ShapeDtypeStruct((N, 4, HW, Cout), jnp.float32),
        grid=(N,),
        in_specs=[
            pl.BlockSpec((1, H, W, Cin), lambda n: (n, 0, 0, 0)),
            pl.BlockSpec((16, Cin, Cout), lambda n: (0, 0, 0)),
            pl.BlockSpec((1, Cout), lambda n: (0, 0)),
            pl.BlockSpec((9, Cout, Cout), lambda n: (0, 0, 0)),
            pl.BlockSpec((1, Cout), lambda n: (0, 0)),
            pl.BlockSpec((Cout, Cout), lambda n: (0, 0)),
            pl.BlockSpec((1, Cout), lambda n: (0, 0)),
            pl.BlockSpec((9, Cout, Cout), lambda n: (0, 0, 0)),
            pl.BlockSpec((1, Cout), lambda n: (0, 0)),
            pl.BlockSpec((Cout, Cout), lambda n: (0, 0)),
            pl.BlockSpec((1, Cout), lambda n: (0, 0)),
        ],
        out_specs=pl.BlockSpec((1, 4, HW, Cout), lambda n: (n, 0, 0, 0)),
        scratch_shapes=[
            pltpu.VMEM((H + 2, Wp, Cin), jnp.float32),        # padded input
            pltpu.VMEM((4, H + 2, Wp, Cout), jnp.float32),    # padded relu comps
        ],
        compiler_params=pltpu.CompilerParams(
            dimension_semantics=("parallel",),
            vmem_limit_bytes=_default_vmem_limit_bytes()),
    )(x, prep["wt"], prep["bt"],
      r1["w3"], r1["b3"], r1["w1"], r1["b1"],
      r2["w3"], r2["b3"], r2["w1"], r2["b1"])

    # Parity components -> interleaved NCHW (single XLA transpose on final output).
    out = out.reshape(N, 2, 2, H, W, Cout)
    out = jnp.transpose(out, (0, 5, 3, 1, 4, 2)).reshape(N, Cout, 2 * H, 2 * W)
    return out


# -----------------------------------------------------------------------------
# Pure-JAX/XLA reference (same math as the PyTorch module), for verification.
# -----------------------------------------------------------------------------
def decoder_block_reference(x_nchw, params):
    hp = lax.Precision.HIGHEST
    wt = params["wt"]                                             # (Cin, Cout, 4, 4)
    w = jnp.transpose(wt[:, :, ::-1, ::-1], (1, 0, 2, 3))         # (Cout, Cin, 4, 4)
    y = lax.conv_general_dilated(
        x_nchw.astype(jnp.float32), w, window_strides=(1, 1),
        padding=((2, 2), (2, 2)), lhs_dilation=(2, 2),
        dimension_numbers=("NCHW", "OIHW", "NCHW"), precision=hp)
    y = y + params["bt"].reshape(1, -1, 1, 1)

    def res(y, p):
        h = jnp.maximum(y, 0.0)
        h = lax.conv_general_dilated(
            h, p["w3"], (1, 1), ((1, 1), (1, 1)),
            dimension_numbers=("NCHW", "OIHW", "NCHW"), precision=hp)
        h = jnp.maximum(h + p["b3"].reshape(1, -1, 1, 1), 0.0)
        h = lax.conv_general_dilated(
            h, p["w1"], (1, 1), ((0, 0), (0, 0)),
            dimension_numbers=("NCHW", "OIHW", "NCHW"), precision=hp)
        return y + h + p["b1"].reshape(1, -1, 1, 1)

    y = res(y, params["res1"])
    y = res(y, params["res2"])
    return y


if __name__ == "__main__":
    N, Cin, H, W = 2, 4, 8, 8
    Cout = 8

    key = jax.random.PRNGKey(0)
    ks = jax.random.split(key, 11)

    def uinit(k, shape, fan_in):
        bound = 1.0 / float(fan_in) ** 0.5
        return jax.random.uniform(k, shape, jnp.float32, -bound, bound)

    params = {
        "wt": uinit(ks[1], (Cin, Cout, 4, 4), Cin * 16),
        "bt": uinit(ks[2], (Cout,), Cin * 16),
        "res1": {
            "w3": uinit(ks[3], (Cout, Cout, 3, 3), Cout * 9),
            "b3": uinit(ks[4], (Cout,), Cout * 9),
            "w1": uinit(ks[5], (Cout, Cout, 1, 1), Cout),
            "b1": uinit(ks[6], (Cout,), Cout),
        },
        "res2": {
            "w3": uinit(ks[7], (Cout, Cout, 3, 3), Cout * 9),
            "b3": uinit(ks[8], (Cout,), Cout * 9),
            "w1": uinit(ks[9], (Cout, Cout, 1, 1), Cout),
            "b1": uinit(ks[10], (Cout,), Cout),
        },
    }

    x = jax.random.normal(ks[0], (N, Cin, H, W), jnp.float32)

    ref = decoder_block_reference(x, params)
    fwd = jax.jit(decoder_block)

    # f32 MXU inputs: bit-faithful to the f32 PyTorch numerics.
    prep_f32 = prepare_params(params, compute_dtype=jnp.float32)
    out_f32 = jax.block_until_ready(fwd(x, prep_f32))
    assert out_f32.shape == (N, Cout, 2 * H, 2 * W), out_f32.shape
    assert bool(jnp.all(jnp.isfinite(out_f32)))
    err_f32 = float(jnp.max(jnp.abs(out_f32 - ref)))
    assert err_f32 < 1e-3, f"f32 max abs error vs reference: {err_f32}"

    # bf16 MXU inputs (f32 accumulation): the full-rate MXU path on v5e/v6e/v7x.
    prep_bf16 = prepare_params(params, compute_dtype=jnp.bfloat16)
    out_bf16 = jax.block_until_ready(fwd(x, prep_bf16))
    assert bool(jnp.all(jnp.isfinite(out_bf16)))
    err_bf16 = float(jnp.max(jnp.abs(out_bf16 - ref)))
    assert err_bf16 < 5e-2, f"bf16 max abs error vs reference: {err_bf16}"

    print("KERNEL_OK")
</pallas_src>

<mosaic_0001>
module attributes {stable_mosaic.version = 11 : i64} {
  func.func @_decoder_block_kernel(%arg0: i32, %arg1: memref<1x8x8x4xf32, #tpu.memory_space<vmem>>, %arg2: memref<16x4x8xf32, #tpu.memory_space<vmem>>, %arg3: memref<1x8xf32, #tpu.memory_space<vmem>>, %arg4: memref<9x8x8xf32, #tpu.memory_space<vmem>>, %arg5: memref<1x8xf32, #tpu.memory_space<vmem>>, %arg6: memref<8x8xf32, #tpu.memory_space<vmem>>, %arg7: memref<1x8xf32, #tpu.memory_space<vmem>>, %arg8: memref<9x8x8xf32, #tpu.memory_space<vmem>>, %arg9: memref<1x8xf32, #tpu.memory_space<vmem>>, %arg10: memref<8x8xf32, #tpu.memory_space<vmem>>, %arg11: memref<1x8xf32, #tpu.memory_space<vmem>>, %arg12: memref<1x4x64x8xf32, #tpu.memory_space<vmem>>, %arg13: memref<10x17x4xf32, #tpu.memory_space<vmem>>, %arg14: memref<4x10x17x8xf32, #tpu.memory_space<vmem>>) attributes {dimension_semantics = [#tpu.dimension_semantics<parallel>], iteration_bounds = array<i64: 2>, scalar_prefetch = 0 : i64, scratch_operands = 2 : i64, tpu.core_type = #tpu.core_type<tc>, window_params = [{transform_indices = @transform_0, window_bounds = array<i64: 1, 8, 8, 4>}, {pipeline_mode = #tpu.pipeline_mode<synchronous>, transform_indices = @transform_1, window_bounds = array<i64: 16, 4, 8>}, {pipeline_mode = #tpu.pipeline_mode<synchronous>, transform_indices = @transform_2, window_bounds = array<i64: 1, 8>}, {pipeline_mode = #tpu.pipeline_mode<synchronous>, transform_indices = @transform_3, window_bounds = array<i64: 9, 8, 8>}, {pipeline_mode = #tpu.pipeline_mode<synchronous>, transform_indices = @transform_4, window_bounds = array<i64: 1, 8>}, {pipeline_mode = #tpu.pipeline_mode<synchronous>, transform_indices = @transform_5, window_bounds = array<i64: 8, 8>}, {pipeline_mode = #tpu.pipeline_mode<synchronous>, transform_indices = @transform_6, window_bounds = array<i64: 1, 8>}, {pipeline_mode = #tpu.pipeline_mode<synchronous>, transform_indices = @transform_7, window_bounds = array<i64: 9, 8, 8>}, {pipeline_mode = #tpu.pipeline_mode<synchronous>, transform_indices = @transform_8, window_bounds = array<i64: 1, 8>}, {pipeline_mode = #tpu.pipeline_mode<synchronous>, transform_indices = @transform_9, window_bounds = array<i64: 8, 8>}, {pipeline_mode = #tpu.pipeline_mode<synchronous>, transform_indices = @transform_10, window_bounds = array<i64: 1, 8>}, {transform_indices = @transform_11, window_bounds = array<i64: 1, 4, 64, 8>}]} {
    %cst = arith.constant 0.000000e+00 : f32
    %0 = vector.broadcast %cst : f32 to vector<1x17x4xf32>
    %c0 = arith.constant 0 : index
    %c0_0 = arith.constant 0 : index
    %c0_1 = arith.constant 0 : index
    %1 = vector.load %arg13[%c0, %c0_0, %c0_1] : memref<10x17x4xf32, #tpu.memory_space<vmem>>, vector<1x17x4xf32>
    tpu.vector_store %arg13[%c0, %c0_0, %c0_1], %0 {strides = array<i32>} : memref<10x17x4xf32, #tpu.memory_space<vmem>>, vector<1x17x4xf32>,
    %cst_2 = arith.constant 0.000000e+00 : f32
    %2 = vector.broadcast %cst_2 : f32 to vector<1x17x4xf32>
    %c9 = arith.constant 9 : index
    %c0_3 = arith.constant 0 : index
    %c0_4 = arith.constant 0 : index
    %3 = vector.load %arg13[%c9, %c0_3, %c0_4] : memref<10x17x4xf32, #tpu.memory_space<vmem>>, vector<1x17x4xf32>
    tpu.vector_store %arg13[%c9, %c0_3, %c0_4], %2 {strides = array<i32>} : memref<10x17x4xf32, #tpu.memory_space<vmem>>, vector<1x17x4xf32>,
    %cst_5 = arith.constant 0.000000e+00 : f32
    %4 = vector.broadcast %cst_5 : f32 to vector<10x1x4xf32>
    %c0_6 = arith.constant 0 : index
    %c7 = arith.constant 7 : index
    %c0_7 = arith.constant 0 : index
    %5 = vector.load %arg13[%c0_6, %c7, %c0_7] : memref<10x17x4xf32, #tpu.memory_space<vmem>>, vector<10x1x4xf32>
    tpu.vector_store %arg13[%c0_6, %c7, %c0_7], %4 {strides = array<i32>} : memref<10x17x4xf32, #tpu.memory_space<vmem>>, vector<10x1x4xf32>,
    %cst_8 = arith.constant 0.000000e+00 : f32
    %6 = vector.broadcast %cst_8 : f32 to vector<10x1x4xf32>
    %c0_9 = arith.constant 0 : index
    %c16 = arith.constant 16 : index
    %c0_10 = arith.constant 0 : index
    %7 = vector.load %arg13[%c0_9, %c16, %c0_10] : memref<10x17x4xf32, #tpu.memory_space<vmem>>, vector<10x1x4xf32>
    tpu.vector_store %arg13[%c0_9, %c16, %c0_10], %6 {strides = array<i32>} : memref<10x17x4xf32, #tpu.memory_space<vmem>>, vector<10x1x4xf32>,
    %cst_11 = arith.constant 0.000000e+00 : f32
    %8 = vector.broadcast %cst_11 : f32 to vector<4x1x17x8xf32>
    %c0_12 = arith.constant 0 : index
    %c0_13 = arith.constant 0 : index
    %c0_14 = arith.constant 0 : index
    %c0_15 = arith.constant 0 : index
    %9 = vector.load %arg14[%c0_12, %c0_13, %c0_14, %c0_15] : memref<4x10x17x8xf32, #tpu.memory_space<vmem>>, vector<4x1x17x8xf32>
    tpu.vector_store %arg14[%c0_12, %c0_13, %c0_14, %c0_15], %8 {strides = array<i32>} : memref<4x10x17x8xf32, #tpu.memory_space<vmem>>, vector<4x1x17x8xf32>,
    %cst_16 = arith.constant 0.000000e+00 : f32
    %10 = vector.broadcast %cst_16 : f32 to vector<4x1x17x8xf32>
    %c0_17 = arith.constant 0 : index
    %c9_18 = arith.constant 9 : index
    %c0_19 = arith.constant 0 : index
    %c0_20 = arith.constant 0 : index
    %11 = vector.load %arg14[%c0_17, %c9_18, %c0_19, %c0_20] : memref<4x10x17x8xf32, #tpu.memory_space<vmem>>, vector<4x1x17x8xf32>
    tpu.vector_store %arg14[%c0_17, %c9_18, %c0_19, %c0_20], %10 {strides = array<i32>} : memref<4x10x17x8xf32, #tpu.memory_space<vmem>>, vector<4x1x17x8xf32>,
    %cst_21 = arith.constant 0.000000e+00 : f32
    %12 = vector.broadcast %cst_21 : f32 to vector<4x10x1x8xf32>
    %c0_22 = arith.constant 0 : index
    %c0_23 = arith.constant 0 : index
    %c7_24 = arith.constant 7 : index
    %c0_25 = arith.constant 0 : index
    %13 = vector.load %arg14[%c0_22, %c0_23, %c7_24, %c0_25] : memref<4x10x17x8xf32, #tpu.memory_space<vmem>>, vector<4x10x1x8xf32>
    tpu.vector_store %arg14[%c0_22, %c0_23, %c7_24, %c0_25], %12 {strides = array<i32>} : memref<4x10x17x8xf32, #tpu.memory_space<vmem>>, vector<4x10x1x8xf32>,
    %cst_26 = arith.constant 0.000000e+00 : f32
    %14 = vector.broadcast %cst_26 : f32 to vector<4x10x1x8xf32>
    %c0_27 = arith.constant 0 : index
    %c0_28 = arith.constant 0 : index
    %c16_29 = arith.constant 16 : index
    %c0_30 = arith.constant 0 : index
    %15 = vector.load %arg14[%c0_27, %c0_28, %c16_29, %c0_30] : memref<4x10x17x8xf32, #tpu.memory_space<vmem>>, vector<4x10x1x8xf32>
    tpu.vector_store %arg14[%c0_27, %c0_28, %c16_29, %c0_30], %14 {strides = array<i32>} : memref<4x10x17x8xf32, #tpu.memory_space<vmem>>, vector<4x10x1x8xf32>,
    %c0_31 = arith.constant 0 : index
    %c0_32 = arith.constant 0 : index
    %c0_33 = arith.constant 0 : index
    %c0_34 = arith.constant 0 : index
    %16 = vector.load %arg1[%c0_31, %c0_32, %c0_33, %c0_34] : memref<1x8x8x4xf32, #tpu.memory_space<vmem>>, vector<1x8x8x4xf32>
    %17 = vector.shape_cast %16 : vector<1x8x8x4xf32> to vector<8x8x4xf32>
    %c1 = arith.constant 1 : index
    %c8 = arith.constant 8 : index
    %c0_35 = arith.constant 0 : index
    %18 = vector.load %arg13[%c1, %c8, %c0_35] : memref<10x17x4xf32, #tpu.memory_space<vmem>>, vector<8x8x4xf32>
    tpu.vector_store %arg13[%c1, %c8, %c0_35], %17 {strides = array<i32>} : memref<10x17x4xf32, #tpu.memory_space<vmem>>, vector<8x8x4xf32>,
    %c0_36 = arith.constant 0 : index
    %c0_37 = arith.constant 0 : index
    %19 = vector.load %arg3[%c0_36, %c0_37] : memref<1x8xf32, #tpu.memory_space<vmem>>, vector<1x8xf32>
    %cst_38 = arith.constant 0.000000e+00 : f32
    %20 = vector.broadcast %cst_38 : f32 to vector<64x8xf32>
    %c0_39 = arith.constant 0 : index
    %c7_40 = arith.constant 7 : index
    %c0_41 = arith.constant 0 : index
    %21 = vector.load %arg13[%c0_39, %c7_40, %c0_41] : memref<10x17x4xf32, #tpu.memory_space<vmem>>, vector<8x8x4xf32>
    %22 = vector.shape_cast %21 : vector<8x8x4xf32> to vector<64x4xf32>
    %c0_42 = arith.constant 0 : index
    %c0_43 = arith.constant 0 : index
    %c0_44 = arith.constant 0 : index
    %23 = vector.load %arg2[%c0_42, %c0_43, %c0_44] : memref<16x4x8xf32, #tpu.memory_space<vmem>>, vector<1x4x8xf32>
    %24 = vector.shape_cast %23 : vector<1x4x8xf32> to vector<4x8xf32>
    %cst_45 = arith.constant dense<0.000000e+00> : vector<64x8xf32>
    %25 = tpu.matmul %22, %24, %cst_45 {dimension_numbers = #tpu.dot_dimension_numbers<[1], [0], [0], [1], [0, 0, 1, 1], [], []>} : vector<64x4xf32>, vector<4x8xf32>, vector<64x8xf32> -> vector<64x8xf32>
    %26 = arith.addf %20, %25 : vector<64x8xf32>
    %c0_46 = arith.constant 0 : index
    %c8_47 = arith.constant 8 : index
    %c0_48 = arith.constant 0 : index
    %27 = vector.load %arg13[%c0_46, %c8_47, %c0_48] : memref<10x17x4xf32, #tpu.memory_space<vmem>>, vector<8x8x4xf32>
    %28 = vector.shape_cast %27 : vector<8x8x4xf32> to vector<64x4xf32>
    %c1_49 = arith.constant 1 : index
    %c0_50 = arith.constant 0 : index
    %c0_51 = arith.constant 0 : index
    %29 = vector.load %arg2[%c1_49, %c0_50, %c0_51] : memref<16x4x8xf32, #tpu.memory_space<vmem>>, vector<1x4x8xf32>
    %30 = vector.shape_cast %29 : vector<1x4x8xf32> to vector<4x8xf32>
    %cst_52 = arith.constant dense<0.000000e+00> : vector<64x8xf32>
    %31 = tpu.matmul %28, %30, %cst_52 {dimension_numbers = #tpu.dot_dimension_numbers<[1], [0], [0], [1], [0, 0, 1, 1], [], []>} : vector<64x4xf32>, vector<4x8xf32>, vector<64x8xf32> -> vector<64x8xf32>
    %32 = arith.addf %26, %31 : vector<64x8xf32>
    %c1_53 = arith.constant 1 : index
    %c7_54 = arith.constant 7 : index
    %c0_55 = arith.constant 0 : index
    %33 = vector.load %arg13[%c1_53, %c7_54, %c0_55] : memref<10x17x4xf32, #tpu.memory_space<vmem>>, vector<8x8x4xf32>
    %34 = vector.shape_cast %33 : vector<8x8x4xf32> to vector<64x4xf32>
    %c2 = arith.constant 2 : index
    %c0_56 = arith.constant 0 : index
    %c0_57 = arith.constant 0 : index
    %35 = vector.load %arg2[%c2, %c0_56, %c0_57] : memref<16x4x8xf32, #tpu.memory_space<vmem>>, vector<1x4x8xf32>
    %36 = vector.shape_cast %35 : vector<1x4x8xf32> to vector<4x8xf32>
    %cst_58 = arith.constant dense<0.000000e+00> : vector<64x8xf32>
    %37 = tpu.matmul %34, %36, %cst_58 {dimension_numbers = #tpu.dot_dimension_numbers<[1], [0], [0], [1], [0, 0, 1, 1], [], []>} : vector<64x4xf32>, vector<4x8xf32>, vector<64x8xf32> -> vector<64x8xf32>
    %38 = arith.addf %32, %37 : vector<64x8xf32>
    %c1_59 = arith.constant 1 : index
    %c8_60 = arith.constant 8 : index
    %c0_61 = arith.constant 0 : index
    %39 = vector.load %arg13[%c1_59, %c8_60, %c0_61] : memref<10x17x4xf32, #tpu.memory_space<vmem>>, vector<8x8x4xf32>
    %40 = vector.shape_cast %39 : vector<8x8x4xf32> to vector<64x4xf32>
    %c3 = arith.constant 3 : index
    %c0_62 = arith.constant 0 : index
    %c0_63 = arith.constant 0 : index
    %41 = vector.load %arg2[%c3, %c0_62, %c0_63] : memref<16x4x8xf32, #tpu.memory_space<vmem>>, vector<1x4x8xf32>
    %42 = vector.shape_cast %41 : vector<1x4x8xf32> to vector<4x8xf32>
    %cst_64 = arith.constant dense<0.000000e+00> : vector<64x8xf32>
    %43 = tpu.matmul %40, %42, %cst_64 {dimension_numbers = #tpu.dot_dimension_numbers<[1], [0], [0], [1], [0, 0, 1, 1], [], []>} : vector<64x4xf32>, vector<4x8xf32>, vector<64x8xf32> -> vector<64x8xf32>
    %44 = arith.addf %38, %43 : vector<64x8xf32>
    %45 = vector.broadcast %19 : vector<1x8xf32> to vector<64x8xf32>
    %46 = arith.addf %44, %45 : vector<64x8xf32>
    %c0_65 = arith.constant 0 : index
    %c0_66 = arith.constant 0 : index
    %c0_67 = arith.constant 0 : index
    %c0_68 = arith.constant 0 : index
    %47 = vector.load %arg12[%c0_65, %c0_66, %c0_67, %c0_68] : memref<1x4x64x8xf32, #tpu.memory_space<vmem>>, vector<1x1x64x8xf32>
    %48 = vector.shape_cast %47 : vector<1x1x64x8xf32> to vector<64x8xf32>
    %49 = vector.shape_cast %46 : vector<64x8xf32> to vector<1x1x64x8xf32>
    tpu.vector_store %arg12[%c0_65, %c0_66, %c0_67, %c0_68], %49 {strides = array<i32>} : memref<1x4x64x8xf32, #tpu.memory_space<vmem>>, vector<1x1x64x8xf32>,
    %cst_69 = arith.constant 0.000000e+00 : f32
    %50 = vector.broadcast %cst_69 : f32 to vector<64x8xf32>
    %c0_70 = arith.constant 0 : index
    %c8_71 = arith.constant 8 : index
    %c0_72 = arith.constant 0 : index
    %51 = vector.load %arg13[%c0_70, %c8_71, %c0_72] : memref<10x17x4xf32, #tpu.memory_space<vmem>>, vector<8x8x4xf32>
    %52 = vector.shape_cast %51 : vector<8x8x4xf32> to vector<64x4xf32>
    %c4 = arith.constant 4 : index
    %c0_73 = arith.constant 0 : index
    %c0_74 = arith.constant 0 : index
    %53 = vector.load %arg2[%c4, %c0_73, %c0_74] : memref<16x4x8xf32, #tpu.memory_space<vmem>>, vector<1x4x8xf32>
    %54 = vector.shape_cast %53 : vector<1x4x8xf32> to vector<4x8xf32>
    %cst_75 = arith.constant dense<0.000000e+00> : vector<64x8xf32>
    %55 = tpu.matmul %52, %54, %cst_75 {dimension_numbers = #tpu.dot_dimension_numbers<[1], [0], [0], [1], [0, 0, 1, 1], [], []>} : vector<64x4xf32>, vector<4x8xf32>, vector<64x8xf32> -> vector<64x8xf32>
    %56 = arith.addf %50, %55 : vector<64x8xf32>
    %c0_76 = arith.constant 0 : index
    %c9_77 = arith.constant 9 : index
    %c0_78 = arith.constant 0 : index
    %57 = vector.load %arg13[%c0_76, %c9_77, %c0_78] : memref<10x17x4xf32, #tpu.memory_space<vmem>>, vector<8x8x4xf32>
    %58 = vector.shape_cast %57 : vector<8x8x4xf32> to vector<64x4xf32>
    %c5 = arith.constant 5 : index
    %c0_79 = arith.constant 0 : index
    %c0_80 = arith.constant 0 : index
    %59 = vector.load %arg2[%c5, %c0_79, %c0_80] : memref<16x4x8xf32, #tpu.memory_space<vmem>>, vector<1x4x8xf32>
    %60 = vector.shape_cast %59 : vector<1x4x8xf32> to vector<4x8xf32>
    %cst_81 = arith.constant dense<0.000000e+00> : vector<64x8xf32>
    %61 = tpu.matmul %58, %60, %cst_81 {dimension_numbers = #tpu.dot_dimension_numbers<[1], [0], [0], [1], [0, 0, 1, 1], [], []>} : vector<64x4xf32>, vector<4x8xf32>, vector<64x8xf32> -> vector<64x8xf32>
    %62 = arith.addf %56, %61 : vector<64x8xf32>
    %c1_82 = arith.constant 1 : index
    %c8_83 = arith.constant 8 : index
    %c0_84 = arith.constant 0 : index
    %63 = vector.load %arg13[%c1_82, %c8_83, %c0_84] : memref<10x17x4xf32, #tpu.memory_space<vmem>>, vector<8x8x4xf32>
    %64 = vector.shape_cast %63 : vector<8x8x4xf32> to vector<64x4xf32>
    %c6 = arith.constant 6 : index
    %c0_85 = arith.constant 0 : index
    %c0_86 = arith.constant 0 : index
    %65 = vector.load %arg2[%c6, %c0_85, %c0_86] : memref<16x4x8xf32, #tpu.memory_space<vmem>>, vector<1x4x8xf32>
    %66 = vector.shape_cast %65 : vector<1x4x8xf32> to vector<4x8xf32>
    %cst_87 = arith.constant dense<0.000000e+00> : vector<64x8xf32>
    %67 = tpu.matmul %64, %66, %cst_87 {dimension_numbers = #tpu.dot_dimension_numbers<[1], [0], [0], [1], [0, 0, 1, 1], [], []>} : vector<64x4xf32>, vector<4x8xf32>, vector<64x8xf32> -> vector<64x8xf32>
    %68 = arith.addf %62, %67 : vector<64x8xf32>
    %c1_88 = arith.constant 1 : index
    %c9_89 = arith.constant 9 : index
    %c0_90 = arith.constant 0 : index
    %69 = vector.load %arg13[%c1_88, %c9_89, %c0_90] : memref<10x17x4xf32, #tpu.memory_space<vmem>>, vector<8x8x4xf32>
    %70 = vector.shape_cast %69 : vector<8x8x4xf32> to vector<64x4xf32>
    %c7_91 = arith.constant 7 : index
    %c0_92 = arith.constant 0 : index
    %c0_93 = arith.constant 0 : index
    %71 = vector.load %arg2[%c7_91, %c0_92, %c0_93] : memref<16x4x8xf32, #tpu.memory_space<vmem>>, vector<1x4x8xf32>
    %72 = vector.shape_cast %71 : vector<1x4x8xf32> to vector<4x8xf32>
    %cst_94 = arith.constant dense<0.000000e+00> : vector<64x8xf32>
    %73 = tpu.matmul %70, %72, %cst_94 {dimension_numbers = #tpu.dot_dimension_numbers<[1], [0], [0], [1], [0, 0, 1, 1], [], []>} : vector<64x4xf32>, vector<4x8xf32>, vector<64x8xf32> -> vector<64x8xf32>
    %74 = arith.addf %68, %73 : vector<64x8xf32>
    %75 = vector.broadcast %19 : vector<1x8xf32> to vector<64x8xf32>
    %76 = arith.addf %74, %75 : vector<64x8xf32>
    %c0_95 = arith.constant 0 : index
    %c1_96 = arith.constant 1 : index
    %c0_97 = arith.constant 0 : index
    %c0_98 = arith.constant 0 : index
    %77 = vector.load %arg12[%c0_95, %c1_96, %c0_97, %c0_98] : memref<1x4x64x8xf32, #tpu.memory_space<vmem>>, vector<1x1x64x8xf32>
    %78 = vector.shape_cast %77 : vector<1x1x64x8xf32> to vector<64x8xf32>
    %79 = vector.shape_cast %76 : vector<64x8xf32> to vector<1x1x64x8xf32>
    tpu.vector_store %arg12[%c0_95, %c1_96, %c0_97, %c0_98], %79 {strides = array<i32>} : memref<1x4x64x8xf32, #tpu.memory_space<vmem>>, vector<1x1x64x8xf32>,
    %cst_99 = arith.constant 0.000000e+00 : f32
    %80 = vector.broadcast %cst_99 : f32 to vector<64x8xf32>
    %c1_100 = arith.constant 1 : index
    %c7_101 = arith.constant 7 : index
    %c0_102 = arith.constant 0 : index
    %81 = vector.load %arg13[%c1_100, %c7_101, %c0_102] : memref<10x17x4xf32, #tpu.memory_space<vmem>>, vector<8x8x4xf32>
    %82 = vector.shape_cast %81 : vector<8x8x4xf32> to vector<64x4xf32>
    %c8_103 = arith.constant 8 : index
    %c0_104 = arith.constant 0 : index
    %c0_105 = arith.constant 0 : index
    %83 = vector.load %arg2[%c8_103, %c0_104, %c0_105] : memref<16x4x8xf32, #tpu.memory_space<vmem>>, vector<1x4x8xf32>
    %84 = vector.shape_cast %83 : vector<1x4x8xf32> to vector<4x8xf32>
    %cst_106 = arith.constant dense<0.000000e+00> : vector<64x8xf32>
    %85 = tpu.matmul %82, %84, %cst_106 {dimension_numbers = #tpu.dot_dimension_numbers<[1], [0], [0], [1], [0, 0, 1, 1], [], []>} : vector<64x4xf32>, vector<4x8xf32>, vector<64x8xf32> -> vector<64x8xf32>
    %86 = arith.addf %80, %85 : vector<64x8xf32>
    %c1_107 = arith.constant 1 : index
    %c8_108 = arith.constant 8 : index
    %c0_109 = arith.constant 0 : index
    %87 = vector.load %arg13[%c1_107, %c8_108, %c0_109] : memref<10x17x4xf32, #tpu.memory_space<vmem>>, vector<8x8x4xf32>
    %88 = vector.shape_cast %87 : vector<8x8x4xf32> to vector<64x4xf32>
    %c9_110 = arith.constant 9 : index
    %c0_111 = arith.constant 0 : index
    %c0_112 = arith.constant 0 : index
    %89 = vector.load %arg2[%c9_110, %c0_111, %c0_112] : memref<16x4x8xf32, #tpu.memory_space<vmem>>, vector<1x4x8xf32>
    %90 = vector.shape_cast %89 : vector<1x4x8xf32> to vector<4x8xf32>
    %cst_113 = arith.constant dense<0.000000e+00> : vector<64x8xf32>
    %91 = tpu.matmul %88, %90, %cst_113 {dimension_numbers = #tpu.dot_dimension_numbers<[1], [0], [0], [1], [0, 0, 1, 1], [], []>} : vector<64x4xf32>, vector<4x8xf32>, vector<64x8xf32> -> vector<64x8xf32>
    %92 = arith.addf %86, %91 : vector<64x8xf32>
    %c2_114 = arith.constant 2 : index
    %c7_115 = arith.constant 7 : index
    %c0_116 = arith.constant 0 : index
    %93 = vector.load %arg13[%c2_114, %c7_115, %c0_116] : memref<10x17x4xf32, #tpu.memory_space<vmem>>, vector<8x8x4xf32>
    %94 = vector.shape_cast %93 : vector<8x8x4xf32> to vector<64x4xf32>
    %c10 = arith.constant 10 : index
    %c0_117 = arith.constant 0 : index
    %c0_118 = arith.constant 0 : index
    %95 = vector.load %arg2[%c10, %c0_117, %c0_118] : memref<16x4x8xf32, #tpu.memory_space<vmem>>, vector<1x4x8xf32>
    %96 = vector.shape_cast %95 : vector<1x4x8xf32> to vector<4x8xf32>
    %cst_119 = arith.constant dense<0.000000e+00> : vector<64x8xf32>
    %97 = tpu.matmul %94, %96, %cst_119 {dimension_numbers = #tpu.dot_dimension_numbers<[1], [0], [0], [1], [0, 0, 1, 1], [], []>} : vector<64x4xf32>, vector<4x8xf32>, vector<64x8xf32> -> vector<64x8xf32>
    %98 = arith.addf %92, %97 : vector<64x8xf32>
    %c2_120 = arith.constant 2 : index
    %c8_121 = arith.constant 8 : index
    %c0_122 = arith.constant 0 : index
    %99 = vector.load %arg13[%c2_120, %c8_121, %c0_122] : memref<10x17x4xf32, #tpu.memory_space<vmem>>, vector<8x8x4xf32>
    %100 = vector.shape_cast %99 : vector<8x8x4xf32> to vector<64x4xf32>
    %c11 = arith.constant 11 : index
    %c0_123 = arith.constant 0 : index
    %c0_124 = arith.constant 0 : index
    %101 = vector.load %arg2[%c11, %c0_123, %c0_124] : memref<16x4x8xf32, #tpu.memory_space<vmem>>, vector<1x4x8xf32>
    %102 = vector.shape_cast %101 : vector<1x4x8xf32> to vector<4x8xf32>
    %cst_125 = arith.constant dense<0.000000e+00> : vector<64x8xf32>
    %103 = tpu.matmul %100, %102, %cst_125 {dimension_numbers = #tpu.dot_dimension_numbers<[1], [0], [0], [1], [0, 0, 1, 1], [], []>} : vector<64x4xf32>, vector<4x8xf32>, vector<64x8xf32> -> vector<64x8xf32>
    %104 = arith.addf %98, %103 : vector<64x8xf32>
    %105 = vector.broadcast %19 : vector<1x8xf32> to vector<64x8xf32>
    %106 = arith.addf %104, %105 : vector<64x8xf32>
    %c0_126 = arith.constant 0 : index
    %c2_127 = arith.constant 2 : index
    %c0_128 = arith.constant 0 : index
    %c0_129 = arith.constant 0 : index
    %107 = vector.load %arg12[%c0_126, %c2_127, %c0_128, %c0_129] : memref<1x4x64x8xf32, #tpu.memory_space<vmem>>, vector<1x1x64x8xf32>
    %108 = vector.shape_cast %107 : vector<1x1x64x8xf32> to vector<64x8xf32>
    %109 = vector.shape_cast %106 : vector<64x8xf32> to vector<1x1x64x8xf32>
    tpu.vector_store %arg12[%c0_126, %c2_127, %c0_128, %c0_129], %109 {strides = array<i32>} : memref<1x4x64x8xf32, #tpu.memory_space<vmem>>, vector<1x1x64x8xf32>,
    %cst_130 = arith.constant 0.000000e+00 : f32
    %110 = vector.broadcast %cst_130 : f32 to vector<64x8xf32>
    %c1_131 = arith.constant 1 : index
    %c8_132 = arith.constant 8 : index
    %c0_133 = arith.constant 0 : index
    %111 = vector.load %arg13[%c1_131, %c8_132, %c0_133] : memref<10x17x4xf32, #tpu.memory_space<vmem>>, vector<8x8x4xf32>
    %112 = vector.shape_cast %111 : vector<8x8x4xf32> to vector<64x4xf32>
    %c12 = arith.constant 12 : index
    %c0_134 = arith.constant 0 : index
    %c0_135 = arith.constant 0 : index
    %113 = vector.load %arg2[%c12, %c0_134, %c0_135] : memref<16x4x8xf32, #tpu.memory_space<vmem>>, vector<1x4x8xf32>
    %114 = vector.shape_cast %113 : vector<1x4x8xf32> to vector<4x8xf32>
    %cst_136 = arith.constant dense<0.000000e+00> : vector<64x8xf32>
    %115 = tpu.matmul %112, %114, %cst_136 {dimension_numbers = #tpu.dot_dimension_numbers<[1], [0], [0], [1], [0, 0, 1, 1], [], []>} : vector<64x4xf32>, vector<4x8xf32>, vector<64x8xf32> -> vector<64x8xf32>
    %116 = arith.addf %110, %115 : vector<64x8xf32>
    %c1_137 = arith.constant 1 : index
    %c9_138 = arith.constant 9 : index
    %c0_139 = arith.constant 0 : index
    %117 = vector.load %arg13[%c1_137, %c9_138, %c0_139] : memref<10x17x4xf32, #tpu.memory_space<vmem>>, vector<8x8x4xf32>
    %118 = vector.shape_cast %117 : vector<8x8x4xf32> to vector<64x4xf32>
    %c13 = arith.constant 13 : index
    %c0_140 = arith.constant 0 : index
    %c0_141 = arith.constant 0 : index
    %119 = vector.load %arg2[%c13, %c0_140, %c0_141] : memref<16x4x8xf32, #tpu.memory_space<vmem>>, vector<1x4x8xf32>
    %120 = vector.shape_cast %119 : vector<1x4x8xf32> to vector<4x8xf32>
    %cst_142 = arith.constant dense<0.000000e+00> : vector<64x8xf32>
    %121 = tpu.matmul %118, %120, %cst_142 {dimension_numbers = #tpu.dot_dimension_numbers<[1], [0], [0], [1], [0, 0, 1, 1], [], []>} : vector<64x4xf32>, vector<4x8xf32>, vector<64x8xf32> -> vector<64x8xf32>
    %122 = arith.addf %116, %121 : vector<64x8xf32>
    %c2_143 = arith.constant 2 : index
    %c8_144 = arith.constant 8 : index
    %c0_145 = arith.constant 0 : index
    %123 = vector.load %arg13[%c2_143, %c8_144, %c0_145] : memref<10x17x4xf32, #tpu.memory_space<vmem>>, vector<8x8x4xf32>
    %124 = vector.shape_cast %123 : vector<8x8x4xf32> to vector<64x4xf32>
    %c14 = arith.constant 14 : index
    %c0_146 = arith.constant 0 : index
    %c0_147 = arith.constant 0 : index
    %125 = vector.load %arg2[%c14, %c0_146, %c0_147] : memref<16x4x8xf32, #tpu.memory_space<vmem>>, vector<1x4x8xf32>
    %126 = vector.shape_cast %125 : vector<1x4x8xf32> to vector<4x8xf32>
    %cst_148 = arith.constant dense<0.000000e+00> : vector<64x8xf32>
    %127 = tpu.matmul %124, %126, %cst_148 {dimension_numbers = #tpu.dot_dimension_numbers<[1], [0], [0], [1], [0, 0, 1, 1], [], []>} : vector<64x4xf32>, vector<4x8xf32>, vector<64x8xf32> -> vector<64x8xf32>
    %128 = arith.addf %122, %127 : vector<64x8xf32>
    %c2_149 = arith.constant 2 : index
    %c9_150 = arith.constant 9 : index
    %c0_151 = arith.constant 0 : index
    %129 = vector.load %arg13[%c2_149, %c9_150, %c0_151] : memref<10x17x4xf32, #tpu.memory_space<vmem>>, vector<8x8x4xf32>
    %130 = vector.shape_cast %129 : vector<8x8x4xf32> to vector<64x4xf32>
    %c15 = arith.constant 15 : index
    %c0_152 = arith.constant 0 : index
    %c0_153 = arith.constant 0 : index
    %131 = vector.load %arg2[%c15, %c0_152, %c0_153] : memref<16x4x8xf32, #tpu.memory_space<vmem>>, vector<1x4x8xf32>
    %132 = vector.shape_cast %131 : vector<1x4x8xf32> to vector<4x8xf32>
    %cst_154 = arith.constant dense<0.000000e+00> : vector<64x8xf32>
    %133 = tpu.matmul %130, %132, %cst_154 {dimension_numbers = #tpu.dot_dimension_numbers<[1], [0], [0], [1], [0, 0, 1, 1], [], []>} : vector<64x4xf32>, vector<4x8xf32>, vector<64x8xf32> -> vector<64x8xf32>
    %134 = arith.addf %128, %133 : vector<64x8xf32>
    %135 = vector.broadcast %19 : vector<1x8xf32> to vector<64x8xf32>
    %136 = arith.addf %134, %135 : vector<64x8xf32>
    %c0_155 = arith.constant 0 : index
    %c3_156 = arith.constant 3 : index
    %c0_157 = arith.constant 0 : index
    %c0_158 = arith.constant 0 : index
    %137 = vector.load %arg12[%c0_155, %c3_156, %c0_157, %c0_158] : memref<1x4x64x8xf32, #tpu.memory_space<vmem>>, vector<1x1x64x8xf32>
    %138 = vector.shape_cast %137 : vector<1x1x64x8xf32> to vector<64x8xf32>
    %139 = vector.shape_cast %136 : vector<64x8xf32> to vector<1x1x64x8xf32>
    tpu.vector_store %arg12[%c0_155, %c3_156, %c0_157, %c0_158], %139 {strides = array<i32>} : memref<1x4x64x8xf32, #tpu.memory_space<vmem>>, vector<1x1x64x8xf32>,
    %c0_159 = arith.constant 0 : index
    %c0_160 = arith.constant 0 : index
    %140 = vector.load %arg5[%c0_159, %c0_160] : memref<1x8xf32, #tpu.memory_space<vmem>>, vector<1x8xf32>
    %c0_161 = arith.constant 0 : index
    %c0_162 = arith.constant 0 : index
    %141 = vector.load %arg7[%c0_161, %c0_162] : memref<1x8xf32, #tpu.memory_space<vmem>>, vector<1x8xf32>
    %c0_163 = arith.constant 0 : index
    %c0_164 = arith.constant 0 : index
    %142 = vector.load %arg6[%c0_163, %c0_164] : memref<8x8xf32, #tpu.memory_space<vmem>>, vector<8x8xf32>
    %c0_165 = arith.constant 0 : index
    %c0_166 = arith.constant 0 : index
    %c0_167 = arith.constant 0 : index
    %c0_168 = arith.constant 0 : index
    %143 = vector.load %arg12[%c0_165, %c0_166, %c0_167, %c0_168] : memref<1x4x64x8xf32, #tpu.memory_space<vmem>>, vector<1x1x64x8xf32>
    %144 = vector.shape_cast %143 : vector<1x1x64x8xf32> to vector<64x8xf32>
    %cst_169 = arith.constant 0.000000e+00 : f32
    %145 = vector.broadcast %cst_169 : f32 to vector<64x8xf32>
    %146 = arith.maximumf %144, %145 : vector<64x8xf32>
    %147 = vector.shape_cast %146 : vector<64x8xf32> to vector<8x8x8xf32>
    %c0_170 = arith.constant 0 : index
    %c1_171 = arith.constant 1 : index
    %c8_172 = arith.constant 8 : index
    %c0_173 = arith.constant 0 : index
    %148 = vector.load %arg14[%c0_170, %c1_171, %c8_172, %c0_173] : memref<4x10x17x8xf32, #tpu.memory_space<vmem>>, vector<1x8x8x8xf32>
    %149 = vector.shape_cast %148 : vector<1x8x8x8xf32> to vector<8x8x8xf32>
    %150 = vector.shape_cast %147 : vector<8x8x8xf32> to vector<1x8x8x8xf32>
    tpu.vector_store %arg14[%c0_170, %c1_171, %c8_172, %c0_173], %150 {strides = array<i32>} : memref<4x10x17x8xf32, #tpu.memory_space<vmem>>, vector<1x8x8x8xf32>,
    %c0_174 = arith.constant 0 : index
    %c1_175 = arith.constant 1 : index
    %c0_176 = arith.constant 0 : index
    %c0_177 = arith.constant 0 : index
    %151 = vector.load %arg12[%c0_174, %c1_175, %c0_176, %c0_177] : memref<1x4x64x8xf32, #tpu.memory_space<vmem>>, vector<1x1x64x8xf32>
    %152 = vector.shape_cast %151 : vector<1x1x64x8xf32> to vector<64x8xf32>
    %cst_178 = arith.constant 0.000000e+00 : f32
    %153 = vector.broadcast %cst_178 : f32 to vector<64x8xf32>
    %154 = arith.maximumf %152, %153 : vector<64x8xf32>
    %155 = vector.shape_cast %154 : vector<64x8xf32> to vector<8x8x8xf32>
    %c1_179 = arith.constant 1 : index
    %c1_180 = arith.constant 1 : index
    %c8_181 = arith.constant 8 : index
    %c0_182 = arith.constant 0 : index
    %156 = vector.load %arg14[%c1_179, %c1_180, %c8_181, %c0_182] : memref<4x10x17x8xf32, #tpu.memory_space<vmem>>, vector<1x8x8x8xf32>
    %157 = vector.shape_cast %156 : vector<1x8x8x8xf32> to vector<8x8x8xf32>
    %158 = vector.shape_cast %155 : vector<8x8x8xf32> to vector<1x8x8x8xf32>
    tpu.vector_store %arg14[%c1_179, %c1_180, %c8_181, %c0_182], %158 {strides = array<i32>} : memref<4x10x17x8xf32, #tpu.memory_space<vmem>>, vector<1x8x8x8xf32>,
    %c0_183 = arith.constant 0 : index
    %c2_184 = arith.constant 2 : index
    %c0_185 = arith.constant 0 : index
    %c0_186 = arith.constant 0 : index
    %159 = vector.load %arg12[%c0_183, %c2_184, %c0_185, %c0_186] : memref<1x4x64x8xf32, #tpu.memory_space<vmem>>, vector<1x1x64x8xf32>
    %160 = vector.shape_cast %159 : vector<1x1x64x8xf32> to vector<64x8xf32>
    %cst_187 = arith.constant 0.000000e+00 : f32
    %161 = vector.broadcast %cst_187 : f32 to vector<64x8xf32>
    %162 = arith.maximumf %160, %161 : vector<64x8xf32>
    %163 = vector.shape_cast %162 : vector<64x8xf32> to vector<8x8x8xf32>
    %c2_188 = arith.constant 2 : index
    %c1_189 = arith.constant 1 : index
    %c8_190 = arith.constant 8 : index
    %c0_191 = arith.constant 0 : index
    %164 = vector.load %arg14[%c2_188, %c1_189, %c8_190, %c0_191] : memref<4x10x17x8xf32, #tpu.memory_space<vmem>>, vector<1x8x8x8xf32>
    %165 = vector.shape_cast %164 : vector<1x8x8x8xf32> to vector<8x8x8xf32>
    %166 = vector.shape_cast %163 : vector<8x8x8xf32> to vector<1x8x8x8xf32>
    tpu.vector_store %arg14[%c2_188, %c1_189, %c8_190, %c0_191], %166 {strides = array<i32>} : memref<4x10x17x8xf32, #tpu.memory_space<vmem>>, vector<1x8x8x8xf32>,
    %c0_192 = arith.constant 0 : index
    %c3_193 = arith.constant 3 : index
    %c0_194 = arith.constant 0 : index
    %c0_195 = arith.constant 0 : index
    %167 = vector.load %arg12[%c0_192, %c3_193, %c0_194, %c0_195] : memref<1x4x64x8xf32, #tpu.memory_space<vmem>>, vector<1x1x64x8xf32>
    %168 = vector.shape_cast %167 : vector<1x1x64x8xf32> to vector<64x8xf32>
    %cst_196 = arith.constant 0.000000e+00 : f32
    %169 = vector.broadcast %cst_196 : f32 to vector<64x8xf32>
    %170 = arith.maximumf %168, %169 : vector<64x8xf32>
    %171 = vector.shape_cast %170 : vector<64x8xf32> to vector<8x8x8xf32>
    %c3_197 = arith.constant 3 : index
    %c1_198 = arith.constant 1 : index
    %c8_199 = arith.constant 8 : index
    %c0_200 = arith.constant 0 : index
    %172 = vector.load %arg14[%c3_197, %c1_198, %c8_199, %c0_200] : memref<4x10x17x8xf32, #tpu.memory_space<vmem>>, vector<1x8x8x8xf32>
    %173 = vector.shape_cast %172 : vector<1x8x8x8xf32> to vector<8x8x8xf32>
    %174 = vector.shape_cast %171 : vector<8x8x8xf32> to vector<1x8x8x8xf32>
    tpu.vector_store %arg14[%c3_197, %c1_198, %c8_199, %c0_200], %174 {strides = array<i32>} : memref<4x10x17x8xf32, #tpu.memory_space<vmem>>, vector<1x8x8x8xf32>,
    %cst_201 = arith.constant 0.000000e+00 : f32
    %175 = vector.broadcast %cst_201 : f32 to vector<64x8xf32>
    %c3_202 = arith.constant 3 : index
    %c0_203 = arith.constant 0 : index
    %c7_204 = arith.constant 7 : index
    %c0_205 = arith.constant 0 : index
    %176 = vector.load %arg14[%c3_202, %c0_203, %c7_204, %c0_205] : memref<4x10x17x8xf32, #tpu.memory_space<vmem>>, vector<1x8x8x8xf32>
    %177 = vector.shape_cast %176 : vector<1x8x8x8xf32> to vector<8x8x8xf32>
    %178 = vector.shape_cast %177 : vector<8x8x8xf32> to vector<64x8xf32>
    %c0_206 = arith.constant 0 : index
    %c0_207 = arith.constant 0 : index
    %c0_208 = arith.constant 0 : index
    %179 = vector.load %arg4[%c0_206, %c0_207, %c0_208] : memref<9x8x8xf32, #tpu.memory_space<vmem>>, vector<1x8x8xf32>
    %180 = vector.shape_cast %179 : vector<1x8x8xf32> to vector<8x8xf32>
    %cst_209 = arith.constant dense<0.000000e+00> : vector<64x8xf32>
    %181 = tpu.matmul %178, %180, %cst_209 {dimension_numbers = #tpu.dot_dimension_numbers<[1], [0], [0], [1], [0, 0, 1, 1], [], []>} : vector<64x8xf32>, vector<8x8xf32>, vector<64x8xf32> -> vector<64x8xf32>
    %182 = arith.addf %175, %181 : vector<64x8xf32>
    %c2_210 = arith.constant 2 : index
    %c0_211 = arith.constant 0 : index
    %c8_212 = arith.constant 8 : index
    %c0_213 = arith.constant 0 : index
    %183 = vector.load %arg14[%c2_210, %c0_211, %c8_212, %c0_213] : memref<4x10x17x8xf32, #tpu.memory_space<vmem>>, vector<1x8x8x8xf32>
    %184 = vector.shape_cast %183 : vector<1x8x8x8xf32> to vector<8x8x8xf32>
    %185 = vector.shape_cast %184 : vector<8x8x8xf32> to vector<64x8xf32>
    %c1_214 = arith.constant 1 : index
    %c0_215 = arith.constant 0 : index
    %c0_216 = arith.constant 0 : index
    %186 = vector.load %arg4[%c1_214, %c0_215, %c0_216] : memref<9x8x8xf32, #tpu.memory_space<vmem>>, vector<1x8x8xf32>
    %187 = vector.shape_cast %186 : vector<1x8x8xf32> to vector<8x8xf32>
    %cst_217 = arith.constant dense<0.000000e+00> : vector<64x8xf32>
    %188 = tpu.matmul %185, %187, %cst_217 {dimension_numbers = #tpu.dot_dimension_numbers<[1], [0], [0], [1], [0, 0, 1, 1], [], []>} : vector<64x8xf32>, vector<8x8xf32>, vector<64x8xf32> -> vector<64x8xf32>
    %189 = arith.addf %182, %188 : vector<64x8xf32>
    %c3_218 = arith.constant 3 : index
    %c0_219 = arith.constant 0 : index
    %c8_220 = arith.constant 8 : index
    %c0_221 = arith.constant 0 : index
    %190 = vector.load %arg14[%c3_218, %c0_219, %c8_220, %c0_221] : memref<4x10x17x8xf32, #tpu.memory_space<vmem>>, vector<1x8x8x8xf32>
    %191 = vector.shape_cast %190 : vector<1x8x8x8xf32> to vector<8x8x8xf32>
    %192 = vector.shape_cast %191 : vector<8x8x8xf32> to vector<64x8xf32>
    %c2_222 = arith.constant 2 : index
    %c0_223 = arith.constant 0 : index
    %c0_224 = arith.constant 0 : index
    %193 = vector.load %arg4[%c2_222, %c0_223, %c0_224] : memref<9x8x8xf32, #tpu.memory_space<vmem>>, vector<1x8x8xf32>
    %194 = vector.shape_cast %193 : vector<1x8x8xf32> to vector<8x8xf32>
    %cst_225 = arith.constant dense<0.000000e+00> : vector<64x8xf32>
    %195 = tpu.matmul %192, %194, %cst_225 {dimension_numbers = #tpu.dot_dimension_numbers<[1], [0], [0], [1], [0, 0, 1, 1], [], []>} : vector<64x8xf32>, vector<8x8xf32>, vector<64x8xf32> -> vector<64x8xf32>
    %196 = arith.addf %189, %195 : vector<64x8xf32>
    %c1_226 = arith.constant 1 : index
    %c1_227 = arith.constant 1 : index
    %c7_228 = arith.constant 7 : index
    %c0_229 = arith.constant 0 : index
    %197 = vector.load %arg14[%c1_226, %c1_227, %c7_228, %c0_229] : memref<4x10x17x8xf32, #tpu.memory_space<vmem>>, vector<1x8x8x8xf32>
    %198 = vector.shape_cast %197 : vector<1x8x8x8xf32> to vector<8x8x8xf32>
    %199 = vector.shape_cast %198 : vector<8x8x8xf32> to vector<64x8xf32>
    %c3_230 = arith.constant 3 : index
    %c0_231 = arith.constant 0 : index
    %c0_232 = arith.constant 0 : index
    %200 = vector.load %arg4[%c3_230, %c0_231, %c0_232] : memref<9x8x8xf32, #tpu.memory_space<vmem>>, vector<1x8x8xf32>
    %201 = vector.shape_cast %200 : vector<1x8x8xf32> to vector<8x8xf32>
    %cst_233 = arith.constant dense<0.000000e+00> : vector<64x8xf32>
    %202 = tpu.matmul %199, %201, %cst_233 {dimension_numbers = #tpu.dot_dimension_numbers<[1], [0], [0], [1], [0, 0, 1, 1], [], []>} : vector<64x8xf32>, vector<8x8xf32>, vector<64x8xf32> -> vector<64x8xf32>
    %203 = arith.addf %196, %202 : vector<64x8xf32>
    %c0_234 = arith.constant 0 : index
    %c1_235 = arith.constant 1 : index
    %c8_236 = arith.constant 8 : index
    %c0_237 = arith.constant 0 : index
    %204 = vector.load %arg14[%c0_234, %c1_235, %c8_236, %c0_237] : memref<4x10x17x8xf32, #tpu.memory_space<vmem>>, vector<1x8x8x8xf32>
    %205 = vector.shape_cast %204 : vector<1x8x8x8xf32> to vector<8x8x8xf32>
    %206 = vector.shape_cast %205 : vector<8x8x8xf32> to vector<64x8xf32>
    %c4_238 = arith.constant 4 : index
    %c0_239 = arith.constant 0 : index
    %c0_240 = arith.constant 0 : index
    %207 = vector.load %arg4[%c4_238, %c0_239, %c0_240] : memref<9x8x8xf32, #tpu.memory_space<vmem>>, vector<1x8x8xf32>
    %208 = vector.shape_cast %207 : vector<1x8x8xf32> to vector<8x8xf32>
    %cst_241 = arith.constant dense<0.000000e+00> : vector<64x8xf32>
    %209 = tpu.matmul %206, %208, %cst_241 {dimension_numbers = #tpu.dot_dimension_numbers<[1], [0], [0], [1], [0, 0, 1, 1], [], []>} : vector<64x8xf32>, vector<8x8xf32>, vector<64x8xf32> -> vector<64x8xf32>
    %210 = arith.addf %203, %209 : vector<64x8xf32>
    %c1_242 = arith.constant 1 : index
    %c1_243 = arith.constant 1 : index
    %c8_244 = arith.constant 8 : index
    %c0_245 = arith.constant 0 : index
    %211 = vector.load %arg14[%c1_242, %c1_243, %c8_244, %c0_245] : memref<4x10x17x8xf32, #tpu.memory_space<vmem>>, vector<1x8x8x8xf32>
    %212 = vector.shape_cast %211 : vector<1x8x8x8xf32> to vector<8x8x8xf32>
    %213 = vector.shape_cast %212 : vector<8x8x8xf32> to vector<64x8xf32>
    %c5_246 = arith.constant 5 : index
    %c0_247 = arith.constant 0 : index
    %c0_248 = arith.constant 0 : index
    %214 = vector.load %arg4[%c5_246, %c0_247, %c0_248] : memref<9x8x8xf32, #tpu.memory_space<vmem>>, vector<1x8x8xf32>
    %215 = vector.shape_cast %214 : vector<1x8x8xf32> to vector<8x8xf32>
    %cst_249 = arith.constant dense<0.000000e+00> : vector<64x8xf32>
    %216 = tpu.matmul %213, %215, %cst_249 {dimension_numbers = #tpu.dot_dimension_numbers<[1], [0], [0], [1], [0, 0, 1, 1], [], []>} : vector<64x8xf32>, vector<8x8xf32>, vector<64x8xf32> -> vector<64x8xf32>
    %217 = arith.addf %210, %216 : vector<64x8xf32>
    %c3_250 = arith.constant 3 : index
    %c1_251 = arith.constant 1 : index
    %c7_252 = arith.constant 7 : index
    %c0_253 = arith.constant 0 : index
    %218 = vector.load %arg14[%c3_250, %c1_251, %c7_252, %c0_253] : memref<4x10x17x8xf32, #tpu.memory_space<vmem>>, vector<1x8x8x8xf32>
    %219 = vector.shape_cast %218 : vector<1x8x8x8xf32> to vector<8x8x8xf32>
    %220 = vector.shape_cast %219 : vector<8x8x8xf32> to vector<64x8xf32>
    %c6_254 = arith.constant 6 : index
    %c0_255 = arith.constant 0 : index
    %c0_256 = arith.constant 0 : index
    %221 = vector.load %arg4[%c6_254, %c0_255, %c0_256] : memref<9x8x8xf32, #tpu.memory_space<vmem>>, vector<1x8x8xf32>
    %222 = vector.shape_cast %221 : vector<1x8x8xf32> to vector<8x8xf32>
    %cst_257 = arith.constant dense<0.000000e+00> : vector<64x8xf32>
    %223 = tpu.matmul %220, %222, %cst_257 {dimension_numbers = #tpu.dot_dimension_numbers<[1], [0], [0], [1], [0, 0, 1, 1], [], []>} : vector<64x8xf32>, vector<8x8xf32>, vector<64x8xf32> -> vector<64x8xf32>
    %224 = arith.addf %217, %223 : vector<64x8xf32>
    %c2_258 = arith.constant 2 : index
    %c1_259 = arith.constant 1 : index
    %c8_260 = arith.constant 8 : index
    %c0_261 = arith.constant 0 : index
    %225 = vector.load %arg14[%c2_258, %c1_259, %c8_260, %c0_261] : memref<4x10x17x8xf32, #tpu.memory_space<vmem>>, vector<1x8x8x8xf32>
    %226 = vector.shape_cast %225 : vector<1x8x8x8xf32> to vector<8x8x8xf32>
    %227 = vector.shape_cast %226 : vector<8x8x8xf32> to vector<64x8xf32>
    %c7_262 = arith.constant 7 : index
    %c0_263 = arith.constant 0 : index
    %c0_264 = arith.constant 0 : index
    %228 = vector.load %arg4[%c7_262, %c0_263, %c0_264] : memref<9x8x8xf32, #tpu.memory_space<vmem>>, vector<1x8x8xf32>
    %229 = vector.shape_cast %228 : vector<1x8x8xf32> to vector<8x8xf32>
    %cst_265 = arith.constant dense<0.000000e+00> : vector<64x8xf32>
    %230 = tpu.matmul %227, %229, %cst_265 {dimension_numbers = #tpu.dot_dimension_numbers<[1], [0], [0], [1], [0, 0, 1, 1], [], []>} : vector<64x8xf32>, vector<8x8xf32>, vector<64x8xf32> -> vector<64x8xf32>
    %231 = arith.addf %224, %230 : vector<64x8xf32>
    %c3_266 = arith.constant 3 : index
    %c1_267 = arith.constant 1 : index
    %c8_268 = arith.constant 8 : index
    %c0_269 = arith.constant 0 : index
    %232 = vector.load %arg14[%c3_266, %c1_267, %c8_268, %c0_269] : memref<4x10x17x8xf32, #tpu.memory_space<vmem>>, vector<1x8x8x8xf32>
    %233 = vector.shape_cast %232 : vector<1x8x8x8xf32> to vector<8x8x8xf32>
    %234 = vector.shape_cast %233 : vector<8x8x8xf32> to vector<64x8xf32>
    %c8_270 = arith.constant 8 : index
    %c0_271 = arith.constant 0 : index
    %c0_272 = arith.constant 0 : index
    %235 = vector.load %arg4[%c8_270, %c0_271, %c0_272] : memref<9x8x8xf32, #tpu.memory_space<vmem>>, vector<1x8x8xf32>
    %236 = vector.shape_cast %235 : vector<1x8x8xf32> to vector<8x8xf32>
    %cst_273 = arith.constant dense<0.000000e+00> : vector<64x8xf32>
    %237 = tpu.matmul %234, %236, %cst_273 {dimension_numbers = #tpu.dot_dimension_numbers<[1], [0], [0], [1], [0, 0, 1, 1], [], []>} : vector<64x8xf32>, vector<8x8xf32>, vector<64x8xf32> -> vector<64x8xf32>
    %238 = arith.addf %231, %237 : vector<64x8xf32>
    %239 = vector.broadcast %140 : vector<1x8xf32> to vector<64x8xf32>
    %240 = arith.addf %238, %239 : vector<64x8xf32>
    %cst_274 = arith.constant 0.000000e+00 : f32
    %241 = vector.broadcast %cst_274 : f32 to vector<64x8xf32>
    %242 = arith.maximumf %240, %241 : vector<64x8xf32>
    %c0_275 = arith.constant 0 : index
    %c0_276 = arith.constant 0 : index
    %c0_277 = arith.constant 0 : index
    %c0_278 = arith.constant 0 : index
    %243 = vector.load %arg12[%c0_275, %c0_276, %c0_277, %c0_278] : memref<1x4x64x8xf32, #tpu.memory_space<vmem>>, vector<1x1x64x8xf32>
    %244 = vector.shape_cast %243 : vector<1x1x64x8xf32> to vector<64x8xf32>
    %cst_279 = arith.constant dense<0.000000e+00> : vector<64x8xf32>
    %245 = tpu.matmul %242, %142, %cst_279 {dimension_numbers = #tpu.dot_dimension_numbers<[1], [0], [0], [1], [0, 0, 1, 1], [], []>} : vector<64x8xf32>, vector<8x8xf32>, vector<64x8xf32> -> vector<64x8xf32>
    %246 = arith.addf %244, %245 : vector<64x8xf32>
    %247 = vector.broadcast %141 : vector<1x8xf32> to vector<64x8xf32>
    %248 = arith.addf %246, %247 : vector<64x8xf32>
    %c0_280 = arith.constant 0 : index
    %c0_281 = arith.constant 0 : index
    %c0_282 = arith.constant 0 : index
    %c0_283 = arith.constant 0 : index
    %249 = vector.load %arg12[%c0_280, %c0_281, %c0_282, %c0_283] : memref<1x4x64x8xf32, #tpu.memory_space<vmem>>, vector<1x1x64x8xf32>
    %250 = vector.shape_cast %249 : vector<1x1x64x8xf32> to vector<64x8xf32>
    %251 = vector.shape_cast %248 : vector<64x8xf32> to vector<1x1x64x8xf32>
    tpu.vector_store %arg12[%c0_280, %c0_281, %c0_282, %c0_283], %251 {strides = array<i32>} : memref<1x4x64x8xf32, #tpu.memory_space<vmem>>, vector<1x1x64x8xf32>,
    %cst_284 = arith.constant 0.000000e+00 : f32
    %252 = vector.broadcast %cst_284 : f32 to vector<64x8xf32>
    %c2_285 = arith.constant 2 : index
    %c0_286 = arith.constant 0 : index
    %c8_287 = arith.constant 8 : index
    %c0_288 = arith.constant 0 : index
    %253 = vector.load %arg14[%c2_285, %c0_286, %c8_287, %c0_288] : memref<4x10x17x8xf32, #tpu.memory_space<vmem>>, vector<1x8x8x8xf32>
    %254 = vector.shape_cast %253 : vector<1x8x8x8xf32> to vector<8x8x8xf32>
    %255 = vector.shape_cast %254 : vector<8x8x8xf32> to vector<64x8xf32>
    %c0_289 = arith.constant 0 : index
    %c0_290 = arith.constant 0 : index
    %c0_291 = arith.constant 0 : index
    %256 = vector.load %arg4[%c0_289, %c0_290, %c0_291] : memref<9x8x8xf32, #tpu.memory_space<vmem>>, vector<1x8x8xf32>
    %257 = vector.shape_cast %256 : vector<1x8x8xf32> to vector<8x8xf32>
    %cst_292 = arith.constant dense<0.000000e+00> : vector<64x8xf32>
    %258 = tpu.matmul %255, %257, %cst_292 {dimension_numbers = #tpu.dot_dimension_numbers<[1], [0], [0], [1], [0, 0, 1, 1], [], []>} : vector<64x8xf32>, vector<8x8xf32>, vector<64x8xf32> -> vector<64x8xf32>
    %259 = arith.addf %252, %258 : vector<64x8xf32>
    %c3_293 = arith.constant 3 : index
    %c0_294 = arith.constant 0 : index
    %c8_295 = arith.constant 8 : index
    %c0_296 = arith.constant 0 : index
    %260 = vector.load %arg14[%c3_293, %c0_294, %c8_295, %c0_296] : memref<4x10x17x8xf32, #tpu.memory_space<vmem>>, vector<1x8x8x8xf32>
    %261 = vector.shape_cast %260 : vector<1x8x8x8xf32> to vector<8x8x8xf32>
    %262 = vector.shape_cast %261 : vector<8x8x8xf32> to vector<64x8xf32>
    %c1_297 = arith.constant 1 : index
    %c0_298 = arith.constant 0 : index
    %c0_299 = arith.constant 0 : index
    %263 = vector.load %arg4[%c1_297, %c0_298, %c0_299] : memref<9x8x8xf32, #tpu.memory_space<vmem>>, vector<1x8x8xf32>
    %264 = vector.shape_cast %263 : vector<1x8x8xf32> to vector<8x8xf32>
    %cst_300 = arith.constant dense<0.000000e+00> : vector<64x8xf32>
    %265 = tpu.matmul %262, %264, %cst_300 {dimension_numbers = #tpu.dot_dimension_numbers<[1], [0], [0], [1], [0, 0, 1, 1], [], []>} : vector<64x8xf32>, vector<8x8xf32>, vector<64x8xf32> -> vector<64x8xf32>
    %266 = arith.addf %259, %265 : vector<64x8xf32>
    %c2_301 = arith.constant 2 : index
    %c0_302 = arith.constant 0 : index
    %c9_303 = arith.constant 9 : index
    %c0_304 = arith.constant 0 : index
    %267 = vector.load %arg14[%c2_301, %c0_302, %c9_303, %c0_304] : memref<4x10x17x8xf32, #tpu.memory_space<vmem>>, vector<1x8x8x8xf32>
    %268 = vector.shape_cast %267 : vector<1x8x8x8xf32> to vector<8x8x8xf32>
    %269 = vector.shape_cast %268 : vector<8x8x8xf32> to vector<64x8xf32>
    %c2_305 = arith.constant 2 : index
    %c0_306 = arith.constant 0 : index
    %c0_307 = arith.constant 0 : index
    %270 = vector.load %arg4[%c2_305, %c0_306, %c0_307] : memref<9x8x8xf32, #tpu.memory_space<vmem>>, vector<1x8x8xf32>
    %271 = vector.shape_cast %270 : vector<1x8x8xf32> to vector<8x8xf32>
    %cst_308 = arith.constant dense<0.000000e+00> : vector<64x8xf32>
    %272 = tpu.matmul %269, %271, %cst_308 {dimension_numbers = #tpu.dot_dimension_numbers<[1], [0], [0], [1], [0, 0, 1, 1], [], []>} : vector<64x8xf32>, vector<8x8xf32>, vector<64x8xf32> -> vector<64x8xf32>
    %273 = arith.addf %266, %272 : vector<64x8xf32>
    %c0_309 = arith.constant 0 : index
    %c1_310 = arith.constant 1 : index
    %c8_311 = arith.constant 8 : index
    %c0_312 = arith.constant 0 : index
    %274 = vector.load %arg14[%c0_309, %c1_310, %c8_311, %c0_312] : memref<4x10x17x8xf32, #tpu.memory_space<vmem>>, vector<1x8x8x8xf32>
    %275 = vector.shape_cast %274 : vector<1x8x8x8xf32> to vector<8x8x8xf32>
    %276 = vector.shape_cast %275 : vector<8x8x8xf32> to vector<64x8xf32>
    %c3_313 = arith.constant 3 : index
    %c0_314 = arith.constant 0 : index
    %c0_315 = arith.constant 0 : index
    %277 = vector.load %arg4[%c3_313, %c0_314, %c0_315] : memref<9x8x8xf32, #tpu.memory_space<vmem>>, vector<1x8x8xf32>
    %278 = vector.shape_cast %277 : vector<1x8x8xf32> to vector<8x8xf32>
    %cst_316 = arith.constant dense<0.000000e+00> : vector<64x8xf32>
    %279 = tpu.matmul %276, %278, %cst_316 {dimension_numbers = #tpu.dot_dimension_numbers<[1], [0], [0], [1], [0, 0, 1, 1], [], []>} : vector<64x8xf32>, vector<8x8xf32>, vector<64x8xf32> -> vector<64x8xf32>
    %280 = arith.addf %273, %279 : vector<64x8xf32>
    %c1_317 = arith.constant 1 : index
    %c1_318 = arith.constant 1 : index
    %c8_319 = arith.constant 8 : index
    %c0_320 = arith.constant 0 : index
    %281 = vector.load %arg14[%c1_317, %c1_318, %c8_319, %c0_320] : memref<4x10x17x8xf32, #tpu.memory_space<vmem>>, vector<1x8x8x8xf32>
    %282 = vector.shape_cast %281 : vector<1x8x8x8xf32> to vector<8x8x8xf32>
    %283 = vector.shape_cast %282 : vector<8x8x8xf32> to vector<64x8xf32>
    %c4_321 = arith.constant 4 : index
    %c0_322 = arith.constant 0 : index
    %c0_323 = arith.constant 0 : index
    %284 = vector.load %arg4[%c4_321, %c0_322, %c0_323] : memref<9x8x8xf32, #tpu.memory_space<vmem>>, vector<1x8x8xf32>
    %285 = vector.shape_cast %284 : vector<1x8x8xf32> to vector<8x8xf32>
    %cst_324 = arith.constant dense<0.000000e+00> : vector<64x8xf32>
    %286 = tpu.matmul %283, %285, %cst_324 {dimension_numbers = #tpu.dot_dimension_numbers<[1], [0], [0], [1], [0, 0, 1, 1], [], []>} : vector<64x8xf32>, vector<8x8xf32>, vector<64x8xf32> -> vector<64x8xf32>
    %287 = arith.addf %280, %286 : vector<64x8xf32>
    %c0_325 = arith.constant 0 : index
    %c1_326 = arith.constant 1 : index
    %c9_327 = arith.constant 9 : index
    %c0_328 = arith.constant 0 : index
    %288 = vector.load %arg14[%c0_325, %c1_326, %c9_327, %c0_328] : memref<4x10x17x8xf32, #tpu.memory_space<vmem>>, vector<1x8x8x8xf32>
    %289 = vector.shape_cast %288 : vector<1x8x8x8xf32> to vector<8x8x8xf32>
    %290 = vector.shape_cast %289 : vector<8x8x8xf32> to vector<64x8xf32>
    %c5_329 = arith.constant 5 : index
    %c0_330 = arith.constant 0 : index
    %c0_331 = arith.constant 0 : index
    %291 = vector.load %arg4[%c5_329, %c0_330, %c0_331] : memref<9x8x8xf32, #tpu.memory_space<vmem>>, vector<1x8x8xf32>
    %292 = vector.shape_cast %291 : vector<1x8x8xf32> to vector<8x8xf32>
    %cst_332 = arith.constant dense<0.000000e+00> : vector<64x8xf32>
    %293 = tpu.matmul %290, %292, %cst_332 {dimension_numbers = #tpu.dot_dimension_numbers<[1], [0], [0], [1], [0, 0, 1, 1], [], []>} : vector<64x8xf32>, vector<8x8xf32>, vector<64x8xf32> -> vector<64x8xf32>
    %294 = arith.addf %287, %293 : vector<64x8xf32>
    %c2_333 = arith.constant 2 : index
    %c1_334 = arith.constant 1 : index
    %c8_335 = arith.constant 8 : index
    %c0_336 = arith.constant 0 : index
    %295 = vector.load %arg14[%c2_333, %c1_334, %c8_335, %c0_336] : memref<4x10x17x8xf32, #tpu.memory_space<vmem>>, vector<1x8x8x8xf32>
    %296 = vector.shape_cast %295 : vector<1x8x8x8xf32> to vector<8x8x8xf32>
    %297 = vector.shape_cast %296 : vector<8x8x8xf32> to vector<64x8xf32>
    %c6_337 = arith.constant 6 : index
    %c0_338 = arith.constant 0 : index
    %c0_339 = arith.constant 0 : index
    %298 = vector.load %arg4[%c6_337, %c0_338, %c0_339] : memref<9x8x8xf32, #tpu.memory_space<vmem>>, vector<1x8x8xf32>
    %299 = vector.shape_cast %298 : vector<1x8x8xf32> to vector<8x8xf32>
    %cst_340 = arith.constant dense<0.000000e+00> : vector<64x8xf32>
    %300 = tpu.matmul %297, %299, %cst_340 {dimension_numbers = #tpu.dot_dimension_numbers<[1], [0], [0], [1], [0, 0, 1, 1], [], []>} : vector<64x8xf32>, vector<8x8xf32>, vector<64x8xf32> -> vector<64x8xf32>
    %301 = arith.addf %294, %300 : vector<64x8xf32>
    %c3_341 = arith.constant 3 : index
    %c1_342 = arith.constant 1 : index
    %c8_343 = arith.constant 8 : index
    %c0_344 = arith.constant 0 : index
    %302 = vector.load %arg14[%c3_341, %c1_342, %c8_343, %c0_344] : memref<4x10x17x8xf32, #tpu.memory_space<vmem>>, vector<1x8x8x8xf32>
    %303 = vector.shape_cast %302 : vector<1x8x8x8xf32> to vector<8x8x8xf32>
    %304 = vector.shape_cast %303 : vector<8x8x8xf32> to vector<64x8xf32>
    %c7_345 = arith.constant 7 : index
    %c0_346 = arith.constant 0 : index
    %c0_347 = arith.constant 0 : index
    %305 = vector.load %arg4[%c7_345, %c0_346, %c0_347] : memref<9x8x8xf32, #tpu.memory_space<vmem>>, vector<1x8x8xf32>
    %306 = vector.shape_cast %305 : vector<1x8x8xf32> to vector<8x8xf32>
    %cst_348 = arith.constant dense<0.000000e+00> : vector<64x8xf32>
    %307 = tpu.matmul %304, %306, %cst_348 {dimension_numbers = #tpu.dot_dimension_numbers<[1], [0], [0], [1], [0, 0, 1, 1], [], []>} : vector<64x8xf32>, vector<8x8xf32>, vector<64x8xf32> -> vector<64x8xf32>
    %308 = arith.addf %301, %307 : vector<64x8xf32>
    %c2_349 = arith.constant 2 : index
    %c1_350 = arith.constant 1 : index
    %c9_351 = arith.constant 9 : index
    %c0_352 = arith.constant 0 : index
    %309 = vector.load %arg14[%c2_349, %c1_350, %c9_351, %c0_352] : memref<4x10x17x8xf32, #tpu.memory_space<vmem>>, vector<1x8x8x8xf32>
    %310 = vector.shape_cast %309 : vector<1x8x8x8xf32> to vector<8x8x8xf32>
    %311 = vector.shape_cast %310 : vector<8x8x8xf32> to vector<64x8xf32>
    %c8_353 = arith.constant 8 : index
    %c0_354 = arith.constant 0 : index
    %c0_355 = arith.constant 0 : index
    %312 = vector.load %arg4[%c8_353, %c0_354, %c0_355] : memref<9x8x8xf32, #tpu.memory_space<vmem>>, vector<1x8x8xf32>
    %313 = vector.shape_cast %312 : vector<1x8x8xf32> to vector<8x8xf32>
    %cst_356 = arith.constant dense<0.000000e+00> : vector<64x8xf32>
    %314 = tpu.matmul %311, %313, %cst_356 {dimension_numbers = #tpu.dot_dimension_numbers<[1], [0], [0], [1], [0, 0, 1, 1], [], []>} : vector<64x8xf32>, vector<8x8xf32>, vector<64x8xf32> -> vector<64x8xf32>
    %315 = arith.addf %308, %314 : vector<64x8xf32>
    %316 = vector.broadcast %140 : vector<1x8xf32> to vector<64x8xf32>
    %317 = arith.addf %315, %316 : vector<64x8xf32>
    %cst_357 = arith.constant 0.000000e+00 : f32
    %318 = vector.broadcast %cst_357 : f32 to vector<64x8xf32>
    %319 = arith.maximumf %317, %318 : vector<64x8xf32>
    %c0_358 = arith.constant 0 : index
    %c1_359 = arith.constant 1 : index
    %c0_360 = arith.constant 0 : index
    %c0_361 = arith.constant 0 : index
    %320 = vector.load %arg12[%c0_358, %c1_359, %c0_360, %c0_361] : memref<1x4x64x8xf32, #tpu.memory_space<vmem>>, vector<1x1x64x8xf32>
    %321 = vector.shape_cast %320 : vector<1x1x64x8xf32> to vector<64x8xf32>
    %cst_362 = arith.constant dense<0.000000e+00> : vector<64x8xf32>
    %322 = tpu.matmul %319, %142, %cst_362 {dimension_numbers = #tpu.dot_dimension_numbers<[1], [0], [0], [1], [0, 0, 1, 1], [], []>} : vector<64x8xf32>, vector<8x8xf32>, vector<64x8xf32> -> vector<64x8xf32>
    %323 = arith.addf %321, %322 : vector<64x8xf32>
    %324 = vector.broadcast %141 : vector<1x8xf32> to vector<64x8xf32>
    %325 = arith.addf %323, %324 : vector<64x8xf32>
    %c0_363 = arith.constant 0 : index
    %c1_364 = arith.constant 1 : index
    %c0_365 = arith.constant 0 : index
    %c0_366 = arith.constant 0 : index
    %326 = vector.load %arg12[%c0_363, %c1_364, %c0_365, %c0_366] : memref<1x4x64x8xf32, #tpu.memory_space<vmem>>, vector<1x1x64x8xf32>
    %327 = vector.shape_cast %326 : vector<1x1x64x8xf32> to vector<64x8xf32>
    %328 = vector.shape_cast %325 : vector<64x8xf32> to vector<1x1x64x8xf32>
    tpu.vector_store %arg12[%c0_363, %c1_364, %c0_365, %c0_366], %328 {strides = array<i32>} : memref<1x4x64x8xf32, #tpu.memory_space<vmem>>, vector<1x1x64x8xf32>,
    %cst_367 = arith.constant 0.000000e+00 : f32
    %329 = vector.broadcast %cst_367 : f32 to vector<64x8xf32>
    %c1_368 = arith.constant 1 : index
    %c1_369 = arith.constant 1 : index
    %c7_370 = arith.constant 7 : index
    %c0_371 = arith.constant 0 : index
    %330 = vector.load %arg14[%c1_368, %c1_369, %c7_370, %c0_371] : memref<4x10x17x8xf32, #tpu.memory_space<vmem>>, vector<1x8x8x8xf32>
    %331 = vector.shape_cast %330 : vector<1x8x8x8xf32> to vector<8x8x8xf32>
    %332 = vector.shape_cast %331 : vector<8x8x8xf32> to vector<64x8xf32>
    %c0_372 = arith.constant 0 : index
    %c0_373 = arith.constant 0 : index
    %c0_374 = arith.constant 0 : index
    %333 = vector.load %arg4[%c0_372, %c0_373, %c0_374] : memref<9x8x8xf32, #tpu.memory_space<vmem>>, vector<1x8x8xf32>
    %334 = vector.shape_cast %333 : vector<1x8x8xf32> to vector<8x8xf32>
    %cst_375 = arith.constant dense<0.000000e+00> : vector<64x8xf32>
    %335 = tpu.matmul %332, %334, %cst_375 {dimension_numbers = #tpu.dot_dimension_numbers<[1], [0], [0], [1], [0, 0, 1, 1], [], []>} : vector<64x8xf32>, vector<8x8xf32>, vector<64x8xf32> -> vector<64x8xf32>
    %336 = arith.addf %329, %335 : vector<64x8xf32>
    %c0_376 = arith.constant 0 : index
    %c1_377 = arith.constant 1 : index
    %c8_378 = arith.constant 8 : index
    %c0_379 = arith.constant 0 : index
    %337 = vector.load %arg14[%c0_376, %c1_377, %c8_378, %c0_379] : memref<4x10x17x8xf32, #tpu.memory_space<vmem>>, vector<1x8x8x8xf32>
    %338 = vector.shape_cast %337 : vector<1x8x8x8xf32> to vector<8x8x8xf32>
    %339 = vector.shape_cast %338 : vector<8x8x8xf32> to vector<64x8xf32>
    %c1_380 = arith.constant 1 : index
    %c0_381 = arith.constant 0 : index
    %c0_382 = arith.constant 0 : index
    %340 = vector.load %arg4[%c1_380, %c0_381, %c0_382] : memref<9x8x8xf32, #tpu.memory_space<vmem>>, vector<1x8x8xf32>
    %341 = vector.shape_cast %340 : vector<1x8x8xf32> to vector<8x8xf32>
    %cst_383 = arith.constant dense<0.000000e+00> : vector<64x8xf32>
    %342 = tpu.matmul %339, %341, %cst_383 {dimension_numbers = #tpu.dot_dimension_numbers<[1], [0], [0], [1], [0, 0, 1, 1], [], []>} : vector<64x8xf32>, vector<8x8xf32>, vector<64x8xf32> -> vector<64x8xf32>
    %343 = arith.addf %336, %342 : vector<64x8xf32>
    %c1_384 = arith.constant 1 : index
    %c1_385 = arith.constant 1 : index
    %c8_386 = arith.constant 8 : index
    %c0_387 = arith.constant 0 : index
    %344 = vector.load %arg14[%c1_384, %c1_385, %c8_386, %c0_387] : memref<4x10x17x8xf32, #tpu.memory_space<vmem>>, vector<1x8x8x8xf32>
    %345 = vector.shape_cast %344 : vector<1x8x8x8xf32> to vector<8x8x8xf32>
    %346 = vector.shape_cast %345 : vector<8x8x8xf32> to vector<64x8xf32>
    %c2_388 = arith.constant 2 : index
    %c0_389 = arith.constant 0 : index
    %c0_390 = arith.constant 0 : index
    %347 = vector.load %arg4[%c2_388, %c0_389, %c0_390] : memref<9x8x8xf32, #tpu.memory_space<vmem>>, vector<1x8x8xf32>
    %348 = vector.shape_cast %347 : vector<1x8x8xf32> to vector<8x8xf32>
    %cst_391 = arith.constant dense<0.000000e+00> : vector<64x8xf32>
    %349 = tpu.matmul %346, %348, %cst_391 {dimension_numbers = #tpu.dot_dimension_numbers<[1], [0], [0], [1], [0, 0, 1, 1], [], []>} : vector<64x8xf32>, vector<8x8xf32>, vector<64x8xf32> -> vector<64x8xf32>
    %350 = arith.addf %343, %349 : vector<64x8xf32>
    %c3_392 = arith.constant 3 : index
    %c1_393 = arith.constant 1 : index
    %c7_394 = arith.constant 7 : index
    %c0_395 = arith.constant 0 : index
    %351 = vector.load %arg14[%c3_392, %c1_393, %c7_394, %c0_395] : memref<4x10x17x8xf32, #tpu.memory_space<vmem>>, vector<1x8x8x8xf32>
    %352 = vector.shape_cast %351 : vector<1x8x8x8xf32> to vector<8x8x8xf32>
    %353 = vector.shape_cast %352 : vector<8x8x8xf32> to vector<64x8xf32>
    %c3_396 = arith.constant 3 : index
    %c0_397 = arith.constant 0 : index
    %c0_398 = arith.constant 0 : index
    %354 = vector.load %arg4[%c3_396, %c0_397, %c0_398] : memref<9x8x8xf32, #tpu.memory_space<vmem>>, vector<1x8x8xf32>
    %355 = vector.shape_cast %354 : vector<1x8x8xf32> to vector<8x8xf32>
    %cst_399 = arith.constant dense<0.000000e+00> : vector<64x8xf32>
    %356 = tpu.matmul %353, %355, %cst_399 {dimension_numbers = #tpu.dot_dimension_numbers<[1], [0], [0], [1], [0, 0, 1, 1], [], []>} : vector<64x8xf32>, vector<8x8xf32>, vector<64x8xf32> -> vector<64x8xf32>
    %357 = arith.addf %350, %356 : vector<64x8xf32>
    %c2_400 = arith.constant 2 : index
    %c1_401 = arith.constant 1 : index
    %c8_402 = arith.constant 8 : index
    %c0_403 = arith.constant 0 : index
    %358 = vector.load %arg14[%c2_400, %c1_401, %c8_402, %c0_403] : memref<4x10x17x8xf32, #tpu.memory_space<vmem>>, vector<1x8x8x8xf32>
    %359 = vector.shape_cast %358 : vector<1x8x8x8xf32> to vector<8x8x8xf32>
    %360 = vector.shape_cast %359 : vector<8x8x8xf32> to vector<64x8xf32>
    %c4_404 = arith.constant 4 : index
    %c0_405 = arith.constant 0 : index
    %c0_406 = arith.constant 0 : index
    %361 = vector.load %arg4[%c4_404, %c0_405, %c0_406] : memref<9x8x8xf32, #tpu.memory_space<vmem>>, vector<1x8x8xf32>
    %362 = vector.shape_cast %361 : vector<1x8x8xf32> to vector<8x8xf32>
    %cst_407 = arith.constant dense<0.000000e+00> : vector<64x8xf32>
    %363 = tpu.matmul %360, %362, %cst_407 {dimension_numbers = #tpu.dot_dimension_numbers<[1], [0], [0], [1], [0, 0, 1, 1], [], []>} : vector<64x8xf32>, vector<8x8xf32>, vector<64x8xf32> -> vector<64x8xf32>
    %364 = arith.addf %357, %363 : vector<64x8xf32>
    %c3_408 = arith.constant 3 : index
    %c1_409 = arith.constant 1 : index
    %c8_410 = arith.constant 8 : index
    %c0_411 = arith.constant 0 : index
    %365 = vector.load %arg14[%c3_408, %c1_409, %c8_410, %c0_411] : memref<4x10x17x8xf32, #tpu.memory_space<vmem>>, vector<1x8x8x8xf32>
    %366 = vector.shape_cast %365 : vector<1x8x8x8xf32> to vector<8x8x8xf32>
    %367 = vector.shape_cast %366 : vector<8x8x8xf32> to vector<64x8xf32>
    %c5_412 = arith.constant 5 : index
    %c0_413 = arith.constant 0 : index
    %c0_414 = arith.constant 0 : index
    %368 = vector.load %arg4[%c5_412, %c0_413, %c0_414] : memref<9x8x8xf32, #tpu.memory_space<vmem>>, vector<1x8x8xf32>
    %369 = vector.shape_cast %368 : vector<1x8x8xf32> to vector<8x8xf32>
    %cst_415 = arith.constant dense<0.000000e+00> : vector<64x8xf32>
    %370 = tpu.matmul %367, %369, %cst_415 {dimension_numbers = #tpu.dot_dimension_numbers<[1], [0], [0], [1], [0, 0, 1, 1], [], []>} : vector<64x8xf32>, vector<8x8xf32>, vector<64x8xf32> -> vector<64x8xf32>
    %371 = arith.addf %364, %370 : vector<64x8xf32>
    %c1_416 = arith.constant 1 : index
    %c2_417 = arith.constant 2 : index
    %c7_418 = arith.constant 7 : index
    %c0_419 = arith.constant 0 : index
    %372 = vector.load %arg14[%c1_416, %c2_417, %c7_418, %c0_419] : memref<4x10x17x8xf32, #tpu.memory_space<vmem>>, vector<1x8x8x8xf32>
    %373 = vector.shape_cast %372 : vector<1x8x8x8xf32> to vector<8x8x8xf32>
    %374 = vector.shape_cast %373 : vector<8x8x8xf32> to vector<64x8xf32>
    %c6_420 = arith.constant 6 : index
    %c0_421 = arith.constant 0 : index
    %c0_422 = arith.constant 0 : index
    %375 = vector.load %arg4[%c6_420, %c0_421, %c0_422] : memref<9x8x8xf32, #tpu.memory_space<vmem>>, vector<1x8x8xf32>
    %376 = vector.shape_cast %375 : vector<1x8x8xf32> to vector<8x8xf32>
    %cst_423 = arith.constant dense<0.000000e+00> : vector<64x8xf32>
    %377 = tpu.matmul %374, %376, %cst_423 {dimension_numbers = #tpu.dot_dimension_numbers<[1], [0], [0], [1], [0, 0, 1, 1], [], []>} : vector<64x8xf32>, vector<8x8xf32>, vector<64x8xf32> -> vector<64x8xf32>
    %378 = arith.addf %371, %377 : vector<64x8xf32>
    %c0_424 = arith.constant 0 : index
    %c2_425 = arith.constant 2 : index
    %c8_426 = arith.constant 8 : index
    %c0_427 = arith.constant 0 : index
    %379 = vector.load %arg14[%c0_424, %c2_425, %c8_426, %c0_427] : memref<4x10x17x8xf32, #tpu.memory_space<vmem>>, vector<1x8x8x8xf32>
    %380 = vector.shape_cast %379 : vector<1x8x8x8xf32> to vector<8x8x8xf32>
    %381 = vector.shape_cast %380 : vector<8x8x8xf32> to vector<64x8xf32>
    %c7_428 = arith.constant 7 : index
    %c0_429 = arith.constant 0 : index
    %c0_430 = arith.constant 0 : index
    %382 = vector.load %arg4[%c7_428, %c0_429, %c0_430] : memref<9x8x8xf32, #tpu.memory_space<vmem>>, vector<1x8x8xf32>
    %383 = vector.shape_cast %382 : vector<1x8x8xf32> to vector<8x8xf32>
    %cst_431 = arith.constant dense<0.000000e+00> : vector<64x8xf32>
    %384 = tpu.matmul %381, %383, %cst_431 {dimension_numbers = #tpu.dot_dimension_numbers<[1], [0], [0], [1], [0, 0, 1, 1], [], []>} : vector<64x8xf32>, vector<8x8xf32>, vector<64x8xf32> -> vector<64x8xf32>
    %385 = arith.addf %378, %384 : vector<64x8xf32>
    %c1_432 = arith.constant 1 : index
    %c2_433 = arith.constant 2 : index
    %c8_434 = arith.constant 8 : index
    %c0_435 = arith.constant 0 : index
    %386 = vector.load %arg14[%c1_432, %c2_433, %c8_434, %c0_435] : memref<4x10x17x8xf32, #tpu.memory_space<vmem>>, vector<1x8x8x8xf32>
    %387 = vector.shape_cast %386 : vector<1x8x8x8xf32> to vector<8x8x8xf32>
    %388 = vector.shape_cast %387 : vector<8x8x8xf32> to vector<64x8xf32>
    %c8_436 = arith.constant 8 : index
    %c0_437 = arith.constant 0 : index
    %c0_438 = arith.constant 0 : index
    %389 = vector.load %arg4[%c8_436, %c0_437, %c0_438] : memref<9x8x8xf32, #tpu.memory_space<vmem>>, vector<1x8x8xf32>
    %390 = vector.shape_cast %389 : vector<1x8x8xf32> to vector<8x8xf32>
    %cst_439 = arith.constant dense<0.000000e+00> : vector<64x8xf32>
    %391 = tpu.matmul %388, %390, %cst_439 {dimension_numbers = #tpu.dot_dimension_numbers<[1], [0], [0], [1], [0, 0, 1, 1], [], []>} : vector<64x8xf32>, vector<8x8xf32>, vector<64x8xf32> -> vector<64x8xf32>
    %392 = arith.addf %385, %391 : vector<64x8xf32>
    %393 = vector.broadcast %140 : vector<1x8xf32> to vector<64x8xf32>
    %394 = arith.addf %392, %393 : vector<64x8xf32>
    %cst_440 = arith.constant 0.000000e+00 : f32
    %395 = vector.broadcast %cst_440 : f32 to vector<64x8xf32>
    %396 = arith.maximumf %394, %395 : vector<64x8xf32>
    %c0_441 = arith.constant 0 : index
    %c2_442 = arith.constant 2 : index
    %c0_443 = arith.constant 0 : index
    %c0_444 = arith.constant 0 : index
    %397 = vector.load %arg12[%c0_441, %c2_442, %c0_443, %c0_444] : memref<1x4x64x8xf32, #tpu.memory_space<vmem>>, vector<1x1x64x8xf32>
    %398 = vector.shape_cast %397 : vector<1x1x64x8xf32> to vector<64x8xf32>
    %cst_445 = arith.constant dense<0.000000e+00> : vector<64x8xf32>
    %399 = tpu.matmul %396, %142, %cst_445 {dimension_numbers = #tpu.dot_dimension_numbers<[1], [0], [0], [1], [0, 0, 1, 1], [], []>} : vector<64x8xf32>, vector<8x8xf32>, vector<64x8xf32> -> vector<64x8xf32>
    %400 = arith.addf %398, %399 : vector<64x8xf32>
    %401 = vector.broadcast %141 : vector<1x8xf32> to vector<64x8xf32>
    %402 = arith.addf %400, %401 : vector<64x8xf32>
    %c0_446 = arith.constant 0 : index
    %c2_447 = arith.constant 2 : index
    %c0_448 = arith.constant 0 : index
    %c0_449 = arith.constant 0 : index
    %403 = vector.load %arg12[%c0_446, %c2_447, %c0_448, %c0_449] : memref<1x4x64x8xf32, #tpu.memory_space<vmem>>, vector<1x1x64x8xf32>
    %404 = vector.shape_cast %403 : vector<1x1x64x8xf32> to vector<64x8xf32>
    %405 = vector.shape_cast %402 : vector<64x8xf32> to vector<1x1x64x8xf32>
    tpu.vector_store %arg12[%c0_446, %c2_447, %c0_448, %c0_449], %405 {strides = array<i32>} : memref<1x4x64x8xf32, #tpu.memory_space<vmem>>, vector<1x1x64x8xf32>,
    %cst_450 = arith.constant 0.000000e+00 : f32
    %406 = vector.broadcast %cst_450 : f32 to vector<64x8xf32>
    %c0_451 = arith.constant 0 : index
    %c1_452 = arith.constant 1 : index
    %c8_453 = arith.constant 8 : index
    %c0_454 = arith.constant 0 : index
    %407 = vector.load %arg14[%c0_451, %c1_452, %c8_453, %c0_454] : memref<4x10x17x8xf32, #tpu.memory_space<vmem>>, vector<1x8x8x8xf32>
    %408 = vector.shape_cast %407 : vector<1x8x8x8xf32> to vector<8x8x8xf32>
    %409 = vector.shape_cast %408 : vector<8x8x8xf32> to vector<64x8xf32>
    %c0_455 = arith.constant 0 : index
    %c0_456 = arith.constant 0 : index
    %c0_457 = arith.constant 0 : index
    %410 = vector.load %arg4[%c0_455, %c0_456, %c0_457] : memref<9x8x8xf32, #tpu.memory_space<vmem>>, vector<1x8x8xf32>
    %411 = vector.shape_cast %410 : vector<1x8x8xf32> to vector<8x8xf32>
    %cst_458 = arith.constant dense<0.000000e+00> : vector<64x8xf32>
    %412 = tpu.matmul %409, %411, %cst_458 {dimension_numbers = #tpu.dot_dimension_numbers<[1], [0], [0], [1], [0, 0, 1, 1], [], []>} : vector<64x8xf32>, vector<8x8xf32>, vector<64x8xf32> -> vector<64x8xf32>
    %413 = arith.addf %406, %412 : vector<64x8xf32>
    %c1_459 = arith.constant 1 : index
    %c1_460 = arith.constant 1 : index
    %c8_461 = arith.constant 8 : index
    %c0_462 = arith.constant 0 : index
    %414 = vector.load %arg14[%c1_459, %c1_460, %c8_461, %c0_462] : memref<4x10x17x8xf32, #tpu.memory_space<vmem>>, vector<1x8x8x8xf32>
    %415 = vector.shape_cast %414 : vector<1x8x8x8xf32> to vector<8x8x8xf32>
    %416 = vector.shape_cast %415 : vector<8x8x8xf32> to vector<64x8xf32>
    %c1_463 = arith.constant 1 : index
    %c0_464 = arith.constant 0 : index
    %c0_465 = arith.constant 0 : index
    %417 = vector.load %arg4[%c1_463, %c0_464, %c0_465] : memref<9x8x8xf32, #tpu.memory_space<vmem>>, vector<1x8x8xf32>
    %418 = vector.shape_cast %417 : vector<1x8x8xf32> to vector<8x8xf32>
    %cst_466 = arith.constant dense<0.000000e+00> : vector<64x8xf32>
    %419 = tpu.matmul %416, %418, %cst_466 {dimension_numbers = #tpu.dot_dimension_numbers<[1], [0], [0], [1], [0, 0, 1, 1], [], []>} : vector<64x8xf32>, vector<8x8xf32>, vector<64x8xf32> -> vector<64x8xf32>
    %420 = arith.addf %413, %419 : vector<64x8xf32>
    %c0_467 = arith.constant 0 : index
    %c1_468 = arith.constant 1 : index
    %c9_469 = arith.constant 9 : index
    %c0_470 = arith.constant 0 : index
    %421 = vector.load %arg14[%c0_467, %c1_468, %c9_469, %c0_470] : memref<4x10x17x8xf32, #tpu.memory_space<vmem>>, vector<1x8x8x8xf32>
    %422 = vector.shape_cast %421 : vector<1x8x8x8xf32> to vector<8x8x8xf32>
    %423 = vector.shape_cast %422 : vector<8x8x8xf32> to vector<64x8xf32>
    %c2_471 = arith.constant 2 : index
    %c0_472 = arith.constant 0 : index
    %c0_473 = arith.constant 0 : index
    %424 = vector.load %arg4[%c2_471, %c0_472, %c0_473] : memref<9x8x8xf32, #tpu.memory_space<vmem>>, vector<1x8x8xf32>
    %425 = vector.shape_cast %424 : vector<1x8x8xf32> to vector<8x8xf32>
    %cst_474 = arith.constant dense<0.000000e+00> : vector<64x8xf32>
    %426 = tpu.matmul %423, %425, %cst_474 {dimension_numbers = #tpu.dot_dimension_numbers<[1], [0], [0], [1], [0, 0, 1, 1], [], []>} : vector<64x8xf32>, vector<8x8xf32>, vector<64x8xf32> -> vector<64x8xf32>
    %427 = arith.addf %420, %426 : vector<64x8xf32>
    %c2_475 = arith.constant 2 : index
    %c1_476 = arith.constant 1 : index
    %c8_477 = arith.constant 8 : index
    %c0_478 = arith.constant 0 : index
    %428 = vector.load %arg14[%c2_475, %c1_476, %c8_477, %c0_478] : memref<4x10x17x8xf32, #tpu.memory_space<vmem>>, vector<1x8x8x8xf32>
    %429 = vector.shape_cast %428 : vector<1x8x8x8xf32> to vector<8x8x8xf32>
    %430 = vector.shape_cast %429 : vector<8x8x8xf32> to vector<64x8xf32>
    %c3_479 = arith.constant 3 : index
    %c0_480 = arith.constant 0 : index
    %c0_481 = arith.constant 0 : index
    %431 = vector.load %arg4[%c3_479, %c0_480, %c0_481] : memref<9x8x8xf32, #tpu.memory_space<vmem>>, vector<1x8x8xf32>
    %432 = vector.shape_cast %431 : vector<1x8x8xf32> to vector<8x8xf32>
    %cst_482 = arith.constant dense<0.000000e+00> : vector<64x8xf32>
    %433 = tpu.matmul %430, %432, %cst_482 {dimension_numbers = #tpu.dot_dimension_numbers<[1], [0], [0], [1], [0, 0, 1, 1], [], []>} : vector<64x8xf32>, vector<8x8xf32>, vector<64x8xf32> -> vector<64x8xf32>
    %434 = arith.addf %427, %433 : vector<64x8xf32>
    %c3_483 = arith.constant 3 : index
    %c1_484 = arith.constant 1 : index
    %c8_485 = arith.constant 8 : index
    %c0_486 = arith.constant 0 : index
    %435 = vector.load %arg14[%c3_483, %c1_484, %c8_485, %c0_486] : memref<4x10x17x8xf32, #tpu.memory_space<vmem>>, vector<1x8x8x8xf32>
    %436 = vector.shape_cast %435 : vector<1x8x8x8xf32> to vector<8x8x8xf32>
    %437 = vector.shape_cast %436 : vector<8x8x8xf32> to vector<64x8xf32>
    %c4_487 = arith.constant 4 : index
    %c0_488 = arith.constant 0 : index
    %c0_489 = arith.constant 0 : index
    %438 = vector.load %arg4[%c4_487, %c0_488, %c0_489] : memref<9x8x8xf32, #tpu.memory_space<vmem>>, vector<1x8x8xf32>
    %439 = vector.shape_cast %438 : vector<1x8x8xf32> to vector<8x8xf32>
    %cst_490 = arith.constant dense<0.000000e+00> : vector<64x8xf32>
    %440 = tpu.matmul %437, %439, %cst_490 {dimension_numbers = #tpu.dot_dimension_numbers<[1], [0], [0], [1], [0, 0, 1, 1], [], []>} : vector<64x8xf32>, vector<8x8xf32>, vector<64x8xf32> -> vector<64x8xf32>
    %441 = arith.addf %434, %440 : vector<64x8xf32>
    %c2_491 = arith.constant 2 : index
    %c1_492 = arith.constant 1 : index
    %c9_493 = arith.constant 9 : index
    %c0_494 = arith.constant 0 : index
    %442 = vector.load %arg14[%c2_491, %c1_492, %c9_493, %c0_494] : memref<4x10x17x8xf32, #tpu.memory_space<vmem>>, vector<1x8x8x8xf32>
    %443 = vector.shape_cast %442 : vector<1x8x8x8xf32> to vector<8x8x8xf32>
    %444 = vector.shape_cast %443 : vector<8x8x8xf32> to vector<64x8xf32>
    %c5_495 = arith.constant 5 : index
    %c0_496 = arith.constant 0 : index
    %c0_497 = arith.constant 0 : index
    %445 = vector.load %arg4[%c5_495, %c0_496, %c0_497] : memref<9x8x8xf32, #tpu.memory_space<vmem>>, vector<1x8x8xf32>
    %446 = vector.shape_cast %445 : vector<1x8x8xf32> to vector<8x8xf32>
    %cst_498 = arith.constant dense<0.000000e+00> : vector<64x8xf32>
    %447 = tpu.matmul %444, %446, %cst_498 {dimension_numbers = #tpu.dot_dimension_numbers<[1], [0], [0], [1], [0, 0, 1, 1], [], []>} : vector<64x8xf32>, vector<8x8xf32>, vector<64x8xf32> -> vector<64x8xf32>
    %448 = arith.addf %441, %447 : vector<64x8xf32>
    %c0_499 = arith.constant 0 : index
    %c2_500 = arith.constant 2 : index
    %c8_501 = arith.constant 8 : index
    %c0_502 = arith.constant 0 : index
    %449 = vector.load %arg14[%c0_499, %c2_500, %c8_501, %c0_502] : memref<4x10x17x8xf32, #tpu.memory_space<vmem>>, vector<1x8x8x8xf32>
    %450 = vector.shape_cast %449 : vector<1x8x8x8xf32> to vector<8x8x8xf32>
    %451 = vector.shape_cast %450 : vector<8x8x8xf32> to vector<64x8xf32>
    %c6_503 = arith.constant 6 : index
    %c0_504 = arith.constant 0 : index
    %c0_505 = arith.constant 0 : index
    %452 = vector.load %arg4[%c6_503, %c0_504, %c0_505] : memref<9x8x8xf32, #tpu.memory_space<vmem>>, vector<1x8x8xf32>
    %453 = vector.shape_cast %452 : vector<1x8x8xf32> to vector<8x8xf32>
    %cst_506 = arith.constant dense<0.000000e+00> : vector<64x8xf32>
    %454 = tpu.matmul %451, %453, %cst_506 {dimension_numbers = #tpu.dot_dimension_numbers<[1], [0], [0], [1], [0, 0, 1, 1], [], []>} : vector<64x8xf32>, vector<8x8xf32>, vector<64x8xf32> -> vector<64x8xf32>
    %455 = arith.addf %448, %454 : vector<64x8xf32>
    %c1_507 = arith.constant 1 : index
    %c2_508 = arith.constant 2 : index
    %c8_509 = arith.constant 8 : index
    %c0_510 = arith.constant 0 : index
    %456 = vector.load %arg14[%c1_507, %c2_508, %c8_509, %c0_510] : memref<4x10x17x8xf32, #tpu.memory_space<vmem>>, vector<1x8x8x8xf32>
    %457 = vector.shape_cast %456 : vector<1x8x8x8xf32> to vector<8x8x8xf32>
    %458 = vector.shape_cast %457 : vector<8x8x8xf32> to vector<64x8xf32>
    %c7_511 = arith.constant 7 : index
    %c0_512 = arith.constant 0 : index
    %c0_513 = arith.constant 0 : index
    %459 = vector.load %arg4[%c7_511, %c0_512, %c0_513] : memref<9x8x8xf32, #tpu.memory_space<vmem>>, vector<1x8x8xf32>
    %460 = vector.shape_cast %459 : vector<1x8x8xf32> to vector<8x8xf32>
    %cst_514 = arith.constant dense<0.000000e+00> : vector<64x8xf32>
    %461 = tpu.matmul %458, %460, %cst_514 {dimension_numbers = #tpu.dot_dimension_numbers<[1], [0], [0], [1], [0, 0, 1, 1], [], []>} : vector<64x8xf32>, vector<8x8xf32>, vector<64x8xf32> -> vector<64x8xf32>
    %462 = arith.addf %455, %461 : vector<64x8xf32>
    %c0_515 = arith.constant 0 : index
    %c2_516 = arith.constant 2 : index
    %c9_517 = arith.constant 9 : index
    %c0_518 = arith.constant 0 : index
    %463 = vector.load %arg14[%c0_515, %c2_516, %c9_517, %c0_518] : memref<4x10x17x8xf32, #tpu.memory_space<vmem>>, vector<1x8x8x8xf32>
    %464 = vector.shape_cast %463 : vector<1x8x8x8xf32> to vector<8x8x8xf32>
    %465 = vector.shape_cast %464 : vector<8x8x8xf32> to vector<64x8xf32>
    %c8_519 = arith.constant 8 : index
    %c0_520 = arith.constant 0 : index
    %c0_521 = arith.constant 0 : index
    %466 = vector.load %arg4[%c8_519, %c0_520, %c0_521] : memref<9x8x8xf32, #tpu.memory_space<vmem>>, vector<1x8x8xf32>
    %467 = vector.shape_cast %466 : vector<1x8x8xf32> to vector<8x8xf32>
    %cst_522 = arith.constant dense<0.000000e+00> : vector<64x8xf32>
    %468 = tpu.matmul %465, %467, %cst_522 {dimension_numbers = #tpu.dot_dimension_numbers<[1], [0], [0], [1], [0, 0, 1, 1], [], []>} : vector<64x8xf32>, vector<8x8xf32>, vector<64x8xf32> -> vector<64x8xf32>
    %469 = arith.addf %462, %468 : vector<64x8xf32>
    %470 = vector.broadcast %140 : vector<1x8xf32> to vector<64x8xf32>
    %471 = arith.addf %469, %470 : vector<64x8xf32>
    %cst_523 = arith.constant 0.000000e+00 : f32
    %472 = vector.broadcast %cst_523 : f32 to vector<64x8xf32>
    %473 = arith.maximumf %471, %472 : vector<64x8xf32>
    %c0_524 = arith.constant 0 : index
    %c3_525 = arith.constant 3 : index
    %c0_526 = arith.constant 0 : index
    %c0_527 = arith.constant 0 : index
    %474 = vector.load %arg12[%c0_524, %c3_525, %c0_526, %c0_527] : memref<1x4x64x8xf32, #tpu.memory_space<vmem>>, vector<1x1x64x8xf32>
    %475 = vector.shape_cast %474 : vector<1x1x64x8xf32> to vector<64x8xf32>
    %cst_528 = arith.constant dense<0.000000e+00> : vector<64x8xf32>
    %476 = tpu.matmul %473, %142, %cst_528 {dimension_numbers = #tpu.dot_dimension_numbers<[1], [0], [0], [1], [0, 0, 1, 1], [], []>} : vector<64x8xf32>, vector<8x8xf32>, vector<64x8xf32> -> vector<64x8xf32>
    %477 = arith.addf %475, %476 : vector<64x8xf32>
    %478 = vector.broadcast %141 : vector<1x8xf32> to vector<64x8xf32>
    %479 = arith.addf %477, %478 : vector<64x8xf32>
    %c0_529 = arith.constant 0 : index
    %c3_530 = arith.constant 3 : index
    %c0_531 = arith.constant 0 : index
    %c0_532 = arith.constant 0 : index
    %480 = vector.load %arg12[%c0_529, %c3_530, %c0_531, %c0_532] : memref<1x4x64x8xf32, #tpu.memory_space<vmem>>, vector<1x1x64x8xf32>
    %481 = vector.shape_cast %480 : vector<1x1x64x8xf32> to vector<64x8xf32>
    %482 = vector.shape_cast %479 : vector<64x8xf32> to vector<1x1x64x8xf32>
    tpu.vector_store %arg12[%c0_529, %c3_530, %c0_531, %c0_532], %482 {strides = array<i32>} : memref<1x4x64x8xf32, #tpu.memory_space<vmem>>, vector<1x1x64x8xf32>,
    %c0_533 = arith.constant 0 : index
    %c0_534 = arith.constant 0 : index
    %483 = vector.load %arg9[%c0_533, %c0_534] : memref<1x8xf32, #tpu.memory_space<vmem>>, vector<1x8xf32>
    %c0_535 = arith.constant 0 : index
    %c0_536 = arith.constant 0 : index
    %484 = vector.load %arg11[%c0_535, %c0_536] : memref<1x8xf32, #tpu.memory_space<vmem>>, vector<1x8xf32>
    %c0_537 = arith.constant 0 : index
    %c0_538 = arith.constant 0 : index
    %485 = vector.load %arg10[%c0_537, %c0_538] : memref<8x8xf32, #tpu.memory_space<vmem>>, vector<8x8xf32>
    %c0_539 = arith.constant 0 : index
    %c0_540 = arith.constant 0 : index
    %c0_541 = arith.constant 0 : index
    %c0_542 = arith.constant 0 : index
    %486 = vector.load %arg12[%c0_539, %c0_540, %c0_541, %c0_542] : memref<1x4x64x8xf32, #tpu.memory_space<vmem>>, vector<1x1x64x8xf32>
    %487 = vector.shape_cast %486 : vector<1x1x64x8xf32> to vector<64x8xf32>
    %cst_543 = arith.constant 0.000000e+00 : f32
    %488 = vector.broadcast %cst_543 : f32 to vector<64x8xf32>
    %489 = arith.maximumf %487, %488 : vector<64x8xf32>
    %490 = vector.shape_cast %489 : vector<64x8xf32> to vector<8x8x8xf32>
    %c0_544 = arith.constant 0 : index
    %c1_545 = arith.constant 1 : index
    %c8_546 = arith.constant 8 : index
    %c0_547 = arith.constant 0 : index
    %491 = vector.load %arg14[%c0_544, %c1_545, %c8_546, %c0_547] : memref<4x10x17x8xf32, #tpu.memory_space<vmem>>, vector<1x8x8x8xf32>
    %492 = vector.shape_cast %491 : vector<1x8x8x8xf32> to vector<8x8x8xf32>
    %493 = vector.shape_cast %490 : vector<8x8x8xf32> to vector<1x8x8x8xf32>
    tpu.vector_store %arg14[%c0_544, %c1_545, %c8_546, %c0_547], %493 {strides = array<i32>} : memref<4x10x17x8xf32, #tpu.memory_space<vmem>>, vector<1x8x8x8xf32>,
    %c0_548 = arith.constant 0 : index
    %c1_549 = arith.constant 1 : index
    %c0_550 = arith.constant 0 : index
    %c0_551 = arith.constant 0 : index
    %494 = vector.load %arg12[%c0_548, %c1_549, %c0_550, %c0_551] : memref<1x4x64x8xf32, #tpu.memory_space<vmem>>, vector<1x1x64x8xf32>
    %495 = vector.shape_cast %494 : vector<1x1x64x8xf32> to vector<64x8xf32>
    %cst_552 = arith.constant 0.000000e+00 : f32
    %496 = vector.broadcast %cst_552 : f32 to vector<64x8xf32>
    %497 = arith.maximumf %495, %496 : vector<64x8xf32>
    %498 = vector.shape_cast %497 : vector<64x8xf32> to vector<8x8x8xf32>
    %c1_553 = arith.constant 1 : index
    %c1_554 = arith.constant 1 : index
    %c8_555 = arith.constant 8 : index
    %c0_556 = arith.constant 0 : index
    %499 = vector.load %arg14[%c1_553, %c1_554, %c8_555, %c0_556] : memref<4x10x17x8xf32, #tpu.memory_space<vmem>>, vector<1x8x8x8xf32>
    %500 = vector.shape_cast %499 : vector<1x8x8x8xf32> to vector<8x8x8xf32>
    %501 = vector.shape_cast %498 : vector<8x8x8xf32> to vector<1x8x8x8xf32>
    tpu.vector_store %arg14[%c1_553, %c1_554, %c8_555, %c0_556], %501 {strides = array<i32>} : memref<4x10x17x8xf32, #tpu.memory_space<vmem>>, vector<1x8x8x8xf32>,
    %c0_557 = arith.constant 0 : index
    %c2_558 = arith.constant 2 : index
    %c0_559 = arith.constant 0 : index
    %c0_560 = arith.constant 0 : index
    %502 = vector.load %arg12[%c0_557, %c2_558, %c0_559, %c0_560] : memref<1x4x64x8xf32, #tpu.memory_space<vmem>>, vector<1x1x64x8xf32>
    %503 = vector.shape_cast %502 : vector<1x1x64x8xf32> to vector<64x8xf32>
    %cst_561 = arith.constant 0.000000e+00 : f32
    %504 = vector.broadcast %cst_561 : f32 to vector<64x8xf32>
    %505 = arith.maximumf %503, %504 : vector<64x8xf32>
    %506 = vector.shape_cast %505 : vector<64x8xf32> to vector<8x8x8xf32>
    %c2_562 = arith.constant 2 : index
    %c1_563 = arith.constant 1 : index
    %c8_564 = arith.constant 8 : index
    %c0_565 = arith.constant 0 : index
    %507 = vector.load %arg14[%c2_562, %c1_563, %c8_564, %c0_565] : memref<4x10x17x8xf32, #tpu.memory_space<vmem>>, vector<1x8x8x8xf32>
    %508 = vector.shape_cast %507 : vector<1x8x8x8xf32> to vector<8x8x8xf32>
    %509 = vector.shape_cast %506 : vector<8x8x8xf32> to vector<1x8x8x8xf32>
    tpu.vector_store %arg14[%c2_562, %c1_563, %c8_564, %c0_565], %509 {strides = array<i32>} : memref<4x10x17x8xf32, #tpu.memory_space<vmem>>, vector<1x8x8x8xf32>,
    %c0_566 = arith.constant 0 : index
    %c3_567 = arith.constant 3 : index
    %c0_568 = arith.constant 0 : index
    %c0_569 = arith.constant 0 : index
    %510 = vector.load %arg12[%c0_566, %c3_567, %c0_568, %c0_569] : memref<1x4x64x8xf32, #tpu.memory_space<vmem>>, vector<1x1x64x8xf32>
    %511 = vector.shape_cast %510 : vector<1x1x64x8xf32> to vector<64x8xf32>
    %cst_570 = arith.constant 0.000000e+00 : f32
    %512 = vector.broadcast %cst_570 : f32 to vector<64x8xf32>
    %513 = arith.maximumf %511, %512 : vector<64x8xf32>
    %514 = vector.shape_cast %513 : vector<64x8xf32> to vector<8x8x8xf32>
    %c3_571 = arith.constant 3 : index
    %c1_572 = arith.constant 1 : index
    %c8_573 = arith.constant 8 : index
    %c0_574 = arith.constant 0 : index
    %515 = vector.load %arg14[%c3_571, %c1_572, %c8_573, %c0_574] : memref<4x10x17x8xf32, #tpu.memory_space<vmem>>, vector<1x8x8x8xf32>
    %516 = vector.shape_cast %515 : vector<1x8x8x8xf32> to vector<8x8x8xf32>
    %517 = vector.shape_cast %514 : vector<8x8x8xf32> to vector<1x8x8x8xf32>
    tpu.vector_store %arg14[%c3_571, %c1_572, %c8_573, %c0_574], %517 {strides = array<i32>} : memref<4x10x17x8xf32, #tpu.memory_space<vmem>>, vector<1x8x8x8xf32>,
    %cst_575 = arith.constant 0.000000e+00 : f32
    %518 = vector.broadcast %cst_575 : f32 to vector<64x8xf32>
    %c3_576 = arith.constant 3 : index
    %c0_577 = arith.constant 0 : index
    %c7_578 = arith.constant 7 : index
    %c0_579 = arith.constant 0 : index
    %519 = vector.load %arg14[%c3_576, %c0_577, %c7_578, %c0_579] : memref<4x10x17x8xf32, #tpu.memory_space<vmem>>, vector<1x8x8x8xf32>
    %520 = vector.shape_cast %519 : vector<1x8x8x8xf32> to vector<8x8x8xf32>
    %521 = vector.shape_cast %520 : vector<8x8x8xf32> to vector<64x8xf32>
    %c0_580 = arith.constant 0 : index
    %c0_581 = arith.constant 0 : index
    %c0_582 = arith.constant 0 : index
    %522 = vector.load %arg8[%c0_580, %c0_581, %c0_582] : memref<9x8x8xf32, #tpu.memory_space<vmem>>, vector<1x8x8xf32>
    %523 = vector.shape_cast %522 : vector<1x8x8xf32> to vector<8x8xf32>
    %cst_583 = arith.constant dense<0.000000e+00> : vector<64x8xf32>
    %524 = tpu.matmul %521, %523, %cst_583 {dimension_numbers = #tpu.dot_dimension_numbers<[1], [0], [0], [1], [0, 0, 1, 1], [], []>} : vector<64x8xf32>, vector<8x8xf32>, vector<64x8xf32> -> vector<64x8xf32>
    %525 = arith.addf %518, %524 : vector<64x8xf32>
    %c2_584 = arith.constant 2 : index
    %c0_585 = arith.constant 0 : index
    %c8_586 = arith.constant 8 : index
    %c0_587 = arith.constant 0 : index
    %526 = vector.load %arg14[%c2_584, %c0_585, %c8_586, %c0_587] : memref<4x10x17x8xf32, #tpu.memory_space<vmem>>, vector<1x8x8x8xf32>
    %527 = vector.shape_cast %526 : vector<1x8x8x8xf32> to vector<8x8x8xf32>
    %528 = vector.shape_cast %527 : vector<8x8x8xf32> to vector<64x8xf32>
    %c1_588 = arith.constant 1 : index
    %c0_589 = arith.constant 0 : index
    %c0_590 = arith.constant 0 : index
    %529 = vector.load %arg8[%c1_588, %c0_589, %c0_590] : memref<9x8x8xf32, #tpu.memory_space<vmem>>, vector<1x8x8xf32>
    %530 = vector.shape_cast %529 : vector<1x8x8xf32> to vector<8x8xf32>
    %cst_591 = arith.constant dense<0.000000e+00> : vector<64x8xf32>
    %531 = tpu.matmul %528, %530, %cst_591 {dimension_numbers = #tpu.dot_dimension_numbers<[1], [0], [0], [1], [0, 0, 1, 1], [], []>} : vector<64x8xf32>, vector<8x8xf32>, vector<64x8xf32> -> vector<64x8xf32>
    %532 = arith.addf %525, %531 : vector<64x8xf32>
    %c3_592 = arith.constant 3 : index
    %c0_593 = arith.constant 0 : index
    %c8_594 = arith.constant 8 : index
    %c0_595 = arith.constant 0 : index
    %533 = vector.load %arg14[%c3_592, %c0_593, %c8_594, %c0_595] : memref<4x10x17x8xf32, #tpu.memory_space<vmem>>, vector<1x8x8x8xf32>
    %534 = vector.shape_cast %533 : vector<1x8x8x8xf32> to vector<8x8x8xf32>
    %535 = vector.shape_cast %534 : vector<8x8x8xf32> to vector<64x8xf32>
    %c2_596 = arith.constant 2 : index
    %c0_597 = arith.constant 0 : index
    %c0_598 = arith.constant 0 : index
    %536 = vector.load %arg8[%c2_596, %c0_597, %c0_598] : memref<9x8x8xf32, #tpu.memory_space<vmem>>, vector<1x8x8xf32>
    %537 = vector.shape_cast %536 : vector<1x8x8xf32> to vector<8x8xf32>
    %cst_599 = arith.constant dense<0.000000e+00> : vector<64x8xf32>
    %538 = tpu.matmul %535, %537, %cst_599 {dimension_numbers = #tpu.dot_dimension_numbers<[1], [0], [0], [1], [0, 0, 1, 1], [], []>} : vector<64x8xf32>, vector<8x8xf32>, vector<64x8xf32> -> vector<64x8xf32>
    %539 = arith.addf %532, %538 : vector<64x8xf32>
    %c1_600 = arith.constant 1 : index
    %c1_601 = arith.constant 1 : index
    %c7_602 = arith.constant 7 : index
    %c0_603 = arith.constant 0 : index
    %540 = vector.load %arg14[%c1_600, %c1_601, %c7_602, %c0_603] : memref<4x10x17x8xf32, #tpu.memory_space<vmem>>, vector<1x8x8x8xf32>
    %541 = vector.shape_cast %540 : vector<1x8x8x8xf32> to vector<8x8x8xf32>
    %542 = vector.shape_cast %541 : vector<8x8x8xf32> to vector<64x8xf32>
    %c3_604 = arith.constant 3 : index
    %c0_605 = arith.constant 0 : index
    %c0_606 = arith.constant 0 : index
    %543 = vector.load %arg8[%c3_604, %c0_605, %c0_606] : memref<9x8x8xf32, #tpu.memory_space<vmem>>, vector<1x8x8xf32>
    %544 = vector.shape_cast %543 : vector<1x8x8xf32> to vector<8x8xf32>
    %cst_607 = arith.constant dense<0.000000e+00> : vector<64x8xf32>
    %545 = tpu.matmul %542, %544, %cst_607 {dimension_numbers = #tpu.dot_dimension_numbers<[1], [0], [0], [1], [0, 0, 1, 1], [], []>} : vector<64x8xf32>, vector<8x8xf32>, vector<64x8xf32> -> vector<64x8xf32>
    %546 = arith.addf %539, %545 : vector<64x8xf32>
    %c0_608 = arith.constant 0 : index
    %c1_609 = arith.constant 1 : index
    %c8_610 = arith.constant 8 : index
    %c0_611 = arith.constant 0 : index
    %547 = vector.load %arg14[%c0_608, %c1_609, %c8_610, %c0_611] : memref<4x10x17x8xf32, #tpu.memory_space<vmem>>, vector<1x8x8x8xf32>
    %548 = vector.shape_cast %547 : vector<1x8x8x8xf32> to vector<8x8x8xf32>
    %549 = vector.shape_cast %548 : vector<8x8x8xf32> to vector<64x8xf32>
    %c4_612 = arith.constant 4 : index
    %c0_613 = arith.constant 0 : index
    %c0_614 = arith.constant 0 : index
    %550 = vector.load %arg8[%c4_612, %c0_613, %c0_614] : memref<9x8x8xf32, #tpu.memory_space<vmem>>, vector<1x8x8xf32>
    %551 = vector.shape_cast %550 : vector<1x8x8xf32> to vector<8x8xf32>
    %cst_615 = arith.constant dense<0.000000e+00> : vector<64x8xf32>
    %552 = tpu.matmul %549, %551, %cst_615 {dimension_numbers = #tpu.dot_dimension_numbers<[1], [0], [0], [1], [0, 0, 1, 1], [], []>} : vector<64x8xf32>, vector<8x8xf32>, vector<64x8xf32> -> vector<64x8xf32>
    %553 = arith.addf %546, %552 : vector<64x8xf32>
    %c1_616 = arith.constant 1 : index
    %c1_617 = arith.constant 1 : index
    %c8_618 = arith.constant 8 : index
    %c0_619 = arith.constant 0 : index
    %554 = vector.load %arg14[%c1_616, %c1_617, %c8_618, %c0_619] : memref<4x10x17x8xf32, #tpu.memory_space<vmem>>, vector<1x8x8x8xf32>
    %555 = vector.shape_cast %554 : vector<1x8x8x8xf32> to vector<8x8x8xf32>
    %556 = vector.shape_cast %555 : vector<8x8x8xf32> to vector<64x8xf32>
    %c5_620 = arith.constant 5 : index
    %c0_621 = arith.constant 0 : index
    %c0_622 = arith.constant 0 : index
    %557 = vector.load %arg8[%c5_620, %c0_621, %c0_622] : memref<9x8x8xf32, #tpu.memory_space<vmem>>, vector<1x8x8xf32>
    %558 = vector.shape_cast %557 : vector<1x8x8xf32> to vector<8x8xf32>
    %cst_623 = arith.constant dense<0.000000e+00> : vector<64x8xf32>
    %559 = tpu.matmul %556, %558, %cst_623 {dimension_numbers = #tpu.dot_dimension_numbers<[1], [0], [0], [1], [0, 0, 1, 1], [], []>} : vector<64x8xf32>, vector<8x8xf32>, vector<64x8xf32> -> vector<64x8xf32>
    %560 = arith.addf %553, %559 : vector<64x8xf32>
    %c3_624 = arith.constant 3 : index
    %c1_625 = arith.constant 1 : index
    %c7_626 = arith.constant 7 : index
    %c0_627 = arith.constant 0 : index
    %561 = vector.load %arg14[%c3_624, %c1_625, %c7_626, %c0_627] : memref<4x10x17x8xf32, #tpu.memory_space<vmem>>, vector<1x8x8x8xf32>
    %562 = vector.shape_cast %561 : vector<1x8x8x8xf32> to vector<8x8x8xf32>
    %563 = vector.shape_cast %562 : vector<8x8x8xf32> to vector<64x8xf32>
    %c6_628 = arith.constant 6 : index
    %c0_629 = arith.constant 0 : index
    %c0_630 = arith.constant 0 : index
    %564 = vector.load %arg8[%c6_628, %c0_629, %c0_630] : memref<9x8x8xf32, #tpu.memory_space<vmem>>, vector<1x8x8xf32>
    %565 = vector.shape_cast %564 : vector<1x8x8xf32> to vector<8x8xf32>
    %cst_631 = arith.constant dense<0.000000e+00> : vector<64x8xf32>
    %566 = tpu.matmul %563, %565, %cst_631 {dimension_numbers = #tpu.dot_dimension_numbers<[1], [0], [0], [1], [0, 0, 1, 1], [], []>} : vector<64x8xf32>, vector<8x8xf32>, vector<64x8xf32> -> vector<64x8xf32>
    %567 = arith.addf %560, %566 : vector<64x8xf32>
    %c2_632 = arith.constant 2 : index
    %c1_633 = arith.constant 1 : index
    %c8_634 = arith.constant 8 : index
    %c0_635 = arith.constant 0 : index
    %568 = vector.load %arg14[%c2_632, %c1_633, %c8_634, %c0_635] : memref<4x10x17x8xf32, #tpu.memory_space<vmem>>, vector<1x8x8x8xf32>
    %569 = vector.shape_cast %568 : vector<1x8x8x8xf32> to vector<8x8x8xf32>
    %570 = vector.shape_cast %569 : vector<8x8x8xf32> to vector<64x8xf32>
    %c7_636 = arith.constant 7 : index
    %c0_637 = arith.constant 0 : index
    %c0_638 = arith.constant 0 : index
    %571 = vector.load %arg8[%c7_636, %c0_637, %c0_638] : memref<9x8x8xf32, #tpu.memory_space<vmem>>, vector<1x8x8xf32>
    %572 = vector.shape_cast %571 : vector<1x8x8xf32> to vector<8x8xf32>
    %cst_639 = arith.constant dense<0.000000e+00> : vector<64x8xf32>
    %573 = tpu.matmul %570, %572, %cst_639 {dimension_numbers = #tpu.dot_dimension_numbers<[1], [0], [0], [1], [0, 0, 1, 1], [], []>} : vector<64x8xf32>, vector<8x8xf32>, vector<64x8xf32> -> vector<64x8xf32>
    %574 = arith.addf %567, %573 : vector<64x8xf32>
    %c3_640 = arith.constant 3 : index
    %c1_641 = arith.constant 1 : index
    %c8_642 = arith.constant 8 : index
    %c0_643 = arith.constant 0 : index
    %575 = vector.load %arg14[%c3_640, %c1_641, %c8_642, %c0_643] : memref<4x10x17x8xf32, #tpu.memory_space<vmem>>, vector<1x8x8x8xf32>
    %576 = vector.shape_cast %575 : vector<1x8x8x8xf32> to vector<8x8x8xf32>
    %577 = vector.shape_cast %576 : vector<8x8x8xf32> to vector<64x8xf32>
    %c8_644 = arith.constant 8 : index
    %c0_645 = arith.constant 0 : index
    %c0_646 = arith.constant 0 : index
    %578 = vector.load %arg8[%c8_644, %c0_645, %c0_646] : memref<9x8x8xf32, #tpu.memory_space<vmem>>, vector<1x8x8xf32>
    %579 = vector.shape_cast %578 : vector<1x8x8xf32> to vector<8x8xf32>
    %cst_647 = arith.constant dense<0.000000e+00> : vector<64x8xf32>
    %580 = tpu.matmul %577, %579, %cst_647 {dimension_numbers = #tpu.dot_dimension_numbers<[1], [0], [0], [1], [0, 0, 1, 1], [], []>} : vector<64x8xf32>, vector<8x8xf32>, vector<64x8xf32> -> vector<64x8xf32>
    %581 = arith.addf %574, %580 : vector<64x8xf32>
    %582 = vector.broadcast %483 : vector<1x8xf32> to vector<64x8xf32>
    %583 = arith.addf %581, %582 : vector<64x8xf32>
    %cst_648 = arith.constant 0.000000e+00 : f32
    %584 = vector.broadcast %cst_648 : f32 to vector<64x8xf32>
    %585 = arith.maximumf %583, %584 : vector<64x8xf32>
    %c0_649 = arith.constant 0 : index
    %c0_650 = arith.constant 0 : index
    %c0_651 = arith.constant 0 : index
    %c0_652 = arith.constant 0 : index
    %586 = vector.load %arg12[%c0_649, %c0_650, %c0_651, %c0_652] : memref<1x4x64x8xf32, #tpu.memory_space<vmem>>, vector<1x1x64x8xf32>
    %587 = vector.shape_cast %586 : vector<1x1x64x8xf32> to vector<64x8xf32>
    %cst_653 = arith.constant dense<0.000000e+00> : vector<64x8xf32>
    %588 = tpu.matmul %585, %485, %cst_653 {dimension_numbers = #tpu.dot_dimension_numbers<[1], [0], [0], [1], [0, 0, 1, 1], [], []>} : vector<64x8xf32>, vector<8x8xf32>, vector<64x8xf32> -> vector<64x8xf32>
    %589 = arith.addf %587, %588 : vector<64x8xf32>
    %590 = vector.broadcast %484 : vector<1x8xf32> to vector<64x8xf32>
    %591 = arith.addf %589, %590 : vector<64x8xf32>
    %c0_654 = arith.constant 0 : index
    %c0_655 = arith.constant 0 : index
    %c0_656 = arith.constant 0 : index
    %c0_657 = arith.constant 0 : index
    %592 = vector.load %arg12[%c0_654, %c0_655, %c0_656, %c0_657] : memref<1x4x64x8xf32, #tpu.memory_space<vmem>>, vector<1x1x64x8xf32>
    %593 = vector.shape_cast %592 : vector<1x1x64x8xf32> to vector<64x8xf32>
    %594 = vector.shape_cast %591 : vector<64x8xf32> to vector<1x1x64x8xf32>
    tpu.vector_store %arg12[%c0_654, %c0_655, %c0_656, %c0_657], %594 {strides = array<i32>} : memref<1x4x64x8xf32, #tpu.memory_space<vmem>>, vector<1x1x64x8xf32>,
    %cst_658 = arith.constant 0.000000e+00 : f32
    %595 = vector.broadcast %cst_658 : f32 to vector<64x8xf32>
    %c2_659 = arith.constant 2 : index
    %c0_660 = arith.constant 0 : index
    %c8_661 = arith.constant 8 : index
    %c0_662 = arith.constant 0 : index
    %596 = vector.load %arg14[%c2_659, %c0_660, %c8_661, %c0_662] : memref<4x10x17x8xf32, #tpu.memory_space<vmem>>, vector<1x8x8x8xf32>
    %597 = vector.shape_cast %596 : vector<1x8x8x8xf32> to vector<8x8x8xf32>
    %598 = vector.shape_cast %597 : vector<8x8x8xf32> to vector<64x8xf32>
    %c0_663 = arith.constant 0 : index
    %c0_664 = arith.constant 0 : index
    %c0_665 = arith.constant 0 : index
    %599 = vector.load %arg8[%c0_663, %c0_664, %c0_665] : memref<9x8x8xf32, #tpu.memory_space<vmem>>, vector<1x8x8xf32>
    %600 = vector.shape_cast %599 : vector<1x8x8xf32> to vector<8x8xf32>
    %cst_666 = arith.constant dense<0.000000e+00> : vector<64x8xf32>
    %601 = tpu.matmul %598, %600, %cst_666 {dimension_numbers = #tpu.dot_dimension_numbers<[1], [0], [0], [1], [0, 0, 1, 1], [], []>} : vector<64x8xf32>, vector<8x8xf32>, vector<64x8xf32> -> vector<64x8xf32>
    %602 = arith.addf %595, %601 : vector<64x8xf32>
    %c3_667 = arith.constant 3 : index
    %c0_668 = arith.constant 0 : index
    %c8_669 = arith.constant 8 : index
    %c0_670 = arith.constant 0 : index
    %603 = vector.load %arg14[%c3_667, %c0_668, %c8_669, %c0_670] : memref<4x10x17x8xf32, #tpu.memory_space<vmem>>, vector<1x8x8x8xf32>
    %604 = vector.shape_cast %603 : vector<1x8x8x8xf32> to vector<8x8x8xf32>
    %605 = vector.shape_cast %604 : vector<8x8x8xf32> to vector<64x8xf32>
    %c1_671 = arith.constant 1 : index
    %c0_672 = arith.constant 0 : index
    %c0_673 = arith.constant 0 : index
    %606 = vector.load %arg8[%c1_671, %c0_672, %c0_673] : memref<9x8x8xf32, #tpu.memory_space<vmem>>, vector<1x8x8xf32>
    %607 = vector.shape_cast %606 : vector<1x8x8xf32> to vector<8x8xf32>
    %cst_674 = arith.constant dense<0.000000e+00> : vector<64x8xf32>
    %608 = tpu.matmul %605, %607, %cst_674 {dimension_numbers = #tpu.dot_dimension_numbers<[1], [0], [0], [1], [0, 0, 1, 1], [], []>} : vector<64x8xf32>, vector<8x8xf32>, vector<64x8xf32> -> vector<64x8xf32>
    %609 = arith.addf %602, %608 : vector<64x8xf32>
    %c2_675 = arith.constant 2 : index
    %c0_676 = arith.constant 0 : index
    %c9_677 = arith.constant 9 : index
    %c0_678 = arith.constant 0 : index
    %610 = vector.load %arg14[%c2_675, %c0_676, %c9_677, %c0_678] : memref<4x10x17x8xf32, #tpu.memory_space<vmem>>, vector<1x8x8x8xf32>
    %611 = vector.shape_cast %610 : vector<1x8x8x8xf32> to vector<8x8x8xf32>
    %612 = vector.shape_cast %611 : vector<8x8x8xf32> to vector<64x8xf32>
    %c2_679 = arith.constant 2 : index
    %c0_680 = arith.constant 0 : index
    %c0_681 = arith.constant 0 : index
    %613 = vector.load %arg8[%c2_679, %c0_680, %c0_681] : memref<9x8x8xf32, #tpu.memory_space<vmem>>, vector<1x8x8xf32>
    %614 = vector.shape_cast %613 : vector<1x8x8xf32> to vector<8x8xf32>
    %cst_682 = arith.constant dense<0.000000e+00> : vector<64x8xf32>
    %615 = tpu.matmul %612, %614, %cst_682 {dimension_numbers = #tpu.dot_dimension_numbers<[1], [0], [0], [1], [0, 0, 1, 1], [], []>} : vector<64x8xf32>, vector<8x8xf32>, vector<64x8xf32> -> vector<64x8xf32>
    %616 = arith.addf %609, %615 : vector<64x8xf32>
    %c0_683 = arith.constant 0 : index
    %c1_684 = arith.constant 1 : index
    %c8_685 = arith.constant 8 : index
    %c0_686 = arith.constant 0 : index
    %617 = vector.load %arg14[%c0_683, %c1_684, %c8_685, %c0_686] : memref<4x10x17x8xf32, #tpu.memory_space<vmem>>, vector<1x8x8x8xf32>
    %618 = vector.shape_cast %617 : vector<1x8x8x8xf32> to vector<8x8x8xf32>
    %619 = vector.shape_cast %618 : vector<8x8x8xf32> to vector<64x8xf32>
    %c3_687 = arith.constant 3 : index
    %c0_688 = arith.constant 0 : index
    %c0_689 = arith.constant 0 : index
    %620 = vector.load %arg8[%c3_687, %c0_688, %c0_689] : memref<9x8x8xf32, #tpu.memory_space<vmem>>, vector<1x8x8xf32>
    %621 = vector.shape_cast %620 : vector<1x8x8xf32> to vector<8x8xf32>
    %cst_690 = arith.constant dense<0.000000e+00> : vector<64x8xf32>
    %622 = tpu.matmul %619, %621, %cst_690 {dimension_numbers = #tpu.dot_dimension_numbers<[1], [0], [0], [1], [0, 0, 1, 1], [], []>} : vector<64x8xf32>, vector<8x8xf32>, vector<64x8xf32> -> vector<64x8xf32>
    %623 = arith.addf %616, %622 : vector<64x8xf32>
    %c1_691 = arith.constant 1 : index
    %c1_692 = arith.constant 1 : index
    %c8_693 = arith.constant 8 : index
    %c0_694 = arith.constant 0 : index
    %624 = vector.load %arg14[%c1_691, %c1_692, %c8_693, %c0_694] : memref<4x10x17x8xf32, #tpu.memory_space<vmem>>, vector<1x8x8x8xf32>
    %625 = vector.shape_cast %624 : vector<1x8x8x8xf32> to vector<8x8x8xf32>
    %626 = vector.shape_cast %625 : vector<8x8x8xf32> to vector<64x8xf32>
    %c4_695 = arith.constant 4 : index
    %c0_696 = arith.constant 0 : index
    %c0_697 = arith.constant 0 : index
    %627 = vector.load %arg8[%c4_695, %c0_696, %c0_697] : memref<9x8x8xf32, #tpu.memory_space<vmem>>, vector<1x8x8xf32>
    %628 = vector.shape_cast %627 : vector<1x8x8xf32> to vector<8x8xf32>
    %cst_698 = arith.constant dense<0.000000e+00> : vector<64x8xf32>
    %629 = tpu.matmul %626, %628, %cst_698 {dimension_numbers = #tpu.dot_dimension_numbers<[1], [0], [0], [1], [0, 0, 1, 1], [], []>} : vector<64x8xf32>, vector<8x8xf32>, vector<64x8xf32> -> vector<64x8xf32>
    %630 = arith.addf %623, %629 : vector<64x8xf32>
    %c0_699 = arith.constant 0 : index
    %c1_700 = arith.constant 1 : index
    %c9_701 = arith.constant 9 : index
    %c0_702 = arith.constant 0 : index
    %631 = vector.load %arg14[%c0_699, %c1_700, %c9_701, %c0_702] : memref<4x10x17x8xf32, #tpu.memory_space<vmem>>, vector<1x8x8x8xf32>
    %632 = vector.shape_cast %631 : vector<1x8x8x8xf32> to vector<8x8x8xf32>
    %633 = vector.shape_cast %632 : vector<8x8x8xf32> to vector<64x8xf32>
    %c5_703 = arith.constant 5 : index
    %c0_704 = arith.constant 0 : index
    %c0_705 = arith.constant 0 : index
    %634 = vector.load %arg8[%c5_703, %c0_704, %c0_705] : memref<9x8x8xf32, #tpu.memory_space<vmem>>, vector<1x8x8xf32>
    %635 = vector.shape_cast %634 : vector<1x8x8xf32> to vector<8x8xf32>
    %cst_706 = arith.constant dense<0.000000e+00> : vector<64x8xf32>
    %636 = tpu.matmul %633, %635, %cst_706 {dimension_numbers = #tpu.dot_dimension_numbers<[1], [0], [0], [1], [0, 0, 1, 1], [], []>} : vector<64x8xf32>, vector<8x8xf32>, vector<64x8xf32> -> vector<64x8xf32>
    %637 = arith.addf %630, %636 : vector<64x8xf32>
    %c2_707 = arith.constant 2 : index
    %c1_708 = arith.constant 1 : index
    %c8_709 = arith.constant 8 : index
    %c0_710 = arith.constant 0 : index
    %638 = vector.load %arg14[%c2_707, %c1_708, %c8_709, %c0_710] : memref<4x10x17x8xf32, #tpu.memory_space<vmem>>, vector<1x8x8x8xf32>
    %639 = vector.shape_cast %638 : vector<1x8x8x8xf32> to vector<8x8x8xf32>
    %640 = vector.shape_cast %639 : vector<8x8x8xf32> to vector<64x8xf32>
    %c6_711 = arith.constant 6 : index
    %c0_712 = arith.constant 0 : index
    %c0_713 = arith.constant 0 : index
    %641 = vector.load %arg8[%c6_711, %c0_712, %c0_713] : memref<9x8x8xf32, #tpu.memory_space<vmem>>, vector<1x8x8xf32>
    %642 = vector.shape_cast %641 : vector<1x8x8xf32> to vector<8x8xf32>
    %cst_714 = arith.constant dense<0.000000e+00> : vector<64x8xf32>
    %643 = tpu.matmul %640, %642, %cst_714 {dimension_numbers = #tpu.dot_dimension_numbers<[1], [0], [0], [1], [0, 0, 1, 1], [], []>} : vector<64x8xf32>, vector<8x8xf32>, vector<64x8xf32> -> vector<64x8xf32>
    %644 = arith.addf %637, %643 : vector<64x8xf32>
    %c3_715 = arith.constant 3 : index
    %c1_716 = arith.constant 1 : index
    %c8_717 = arith.constant 8 : index
    %c0_718 = arith.constant 0 : index
    %645 = vector.load %arg14[%c3_715, %c1_716, %c8_717, %c0_718] : memref<4x10x17x8xf32, #tpu.memory_space<vmem>>, vector<1x8x8x8xf32>
    %646 = vector.shape_cast %645 : vector<1x8x8x8xf32> to vector<8x8x8xf32>
    %647 = vector.shape_cast %646 : vector<8x8x8xf32> to vector<64x8xf32>
    %c7_719 = arith.constant 7 : index
    %c0_720 = arith.constant 0 : index
    %c0_721 = arith.constant 0 : index
    %648 = vector.load %arg8[%c7_719, %c0_720, %c0_721] : memref<9x8x8xf32, #tpu.memory_space<vmem>>, vector<1x8x8xf32>
    %649 = vector.shape_cast %648 : vector<1x8x8xf32> to vector<8x8xf32>
    %cst_722 = arith.constant dense<0.000000e+00> : vector<64x8xf32>
    %650 = tpu.matmul %647, %649, %cst_722 {dimension_numbers = #tpu.dot_dimension_numbers<[1], [0], [0], [1], [0, 0, 1, 1], [], []>} : vector<64x8xf32>, vector<8x8xf32>, vector<64x8xf32> -> vector<64x8xf32>
    %651 = arith.addf %644, %650 : vector<64x8xf32>
    %c2_723 = arith.constant 2 : index
    %c1_724 = arith.constant 1 : index
    %c9_725 = arith.constant 9 : index
    %c0_726 = arith.constant 0 : index
    %652 = vector.load %arg14[%c2_723, %c1_724, %c9_725, %c0_726] : memref<4x10x17x8xf32, #tpu.memory_space<vmem>>, vector<1x8x8x8xf32>
    %653 = vector.shape_cast %652 : vector<1x8x8x8xf32> to vector<8x8x8xf32>
    %654 = vector.shape_cast %653 : vector<8x8x8xf32> to vector<64x8xf32>
    %c8_727 = arith.constant 8 : index
    %c0_728 = arith.constant 0 : index
    %c0_729 = arith.constant 0 : index
    %655 = vector.load %arg8[%c8_727, %c0_728, %c0_729] : memref<9x8x8xf32, #tpu.memory_space<vmem>>, vector<1x8x8xf32>
    %656 = vector.shape_cast %655 : vector<1x8x8xf32> to vector<8x8xf32>
    %cst_730 = arith.constant dense<0.000000e+00> : vector<64x8xf32>
    %657 = tpu.matmul %654, %656, %cst_730 {dimension_numbers = #tpu.dot_dimension_numbers<[1], [0], [0], [1], [0, 0, 1, 1], [], []>} : vector<64x8xf32>, vector<8x8xf32>, vector<64x8xf32> -> vector<64x8xf32>
    %658 = arith.addf %651, %657 : vector<64x8xf32>
    %659 = vector.broadcast %483 : vector<1x8xf32> to vector<64x8xf32>
    %660 = arith.addf %658, %659 : vector<64x8xf32>
    %cst_731 = arith.constant 0.000000e+00 : f32
    %661 = vector.broadcast %cst_731 : f32 to vector<64x8xf32>
    %662 = arith.maximumf %660, %661 : vector<64x8xf32>
    %c0_732 = arith.constant 0 : index
    %c1_733 = arith.constant 1 : index
    %c0_734 = arith.constant 0 : index
    %c0_735 = arith.constant 0 : index
    %663 = vector.load %arg12[%c0_732, %c1_733, %c0_734, %c0_735] : memref<1x4x64x8xf32, #tpu.memory_space<vmem>>, vector<1x1x64x8xf32>
    %664 = vector.shape_cast %663 : vector<1x1x64x8xf32> to vector<64x8xf32>
    %cst_736 = arith.constant dense<0.000000e+00> : vector<64x8xf32>
    %665 = tpu.matmul %662, %485, %cst_736 {dimension_numbers = #tpu.dot_dimension_numbers<[1], [0], [0], [1], [0, 0, 1, 1], [], []>} : vector<64x8xf32>, vector<8x8xf32>, vector<64x8xf32> -> vector<64x8xf32>
    %666 = arith.addf %664, %665 : vector<64x8xf32>
    %667 = vector.broadcast %484 : vector<1x8xf32> to vector<64x8xf32>
    %668 = arith.addf %666, %667 : vector<64x8xf32>
    %c0_737 = arith.constant 0 : index
    %c1_738 = arith.constant 1 : index
    %c0_739 = arith.constant 0 : index
    %c0_740 = arith.constant 0 : index
    %669 = vector.load %arg12[%c0_737, %c1_738, %c0_739, %c0_740] : memref<1x4x64x8xf32, #tpu.memory_space<vmem>>, vector<1x1x64x8xf32>
    %670 = vector.shape_cast %669 : vector<1x1x64x8xf32> to vector<64x8xf32>
    %671 = vector.shape_cast %668 : vector<64x8xf32> to vector<1x1x64x8xf32>
    tpu.vector_store %arg12[%c0_737, %c1_738, %c0_739, %c0_740], %671 {strides = array<i32>} : memref<1x4x64x8xf32, #tpu.memory_space<vmem>>, vector<1x1x64x8xf32>,
    %cst_741 = arith.constant 0.000000e+00 : f32
    %672 = vector.broadcast %cst_741 : f32 to vector<64x8xf32>
    %c1_742 = arith.constant 1 : index
    %c1_743 = arith.constant 1 : index
    %c7_744 = arith.constant 7 : index
    %c0_745 = arith.constant 0 : index
    %673 = vector.load %arg14[%c1_742, %c1_743, %c7_744, %c0_745] : memref<4x10x17x8xf32, #tpu.memory_space<vmem>>, vector<1x8x8x8xf32>
    %674 = vector.shape_cast %673 : vector<1x8x8x8xf32> to vector<8x8x8xf32>
    %675 = vector.shape_cast %674 : vector<8x8x8xf32> to vector<64x8xf32>
    %c0_746 = arith.constant 0 : index
    %c0_747 = arith.constant 0 : index
    %c0_748 = arith.constant 0 : index
    %676 = vector.load %arg8[%c0_746, %c0_747, %c0_748] : memref<9x8x8xf32, #tpu.memory_space<vmem>>, vector<1x8x8xf32>
    %677 = vector.shape_cast %676 : vector<1x8x8xf32> to vector<8x8xf32>
    %cst_749 = arith.constant dense<0.000000e+00> : vector<64x8xf32>
    %678 = tpu.matmul %675, %677, %cst_749 {dimension_numbers = #tpu.dot_dimension_numbers<[1], [0], [0], [1], [0, 0, 1, 1], [], []>} : vector<64x8xf32>, vector<8x8xf32>, vector<64x8xf32> -> vector<64x8xf32>
    %679 = arith.addf %672, %678 : vector<64x8xf32>
    %c0_750 = arith.constant 0 : index
    %c1_751 = arith.constant 1 : index
    %c8_752 = arith.constant 8 : index
    %c0_753 = arith.constant 0 : index
    %680 = vector.load %arg14[%c0_750, %c1_751, %c8_752, %c0_753] : memref<4x10x17x8xf32, #tpu.memory_space<vmem>>, vector<1x8x8x8xf32>
    %681 = vector.shape_cast %680 : vector<1x8x8x8xf32> to vector<8x8x8xf32>
    %682 = vector.shape_cast %681 : vector<8x8x8xf32> to vector<64x8xf32>
    %c1_754 = arith.constant 1 : index
    %c0_755 = arith.constant 0 : index
    %c0_756 = arith.constant 0 : index
    %683 = vector.load %arg8[%c1_754, %c0_755, %c0_756] : memref<9x8x8xf32, #tpu.memory_space<vmem>>, vector<1x8x8xf32>
    %684 = vector.shape_cast %683 : vector<1x8x8xf32> to vector<8x8xf32>
    %cst_757 = arith.constant dense<0.000000e+00> : vector<64x8xf32>
    %685 = tpu.matmul %682, %684, %cst_757 {dimension_numbers = #tpu.dot_dimension_numbers<[1], [0], [0], [1], [0, 0, 1, 1], [], []>} : vector<64x8xf32>, vector<8x8xf32>, vector<64x8xf32> -> vector<64x8xf32>
    %686 = arith.addf %679, %685 : vector<64x8xf32>
    %c1_758 = arith.constant 1 : index
    %c1_759 = arith.constant 1 : index
    %c8_760 = arith.constant 8 : index
    %c0_761 = arith.constant 0 : index
    %687 = vector.load %arg14[%c1_758, %c1_759, %c8_760, %c0_761] : memref<4x10x17x8xf32, #tpu.memory_space<vmem>>, vector<1x8x8x8xf32>
    %688 = vector.shape_cast %687 : vector<1x8x8x8xf32> to vector<8x8x8xf32>
    %689 = vector.shape_cast %688 : vector<8x8x8xf32> to vector<64x8xf32>
    %c2_762 = arith.constant 2 : index
    %c0_763 = arith.constant 0 : index
    %c0_764 = arith.constant 0 : index
    %690 = vector.load %arg8[%c2_762, %c0_763, %c0_764] : memref<9x8x8xf32, #tpu.memory_space<vmem>>, vector<1x8x8xf32>
    %691 = vector.shape_cast %690 : vector<1x8x8xf32> to vector<8x8xf32>
    %cst_765 = arith.constant dense<0.000000e+00> : vector<64x8xf32>
    %692 = tpu.matmul %689, %691, %cst_765 {dimension_numbers = #tpu.dot_dimension_numbers<[1], [0], [0], [1], [0, 0, 1, 1], [], []>} : vector<64x8xf32>, vector<8x8xf32>, vector<64x8xf32> -> vector<64x8xf32>
    %693 = arith.addf %686, %692 : vector<64x8xf32>
    %c3_766 = arith.constant 3 : index
    %c1_767 = arith.constant 1 : index
    %c7_768 = arith.constant 7 : index
    %c0_769 = arith.constant 0 : index
    %694 = vector.load %arg14[%c3_766, %c1_767, %c7_768, %c0_769] : memref<4x10x17x8xf32, #tpu.memory_space<vmem>>, vector<1x8x8x8xf32>
    %695 = vector.shape_cast %694 : vector<1x8x8x8xf32> to vector<8x8x8xf32>
    %696 = vector.shape_cast %695 : vector<8x8x8xf32> to vector<64x8xf32>
    %c3_770 = arith.constant 3 : index
    %c0_771 = arith.constant 0 : index
    %c0_772 = arith.constant 0 : index
    %697 = vector.load %arg8[%c3_770, %c0_771, %c0_772] : memref<9x8x8xf32, #tpu.memory_space<vmem>>, vector<1x8x8xf32>
    %698 = vector.shape_cast %697 : vector<1x8x8xf32> to vector<8x8xf32>
    %cst_773 = arith.constant dense<0.000000e+00> : vector<64x8xf32>
    %699 = tpu.matmul %696, %698, %cst_773 {dimension_numbers = #tpu.dot_dimension_numbers<[1], [0], [0], [1], [0, 0, 1, 1], [], []>} : vector<64x8xf32>, vector<8x8xf32>, vector<64x8xf32> -> vector<64x8xf32>
    %700 = arith.addf %693, %699 : vector<64x8xf32>
    %c2_774 = arith.constant 2 : index
    %c1_775 = arith.constant 1 : index
    %c8_776 = arith.constant 8 : index
    %c0_777 = arith.constant 0 : index
    %701 = vector.load %arg14[%c2_774, %c1_775, %c8_776, %c0_777] : memref<4x10x17x8xf32, #tpu.memory_space<vmem>>, vector<1x8x8x8xf32>
    %702 = vector.shape_cast %701 : vector<1x8x8x8xf32> to vector<8x8x8xf32>
    %703 = vector.shape_cast %702 : vector<8x8x8xf32> to vector<64x8xf32>
    %c4_778 = arith.constant 4 : index
    %c0_779 = arith.constant 0 : index
    %c0_780 = arith.constant 0 : index
    %704 = vector.load %arg8[%c4_778, %c0_779, %c0_780] : memref<9x8x8xf32, #tpu.memory_space<vmem>>, vector<1x8x8xf32>
    %705 = vector.shape_cast %704 : vector<1x8x8xf32> to vector<8x8xf32>
    %cst_781 = arith.constant dense<0.000000e+00> : vector<64x8xf32>
    %706 = tpu.matmul %703, %705, %cst_781 {dimension_numbers = #tpu.dot_dimension_numbers<[1], [0], [0], [1], [0, 0, 1, 1], [], []>} : vector<64x8xf32>, vector<8x8xf32>, vector<64x8xf32> -> vector<64x8xf32>
    %707 = arith.addf %700, %706 : vector<64x8xf32>
    %c3_782 = arith.constant 3 : index
    %c1_783 = arith.constant 1 : index
    %c8_784 = arith.constant 8 : index
    %c0_785 = arith.constant 0 : index
    %708 = vector.load %arg14[%c3_782, %c1_783, %c8_784, %c0_785] : memref<4x10x17x8xf32, #tpu.memory_space<vmem>>, vector<1x8x8x8xf32>
    %709 = vector.shape_cast %708 : vector<1x8x8x8xf32> to vector<8x8x8xf32>
    %710 = vector.shape_cast %709 : vector<8x8x8xf32> to vector<64x8xf32>
    %c5_786 = arith.constant 5 : index
    %c0_787 = arith.constant 0 : index
    %c0_788 = arith.constant 0 : index
    %711 = vector.load %arg8[%c5_786, %c0_787, %c0_788] : memref<9x8x8xf32, #tpu.memory_space<vmem>>, vector<1x8x8xf32>
    %712 = vector.shape_cast %711 : vector<1x8x8xf32> to vector<8x8xf32>
    %cst_789 = arith.constant dense<0.000000e+00> : vector<64x8xf32>
    %713 = tpu.matmul %710, %712, %cst_789 {dimension_numbers = #tpu.dot_dimension_numbers<[1], [0], [0], [1], [0, 0, 1, 1], [], []>} : vector<64x8xf32>, vector<8x8xf32>, vector<64x8xf32> -> vector<64x8xf32>
    %714 = arith.addf %707, %713 : vector<64x8xf32>
    %c1_790 = arith.constant 1 : index
    %c2_791 = arith.constant 2 : index
    %c7_792 = arith.constant 7 : index
    %c0_793 = arith.constant 0 : index
    %715 = vector.load %arg14[%c1_790, %c2_791, %c7_792, %c0_793] : memref<4x10x17x8xf32, #tpu.memory_space<vmem>>, vector<1x8x8x8xf32>
    %716 = vector.shape_cast %715 : vector<1x8x8x8xf32> to vector<8x8x8xf32>
    %717 = vector.shape_cast %716 : vector<8x8x8xf32> to vector<64x8xf32>
    %c6_794 = arith.constant 6 : index
    %c0_795 = arith.constant 0 : index
    %c0_796 = arith.constant 0 : index
    %718 = vector.load %arg8[%c6_794, %c0_795, %c0_796] : memref<9x8x8xf32, #tpu.memory_space<vmem>>, vector<1x8x8xf32>
    %719 = vector.shape_cast %718 : vector<1x8x8xf32> to vector<8x8xf32>
    %cst_797 = arith.constant dense<0.000000e+00> : vector<64x8xf32>
    %720 = tpu.matmul %717, %719, %cst_797 {dimension_numbers = #tpu.dot_dimension_numbers<[1], [0], [0], [1], [0, 0, 1, 1], [], []>} : vector<64x8xf32>, vector<8x8xf32>, vector<64x8xf32> -> vector<64x8xf32>
    %721 = arith.addf %714, %720 : vector<64x8xf32>
    %c0_798 = arith.constant 0 : index
    %c2_799 = arith.constant 2 : index
    %c8_800 = arith.constant 8 : index
    %c0_801 = arith.constant 0 : index
    %722 = vector.load %arg14[%c0_798, %c2_799, %c8_800, %c0_801] : memref<4x10x17x8xf32, #tpu.memory_space<vmem>>, vector<1x8x8x8xf32>
    %723 = vector.shape_cast %722 : vector<1x8x8x8xf32> to vector<8x8x8xf32>
    %724 = vector.shape_cast %723 : vector<8x8x8xf32> to vector<64x8xf32>
    %c7_802 = arith.constant 7 : index
    %c0_803 = arith.constant 0 : index
    %c0_804 = arith.constant 0 : index
    %725 = vector.load %arg8[%c7_802, %c0_803, %c0_804] : memref<9x8x8xf32, #tpu.memory_space<vmem>>, vector<1x8x8xf32>
    %726 = vector.shape_cast %725 : vector<1x8x8xf32> to vector<8x8xf32>
    %cst_805 = arith.constant dense<0.000000e+00> : vector<64x8xf32>
    %727 = tpu.matmul %724, %726, %cst_805 {dimension_numbers = #tpu.dot_dimension_numbers<[1], [0], [0], [1], [0, 0, 1, 1], [], []>} : vector<64x8xf32>, vector<8x8xf32>, vector<64x8xf32> -> vector<64x8xf32>
    %728 = arith.addf %721, %727 : vector<64x8xf32>
    %c1_806 = arith.constant 1 : index
    %c2_807 = arith.constant 2 : index
    %c8_808 = arith.constant 8 : index
    %c0_809 = arith.constant 0 : index
    %729 = vector.load %arg14[%c1_806, %c2_807, %c8_808, %c0_809] : memref<4x10x17x8xf32, #tpu.memory_space<vmem>>, vector<1x8x8x8xf32>
    %730 = vector.shape_cast %729 : vector<1x8x8x8xf32> to vector<8x8x8xf32>
    %731 = vector.shape_cast %730 : vector<8x8x8xf32> to vector<64x8xf32>
    %c8_810 = arith.constant 8 : index
    %c0_811 = arith.constant 0 : index
    %c0_812 = arith.constant 0 : index
    %732 = vector.load %arg8[%c8_810, %c0_811, %c0_812] : memref<9x8x8xf32, #tpu.memory_space<vmem>>, vector<1x8x8xf32>
    %733 = vector.shape_cast %732 : vector<1x8x8xf32> to vector<8x8xf32>
    %cst_813 = arith.constant dense<0.000000e+00> : vector<64x8xf32>
    %734 = tpu.matmul %731, %733, %cst_813 {dimension_numbers = #tpu.dot_dimension_numbers<[1], [0], [0], [1], [0, 0, 1, 1], [], []>} : vector<64x8xf32>, vector<8x8xf32>, vector<64x8xf32> -> vector<64x8xf32>
    %735 = arith.addf %728, %734 : vector<64x8xf32>
    %736 = vector.broadcast %483 : vector<1x8xf32> to vector<64x8xf32>
    %737 = arith.addf %735, %736 : vector<64x8xf32>
    %cst_814 = arith.constant 0.000000e+00 : f32
    %738 = vector.broadcast %cst_814 : f32 to vector<64x8xf32>
    %739 = arith.maximumf %737, %738 : vector<64x8xf32>
    %c0_815 = arith.constant 0 : index
    %c2_816 = arith.constant 2 : index
    %c0_817 = arith.constant 0 : index
    %c0_818 = arith.constant 0 : index
    %740 = vector.load %arg12[%c0_815, %c2_816, %c0_817, %c0_818] : memref<1x4x64x8xf32, #tpu.memory_space<vmem>>, vector<1x1x64x8xf32>
    %741 = vector.shape_cast %740 : vector<1x1x64x8xf32> to vector<64x8xf32>
    %cst_819 = arith.constant dense<0.000000e+00> : vector<64x8xf32>
    %742 = tpu.matmul %739, %485, %cst_819 {dimension_numbers = #tpu.dot_dimension_numbers<[1], [0], [0], [1], [0, 0, 1, 1], [], []>} : vector<64x8xf32>, vector<8x8xf32>, vector<64x8xf32> -> vector<64x8xf32>
    %743 = arith.addf %741, %742 : vector<64x8xf32>
    %744 = vector.broadcast %484 : vector<1x8xf32> to vector<64x8xf32>
    %745 = arith.addf %743, %744 : vector<64x8xf32>
    %c0_820 = arith.constant 0 : index
    %c2_821 = arith.constant 2 : index
    %c0_822 = arith.constant 0 : index
    %c0_823 = arith.constant 0 : index
    %746 = vector.load %arg12[%c0_820, %c2_821, %c0_822, %c0_823] : memref<1x4x64x8xf32, #tpu.memory_space<vmem>>, vector<1x1x64x8xf32>
    %747 = vector.shape_cast %746 : vector<1x1x64x8xf32> to vector<64x8xf32>
    %748 = vector.shape_cast %745 : vector<64x8xf32> to vector<1x1x64x8xf32>
    tpu.vector_store %arg12[%c0_820, %c2_821, %c0_822, %c0_823], %748 {strides = array<i32>} : memref<1x4x64x8xf32, #tpu.memory_space<vmem>>, vector<1x1x64x8xf32>,
    %cst_824 = arith.constant 0.000000e+00 : f32
    %749 = vector.broadcast %cst_824 : f32 to vector<64x8xf32>
    %c0_825 = arith.constant 0 : index
    %c1_826 = arith.constant 1 : index
    %c8_827 = arith.constant 8 : index
    %c0_828 = arith.constant 0 : index
    %750 = vector.load %arg14[%c0_825, %c1_826, %c8_827, %c0_828] : memref<4x10x17x8xf32, #tpu.memory_space<vmem>>, vector<1x8x8x8xf32>
    %751 = vector.shape_cast %750 : vector<1x8x8x8xf32> to vector<8x8x8xf32>
    %752 = vector.shape_cast %751 : vector<8x8x8xf32> to vector<64x8xf32>
    %c0_829 = arith.constant 0 : index
    %c0_830 = arith.constant 0 : index
    %c0_831 = arith.constant 0 : index
    %753 = vector.load %arg8[%c0_829, %c0_830, %c0_831] : memref<9x8x8xf32, #tpu.memory_space<vmem>>, vector<1x8x8xf32>
    %754 = vector.shape_cast %753 : vector<1x8x8xf32> to vector<8x8xf32>
    %cst_832 = arith.constant dense<0.000000e+00> : vector<64x8xf32>
    %755 = tpu.matmul %752, %754, %cst_832 {dimension_numbers = #tpu.dot_dimension_numbers<[1], [0], [0], [1], [0, 0, 1, 1], [], []>} : vector<64x8xf32>, vector<8x8xf32>, vector<64x8xf32> -> vector<64x8xf32>
    %756 = arith.addf %749, %755 : vector<64x8xf32>
    %c1_833 = arith.constant 1 : index
    %c1_834 = arith.constant 1 : index
    %c8_835 = arith.constant 8 : index
    %c0_836 = arith.constant 0 : index
    %757 = vector.load %arg14[%c1_833, %c1_834, %c8_835, %c0_836] : memref<4x10x17x8xf32, #tpu.memory_space<vmem>>, vector<1x8x8x8xf32>
    %758 = vector.shape_cast %757 : vector<1x8x8x8xf32> to vector<8x8x8xf32>
    %759 = vector.shape_cast %758 : vector<8x8x8xf32> to vector<64x8xf32>
    %c1_837 = arith.constant 1 : index
    %c0_838 = arith.constant 0 : index
    %c0_839 = arith.constant 0 : index
    %760 = vector.load %arg8[%c1_837, %c0_838, %c0_839] : memref<9x8x8xf32, #tpu.memory_space<vmem>>, vector<1x8x8xf32>
    %761 = vector.shape_cast %760 : vector<1x8x8xf32> to vector<8x8xf32>
    %cst_840 = arith.constant dense<0.000000e+00> : vector<64x8xf32>
    %762 = tpu.matmul %759, %761, %cst_840 {dimension_numbers = #tpu.dot_dimension_numbers<[1], [0], [0], [1], [0, 0, 1, 1], [], []>} : vector<64x8xf32>, vector<8x8xf32>, vector<64x8xf32> -> vector<64x8xf32>
    %763 = arith.addf %756, %762 : vector<64x8xf32>
    %c0_841 = arith.constant 0 : index
    %c1_842 = arith.constant 1 : index
    %c9_843 = arith.constant 9 : index
    %c0_844 = arith.constant 0 : index
    %764 = vector.load %arg14[%c0_841, %c1_842, %c9_843, %c0_844] : memref<4x10x17x8xf32, #tpu.memory_space<vmem>>, vector<1x8x8x8xf32>
    %765 = vector.shape_cast %764 : vector<1x8x8x8xf32> to vector<8x8x8xf32>
    %766 = vector.shape_cast %765 : vector<8x8x8xf32> to vector<64x8xf32>
    %c2_845 = arith.constant 2 : index
    %c0_846 = arith.constant 0 : index
    %c0_847 = arith.constant 0 : index
    %767 = vector.load %arg8[%c2_845, %c0_846, %c0_847] : memref<9x8x8xf32, #tpu.memory_space<vmem>>, vector<1x8x8xf32>
    %768 = vector.shape_cast %767 : vector<1x8x8xf32> to vector<8x8xf32>
    %cst_848 = arith.constant dense<0.000000e+00> : vector<64x8xf32>
    %769 = tpu.matmul %766, %768, %cst_848 {dimension_numbers = #tpu.dot_dimension_numbers<[1], [0], [0], [1], [0, 0, 1, 1], [], []>} : vector<64x8xf32>, vector<8x8xf32>, vector<64x8xf32> -> vector<64x8xf32>
    %770 = arith.addf %763, %769 : vector<64x8xf32>
    %c2_849 = arith.constant 2 : index
    %c1_850 = arith.constant 1 : index
    %c8_851 = arith.constant 8 : index
    %c0_852 = arith.constant 0 : index
    %771 = vector.load %arg14[%c2_849, %c1_850, %c8_851, %c0_852] : memref<4x10x17x8xf32, #tpu.memory_space<vmem>>, vector<1x8x8x8xf32>
    %772 = vector.shape_cast %771 : vector<1x8x8x8xf32> to vector<8x8x8xf32>
    %773 = vector.shape_cast %772 : vector<8x8x8xf32> to vector<64x8xf32>
    %c3_853 = arith.constant 3 : index
    %c0_854 = arith.constant 0 : index
    %c0_855 = arith.constant 0 : index
    %774 = vector.load %arg8[%c3_853, %c0_854, %c0_855] : memref<9x8x8xf32, #tpu.memory_space<vmem>>, vector<1x8x8xf32>
    %775 = vector.shape_cast %774 : vector<1x8x8xf32> to vector<8x8xf32>
    %cst_856 = arith.constant dense<0.000000e+00> : vector<64x8xf32>
    %776 = tpu.matmul %773, %775, %cst_856 {dimension_numbers = #tpu.dot_dimension_numbers<[1], [0], [0], [1], [0, 0, 1, 1], [], []>} : vector<64x8xf32>, vector<8x8xf32>, vector<64x8xf32> -> vector<64x8xf32>
    %777 = arith.addf %770, %776 : vector<64x8xf32>
    %c3_857 = arith.constant 3 : index
    %c1_858 = arith.constant 1 : index
    %c8_859 = arith.constant 8 : index
    %c0_860 = arith.constant 0 : index
    %778 = vector.load %arg14[%c3_857, %c1_858, %c8_859, %c0_860] : memref<4x10x17x8xf32, #tpu.memory_space<vmem>>, vector<1x8x8x8xf32>
    %779 = vector.shape_cast %778 : vector<1x8x8x8xf32> to vector<8x8x8xf32>
    %780 = vector.shape_cast %779 : vector<8x8x8xf32> to vector<64x8xf32>
    %c4_861 = arith.constant 4 : index
    %c0_862 = arith.constant 0 : index
    %c0_863 = arith.constant 0 : index
    %781 = vector.load %arg8[%c4_861, %c0_862, %c0_863] : memref<9x8x8xf32, #tpu.memory_space<vmem>>, vector<1x8x8xf32>
    %782 = vector.shape_cast %781 : vector<1x8x8xf32> to vector<8x8xf32>
    %cst_864 = arith.constant dense<0.000000e+00> : vector<64x8xf32>
    %783 = tpu.matmul %780, %782, %cst_864 {dimension_numbers = #tpu.dot_dimension_numbers<[1], [0], [0], [1], [0, 0, 1, 1], [], []>} : vector<64x8xf32>, vector<8x8xf32>, vector<64x8xf32> -> vector<64x8xf32>
    %784 = arith.addf %777, %783 : vector<64x8xf32>
    %c2_865 = arith.constant 2 : index
    %c1_866 = arith.constant 1 : index
    %c9_867 = arith.constant 9 : index
    %c0_868 = arith.constant 0 : index
    %785 = vector.load %arg14[%c2_865, %c1_866, %c9_867, %c0_868] : memref<4x10x17x8xf32, #tpu.memory_space<vmem>>, vector<1x8x8x8xf32>
    %786 = vector.shape_cast %785 : vector<1x8x8x8xf32> to vector<8x8x8xf32>
    %787 = vector.shape_cast %786 : vector<8x8x8xf32> to vector<64x8xf32>
    %c5_869 = arith.constant 5 : index
    %c0_870 = arith.constant 0 : index
    %c0_871 = arith.constant 0 : index
    %788 = vector.load %arg8[%c5_869, %c0_870, %c0_871] : memref<9x8x8xf32, #tpu.memory_space<vmem>>, vector<1x8x8xf32>
    %789 = vector.shape_cast %788 : vector<1x8x8xf32> to vector<8x8xf32>
    %cst_872 = arith.constant dense<0.000000e+00> : vector<64x8xf32>
    %790 = tpu.matmul %787, %789, %cst_872 {dimension_numbers = #tpu.dot_dimension_numbers<[1], [0], [0], [1], [0, 0, 1, 1], [], []>} : vector<64x8xf32>, vector<8x8xf32>, vector<64x8xf32> -> vector<64x8xf32>
    %791 = arith.addf %784, %790 : vector<64x8xf32>
    %c0_873 = arith.constant 0 : index
    %c2_874 = arith.constant 2 : index
    %c8_875 = arith.constant 8 : index
    %c0_876 = arith.constant 0 : index
    %792 = vector.load %arg14[%c0_873, %c2_874, %c8_875, %c0_876] : memref<4x10x17x8xf32, #tpu.memory_space<vmem>>, vector<1x8x8x8xf32>
    %793 = vector.shape_cast %792 : vector<1x8x8x8xf32> to vector<8x8x8xf32>
    %794 = vector.shape_cast %793 : vector<8x8x8xf32> to vector<64x8xf32>
    %c6_877 = arith.constant 6 : index
    %c0_878 = arith.constant 0 : index
    %c0_879 = arith.constant 0 : index
    %795 = vector.load %arg8[%c6_877, %c0_878, %c0_879] : memref<9x8x8xf32, #tpu.memory_space<vmem>>, vector<1x8x8xf32>
    %796 = vector.shape_cast %795 : vector<1x8x8xf32> to vector<8x8xf32>
    %cst_880 = arith.constant dense<0.000000e+00> : vector<64x8xf32>
    %797 = tpu.matmul %794, %796, %cst_880 {dimension_numbers = #tpu.dot_dimension_numbers<[1], [0], [0], [1], [0, 0, 1, 1], [], []>} : vector<64x8xf32>, vector<8x8xf32>, vector<64x8xf32> -> vector<64x8xf32>
    %798 = arith.addf %791, %797 : vector<64x8xf32>
    %c1_881 = arith.constant 1 : index
    %c2_882 = arith.constant 2 : index
    %c8_883 = arith.constant 8 : index
    %c0_884 = arith.constant 0 : index
    %799 = vector.load %arg14[%c1_881, %c2_882, %c8_883, %c0_884] : memref<4x10x17x8xf32, #tpu.memory_space<vmem>>, vector<1x8x8x8xf32>
    %800 = vector.shape_cast %799 : vector<1x8x8x8xf32> to vector<8x8x8xf32>
    %801 = vector.shape_cast %800 : vector<8x8x8xf32> to vector<64x8xf32>
    %c7_885 = arith.constant 7 : index
    %c0_886 = arith.constant 0 : index
    %c0_887 = arith.constant 0 : index
    %802 = vector.load %arg8[%c7_885, %c0_886, %c0_887] : memref<9x8x8xf32, #tpu.memory_space<vmem>>, vector<1x8x8xf32>
    %803 = vector.shape_cast %802 : vector<1x8x8xf32> to vector<8x8xf32>
    %cst_888 = arith.constant dense<0.000000e+00> : vector<64x8xf32>
    %804 = tpu.matmul %801, %803, %cst_888 {dimension_numbers = #tpu.dot_dimension_numbers<[1], [0], [0], [1], [0, 0, 1, 1], [], []>} : vector<64x8xf32>, vector<8x8xf32>, vector<64x8xf32> -> vector<64x8xf32>
    %805 = arith.addf %798, %804 : vector<64x8xf32>
    %c0_889 = arith.constant 0 : index
    %c2_890 = arith.constant 2 : index
    %c9_891 = arith.constant 9 : index
    %c0_892 = arith.constant 0 : index
    %806 = vector.load %arg14[%c0_889, %c2_890, %c9_891, %c0_892] : memref<4x10x17x8xf32, #tpu.memory_space<vmem>>, vector<1x8x8x8xf32>
    %807 = vector.shape_cast %806 : vector<1x8x8x8xf32> to vector<8x8x8xf32>
    %808 = vector.shape_cast %807 : vector<8x8x8xf32> to vector<64x8xf32>
    %c8_893 = arith.constant 8 : index
    %c0_894 = arith.constant 0 : index
    %c0_895 = arith.constant 0 : index
    %809 = vector.load %arg8[%c8_893, %c0_894, %c0_895] : memref<9x8x8xf32, #tpu.memory_space<vmem>>, vector<1x8x8xf32>
    %810 = vector.shape_cast %809 : vector<1x8x8xf32> to vector<8x8xf32>
    %cst_896 = arith.constant dense<0.000000e+00> : vector<64x8xf32>
    %811 = tpu.matmul %808, %810, %cst_896 {dimension_numbers = #tpu.dot_dimension_numbers<[1], [0], [0], [1], [0, 0, 1, 1], [], []>} : vector<64x8xf32>, vector<8x8xf32>, vector<64x8xf32> -> vector<64x8xf32>
    %812 = arith.addf %805, %811 : vector<64x8xf32>
    %813 = vector.broadcast %483 : vector<1x8xf32> to vector<64x8xf32>
    %814 = arith.addf %812, %813 : vector<64x8xf32>
    %cst_897 = arith.constant 0.000000e+00 : f32
    %815 = vector.broadcast %cst_897 : f32 to vector<64x8xf32>
    %816 = arith.maximumf %814, %815 : vector<64x8xf32>
    %c0_898 = arith.constant 0 : index
    %c3_899 = arith.constant 3 : index
    %c0_900 = arith.constant 0 : index
    %c0_901 = arith.constant 0 : index
    %817 = vector.load %arg12[%c0_898, %c3_899, %c0_900, %c0_901] : memref<1x4x64x8xf32, #tpu.memory_space<vmem>>, vector<1x1x64x8xf32>
    %818 = vector.shape_cast %817 : vector<1x1x64x8xf32> to vector<64x8xf32>
    %cst_902 = arith.constant dense<0.000000e+00> : vector<64x8xf32>
    %819 = tpu.matmul %816, %485, %cst_902 {dimension_numbers = #tpu.dot_dimension_numbers<[1], [0], [0], [1], [0, 0, 1, 1], [], []>} : vector<64x8xf32>, vector<8x8xf32>, vector<64x8xf32> -> vector<64x8xf32>
    %820 = arith.addf %818, %819 : vector<64x8xf32>
    %821 = vector.broadcast %484 : vector<1x8xf32> to vector<64x8xf32>
    %822 = arith.addf %820, %821 : vector<64x8xf32>
    %c0_903 = arith.constant 0 : index
    %c3_904 = arith.constant 3 : index
    %c0_905 = arith.constant 0 : index
    %c0_906 = arith.constant 0 : index
    %823 = vector.load %arg12[%c0_903, %c3_904, %c0_905, %c0_906] : memref<1x4x64x8xf32, #tpu.memory_space<vmem>>, vector<1x1x64x8xf32>
    %824 = vector.shape_cast %823 : vector<1x1x64x8xf32> to vector<64x8xf32>
    %825 = vector.shape_cast %822 : vector<64x8xf32> to vector<1x1x64x8xf32>
    tpu.vector_store %arg12[%c0_903, %c3_904, %c0_905, %c0_906], %825 {strides = array<i32>} : memref<1x4x64x8xf32, #tpu.memory_space<vmem>>, vector<1x1x64x8xf32>,
    return
  }
  func.func @transform_0(%arg0: i32) -> (i32, i32, i32, i32) {
    %c0_i32 = arith.constant 0 : i32
    %c0_i32_0 = arith.constant 0 : i32
    %c0_i32_1 = arith.constant 0 : i32
    %c0_i32_2 = arith.constant 0 : i32
    return %arg0, %c0_i32, %c0_i32_0, %c0_i32_1 : i32, i32, i32, i32
  }
  func.func @transform_1(%arg0: i32) -> (i32, i32, i32) {
    %c0_i32 = arith.constant 0 : i32
    %c0_i32_0 = arith.constant 0 : i32
    %c0_i32_1 = arith.constant 0 : i32
    %c0_i32_2 = arith.constant 0 : i32
    return %c0_i32, %c0_i32_0, %c0_i32_1 : i32, i32, i32
  }
  func.func @transform_2(%arg0: i32) -> (i32, i32) {
    %c0_i32 = arith.constant 0 : i32
    %c0_i32_0 = arith.constant 0 : i32
    %c0_i32_1 = arith.constant 0 : i32
    return %c0_i32, %c0_i32_0 : i32, i32
  }
  func.func @transform_3(%arg0: i32) -> (i32, i32, i32) {
    %c0_i32 = arith.constant 0 : i32
    %c0_i32_0 = arith.constant 0 : i32
    %c0_i32_1 = arith.constant 0 : i32
    %c0_i32_2 = arith.constant 0 : i32
    return %c0_i32, %c0_i32_0, %c0_i32_1 : i32, i32, i32
  }
  func.func @transform_4(%arg0: i32) -> (i32, i32) {
    %c0_i32 = arith.constant 0 : i32
    %c0_i32_0 = arith.constant 0 : i32
    %c0_i32_1 = arith.constant 0 : i32
    return %c0_i32, %c0_i32_0 : i32, i32
  }
  func.func @transform_5(%arg0: i32) -> (i32, i32) {
    %c0_i32 = arith.constant 0 : i32
    %c0_i32_0 = arith.constant 0 : i32
    %c0_i32_1 = arith.constant 0 : i32
    return %c0_i32, %c0_i32_0 : i32, i32
  }
  func.func @transform_6(%arg0: i32) -> (i32, i32) {
    %c0_i32 = arith.constant 0 : i32
    %c0_i32_0 = arith.constant 0 : i32
    %c0_i32_1 = arith.constant 0 : i32
    return %c0_i32, %c0_i32_0 : i32, i32
  }
  func.func @transform_7(%arg0: i32) -> (i32, i32, i32) {
    %c0_i32 = arith.constant 0 : i32
    %c0_i32_0 = arith.constant 0 : i32
    %c0_i32_1 = arith.constant 0 : i32
    %c0_i32_2 = arith.constant 0 : i32
    return %c0_i32, %c0_i32_0, %c0_i32_1 : i32, i32, i32
  }
  func.func @transform_8(%arg0: i32) -> (i32, i32) {
    %c0_i32 = arith.constant 0 : i32
    %c0_i32_0 = arith.constant 0 : i32
    %c0_i32_1 = arith.constant 0 : i32
    return %c0_i32, %c0_i32_0 : i32, i32
  }
  func.func @transform_9(%arg0: i32) -> (i32, i32) {
    %c0_i32 = arith.constant 0 : i32
    %c0_i32_0 = arith.constant 0 : i32
    %c0_i32_1 = arith.constant 0 : i32
    return %c0_i32, %c0_i32_0 : i32, i32
  }
  func.func @transform_10(%arg0: i32) -> (i32, i32) {
    %c0_i32 = arith.constant 0 : i32
    %c0_i32_0 = arith.constant 0 : i32
    %c0_i32_1 = arith.constant 0 : i32
    return %c0_i32, %c0_i32_0 : i32, i32
  }
  func.func @transform_11(%arg0: i32) -> (i32, i32, i32, i32) {
    %c0_i32 = arith.constant 0 : i32
    %c0_i32_0 = arith.constant 0 : i32
    %c0_i32_1 = arith.constant 0 : i32
    %c0_i32_2 = arith.constant 0 : i32
    return %arg0, %c0_i32, %c0_i32_0, %c0_i32_1 : i32, i32, i32, i32
  }
}

</mosaic_0001>

<bundles_post_ra>
// kernel: decoder_block.1
= control target key start
LH: loop header
LB: loop body
LE: loop exit
PB: predicated region body
PF: predicated region fallthrough
CT: control target
= control target key end

     0   :  { %s22922_s0 = inlined_call_operand.hbm [shape: f32[2,8,8,4], index: 0, kind: input, shape index: {}]   ;;  %s22923_s1 = inlined_call_operand.hbm [shape: f32[16,4,8], index: 1, kind: input, shape index: {}]   ;;  %s22924_s2 = inlined_call_operand.hbm [shape: f32[1,8], index: 2, kind: input, shape index: {}]   ;;  %s22925_s3 = inlined_call_operand.hbm [shape: f32[9,8,8], index: 3, kind: input, shape index: {}]   ;;  %s22926_s4 = inlined_call_operand.hbm [shape: f32[1,8], index: 4, kind: input, shape index: {}]   ;;  %s22927_s5 = inlined_call_operand.hbm [shape: f32[8,8], index: 5, kind: input, shape index: {}]   ;;  %s22928_s6 = inlined_call_operand.hbm [shape: f32[1,8], index: 6, kind: input, shape index: {}]   ;;  %s22929_s7 = inlined_call_operand.hbm [shape: f32[9,8,8], index: 7, kind: input, shape index: {}]   ;;  %s22930_s8 = inlined_call_operand.hbm [shape: f32[1,8], index: 8, kind: input, shape index: {}]   ;;  %s22931_s9 = inlined_call_operand.hbm [shape: f32[8,8], index: 9, kind: input, shape index: {}]   ;;  %s22932_s10 = inlined_call_operand.hbm [shape: f32[1,8], index: 10, kind: input, shape index: {}]   ;;  %s22933_s11 = inlined_call_operand.hbm [shape: f32[2,4,64,8], index: 11, kind: output, shape index: {}]  }
   0x1   :  { %22962 = sst [smem:[#allocation44_spill]] %s22922_s0 }
   0x2   :  { %22963 = sst [smem:[#allocation45_spill]] %s22923_s1 }
   0x3   :  { %22964 = sst [smem:[#allocation46_spill]] %s22924_s2 }
   0x4   :  { %22965 = sst [smem:[#allocation47_spill]] %s22933_s11 }
   0x5   :  { %16 = vsyncpa [#allocation5], 0 }
   0x6   :  { %18 = vsyncpa [#allocation5 + $0x1], 0 }
   0x7   :  { %19 = vsyncpa [#allocation8], 0 }
   0x8   :  { %20 = vsyncpa [#allocation11], 0 }
   0x9   :  { %21 = vsyncpa [#allocation14], 0 }
   0xa   :  { %22 = vsyncpa [#allocation17], 0 }
   0xb   :  { %23 = vsyncpa [#allocation20], 0 }
   0xc   :  { %24 = vsyncpa [#allocation6], 0 }
   0xd   :  { %26 = vsyncpa [#allocation6 + $0x1], 0  ;;  %s19771_s17 = smov 0   ;;  %s19773_s18 = smov 0  }
   0xe   :  { %s19775_s19 = smov 0   ;;  %s19777_s20 = smov 0  }
   0xf LB: > { %s19692_s21 = smov [#allocation7]   ;;  %s19792_s23 = sadd.s32 4294967295, %s19690_s20   ;;  %s19690_s20 = sphi %s19777_s20, %s23048_s20   ;;  %s19686_s19 = sphi %s19775_s19, %s23047_s19   ;;  %s19682_s18 = sphi %s19773_s18, %s23046_s18   ;;  %s19678_s17 = sphi %s19771_s17, %s23045_s17  }
  0x10   : > { %s311_s22 = sshll.u32 %s19692_s21, 4  ;;  %p15329_p0 = scmp.ge.s32.totalorder %s19690_s20, 1  ;;  %s19797_s22 = int_to_ptr.vmem [resolvable:$true] %s311_s22 }
  0x11   : > { %p22937_p1 = scmp.eq.s32.totalorder %s19792_s23, 0  ;;  %p299_p2 = scmp.lt.s32.totalorder %s19690_s20, 3 }
  0x12   : > { %s19693_s25 = smov [#allocation10]   ;;  %s19694_s28 = smov [#allocation13]  }
  0x13   : > { %p19799_p3 = pnand %p15329_p0, %p299_p2  ;;  %s335_s26 = sshll.u32 %s19693_s25, 4  ;;  %s19812_s26 = int_to_ptr.vmem [resolvable:$true] %s335_s26 }
  0x14   : > { %s19814_s29 = sshll.u32 %s19694_s28, 4  ;;  %s22969_s1 = sld [smem:[#allocation45_spill]]  ;;  %s361_s29 = int_to_ptr.vmem [resolvable:$true] %s19814_s29 }
  0x15   : > { %s22966_s24 = scalar_select %p19799_p3, 1, 0 }
  0x16   : > { %p19181_p5 = pneg %p19799_p3 }
  0x17   : > { %22967 = sst [smem:[#allocation30_spill]] %s22966_s24 }
  0x18   : > { %p19808_p6 = pnand %p19181_p5, %p22937_p1 }
  0x1a   : > { %s19294_s13 = scalar_lea.hbm %s22969_s1, 1024  ;;  %p19824_p8 = pneg %p19808_p6 }
  0x1b   : > { %p19295_p7 = scmp.ne.s32.totalorder %s22969_s1, %s19294_s13  ;;  %p19301_p11 = scmp.lt.u32.totalorder %s19294_s13, %s22969_s1 }
  0x1d   : > { %p19297_p9 = pnand %p19824_p8, %p19295_p7 }
  0x1f   : > { %p19298_p10 = pneg %p19297_p9 }
  0x21   : > { %p19303_p12 = pnand %p19301_p11, %p19298_p10 }
  0x23   : > { %19306 = shalt.err (!%p19303_p12)
}
  0x24   : > { %s19307_s28 = scalar_lea.vmem %s19797_s22, 1024  ;;  %p19315_p5 = scmp.lt.s32.totalorder %s19797_s22, %s19797_s22 }
  0x25   : > { %p19308_p13 = scmp.ne.s32.totalorder %s19797_s22, %s19307_s28  ;;  %p19316_p4 = scmp.lt.s32.totalorder %s19307_s28, %s19307_s28 }
  0x27   : > { %p19310_p0 = pnand %p19308_p13, %p19824_p8  ;;  %p19317_p7 = por %p19316_p4, %p19315_p5 }
  0x29   : > { %p19311_p2 = pneg %p19310_p0 }
  0x2b   : > { %p19318_p9 = pnand %p19317_p7, %p19311_p2 }
  0x2d   : > { %19321 = shalt.err (!%p19318_p9)
}
  0x2e   : > { %s19695_s30 = smov 64   ;;  %s19696_s12 = smov 4  }
  0x2f   : > { %19184 = dma.hbm_to_vmem [thread:$0]  (!%p19808_p6), %s22969_s1, 1024, %s19797_s22, [#allocation8], %s19695_s30, %s19695_s30, %s19696_s12  }
  0x30   : > { %s19322_s25 = scalar_lea.hbm %s22925_s3, 1152 }
  0x31   : > { %p19323_p4 = scmp.ne.s32.totalorder %s22925_s3, %s19322_s25  ;;  %p19329_p12 = scmp.lt.u32.totalorder %s19322_s25, %s22925_s3 }
  0x33   : > { %p19325_p10 = pnand %p19323_p4, %p19824_p8 }
  0x35   : > { %p19326_p11 = pneg %p19325_p10 }
  0x37   : > { %p19331_p13 = pnand %p19329_p12, %p19326_p11 }
  0x39   : > { %19334 = shalt.err (!%p19331_p13)
}
  0x3a   : > { %s19335_s22 = scalar_lea.vmem %s19812_s26, 1152  ;;  %p19343_p7 = scmp.lt.s32.totalorder %s19812_s26, %s19812_s26 }
  0x3b   : > { %p19336_p0 = scmp.ne.s32.totalorder %s19812_s26, %s19335_s22  ;;  %p19344_p9 = scmp.lt.s32.totalorder %s19335_s22, %s19335_s22 }
  0x3d   : > { %p19338_p2 = pnand %p19336_p0, %p19824_p8  ;;  %p19345_p4 = por %p19344_p9, %p19343_p7 }
  0x3f   : > { %p19339_p5 = pneg %p19338_p2 }
  0x41   : > { %p19346_p10 = pnand %p19345_p4, %p19339_p5 }
  0x43   : > { %19349 = shalt.err (!%p19346_p10)
}
  0x44   : > { %s22939_s11 = smov 128   ;;  %s22941_s0 = smov 8  }
  0x45   : > { %19190 = dma.hbm_to_vmem [thread:$0]  (!%p19808_p6), %s22925_s3, 1152, %s19812_s26, [#allocation11], %s22939_s11, %s22939_s11, %s22941_s0  }
  0x46   : > { %s19350_s14 = scalar_lea.hbm %s22927_s5, 128 }
  0x47   : > { %p19351_p11 = scmp.ne.s32.totalorder %s22927_s5, %s19350_s14  ;;  %p19357_p0 = scmp.lt.u32.totalorder %s19350_s14, %s22927_s5 }
  0x49   : > { %p19353_p12 = pnand %p19351_p11, %p19824_p8 }
  0x4b   : > { %p19354_p13 = pneg %p19353_p12 }
  0x4d   : > { %p19359_p2 = pnand %p19357_p0, %p19354_p13 }
  0x4f   : > { %19362 = shalt.err (!%p19359_p2)
}
  0x50   : > { %s19363_s22 = scalar_lea.vmem %s361_s29, 128  ;;  %p19371_p4 = scmp.lt.s32.totalorder %s361_s29, %s361_s29 }
  0x51   : > { %p19364_p5 = scmp.ne.s32.totalorder %s361_s29, %s19363_s22  ;;  %p19372_p10 = scmp.lt.s32.totalorder %s19363_s22, %s19363_s22 }
  0x53   : > { %p19366_p7 = pnand %p19364_p5, %p19824_p8  ;;  %p19373_p1 = por %p19372_p10, %p19371_p4 }
  0x55   : > { %p19367_p9 = pneg %p19366_p7 }
  0x57   : > { %p19374_p3 = pnand %p19373_p1, %p19367_p9 }
  0x59   : > { %19377 = shalt.err (!%p19374_p3)
}
  0x5a   : > { %19196 = dma.hbm_to_vmem [thread:$0]  (!%p19808_p6), %s22927_s5, 128, %s361_s29, [#allocation14]  }
  0x5b   : > { %s19699_s30 = smov [#allocation16]   ;;  %s19700_s13 = smov [#allocation19]  }
  0x5c   : > { %s381_s12 = sshll.u32 %s19699_s30, 4  ;;  %s406_s14 = sshll.u32 %s19700_s13, 4  ;;  %s382_s12 = int_to_ptr.vmem [resolvable:$true] %s381_s12  ;;  %s407_s14 = int_to_ptr.vmem [resolvable:$true] %s406_s14 }
  0x5d   : > { %s19378_s25 = scalar_lea.hbm %s22929_s7, 1152 }
  0x5e   : > { %p19379_p1 = scmp.ne.s32.totalorder %s22929_s7, %s19378_s25  ;;  %p19385_p12 = scmp.lt.u32.totalorder %s19378_s25, %s22929_s7 }
  0x60   : > { %p19381_p3 = pnand %p19379_p1, %p19824_p8 }
  0x62   : > { %p19382_p11 = pneg %p19381_p3 }
  0x64   : > { %p19387_p13 = pnand %p19385_p12, %p19382_p11 }
  0x66   : > { %19390 = shalt.err (!%p19387_p13)
}
  0x67   : > { %s19391_s29 = scalar_lea.vmem %s382_s12, 1152  ;;  %p19399_p7 = scmp.lt.s32.totalorder %s382_s12, %s382_s12 }
  0x68   : > { %p19392_p0 = scmp.ne.s32.totalorder %s382_s12, %s19391_s29  ;;  %p19400_p9 = scmp.lt.s32.totalorder %s19391_s29, %s19391_s29 }
  0x6a   : > { %p19394_p2 = pnand %p19392_p0, %p19824_p8  ;;  %p19401_p4 = por %p19400_p9, %p19399_p7 }
  0x6c   : > { %p19395_p5 = pneg %p19394_p2 }
  0x6e   : > { %p19402_p10 = pnand %p19401_p4, %p19395_p5 }
  0x70   : > { %19405 = shalt.err (!%p19402_p10)
}
  0x71   : > { %s22971_s24 = smov 128   ;;  %s19406_s21 = scalar_lea.hbm %s22931_s9, 128 }
  0x72   : > { %19202 = dma.hbm_to_vmem [thread:$0]  (!%p19808_p6), %s22929_s7, 1152, %s382_s12, [#allocation17], %s22971_s24, %s22971_s24, %s22941_s0  }
  0x73   : > { %p19407_p1 = scmp.ne.s32.totalorder %s22931_s9, %s19406_s21  ;;  %p19413_p12 = scmp.lt.u32.totalorder %s19406_s21, %s22931_s9 }
  0x75   : > { %p19409_p3 = pnand %p19407_p1, %p19824_p8 }
  0x77   : > { %p19410_p11 = pneg %p19409_p3 }
  0x79   : > { %p19415_p13 = pnand %p19413_p12, %p19410_p11 }
  0x7b   : > { %19418 = shalt.err (!%p19415_p13)
}
  0x7c   : > { %s19419_s29 = scalar_lea.vmem %s407_s14, 128  ;;  %p19427_p7 = scmp.lt.s32.totalorder %s407_s14, %s407_s14 }
  0x7d   : > { %p19420_p0 = scmp.ne.s32.totalorder %s407_s14, %s19419_s29  ;;  %p19428_p9 = scmp.lt.s32.totalorder %s19419_s29, %s19419_s29 }
  0x7f   : > { %p19422_p2 = pnand %p19420_p0, %p19824_p8  ;;  %p19429_p4 = por %p19428_p9, %p19427_p7 }
  0x81   : > { %p19423_p5 = pneg %p19422_p2 }
  0x83   : > { %p19430_p10 = pnand %p19429_p4, %p19423_p5 }
  0x85   : > { %19433 = shalt.err (!%p19430_p10)
}
  0x86   : > { %19208 = dma.hbm_to_vmem [thread:$0]  (!%p19808_p6), %s22931_s9, 128, %s407_s14, [#allocation20]  }
  0x87   : > { %s19701_s30 = smov [#allocation9]   ;;  %s19702_s15 = smov [#allocation12]  }
  0x88   : > { %s325_s13 = sshll.u32 %s19701_s30, 4  ;;  %s349_s21 = sshll.u32 %s19702_s15, 4  ;;  %s326_s13 = int_to_ptr.vmem [resolvable:$true] %s325_s13  ;;  %s350_s21 = int_to_ptr.vmem [resolvable:$true] %s349_s21 }
  0x89   : > { %s22972_s2 = sld [smem:[#allocation46_spill]] }
  0x8f   : > { %s19434_s22 = scalar_lea.hbm %s22972_s2, 16 }
  0x90   : > { %p19435_p1 = scmp.ne.s32.totalorder %s22972_s2, %s19434_s22  ;;  %p19441_p12 = scmp.lt.u32.totalorder %s19434_s22, %s22972_s2 }
  0x92   : > { %p19437_p3 = pnand %p19435_p1, %p19824_p8 }
  0x94   : > { %p19438_p11 = pneg %p19437_p3 }
  0x96   : > { %p19443_p13 = pnand %p19441_p12, %p19438_p11 }
  0x98   : > { %19446 = shalt.err (!%p19443_p13)
}
  0x99   : > { %s19447_s14 = scalar_lea.vmem %s326_s13, 16  ;;  %s19454_s11 = scalar_lea.vmem %s326_s13, 32 }
  0x9a   : > { %p19448_p0 = scmp.ne.s32.totalorder %s326_s13, %s19447_s14  ;;  %p19455_p7 = scmp.lt.s32.totalorder %s326_s13, %s326_s13 }
  0x9b   : > { %p19456_p9 = scmp.lt.s32.totalorder %s19454_s11, %s19447_s14 }
  0x9c   : > { %p19450_p2 = pnand %p19448_p0, %p19824_p8 }
  0x9d   : > { %p19457_p4 = por %p19456_p9, %p19455_p7 }
  0x9e   : > { %p19451_p5 = pneg %p19450_p2 }
  0xa0   : > { %p19458_p10 = pnand %p19457_p4, %p19451_p5 }
  0xa2   : > { %19461 = shalt.err (!%p19458_p10)
}
  0xa3   : > { %19187 = dma.hbm_to_vmem [thread:$0]  (!%p19808_p6), %s22972_s2, 16, %s326_s13, [#allocation8]  }
  0xa4   : > { %s19462_s28 = scalar_lea.hbm %s22926_s4, 16 }
  0xa5   : > { %p19463_p1 = scmp.ne.s32.totalorder %s22926_s4, %s19462_s28  ;;  %p19469_p12 = scmp.lt.u32.totalorder %s19462_s28, %s22926_s4 }
  0xa7   : > { %p19465_p3 = pnand %p19463_p1, %p19824_p8 }
  0xa9   : > { %p19466_p11 = pneg %p19465_p3 }
  0xab   : > { %p19471_p13 = pnand %p19469_p12, %p19466_p11 }
  0xad   : > { %19474 = shalt.err (!%p19471_p13)
}
  0xae   : > { %s19475_s14 = scalar_lea.vmem %s350_s21, 16  ;;  %s19482_s13 = scalar_lea.vmem %s350_s21, 32 }
  0xaf   : > { %p19476_p0 = scmp.ne.s32.totalorder %s350_s21, %s19475_s14  ;;  %p19483_p7 = scmp.lt.s32.totalorder %s350_s21, %s350_s21 }
  0xb0   : > { %p19484_p9 = scmp.lt.s32.totalorder %s19482_s13, %s19475_s14 }
  0xb1   : > { %p19478_p2 = pnand %p19476_p0, %p19824_p8 }
  0xb2   : > { %p19485_p4 = por %p19484_p9, %p19483_p7 }
  0xb3   : > { %p19479_p5 = pneg %p19478_p2 }
  0xb5   : > { %p19486_p10 = pnand %p19485_p4, %p19479_p5 }
  0xb7   : > { %19489 = shalt.err (!%p19486_p10)
}
  0xb8   : > { %19193 = dma.hbm_to_vmem [thread:$0]  (!%p19808_p6), %s22926_s4, 16, %s350_s21, [#allocation11]  }
  0xb9   : > { %s19703_s15 = smov [#allocation15]   ;;  %s19704_s25 = smov [#allocation18]  }
  0xba   : > { %s371_s0 = sshll.u32 %s19703_s15, 4  ;;  %s395_s28 = sshll.u32 %s19704_s25, 4  ;;  %s372_s0 = int_to_ptr.vmem [resolvable:$true] %s371_s0  ;;  %s396_s28 = int_to_ptr.vmem [resolvable:$true] %s395_s28 }
  0xbb   : > { %s19490_s29 = scalar_lea.hbm %s22928_s6, 16 }
  0xbc   : > { %p19491_p1 = scmp.ne.s32.totalorder %s22928_s6, %s19490_s29  ;;  %p19497_p12 = scmp.lt.u32.totalorder %s19490_s29, %s22928_s6 }
  0xbe   : > { %p19493_p3 = pnand %p19491_p1, %p19824_p8 }
  0xc0   : > { %p19494_p11 = pneg %p19493_p3 }
  0xc2   : > { %p19499_p13 = pnand %p19497_p12, %p19494_p11 }
  0xc4   : > { %19502 = shalt.err (!%p19499_p13)
}
  0xc5   : > { %s19503_s21 = scalar_lea.vmem %s372_s0, 16  ;;  %s19510_s30 = scalar_lea.vmem %s372_s0, 32 }
  0xc6   : > { %p19504_p0 = scmp.ne.s32.totalorder %s372_s0, %s19503_s21  ;;  %p19511_p7 = scmp.lt.s32.totalorder %s372_s0, %s372_s0 }
  0xc7   : > { %p19512_p9 = scmp.lt.s32.totalorder %s19510_s30, %s19503_s21 }
  0xc8   : > { %p19506_p2 = pnand %p19504_p0, %p19824_p8 }
  0xc9   : > { %p19513_p4 = por %p19512_p9, %p19511_p7 }
  0xca   : > { %p19507_p5 = pneg %p19506_p2 }
  0xcc   : > { %p19514_p10 = pnand %p19513_p4, %p19507_p5 }
  0xce   : > { %19517 = shalt.err (!%p19514_p10)
}
  0xcf   : > { %19199 = dma.hbm_to_vmem [thread:$0]  (!%p19808_p6), %s22928_s6, 16, %s372_s0, [#allocation14]  }
  0xd0   : > { %s19518_s29 = scalar_lea.hbm %s22930_s8, 16 }
  0xd1   : > { %p19519_p1 = scmp.ne.s32.totalorder %s22930_s8, %s19518_s29  ;;  %p19525_p12 = scmp.lt.u32.totalorder %s19518_s29, %s22930_s8 }
  0xd3   : > { %p19521_p3 = pnand %p19519_p1, %p19824_p8 }
  0xd5   : > { %p19522_p11 = pneg %p19521_p3 }
  0xd7   : > { %p19527_p13 = pnand %p19525_p12, %p19522_p11 }
  0xd9   : > { %19530 = shalt.err (!%p19527_p13)
}
  0xda   : > { %s19531_s21 = scalar_lea.vmem %s396_s28, 16  ;;  %s19538_s0 = scalar_lea.vmem %s396_s28, 32 }
  0xdb   : > { %p19532_p0 = scmp.ne.s32.totalorder %s396_s28, %s19531_s21  ;;  %p19539_p7 = scmp.lt.s32.totalorder %s396_s28, %s396_s28 }
  0xdc   : > { %p19540_p9 = scmp.lt.s32.totalorder %s19538_s0, %s19531_s21 }
  0xdd   : > { %p19534_p2 = pnand %p19532_p0, %p19824_p8 }
  0xde   : > { %p19541_p4 = por %p19540_p9, %p19539_p7 }
  0xdf   : > { %p19535_p5 = pneg %p19534_p2 }
  0xe1   : > { %p19542_p10 = pnand %p19541_p4, %p19535_p5 }
  0xe3   : > { %19545 = shalt.err (!%p19542_p10)
}
  0xe4   : > { %19205 = dma.hbm_to_vmem [thread:$0]  (!%p19808_p6), %s22930_s8, 16, %s396_s28, [#allocation17]  }
  0xe5   : > { %s19705_s25 = smov [#allocation21]   ;;  %s19546_s12 = scalar_lea.hbm %s22932_s10, 16 }
  0xe6   : > { %s417_s22 = sshll.u32 %s19705_s25, 4  ;;  %p19547_p1 = scmp.ne.s32.totalorder %s22932_s10, %s19546_s12  ;;  %s418_s22 = int_to_ptr.vmem [resolvable:$true] %s417_s22 }
  0xe7   : > { %p19553_p12 = scmp.lt.u32.totalorder %s19546_s12, %s22932_s10 }
  0xe8   : > { %p19549_p3 = pnand %p19547_p1, %p19824_p8 }
  0xea   : > { %p19550_p11 = pneg %p19549_p3 }
  0xec   : > { %p19555_p13 = pnand %p19553_p12, %p19550_p11 }
  0xee   : > { %19558 = shalt.err (!%p19555_p13)
}
  0xef   : > { %s19559_s28 = scalar_lea.vmem %s418_s22, 16  ;;  %s19566_s0 = scalar_lea.vmem %s418_s22, 32 }
  0xf0   : > { %p19560_p0 = scmp.ne.s32.totalorder %s418_s22, %s19559_s28  ;;  %p19567_p7 = scmp.lt.s32.totalorder %s418_s22, %s418_s22 }
  0xf1   : > { %p19568_p9 = scmp.lt.s32.totalorder %s19566_s0, %s19559_s28 }
  0xf2   : > { %p19562_p2 = pnand %p19560_p0, %p19824_p8 }
  0xf3   : > { %p19569_p4 = por %p19568_p9, %p19567_p7 }
  0xf4   : > { %p19563_p5 = pneg %p19562_p2 }
  0xf6   : > { %p19570_p10 = pnand %p19569_p4, %p19563_p5 }
  0xf8   : > { %19573 = shalt.err (!%p19570_p10)
}
  0xf9   : > { %19211 = dma.hbm_to_vmem [thread:$0]  (!%p19808_p6), %s22932_s10, 16, %s418_s22, [#allocation20]  }
  0xfa   : > { %s15328_s16 = sadd.s32 4294967294, %s19690_s20   ;;  %s20021_s27 = sadd.s32 1, %s19690_s20  }
  0xfb   : > { %s36_s25 = ssub.s32 %s19690_s20, %s20021_s27  ;;  %s39_s26 = sadd.s32 1, %s19686_s19 }
  0xfc   : > { %p37_p8 = scmp.eq.s32.totalorder %s36_s25, 0  ;;  %p46_p1 = scmp.ne.s32.totalorder %s19686_s19, %s19682_s18 }
  0xfd   : > { %p47_p3 = scmp.eq.s32.totalorder %s19690_s20, 0  ;;  %p52_p11 = scmp.ne.s32.totalorder %s19682_s18, %s19678_s17 }
  0xfe   : > { %s20032_s29 = scalar_select %p37_p8, %s19686_s19, %s39_s26  }
  0xff   : > { %p20034_p12 = por %p47_p3, %p46_p1  ;;  %p22974_p13 = scmp.eq.s32.totalorder %s19792_s23, 0 }
 0x100   : > { %p286_p0 = scmp.eq.s32.totalorder %s19792_s23, 1  ;;  %p292_p2 = scmp.eq.s32.totalorder %s15328_s16, 1 }
 0x101   : > { %p20040_p6 = por %p22974_p13, %p52_p11  ;;  %p19230_p5 = scmp.lt.s32.totalorder %s19690_s20, 2 }
 0x102   : > { %s428_s14 = sand.u32 1, %s19686_s19   ;;  %p20047_p7 = por %p286_p0, %p46_p1 }
 0x103   : > { %p20051_p9 = por %p292_p2, %p52_p11  ;;  %s15341_s21 = sshll.u32 %s428_s14, 6 }
 0x104   : > { %s22976_s13 = scalar_select %p20047_p7, 1, 0 }
 0x105   : > { %s22977_s11 = scalar_select %p20051_p9, 1, 0 }
 0x106   : > { %s16319_s28 = sshll.u32 %s19690_s20, 10  ;;  %s22978_s15 = sld [smem:[#allocation44_spill]] }
 0x107   : > { %s432_s16 = scalar_lea.vmem [#allocation4], %s15341_s21  ;;  %p20065_p4 = pnand %p19230_p5, %p20034_p12 }
 0x108   : > { %s439_s26 = sshll.u32 %s432_s16, 4  ;;  %s20069_s2 = scalar_lea.sflag [#allocation5], %s428_s14  ;;  %s20061_s26 = int_to_ptr.vmem [resolvable:$true] %s439_s26 }
 0x109   : > { %p19576_p8 = pneg %p20065_p4 }
 0x10c   : > { %s20059_s25 = scalar_lea.hbm %s22978_s15, %s16319_s28  ;;  %s19579_s12 = scalar_lea.hbm %s22978_s15, 2048 }
 0x10d   : > { %s19574_s0 = scalar_lea.hbm %s20059_s25, 1024  ;;  %p19580_p11 = scmp.lt.u32.totalorder %s20059_s25, %s22978_s15 }
 0x10e   : > { %p19575_p10 = scmp.ne.s32.totalorder %s20059_s25, %s19574_s0  ;;  %p19581_p12 = scmp.lt.u32.totalorder %s19579_s12, %s19574_s0 }
 0x10f   : > { %p19583_p0 = scmp.lt.u32.totalorder %s19574_s0, %s20059_s25 }
 0x110   : > { %p19577_p1 = pnand %p19576_p8, %p19575_p10  ;;  %p19582_p13 = por %p19581_p12, %p19580_p11 }
 0x112   : > { %p19578_p3 = pneg %p19577_p1  ;;  %p19584_p2 = por %p19583_p0, %p19582_p13 }
 0x114   : > { %p19585_p5 = pnand %p19584_p2, %p19578_p3 }
 0x116   : > { %19588 = shalt.err (!%p19585_p5)
}
 0x117   : > { %s19589_s14 = scalar_lea.vmem %s20061_s26, 1024  ;;  %s19706_s21 = smov [#allocation4]  }
 0x118   : > { %p19590_p10 = scmp.ne.s32.totalorder %s20061_s26, %s19589_s14  ;;  %s19594_s28 = sshll.u32 %s19706_s21, 4  ;;  %s19595_s28 = int_to_ptr.vmem [resolvable:$false] %s19594_s28 }
 0x119   : > { %s19596_s30 = scalar_lea.vmem %s19595_s28, 2048  ;;  %p19597_p7 = scmp.lt.s32.totalorder %s20061_s26, %s19595_s28 }
 0x11a   : > { %p19592_p1 = pnand %p19590_p10, %p19576_p8  ;;  %p19598_p11 = scmp.lt.s32.totalorder %s19596_s30, %s19589_s14 }
 0x11c   : > { %p19593_p9 = pneg %p19592_p1  ;;  %p19599_p12 = por %p19598_p11, %p19597_p7 }
 0x11e   : > { %p19600_p13 = pnand %p19599_p12, %p19593_p9 }
 0x120   : > { %19603 = shalt.err (!%p19600_p13)
}
 0x121   : > { %s22980_s0 = smov 8   ;;  %s22981_s12 = sld [smem:[#allocation30_spill]] }
 0x122   : > { %19215 = dma.hbm_to_vmem [thread:$0]  (!%p20065_p4), %s20059_s25, 1024, %s20061_s26, %s20069_s2, %s22971_s24, %s22971_s24, %s22980_s0  }
 0x127   : > { %p22982_p8 = scmp.ne.s32.totalorder %s22981_s12, 0 }
 0x129   : > { %451 = sbr.rel (%p22982_p8) target bundleno = 4041 (0xfc9), region = 64 }
 0x130   : > { %s20103_s16 = sand.u32 1, %s19682_s18  }
 0x131   : > { %s15345_s14 = sshll.u32 %s20103_s16, 6  ;;  %s454_s21 = scalar_lea.sflag [#allocation5], %s20103_s16 }
 0x132   : > { %s20107_s28 = scalar_lea.vmem [#allocation4], %s15345_s14 }
 0x133   : > { %19649 = dma.done.wait (%p20040_p6), %s454_s21, 1024  }
 0x134   : > { %19651 = vsyncadd (%p20040_p6), %s454_s21, 4294966272  ;;  %p22983_p7 = scmp.eq.s32.totalorder %s19792_s23, 0 }
 0x136   : > { %19653 = dma.done.wait (%p22983_p7), [#allocation8], 1040   ;;  %p22984_p9 = pmov %p22983_p7 }
 0x137   : > { %p22985_p4 = pmov %p22983_p7 }
 0x138   : > { %19655 = vsyncadd (%p22984_p9), [#allocation8], 4294966256 }
 0x139   : > { %19657 = dma.done.wait (%p22985_p4), [#allocation11], 1168   ;;  %p22986_p3 = pmov %p22985_p4 }
 0x13b   : > { %19659 = vsyncadd (%p22986_p3), [#allocation11], 4294966128  ;;  %p22987_p0 = pmov %p22986_p3 }
 0x13d   : > { %19661 = dma.done.wait (%p22987_p0), [#allocation14], 144   ;;  %p22988_p2 = pmov %p22987_p0 }
 0x13e   : > { %p22989_p6 = pmov %p22987_p0 }
 0x13f   : > { %19663 = vsyncadd (%p22988_p2), [#allocation14], 4294967152 }
 0x140   : > { %19665 = dma.done.wait (%p22989_p6), [#allocation17], 1168   ;;  %p22990_p5 = pmov %p22987_p0 }
 0x141   : > { %p22991_p10 = pmov %p22987_p0 }
 0x142   : > { %19667 = vsyncadd (%p22990_p5), [#allocation17], 4294966128 }
 0x143   : > { %19669 = dma.done.wait (%p22991_p10), [#allocation20], 144   ;;  %p22992_p1 = pmov %p22987_p0 }
 0x144   : > { %vm565_vm0 = vcmask 64512   ;;  %vm568_vm1 = vcmask 57344   ;;  %v19707_v0 = vmov 0.0   ;;  %vm536_vm2 = vcmask 31744   ;;  %v708_v1 = vld [vmem:[#allocation7 + $0x4] sm:$0xf] }
 0x145   : > { %19671 = vsyncadd (%p22992_p1), [#allocation20], 4294967152  ;;  %574 = vst.msk [vmem:[#allocation3 + $0x1e8] sm:$0xff] %vm565_vm0, %v19707_v0  ;;  %vm539_vm3 = vcmask 24576   ;;  %vm733_vm4 = vcmask 1043456   ;;  %v672_v4 = vld [vmem:[%s20107_s28] sm:$0xff] }
 0x146   : > { %575 = vst.msk [vmem:[#allocation3 + $0x1f0] sm:$0x1] %vm568_vm1, %v19707_v0  ;;  %582 = vst.msk [vmem:[#allocation3 + $0xe8] sm:$0x1] %vm568_vm1, %v19707_v0  ;;  %v1315_v2 = vld [vmem:[#allocation7 + $0x14] sm:$0xf]  ;;  %17185 = vmatprep.subr.msk.mxu0 %vm733_vm4, %v708_v1 }
 0x147   : > { %576 = vst.msk [vmem:[#allocation3 + $0x2d0] sm:$0xff] %vm565_vm0, %v19707_v0  ;;  %577 = vst.msk [vmem:[#allocation3 + $0x2d8] sm:$0xff] %vm565_vm0, %v19707_v0  ;;  %v698_v3 = vld [vmem:[#allocation7] sm:$0xf]  ;;  %17241 = vmatprep.subr.msk.mxu1 %vm733_vm4, %v1315_v2  ;;  %v673_v5 = vld [vmem:[%s20107_s28 + $0x8] sm:$0xff]  ;;  %17186 = vmatpush3.msk.msra.mxu0 %vm733_vm4, %v708_v1  ;;  %s15356_s1 = sshll.u32 %s20103_s16, 8 }
 0x148   : > { %581 = vst.msk [vmem:[#allocation3 + $0xe0] sm:$0xff] %vm565_vm0, %v19707_v0  ;;  %583 = vst.msk [vmem:[#allocation3 + $0x1c8] sm:$0xff] %vm565_vm0, %v19707_v0  ;;  %v674_v6 = vld [vmem:[%s20107_s28 + $0x10] sm:$0xff]  ;;  %17242 = vmatpush3.msk.msra.mxu1 %vm733_vm4, %v1315_v2  ;;  %v675_v8 = vld [vmem:[%s20107_s28 + $0x18] sm:$0xff]  ;;  %17199 = vmatprep.subr.msk.mxu0 %vm733_vm4, %v698_v3  ;;  %s20635_s2 = scalar_lea.vmem [#allocation22], %s15356_s1  ;;  %s16320_s24 = sshll.u32 %s19792_s23, 12 }
 0x149   : > { %584 = vst.msk [vmem:[#allocation3 + $0x1d0] sm:$0xff] %vm565_vm0, %v19707_v0  ;;  %v676_v9 = vld [vmem:[%s20107_s28 + $0x20] sm:$0xff]  ;;  %v677_v11 = vld [vmem:[%s20107_s28 + $0x28] sm:$0xff]  ;;  %v678_v12 = vld [vmem:[%s20107_s28 + $0x30] sm:$0xff]  ;;  %s15160_s22 = sshll.u32 %s20635_s2, 4  ;;  %s23041_s30 = sld [smem:[#allocation47_spill]]  ;;  %s22873_s22 = int_to_ptr.vmem [resolvable:$true] %s15160_s22 }
 0x14a   : > { %603 = vst.msk [vmem:[#allocation3 + $0x10f] sm:$0x1] %vm568_vm1, %v19707_v0  ;;  %604 = vst.msk [vmem:[#allocation3 + $0x127] sm:$0x1] %vm568_vm1, %v19707_v0  ;;  %v1305_v13 = vld [vmem:[#allocation7 + $0x10] sm:$0xf] }
 0x14b   : > { %605 = vst.msk [vmem:[#allocation3 + $0x13f] sm:$0x1] %vm568_vm1, %v19707_v0  ;;  %606 = vst.msk [vmem:[#allocation3 + $0x157] sm:$0x1] %vm568_vm1, %v19707_v0  ;;  %17255 = vmatprep.subr.msk.mxu1 %vm733_vm4, %v1305_v13  ;;  %v679_v14 = vld [vmem:[%s20107_s28 + $0x38] sm:$0xff]  ;;  %v20617_v55 = vld [vmem:[#allocation10 + $0x8] sm:$0xff] }
 0x14c   : > { %607 = vst.msk [vmem:[#allocation3 + $0x16f] sm:$0x1] %vm568_vm1, %v19707_v0  ;;  %608 = vst.msk [vmem:[#allocation3 + $0x187] sm:$0x1] %vm568_vm1, %v19707_v0  ;;  %v983_v15 = vld [vmem:[#allocation7 + $0x8] sm:$0xf] }
 0x14d   : > { %609 = vst.msk [vmem:[#allocation3 + $0x19f] sm:$0x1] %vm568_vm1, %v19707_v0  ;;  %610 = vst.msk [vmem:[#allocation3 + $0x1b7] sm:$0x1] %vm568_vm1, %v19707_v0  ;;  %v1589_v24 = vld [vmem:[#allocation7 + $0x18] sm:$0xf] }
 0x14e   : > { %623 = vst.msk [vmem:[#allocation3 + $0x2ef] sm:$0x1] %vm568_vm1, %v19707_v0  ;;  %624 = vst.msk [vmem:[#allocation3 + $0x307] sm:$0x1] %vm568_vm1, %v19707_v0  ;;  %v1133_v34 = vld [vmem:[#allocation7 + $0xc] sm:$0xf] }
 0x14f   : > { %625 = vst.msk [vmem:[#allocation3 + $0x31f] sm:$0x1] %vm568_vm1, %v19707_v0  ;;  %626 = vst.msk [vmem:[#allocation3 + $0x337] sm:$0x1] %vm568_vm1, %v19707_v0  ;;  %v1739_v37 = vld [vmem:[#allocation7 + $0x1c] sm:$0xf]  ;;  %s22871_s0 = scalar_lea.hbm %s23041_s30, %s16320_s24 }
 0x150   : > { %627 = vst.msk [vmem:[#allocation3 + $0x34f] sm:$0x1] %vm568_vm1, %v19707_v0  ;;  %628 = vst.msk [vmem:[#allocation3 + $0x367] sm:$0x1] %vm568_vm1, %v19707_v0  ;;  %v1916_v41 = vld [vmem:[#allocation7 + $0x24] sm:$0xf] }
 0x151   : > { %629 = vst.msk [vmem:[#allocation3 + $0x37f] sm:$0x1] %vm568_vm1, %v19707_v0  ;;  %630 = vst.msk [vmem:[#allocation3 + $0x397] sm:$0x1] %vm568_vm1, %v19707_v0  ;;  %v2518_v42 = vld [vmem:[#allocation7 + $0x34] sm:$0xf] }
 0x152   : > { %633 = vst.msk [vmem:[#allocation3 + $0x28] sm:$0x1] %vm568_vm1, %v19707_v0  ;;  %634 = vst.msk [vmem:[#allocation3 + $0x40] sm:$0x1] %vm568_vm1, %v19707_v0  ;;  %v1906_v45 = vld [vmem:[#allocation7 + $0x20] sm:$0xf] }
 0x153   : > { %635 = vst.msk [vmem:[#allocation3 + $0x58] sm:$0x1] %vm568_vm1, %v19707_v0  ;;  %636 = vst.msk [vmem:[#allocation3 + $0x70] sm:$0x1] %vm568_vm1, %v19707_v0  ;;  %v2508_v46 = vld [vmem:[#allocation7 + $0x30] sm:$0xf] }
 0x154   : > { %637 = vst.msk [vmem:[#allocation3 + $0x88] sm:$0x1] %vm568_vm1, %v19707_v0  ;;  %638 = vst.msk [vmem:[#allocation3 + $0xa0] sm:$0x1] %vm568_vm1, %v19707_v0  ;;  %v2191_v48 = vld [vmem:[#allocation7 + $0x28] sm:$0xf] }
 0x155   : > { %639 = vst.msk [vmem:[#allocation3 + $0xb8] sm:$0x1] %vm568_vm1, %v19707_v0  ;;  %640 = vst.msk [vmem:[#allocation3 + $0xd0] sm:$0x1] %vm568_vm1, %v19707_v0  ;;  %v2792_v49 = vld [vmem:[#allocation7 + $0x38] sm:$0xf] }
 0x156   : > { %653 = vst.msk [vmem:[#allocation3 + $0x208] sm:$0x1] %vm568_vm1, %v19707_v0  ;;  %654 = vst.msk [vmem:[#allocation3 + $0x220] sm:$0x1] %vm568_vm1, %v19707_v0  ;;  %v2341_v50 = vld [vmem:[#allocation7 + $0x2c] sm:$0xf] }
 0x157   : > { %655 = vst.msk [vmem:[#allocation3 + $0x238] sm:$0x1] %vm568_vm1, %v19707_v0  ;;  %656 = vst.msk [vmem:[#allocation3 + $0x250] sm:$0x1] %vm568_vm1, %v19707_v0  ;;  %v2942_v51 = vld [vmem:[#allocation7 + $0x3c] sm:$0xf] }
 0x158   : > { %657 = vst.msk [vmem:[#allocation3 + $0x268] sm:$0x1] %vm568_vm1, %v19707_v0  ;;  %658 = vst.msk [vmem:[#allocation3 + $0x280] sm:$0x1] %vm568_vm1, %v19707_v0  ;;  %v20621_v56 = vld [vmem:[#allocation3 + $0x1e8] sm:$0xff]  ;;  %s15147_s23 = scalar_lea.sflag [#allocation6], %s20103_s16 }
 0x159   : > { %659 = vst.msk [vmem:[#allocation3 + $0x298] sm:$0x1] %vm568_vm1, %v19707_v0  ;;  %660 = vst.msk [vmem:[#allocation3 + $0x2b0] sm:$0x1] %vm568_vm1, %v19707_v0  ;;  %v20625_v57 = vld [vmem:[#allocation10] sm:$0xff]  ;;  %s19604_s12 = scalar_lea.vmem %s22873_s22, 4096 }
 0x15a   : > { %611 = vst.msk [vmem:[#allocation3 + $0x1cf] sm:$0x1] %vm568_vm1, %v19707_v0  ;;  %622 = vst.msk [vmem:[#allocation3 + $0x2d7] sm:$0x1] %vm568_vm1, %v19707_v0  ;;  %v20629_v58 = vld [vmem:[#allocation9] ss:$0 sm:$0xff]  ;;  %p19605_p11 = scmp.ne.s32.totalorder %s22873_s22, %s19604_s12 }
 0x15b   : > { %641 = vst.msk [vmem:[#allocation3 + $0xe8] sm:$0x1] %vm568_vm1, %v19707_v0  ;;  %652 = vst.msk [vmem:[#allocation3 + $0x1f0] sm:$0x1] %vm568_vm1, %v19707_v0  ;;  %p23042_p12 = scmp.ne.s32.totalorder %s22976_s13, 0  ;;  %s19708_s14 = smov [#allocation22]  }
 0x15c   : > { %538 = vst.msk [vmem:[#allocation2 + $0x8] sm:$0xff] %vm536_vm2, %v19707_v0  ;;  %537 = vst.msk [vmem:[#allocation2] sm:$0xff] %vm536_vm2, %v19707_v0  ;;  %s19608_s21 = sshll.u32 %s19708_s14, 4  ;;  %s19609_s21 = int_to_ptr.vmem [resolvable:$false] %s19608_s21 }
 0x15d   : > { %542 = vst.msk [vmem:[#allocation2 + $0xd8] sm:$0xff] %vm536_vm2, %v19707_v0  ;;  %543 = vst.msk [vmem:[#allocation2 + $0xe0] sm:$0xff] %vm536_vm2, %v19707_v0  ;;  %p19606_p13 = pnand %p19605_p11, %p23042_p12  ;;  %s19610_s28 = scalar_lea.vmem %s19609_s21, 8192 }
 0x15e   : > { %540 = vst.msk [vmem:[#allocation2 + $0x10] sm:$0x1] %vm539_vm3, %v19707_v0  ;;  %544 = vst.msk [vmem:[#allocation2 + $0xe8] sm:$0x1] %vm539_vm3, %v19707_v0  ;;  %p19611_p7 = scmp.lt.s32.totalorder %s22873_s22, %s19609_s21  ;;  %p19612_p9 = scmp.lt.s32.totalorder %s19610_s28, %s19604_s12 }
 0x15f   : > { %546 = vst.msk [vmem:[#allocation2 + $0x1f] sm:$0x1] %vm539_vm3, %v19707_v0  ;;  %547 = vst.msk [vmem:[#allocation2 + $0x37] sm:$0x1] %vm539_vm3, %v19707_v0  ;;  %p19607_p8 = pneg %p19606_p13 }
 0x160   : > { %548 = vst.msk [vmem:[#allocation2 + $0x4f] sm:$0x1] %vm539_vm3, %v19707_v0  ;;  %549 = vst.msk [vmem:[#allocation2 + $0x67] sm:$0x1] %vm539_vm3, %v19707_v0  ;;  %p19613_p4 = por %p19612_p9, %p19611_p7 }
 0x161   : > { %550 = vst.msk [vmem:[#allocation2 + $0x7f] sm:$0x1] %vm539_vm3, %v19707_v0  ;;  %551 = vst.msk [vmem:[#allocation2 + $0x97] sm:$0x1] %vm539_vm3, %v19707_v0 }
 0x162   : > { %552 = vst.msk [vmem:[#allocation2 + $0xaf] sm:$0x1] %vm539_vm3, %v19707_v0  ;;  %553 = vst.msk [vmem:[#allocation2 + $0xc7] sm:$0x1] %vm539_vm3, %v19707_v0  ;;  %p19614_p3 = pnand %p19613_p4, %p19607_p8 }
 0x163   : > { %556 = vst.msk [vmem:[#allocation2 + $0x28] sm:$0x1] %vm539_vm3, %v19707_v0  ;;  %557 = vst.msk [vmem:[#allocation2 + $0x40] sm:$0x1] %vm539_vm3, %v19707_v0  ;;  %v699_v7 = vld [vmem:[#allocation2 + $0x8] sm:$0xff] }
 0x164   : > { %558 = vst.msk [vmem:[#allocation2 + $0x58] sm:$0x1] %vm539_vm3, %v19707_v0  ;;  %559 = vst.msk [vmem:[#allocation2 + $0x70] sm:$0x1] %vm539_vm3, %v19707_v0  ;;  %17187 = vmatprep.mubr.msk.f32.mxu0 %vm536_vm2, %v699_v7  ;;  %v2790_v53 = vld [vmem:[#allocation2 + $0xe0] sm:$0xff] }
 0x165   : > { %560 = vst.msk [vmem:[#allocation2 + $0x88] sm:$0x1] %vm539_vm3, %v19707_v0  ;;  %561 = vst.msk [vmem:[#allocation2 + $0xa0] sm:$0x1] %vm539_vm3, %v19707_v0 }
 0x166   : > { %562 = vst.msk [vmem:[#allocation2 + $0xb8] sm:$0x1] %vm539_vm3, %v19707_v0  ;;  %563 = vst.msk [vmem:[#allocation2 + $0xd0] sm:$0x1] %vm539_vm3, %v19707_v0 }
 0x167   : > { %555 = vst.msk [vmem:[#allocation2 + $0x10] sm:$0x1] %vm539_vm3, %v19707_v0  ;;  %545 = vst.msk [vmem:[#allocation2 + $0x7] sm:$0x1] %vm539_vm3, %v19707_v0 }
 0x168   : > { %554 = vst.msk [vmem:[#allocation2 + $0xdf] sm:$0x1] %vm539_vm3, %v19707_v0  ;;  %564 = vst.msk [vmem:[#allocation2 + $0xe8] sm:$0x1] %vm539_vm3, %v19707_v0 }
 0x169   : > { %681 = vst.msk [vmem:[#allocation2 + $0x20] sm:$0xff] %vm536_vm2, %v672_v4  ;;  %682 = vst.msk [vmem:[#allocation2 + $0x38] sm:$0xff] %vm536_vm2, %v673_v5 }
 0x16a   : > { %683 = vst.msk [vmem:[#allocation2 + $0x50] sm:$0xff] %vm536_vm2, %v674_v6  ;;  %684 = vst.msk [vmem:[#allocation2 + $0x68] sm:$0xff] %vm536_vm2, %v675_v8 }
 0x16b   : > { %685 = vst.msk [vmem:[#allocation2 + $0x80] sm:$0xff] %vm536_vm2, %v676_v9  ;;  %686 = vst.msk [vmem:[#allocation2 + $0x98] sm:$0xff] %vm536_vm2, %v677_v11 }
 0x16c   : > { %687 = vst.msk [vmem:[#allocation2 + $0xb0] sm:$0xff] %vm536_vm2, %v678_v12  ;;  %688 = vst.msk [vmem:[#allocation2 + $0xc8] sm:$0xff] %vm536_vm2, %v679_v14 }
 0x16e   : > { %v1306_v10 = vld [vmem:[#allocation2 + $0x9] sm:$0xff] }
 0x16f   : > { %17243 = vmatprep.mubr.msk.f32.mxu1 %vm536_vm2, %v1306_v10  ;;  %v690_v31 = vld [vmem:[#allocation2 + $0x7] sm:$0xff]  ;;  %v2189_v52 = vld [vmem:[#allocation2 + $0xdf] sm:$0xff] }
 0x170   : > { %v20297_v16 = vld [vmem:[#allocation2 + $0x20] sm:$0xff]  ;;  %v20301_v18 = vld [vmem:[#allocation2 + $0x38] sm:$0xff] }
 0x171   : > { %v20299_v17 = vld [vmem:[#allocation2 + $0x21] sm:$0xff]  ;;  %17188 = vmatmul.mubr.msk.f32.vlgmr.msra.gmra.mrb[0].mxu0 %vm536_vm2, %v20297_v16  ;;  %v20307_v19 = vld [vmem:[#allocation2 + $0x39] sm:$0xff]  ;;  %v20312_v20 = vld [vmem:[#allocation2 + $0x50] sm:$0xff] }
 0x172   : > { %17244 = vmatmul.mubr.msk.f32.vlgmr.msra.gmra.mrb[0].mxu1 %vm536_vm2, %v20299_v17  ;;  %17200 = vmatpush3.msk.msra.mxu0 %vm733_vm4, %v698_v3  ;;  %v20314_v21 = vld [vmem:[#allocation2 + $0x51] sm:$0xff]  ;;  %v20318_v22 = vld [vmem:[#allocation2 + $0x68] sm:$0xff]  ;;  %v20332_v25 = vld [vmem:[#allocation2 + $0x80] sm:$0xff] }
 0x173   : > { %17190 = vmatprep.mubr.msk.f32.mxu0 %vm536_vm2, %v20301_v18  ;;  %17246 = vmatprep.mubr.msk.f32.mxu1 %vm536_vm2, %v20307_v19  ;;  %v20320_v23 = vld [vmem:[#allocation2 + $0x69] sm:$0xff]  ;;  %v20334_v26 = vld [vmem:[#allocation2 + $0x81] sm:$0xff]  ;;  %v20336_v27 = vld [vmem:[#allocation2 + $0x98] sm:$0xff] }
 0x174   : > { %17213 = vmatprep.subr.msk.mxu0 %vm733_vm4, %v983_v15  ;;  %17256 = vmatpush3.msk.msra.mxu1 %vm733_vm4, %v1305_v13  ;;  %v20338_v28 = vld [vmem:[#allocation2 + $0x99] sm:$0xff]  ;;  %v20349_v29 = vld [vmem:[#allocation2 + $0xb0] sm:$0xff]  ;;  %v20374_v36 = vld [vmem:[#allocation2 + $0x67] sm:$0xff] }
 0x175   : > { %17191 = vmatmul.mubr.msk.f32.gmra.mrb[2].mxu0 %vm536_vm2, %v20312_v20  ;;  %17269 = vmatprep.subr.msk.mxu1 %vm733_vm4, %v1589_v24  ;;  %v20351_v30 = vld [vmem:[#allocation2 + $0xb1] sm:$0xff]  ;;  %v20359_v32 = vld [vmem:[#allocation2 + $0x1f] sm:$0xff]  ;;  %v20437_v43 = vld [vmem:[#allocation2 + $0xc7] sm:$0xff] }
 0x176   : > { %17247 = vmatmul.mubr.msk.f32.gmra.mrb[2].mxu1 %vm536_vm2, %v20314_v21  ;;  %17193 = vmatprep.mubr.msk.f32.mxu0 %vm536_vm2, %v20318_v22  ;;  %v20361_v33 = vld [vmem:[#allocation2 + $0x37] sm:$0xff]  ;;  %v20370_v35 = vld [vmem:[#allocation2 + $0x4f] sm:$0xff]  ;;  %v20386_v38 = vld [vmem:[#allocation2 + $0x7f] sm:$0xff] }
 0x177   : > { %17249 = vmatprep.mubr.msk.f32.mxu1 %vm536_vm2, %v20320_v23  ;;  %v20388_v39 = vld [vmem:[#allocation2 + $0x97] sm:$0xff]  ;;  %v20399_v40 = vld [vmem:[#allocation2 + $0xaf] sm:$0xff]  ;;  %v2940_v54 = vld [vmem:[#allocation2 + $0xe1] sm:$0xff] }
 0x178   : > { %v20439_v44 = vld [vmem:[#allocation2 + $0xc8] sm:$0xff] }
 0x179   : > { %17194 = vmatmul.mubr.msk.f32.gmra.mrb[4].mxu0 %vm536_vm2, %v20332_v25  ;;  %v20477_v47 = vld [vmem:[#allocation2 + $0xc9] sm:$0xff] }
 0x17a   : > { %17250 = vmatmul.mubr.msk.f32.gmra.mrb[4].mxu1 %vm536_vm2, %v20334_v26  ;;  %17196 = vmatprep.mubr.msk.f32.mxu0 %vm536_vm2, %v20336_v27 }
 0x17b   : > { %17252 = vmatprep.mubr.msk.f32.mxu1 %vm536_vm2, %v20338_v28 }
 0x17d   : > { %17197 = vmatmul.mubr.msk.f32.gmra.mrb[6].mxu0 %vm536_vm2, %v20349_v29 }
 0x17e   : > { %17253 = vmatmul.mubr.msk.f32.gmra.mrb[6].mxu1 %vm536_vm2, %v20351_v30  ;;  %17201 = vmatprep.mubr.msk.f32.mxu0 %vm536_vm2, %v690_v31 }
 0x17f   : > { %17257 = vmatprep.mubr.msk.f32.mxu1 %vm536_vm2, %v699_v7 }
 0x181   : > { %17202 = vmatmul.mubr.msk.f32.vlgmr.msra.gmra.mrb[0].mxu0 %vm536_vm2, %v20359_v32 }
 0x182   : > { %17258 = vmatmul.mubr.msk.f32.vlgmr.msra.gmra.mrb[0].mxu1 %vm536_vm2, %v20297_v16  ;;  %17214 = vmatpush3.msk.msra.mxu0 %vm733_vm4, %v983_v15 }
 0x183   : > { %17204 = vmatprep.mubr.msk.f32.mxu0 %vm536_vm2, %v20361_v33  ;;  %17260 = vmatprep.mubr.msk.f32.mxu1 %vm536_vm2, %v20301_v18 }
 0x184   : > { %17227 = vmatprep.subr.msk.mxu0 %vm733_vm4, %v1133_v34  ;;  %17270 = vmatpush3.msk.msra.mxu1 %vm733_vm4, %v1589_v24 }
 0x185   : > { %17205 = vmatmul.mubr.msk.f32.gmra.mrb[2].mxu0 %vm536_vm2, %v20370_v35  ;;  %17283 = vmatprep.subr.msk.mxu1 %vm733_vm4, %v1739_v37 }
 0x186   : > { %17261 = vmatmul.mubr.msk.f32.gmra.mrb[2].mxu1 %vm536_vm2, %v20312_v20  ;;  %17207 = vmatprep.mubr.msk.f32.mxu0 %vm536_vm2, %v20374_v36 }
 0x187   : > { %17263 = vmatprep.mubr.msk.f32.mxu1 %vm536_vm2, %v20318_v22 }
 0x189   : > { %17208 = vmatmul.mubr.msk.f32.gmra.mrb[4].mxu0 %vm536_vm2, %v20386_v38 }
 0x18a   : > { %17264 = vmatmul.mubr.msk.f32.gmra.mrb[4].mxu1 %vm536_vm2, %v20332_v25  ;;  %17210 = vmatprep.mubr.msk.f32.mxu0 %vm536_vm2, %v20388_v39 }
 0x18b   : > { %17266 = vmatprep.mubr.msk.f32.mxu1 %vm536_vm2, %v20336_v27 }
 0x18d   : > { %17211 = vmatmul.mubr.msk.f32.gmra.mrb[6].mxu0 %vm536_vm2, %v20399_v40 }
 0x18e   : > { %17267 = vmatmul.mubr.msk.f32.gmra.mrb[6].mxu1 %vm536_vm2, %v20349_v29  ;;  %17215 = vmatprep.mubr.msk.f32.mxu0 %vm536_vm2, %v20359_v32 }
 0x18f   : > { %17271 = vmatprep.mubr.msk.f32.mxu1 %vm536_vm2, %v20297_v16 }
 0x191   : > { %17216 = vmatmul.mubr.msk.f32.vlgmr.msra.gmra.mrb[0].mxu0 %vm536_vm2, %v20361_v33 }
 0x192   : > { %17272 = vmatmul.mubr.msk.f32.vlgmr.msra.gmra.mrb[0].mxu1 %vm536_vm2, %v20301_v18  ;;  %17228 = vmatpush3.msk.msra.mxu0 %vm733_vm4, %v1133_v34 }
 0x193   : > { %17218 = vmatprep.mubr.msk.f32.mxu0 %vm536_vm2, %v20370_v35  ;;  %17274 = vmatprep.mubr.msk.f32.mxu1 %vm536_vm2, %v20312_v20 }
 0x194   : > { %17284 = vmatpush3.msk.msra.mxu1 %vm733_vm4, %v1739_v37  ;;  %17297 = vmatprep.subr.msk.mxu0 %vm733_vm4, %v1916_v41 }
 0x195   : > { %17353 = vmatprep.subr.msk.mxu1 %vm733_vm4, %v2518_v42  ;;  %17219 = vmatmul.mubr.msk.f32.gmra.mrb[2].mxu0 %vm536_vm2, %v20374_v36 }
 0x196   : > { %17275 = vmatmul.mubr.msk.f32.gmra.mrb[2].mxu1 %vm536_vm2, %v20318_v22  ;;  %17221 = vmatprep.mubr.msk.f32.mxu0 %vm536_vm2, %v20386_v38 }
 0x197   : > { %17277 = vmatprep.mubr.msk.f32.mxu1 %vm536_vm2, %v20332_v25 }
 0x199   : > { %17222 = vmatmul.mubr.msk.f32.gmra.mrb[4].mxu0 %vm536_vm2, %v20388_v39 }
 0x19a   : > { %17278 = vmatmul.mubr.msk.f32.gmra.mrb[4].mxu1 %vm536_vm2, %v20336_v27  ;;  %17224 = vmatprep.mubr.msk.f32.mxu0 %vm536_vm2, %v20399_v40 }
 0x19b   : > { %17280 = vmatprep.mubr.msk.f32.mxu1 %vm536_vm2, %v20349_v29 }
 0x19d   : > { %17225 = vmatmul.mubr.msk.f32.gmra.mrb[6].mxu0 %vm536_vm2, %v20437_v43 }
 0x19e   : > { %17281 = vmatmul.mubr.msk.f32.gmra.mrb[6].mxu1 %vm536_vm2, %v20439_v44  ;;  %17229 = vmatprep.mubr.msk.f32.mxu0 %vm536_vm2, %v20297_v16 }
 0x19f   : > { %17285 = vmatprep.mubr.msk.f32.mxu1 %vm536_vm2, %v20299_v17 }
 0x1a1   : > { %17230 = vmatmul.mubr.msk.f32.vlgmr.msra.gmra.mrb[0].mxu0 %vm536_vm2, %v20301_v18 }
 0x1a2   : > { %17286 = vmatmul.mubr.msk.f32.vlgmr.msra.gmra.mrb[0].mxu1 %vm536_vm2, %v20307_v19  ;;  %17298 = vmatpush3.msk.msra.mxu0 %vm733_vm4, %v1916_v41 }
 0x1a3   : > { %17232 = vmatprep.mubr.msk.f32.mxu0 %vm536_vm2, %v20312_v20  ;;  %17288 = vmatprep.mubr.msk.f32.mxu1 %vm536_vm2, %v20314_v21 }
 0x1a4   : > { %17311 = vmatprep.subr.msk.mxu0 %vm733_vm4, %v1906_v45  ;;  %17354 = vmatpush3.msk.msra.mxu1 %vm733_vm4, %v2518_v42 }
 0x1a5   : > { %17233 = vmatmul.mubr.msk.f32.gmra.mrb[2].mxu0 %vm536_vm2, %v20318_v22  ;;  %17367 = vmatprep.subr.msk.mxu1 %vm733_vm4, %v2508_v46 }
 0x1a6   : > { %17289 = vmatmul.mubr.msk.f32.gmra.mrb[2].mxu1 %vm536_vm2, %v20320_v23  ;;  %17235 = vmatprep.mubr.msk.f32.mxu0 %vm536_vm2, %v20332_v25 }
 0x1a7   : > { %17291 = vmatprep.mubr.msk.f32.mxu1 %vm536_vm2, %v20334_v26 }
 0x1a9   : > { %17236 = vmatmul.mubr.msk.f32.gmra.mrb[4].mxu0 %vm536_vm2, %v20336_v27 }
 0x1aa   : > { %17292 = vmatmul.mubr.msk.f32.gmra.mrb[4].mxu1 %vm536_vm2, %v20338_v28  ;;  %17238 = vmatprep.mubr.msk.f32.mxu0 %vm536_vm2, %v20349_v29 }
 0x1ab   : > { %17294 = vmatprep.mubr.msk.f32.mxu1 %vm536_vm2, %v20351_v30 }
 0x1ad   : > { %17239 = vmatmul.mubr.msk.f32.gmra.mrb[6].mxu0 %vm536_vm2, %v20439_v44 }
 0x1ae   : > { %17295 = vmatmul.mubr.msk.f32.gmra.mrb[6].mxu1 %vm536_vm2, %v20477_v47  ;;  %17299 = vmatprep.mubr.msk.f32.mxu0 %vm536_vm2, %v20297_v16 }
 0x1af   : > { %17355 = vmatprep.mubr.msk.f32.mxu1 %vm536_vm2, %v20299_v17 }
 0x1b1   : > { %17300 = vmatmul.mubr.msk.f32.vlgmr.msra.gmra.mrb[8].mxu0 %vm536_vm2, %v20301_v18 }
 0x1b2   : > { %17356 = vmatmul.mubr.msk.f32.vlgmr.msra.gmra.mrb[8].mxu1 %vm536_vm2, %v20307_v19  ;;  %17312 = vmatpush3.msk.msra.mxu0 %vm733_vm4, %v1906_v45 }
 0x1b3   : > { %17302 = vmatprep.mubr.msk.f32.mxu0 %vm536_vm2, %v20312_v20  ;;  %17358 = vmatprep.mubr.msk.f32.mxu1 %vm536_vm2, %v20314_v21 }
 0x1b4   : > { %17325 = vmatprep.subr.msk.mxu0 %vm733_vm4, %v2191_v48  ;;  %17368 = vmatpush3.msk.msra.mxu1 %vm733_vm4, %v2508_v46 }
 0x1b5   : > { %17303 = vmatmul.mubr.msk.f32.gmra.mrb[10].mxu0 %vm536_vm2, %v20318_v22  ;;  %17381 = vmatprep.subr.msk.mxu1 %vm733_vm4, %v2792_v49 }
 0x1b6   : > { %17359 = vmatmul.mubr.msk.f32.gmra.mrb[10].mxu1 %vm536_vm2, %v20320_v23  ;;  %17305 = vmatprep.mubr.msk.f32.mxu0 %vm536_vm2, %v20332_v25 }
 0x1b7   : > { %17361 = vmatprep.mubr.msk.f32.mxu1 %vm536_vm2, %v20334_v26 }
 0x1b9   : > { %17306 = vmatmul.mubr.msk.f32.gmra.mrb[12].mxu0 %vm536_vm2, %v20336_v27 }
 0x1ba   : > { %17362 = vmatmul.mubr.msk.f32.gmra.mrb[12].mxu1 %vm536_vm2, %v20338_v28  ;;  %17308 = vmatprep.mubr.msk.f32.mxu0 %vm536_vm2, %v20349_v29 }
 0x1bb   : > { %17364 = vmatprep.mubr.msk.f32.mxu1 %vm536_vm2, %v20351_v30 }
 0x1bd   : > { %17309 = vmatmul.mubr.msk.f32.gmra.mrb[14].mxu0 %vm536_vm2, %v20439_v44 }
 0x1be   : > { %17365 = vmatmul.mubr.msk.f32.gmra.mrb[14].mxu1 %vm536_vm2, %v20477_v47  ;;  %17313 = vmatprep.mubr.msk.f32.mxu0 %vm536_vm2, %v20359_v32 }
 0x1bf   : > { %17369 = vmatprep.mubr.msk.f32.mxu1 %vm536_vm2, %v20297_v16 }
 0x1c1   : > { %17314 = vmatmul.mubr.msk.f32.vlgmr.msra.gmra.mrb[8].mxu0 %vm536_vm2, %v20361_v33 }
 0x1c2   : > { %17370 = vmatmul.mubr.msk.f32.vlgmr.msra.gmra.mrb[8].mxu1 %vm536_vm2, %v20301_v18  ;;  %17326 = vmatpush3.msk.msra.mxu0 %vm733_vm4, %v2191_v48 }
 0x1c3   : > { %17316 = vmatprep.mubr.msk.f32.mxu0 %vm536_vm2, %v20370_v35  ;;  %17372 = vmatprep.mubr.msk.f32.mxu1 %vm536_vm2, %v20312_v20 }
 0x1c4   : > { %17339 = vmatprep.subr.msk.mxu0 %vm733_vm4, %v2341_v50  ;;  %17382 = vmatpush3.msk.msra.mxu1 %vm733_vm4, %v2792_v49 }
 0x1c5   : > { %17317 = vmatmul.mubr.msk.f32.gmra.mrb[10].mxu0 %vm536_vm2, %v20374_v36  ;;  %17395 = vmatprep.subr.msk.mxu1 %vm733_vm4, %v2942_v51 }
 0x1c6   : > { %17373 = vmatmul.mubr.msk.f32.gmra.mrb[10].mxu1 %vm536_vm2, %v20318_v22  ;;  %17319 = vmatprep.mubr.msk.f32.mxu0 %vm536_vm2, %v20386_v38 }
 0x1c7   : > { %17375 = vmatprep.mubr.msk.f32.mxu1 %vm536_vm2, %v20332_v25 }
 0x1c9   : > { %17320 = vmatmul.mubr.msk.f32.gmra.mrb[12].mxu0 %vm536_vm2, %v20388_v39 }
 0x1ca   : > { %17376 = vmatmul.mubr.msk.f32.gmra.mrb[12].mxu1 %vm536_vm2, %v20336_v27  ;;  %17322 = vmatprep.mubr.msk.f32.mxu0 %vm536_vm2, %v20399_v40 }
 0x1cb   : > { %17378 = vmatprep.mubr.msk.f32.mxu1 %vm536_vm2, %v20349_v29 }
 0x1cd   : > { %17323 = vmatmul.mubr.msk.f32.gmra.mrb[14].mxu0 %vm536_vm2, %v20437_v43 }
 0x1ce   : > { %17379 = vmatmul.mubr.msk.f32.gmra.mrb[14].mxu1 %vm536_vm2, %v20439_v44  ;;  %17327 = vmatprep.mubr.msk.f32.mxu0 %vm536_vm2, %v20361_v33 }
 0x1cf   : > { %17383 = vmatprep.mubr.msk.f32.mxu1 %vm536_vm2, %v20301_v18 }
 0x1d1   : > { %17328 = vmatmul.mubr.msk.f32.vlgmr.msra.gmra.mrb[8].mxu0 %vm536_vm2, %v20370_v35 }
 0x1d2   : > { %17384 = vmatmul.mubr.msk.f32.vlgmr.msra.gmra.mrb[8].mxu1 %vm536_vm2, %v20312_v20  ;;  %17340 = vmatpush3.msk.msra.mxu0 %vm733_vm4, %v2341_v50 }
 0x1d3   : > { %17330 = vmatprep.mubr.msk.f32.mxu0 %vm536_vm2, %v20374_v36  ;;  %17386 = vmatprep.mubr.msk.f32.mxu1 %vm536_vm2, %v20318_v22 }
 0x1d4   : > { %17396 = vmatpush3.msk.msra.mxu1 %vm733_vm4, %v2942_v51  ;;  %17409 = vmatprep.subr.mxu0 %v20617_v55 }
 0x1d5   : > { %17331 = vmatmul.mubr.msk.f32.gmra.mrb[10].mxu0 %vm536_vm2, %v20386_v38 }
 0x1d6   : > { %17387 = vmatmul.mubr.msk.f32.gmra.mrb[10].mxu1 %vm536_vm2, %v20332_v25  ;;  %17333 = vmatprep.mubr.msk.f32.mxu0 %vm536_vm2, %v20388_v39 }
 0x1d7   : > { %17389 = vmatprep.mubr.msk.f32.mxu1 %vm536_vm2, %v20336_v27 }
 0x1d9   : > { %17334 = vmatmul.mubr.msk.f32.gmra.mrb[12].mxu0 %vm536_vm2, %v20399_v40 }
 0x1da   : > { %17390 = vmatmul.mubr.msk.f32.gmra.mrb[12].mxu1 %vm536_vm2, %v20349_v29  ;;  %17336 = vmatprep.mubr.msk.f32.mxu0 %vm536_vm2, %v20437_v43 }
 0x1db   : > { %17392 = vmatprep.mubr.msk.f32.mxu1 %vm536_vm2, %v20439_v44 }
 0x1dd   : > { %17337 = vmatmul.mubr.msk.f32.gmra.mrb[14].mxu0 %vm536_vm2, %v2189_v52 }
 0x1de   : > { %17393 = vmatmul.mubr.msk.f32.gmra.mrb[14].mxu1 %vm536_vm2, %v2790_v53  ;;  %17341 = vmatprep.mubr.msk.f32.mxu0 %vm536_vm2, %v20301_v18 }
 0x1df   : > { %17397 = vmatprep.mubr.msk.f32.mxu1 %vm536_vm2, %v20307_v19 }
 0x1e1   : > { %17342 = vmatmul.mubr.msk.f32.vlgmr.msra.gmra.mrb[8].mxu0 %vm536_vm2, %v20312_v20 }
 0x1e2   : > { %17398 = vmatmul.mubr.msk.f32.vlgmr.msra.gmra.mrb[8].mxu1 %vm536_vm2, %v20314_v21  ;;  %17344 = vmatprep.mubr.msk.f32.mxu0 %vm536_vm2, %v20318_v22 }
 0x1e3   : > { %17400 = vmatprep.mubr.msk.f32.mxu1 %vm536_vm2, %v20320_v23  ;;  %17410 = vmatpush3.msra.mxu0 %v20617_v55 }
 0x1e4   : > { %17423 = vmatprep.subr.mxu0 %v20625_v57 }
 0x1e5   : > { %17345 = vmatmul.mubr.msk.f32.gmra.mrb[10].mxu0 %vm536_vm2, %v20332_v25 }
 0x1e6   : > { %17401 = vmatmul.mubr.msk.f32.gmra.mrb[10].mxu1 %vm536_vm2, %v20334_v26  ;;  %17347 = vmatprep.mubr.msk.f32.mxu0 %vm536_vm2, %v20336_v27 }
 0x1e7   : > { %17403 = vmatprep.mubr.msk.f32.mxu1 %vm536_vm2, %v20338_v28 }
 0x1e9   : > { %17348 = vmatmul.mubr.msk.f32.gmra.mrb[12].mxu0 %vm536_vm2, %v20349_v29 }
 0x1ea   : > { %17404 = vmatmul.mubr.msk.f32.gmra.mrb[12].mxu1 %vm536_vm2, %v20351_v30  ;;  %17350 = vmatprep.mubr.msk.f32.mxu0 %vm536_vm2, %v20439_v44 }
 0x1eb   : > { %17406 = vmatprep.mubr.msk.f32.mxu1 %vm536_vm2, %v20477_v47 }
 0x1ed   : > { %17351 = vmatmul.mubr.msk.f32.gmra.mrb[14].mxu0 %vm536_vm2, %v2790_v53 }
 0x1ee   : > { %17407 = vmatmul.mubr.msk.f32.gmra.mrb[14].mxu1 %vm536_vm2, %v2940_v54  ;;  %17411 = vmatprep.mubr.msk.f32.mxu0 %vm565_vm0, %v20621_v56 }
 0x274   : > { %v17231_v59 = vpop.f32.mrb[0].mxu0 }
 0x275   : > { %v17287_v60 = vpop.f32.mrb[0].mxu1  ;;  %v1281_v61 = vadd.f32 %v17231_v59, %v20629_v58  ;;  %v1227_v63 = vpop.f32.mrb[1].mxu0 }
 0x276   : > { %v1881_v62 = vadd.f32 %v17287_v60, %v20629_v58  ;;  %v1833_v0 = vpop.f32.mrb[1].mxu1  ;;  %v1280_v1 = vadd.f32 %v20629_v58, %v1227_v63 }
 0x277   : > { %v1880_v2 = vadd.f32 %v20629_v58, %v1833_v0  ;;  %1289 = vst.msk [vmem:[%s20635_s2 + $0x8] sm:$0xff] %vm565_vm0, %v1281_v61 }
 0x278   : > { %15431 = vst.msk [vmem:[%s20635_s2 + $0x48] sm:$0xff] %vm565_vm0, %v1881_v62  ;;  %1288 = vst.msk [vmem:[%s20635_s2] sm:$0xff] %vm565_vm0, %v1280_v1  ;;  %v17234_v3 = vpop.f32.mrb[2].mxu0 }
 0x279   : > { %15430 = vst.msk [vmem:[%s20635_s2 + $0x40] sm:$0xff] %vm565_vm0, %v1880_v2  ;;  %v17290_v4 = vpop.f32.mrb[2].mxu1  ;;  %v1283_v5 = vadd.f32 %v17234_v3, %v20629_v58  ;;  %v1237_v7 = vpop.f32.mrb[3].mxu0 }
 0x27a   : > { %v1883_v6 = vadd.f32 %v17290_v4, %v20629_v58  ;;  %v1843_v8 = vpop.f32.mrb[3].mxu1  ;;  %v1282_v9 = vadd.f32 %v20629_v58, %v1237_v7 }
 0x27b   : > { %v1882_v10 = vadd.f32 %v20629_v58, %v1843_v8  ;;  %1291 = vst.msk [vmem:[%s20635_s2 + $0x18] sm:$0xff] %vm565_vm0, %v1283_v5 }
 0x27c   : > { %15433 = vst.msk [vmem:[%s20635_s2 + $0x58] sm:$0xff] %vm565_vm0, %v1883_v6  ;;  %1290 = vst.msk [vmem:[%s20635_s2 + $0x10] sm:$0xff] %vm565_vm0, %v1282_v9  ;;  %v17237_v11 = vpop.f32.mrb[4].mxu0 }
 0x27d   : > { %15432 = vst.msk [vmem:[%s20635_s2 + $0x50] sm:$0xff] %vm565_vm0, %v1882_v10  ;;  %v17293_v12 = vpop.f32.mrb[4].mxu1  ;;  %v1285_v13 = vadd.f32 %v17237_v11, %v20629_v58  ;;  %v1247_v15 = vpop.f32.mrb[5].mxu0 }
 0x27e   : > { %v1885_v14 = vadd.f32 %v17293_v12, %v20629_v58  ;;  %v1853_v16 = vpop.f32.mrb[5].mxu1  ;;  %v3104_v17 = vld [vmem:[%s20635_s2 + $0x8] sm:$0xff]  ;;  %v1284_v19 = vadd.f32 %v20629_v58, %v1247_v15 }
 0x27f   : > { %v15527_v18 = vld [vmem:[%s20635_s2 + $0x48] sm:$0xff]  ;;  %v1884_v20 = vadd.f32 %v20629_v58, %v1853_v16  ;;  %v3112_v21 = vmax.f32 %v3104_v17, 0.0  ;;  %v3103_v23 = vld [vmem:[%s20635_s2] sm:$0xff]  ;;  %1293 = vst.msk [vmem:[%s20635_s2 + $0x28] sm:$0xff] %vm565_vm0, %v1285_v13 }
 0x280   : > { %v3137_v22 = vmax.f32 %v15527_v18, 0.0  ;;  %v15526_v24 = vld [vmem:[%s20635_s2 + $0x40] sm:$0xff]  ;;  %15435 = vst.msk [vmem:[%s20635_s2 + $0x68] sm:$0xff] %vm565_vm0, %v1885_v14  ;;  %1292 = vst.msk [vmem:[%s20635_s2 + $0x20] sm:$0xff] %vm565_vm0, %v1284_v19  ;;  %v17240_v25 = vpop.f32.mrb[6].mxu0  ;;  %v3111_v28 = vmax.f32 %v3103_v23, 0.0 }
 0x281   : > { %15434 = vst.msk [vmem:[%s20635_s2 + $0x60] sm:$0xff] %vm565_vm0, %v1884_v20  ;;  %v17296_v26 = vpop.f32.mrb[6].mxu1  ;;  %v3136_v27 = vmax.f32 %v15526_v24, 0.0  ;;  %3121 = vst.msk [vmem:[#allocation3 + $0x38] sm:$0xff] %vm565_vm0, %v3112_v21  ;;  %v1287_v29 = vadd.f32 %v17240_v25, %v20629_v58  ;;  %v1257_v31 = vpop.f32.mrb[7].mxu0 }
 0x282   : > { %3146 = vst.msk [vmem:[#allocation3 + $0x128] sm:$0xff] %vm565_vm0, %v3137_v22  ;;  %v1887_v30 = vadd.f32 %v17296_v26, %v20629_v58  ;;  %v1863_v32 = vpop.f32.mrb[7].mxu1  ;;  %v3106_v33 = vld [vmem:[%s20635_s2 + $0x18] sm:$0xff]  ;;  %v1286_v35 = vadd.f32 %v20629_v58, %v1257_v31  ;;  %3120 = vst.msk [vmem:[#allocation3 + $0x20] sm:$0xff] %vm565_vm0, %v3111_v28 }
 0x283   : > { %v15529_v34 = vld [vmem:[%s20635_s2 + $0x58] sm:$0xff]  ;;  %v1886_v36 = vadd.f32 %v20629_v58, %v1863_v32  ;;  %3145 = vst.msk [vmem:[#allocation3 + $0x110] sm:$0xff] %vm565_vm0, %v3136_v27  ;;  %v3105_v37 = vld [vmem:[%s20635_s2 + $0x10] sm:$0xff]  ;;  %1295 = vst.msk [vmem:[%s20635_s2 + $0x38] sm:$0xff] %vm565_vm0, %v1287_v29  ;;  %v3114_v40 = vmax.f32 %v3106_v33, 0.0 }
 0x284   : > { %v15528_v38 = vld [vmem:[%s20635_s2 + $0x50] sm:$0xff]  ;;  %15437 = vst.msk [vmem:[%s20635_s2 + $0x78] sm:$0xff] %vm565_vm0, %v1887_v30  ;;  %v3139_v39 = vmax.f32 %v15529_v34, 0.0  ;;  %1294 = vst.msk [vmem:[%s20635_s2 + $0x30] sm:$0xff] %vm565_vm0, %v1286_v35  ;;  %v3113_v42 = vmax.f32 %v3105_v37, 0.0 }
 0x285   : > { %15436 = vst.msk [vmem:[%s20635_s2 + $0x70] sm:$0xff] %vm565_vm0, %v1886_v36  ;;  %v3138_v41 = vmax.f32 %v15528_v38, 0.0  ;;  %3123 = vst.msk [vmem:[#allocation3 + $0x68] sm:$0xff] %vm565_vm0, %v3114_v40 }
 0x286   : > { %3148 = vst.msk [vmem:[#allocation3 + $0x158] sm:$0xff] %vm565_vm0, %v3139_v39  ;;  %v3108_v43 = vld [vmem:[%s20635_s2 + $0x28] sm:$0xff]  ;;  %3122 = vst.msk [vmem:[#allocation3 + $0x50] sm:$0xff] %vm565_vm0, %v3113_v42 }
 0x287   : > { %v15531_v44 = vld [vmem:[%s20635_s2 + $0x68] sm:$0xff]  ;;  %3147 = vst.msk [vmem:[#allocation3 + $0x140] sm:$0xff] %vm565_vm0, %v3138_v41  ;;  %v3107_v45 = vld [vmem:[%s20635_s2 + $0x20] sm:$0xff]  ;;  %v3116_v48 = vmax.f32 %v3108_v43, 0.0 }
 0x288   : > { %v15530_v46 = vld [vmem:[%s20635_s2 + $0x60] sm:$0xff]  ;;  %v3141_v47 = vmax.f32 %v15531_v44, 0.0  ;;  %v3115_v50 = vmax.f32 %v3107_v45, 0.0 }
 0x289   : > { %v3140_v49 = vmax.f32 %v15530_v46, 0.0  ;;  %3125 = vst.msk [vmem:[#allocation3 + $0x98] sm:$0xff] %vm565_vm0, %v3116_v48 }
 0x28a   : > { %3150 = vst.msk [vmem:[#allocation3 + $0x188] sm:$0xff] %vm565_vm0, %v3141_v47  ;;  %v3110_v51 = vld [vmem:[%s20635_s2 + $0x38] sm:$0xff]  ;;  %3124 = vst.msk [vmem:[#allocation3 + $0x80] sm:$0xff] %vm565_vm0, %v3115_v50 }
 0x28b   : > { %v15533_v52 = vld [vmem:[%s20635_s2 + $0x78] sm:$0xff]  ;;  %3149 = vst.msk [vmem:[#allocation3 + $0x170] sm:$0xff] %vm565_vm0, %v3140_v49  ;;  %v3109_v53 = vld [vmem:[%s20635_s2 + $0x30] sm:$0xff]  ;;  %v3118_v60 = vmax.f32 %v3110_v51, 0.0 }
 0x28c   : > { %v15532_v54 = vld [vmem:[%s20635_s2 + $0x70] sm:$0xff]  ;;  %v3143_v59 = vmax.f32 %v15533_v52, 0.0  ;;  %v3117_v62 = vmax.f32 %v3109_v53, 0.0 }
 0x28d   : > { %v3142_v61 = vmax.f32 %v15532_v54, 0.0  ;;  %3127 = vst.msk [vmem:[#allocation3 + $0xc8] sm:$0xff] %vm565_vm0, %v3118_v60 }
 0x28e   : > { %3152 = vst.msk [vmem:[#allocation3 + $0x1b8] sm:$0xff] %vm565_vm0, %v3143_v59  ;;  %3126 = vst.msk [vmem:[#allocation3 + $0xb0] sm:$0xff] %vm565_vm0, %v3117_v62  ;;  %v20784_v59 = vld [vmem:[#allocation10 + $0x10] sm:$0xff] }
 0x28f   : > { %3151 = vst.msk [vmem:[#allocation3 + $0x1a0] sm:$0xff] %vm565_vm0, %v3142_v61 }
 0x2b4   : > { %v17343_v63 = vpop.f32.mrb[8].mxu0 }
 0x2b5   : > { %v17399_v0 = vpop.f32.mrb[8].mxu1  ;;  %v2483_v1 = vadd.f32 %v17343_v63, %v20629_v58  ;;  %v2435_v3 = vpop.f32.mrb[9].mxu0 }
 0x2b6   : > { %v3084_v2 = vadd.f32 %v17399_v0, %v20629_v58  ;;  %v3036_v4 = vpop.f32.mrb[9].mxu1  ;;  %v2482_v5 = vadd.f32 %v20629_v58, %v2435_v3 }
 0x2b7   : > { %v3083_v6 = vadd.f32 %v20629_v58, %v3036_v4  ;;  %15475 = vst.msk [vmem:[%s20635_s2 + $0x88] sm:$0xff] %vm565_vm0, %v2483_v1 }
 0x2b8   : > { %15519 = vst.msk [vmem:[%s20635_s2 + $0xc8] sm:$0xff] %vm565_vm0, %v3084_v2  ;;  %15474 = vst.msk [vmem:[%s20635_s2 + $0x80] sm:$0xff] %vm565_vm0, %v2482_v5  ;;  %v17346_v7 = vpop.f32.mrb[10].mxu0 }
 0x2b9   : > { %15518 = vst.msk [vmem:[%s20635_s2 + $0xc0] sm:$0xff] %vm565_vm0, %v3083_v6  ;;  %v17402_v8 = vpop.f32.mrb[10].mxu1  ;;  %v2485_v9 = vadd.f32 %v17346_v7, %v20629_v58  ;;  %v2445_v11 = vpop.f32.mrb[11].mxu0 }
 0x2ba   : > { %v3086_v10 = vadd.f32 %v17402_v8, %v20629_v58  ;;  %v3046_v12 = vpop.f32.mrb[11].mxu1  ;;  %v2484_v13 = vadd.f32 %v20629_v58, %v2445_v11  ;;  %v20825_v11 = vld [vmem:[#allocation13] sm:$0xff] }
 0x2bb   : > { %v3085_v14 = vadd.f32 %v20629_v58, %v3046_v12  ;;  %15477 = vst.msk [vmem:[%s20635_s2 + $0x98] sm:$0xff] %vm565_vm0, %v2485_v9  ;;  %v3204_v9 = vld [vmem:[#allocation3 + $0x2d7] sm:$0xff]  ;;  %17535 = vmatprep.subr.mxu1 %v20825_v11 }
 0x2bc   : > { %15521 = vst.msk [vmem:[%s20635_s2 + $0xd8] sm:$0xff] %vm565_vm0, %v3086_v10  ;;  %15476 = vst.msk [vmem:[%s20635_s2 + $0x90] sm:$0xff] %vm565_vm0, %v2484_v13  ;;  %v17349_v15 = vpop.f32.mrb[12].mxu0  ;;  %17536 = vmatpush3.msra.mxu1 %v20825_v11  ;;  %v20832_v13 = vld [vmem:[#allocation10 + $0x18] sm:$0xff] }
 0x2bd   : > { %15520 = vst.msk [vmem:[%s20635_s2 + $0xd0] sm:$0xff] %vm565_vm0, %v3085_v14  ;;  %v17405_v16 = vpop.f32.mrb[12].mxu1  ;;  %v2487_v17 = vadd.f32 %v17349_v15, %v20629_v58  ;;  %v2455_v19 = vpop.f32.mrb[13].mxu0  ;;  %17549 = vmatprep.subr.mxu1 %v20617_v55 }
 0x2be   : > { %v3088_v18 = vadd.f32 %v17405_v16, %v20629_v58  ;;  %v3056_v20 = vpop.f32.mrb[13].mxu1  ;;  %v15535_v21 = vld [vmem:[%s20635_s2 + $0x88] sm:$0xff]  ;;  %v2486_v23 = vadd.f32 %v20629_v58, %v2455_v19 }
 0x2bf   : > { %v15543_v22 = vld [vmem:[%s20635_s2 + $0xc8] sm:$0xff]  ;;  %v3087_v24 = vadd.f32 %v20629_v58, %v3056_v20  ;;  %v15534_v25 = vld [vmem:[%s20635_s2 + $0x80] sm:$0xff]  ;;  %15479 = vst.msk [vmem:[%s20635_s2 + $0xa8] sm:$0xff] %vm565_vm0, %v2487_v17  ;;  %v3162_v27 = vmax.f32 %v15535_v21, 0.0 }
 0x2c0   : > { %v15542_v26 = vld [vmem:[%s20635_s2 + $0xc0] sm:$0xff]  ;;  %15523 = vst.msk [vmem:[%s20635_s2 + $0xe8] sm:$0xff] %vm565_vm0, %v3088_v18  ;;  %v3187_v28 = vmax.f32 %v15543_v22, 0.0  ;;  %v3161_v29 = vmax.f32 %v15534_v25, 0.0  ;;  %15478 = vst.msk [vmem:[%s20635_s2 + $0xa0] sm:$0xff] %vm565_vm0, %v2486_v23  ;;  %v17352_v31 = vpop.f32.mrb[14].mxu0 }
 0x2c1   : > { %v3186_v30 = vmax.f32 %v15542_v26, 0.0  ;;  %15522 = vst.msk [vmem:[%s20635_s2 + $0xe0] sm:$0xff] %vm565_vm0, %v3087_v24  ;;  %v17408_v32 = vpop.f32.mrb[14].mxu1  ;;  %v2489_v33 = vadd.f32 %v17352_v31, %v20629_v58  ;;  %v2465_v35 = vpop.f32.mrb[15].mxu0  ;;  %3171 = vst.msk [vmem:[#allocation3 + $0x218] sm:$0xff] %vm565_vm0, %v3162_v27  ;;  %v20859_v19 = vld [vmem:[#allocation3 + $0x2d8] sm:$0xff] }
 0x2c2   : > { %v3090_v34 = vadd.f32 %v17408_v32, %v20629_v58  ;;  %v3066_v36 = vpop.f32.mrb[15].mxu1  ;;  %3196 = vst.msk [vmem:[#allocation3 + $0x308] sm:$0xff] %vm565_vm0, %v3187_v28  ;;  %3170 = vst.msk [vmem:[#allocation3 + $0x200] sm:$0xff] %vm565_vm0, %v3161_v29  ;;  %v15537_v37 = vld [vmem:[%s20635_s2 + $0x98] sm:$0xff]  ;;  %v2488_v39 = vadd.f32 %v20629_v58, %v2465_v35  ;;  %v20899_v29 = vld [vmem:[#allocation3 + $0x10f] sm:$0xff] }
 0x2c3   : > { %3195 = vst.msk [vmem:[#allocation3 + $0x2f0] sm:$0xff] %vm565_vm0, %v3186_v30  ;;  %v15545_v38 = vld [vmem:[%s20635_s2 + $0xd8] sm:$0xff]  ;;  %v3089_v40 = vadd.f32 %v20629_v58, %v3066_v36  ;;  %v15536_v41 = vld [vmem:[%s20635_s2 + $0x90] sm:$0xff]  ;;  %15481 = vst.msk [vmem:[%s20635_s2 + $0xb8] sm:$0xff] %vm565_vm0, %v2489_v33  ;;  %v3164_v43 = vmax.f32 %v15537_v37, 0.0 }
 0x2c4   : > { %v15544_v42 = vld [vmem:[%s20635_s2 + $0xd0] sm:$0xff]  ;;  %15525 = vst.msk [vmem:[%s20635_s2 + $0xf8] sm:$0xff] %vm565_vm0, %v3090_v34  ;;  %v3189_v44 = vmax.f32 %v15545_v38, 0.0  ;;  %15480 = vst.msk [vmem:[%s20635_s2 + $0xb0] sm:$0xff] %vm565_vm0, %v2488_v39  ;;  %v3163_v45 = vmax.f32 %v15536_v41, 0.0  ;;  %v20869_v22 = vld [vmem:[#allocation10 + $0x20] sm:$0xff] }
 0x2c5   : > { %15524 = vst.msk [vmem:[%s20635_s2 + $0xf0] sm:$0xff] %vm565_vm0, %v3089_v40  ;;  %v3188_v46 = vmax.f32 %v15544_v42, 0.0  ;;  %3173 = vst.msk [vmem:[#allocation3 + $0x248] sm:$0xff] %vm565_vm0, %v3164_v43  ;;  %v20903_v30 = vld [vmem:[#allocation3 + $0x127] sm:$0xff]  ;;  %v20909_v32 = vld [vmem:[#allocation3 + $0x13f] sm:$0xff] }
 0x2c6   : > { %3198 = vst.msk [vmem:[#allocation3 + $0x338] sm:$0xff] %vm565_vm0, %v3189_v44  ;;  %v15539_v58 = vld [vmem:[%s20635_s2 + $0xa8] sm:$0xff]  ;;  %3172 = vst.msk [vmem:[#allocation3 + $0x230] sm:$0xff] %vm565_vm0, %v3163_v45  ;;  %v20905_v31 = vld [vmem:[#allocation10 + $0x28] sm:$0xff] }
 0x2c7   : > { %v15547_v47 = vld [vmem:[%s20635_s2 + $0xe8] sm:$0xff]  ;;  %3197 = vst.msk [vmem:[#allocation3 + $0x320] sm:$0xff] %vm565_vm0, %v3188_v46  ;;  %v15538_v48 = vld [vmem:[%s20635_s2 + $0xa0] sm:$0xff]  ;;  %v3166_v50 = vmax.f32 %v15539_v58, 0.0  ;;  %v20927_v36 = vld [vmem:[#allocation3 + $0x19f] sm:$0xff] }
 0x2c8   : > { %v15546_v49 = vld [vmem:[%s20635_s2 + $0xe0] sm:$0xff]  ;;  %v3191_v51 = vmax.f32 %v15547_v47, 0.0  ;;  %v3165_v52 = vmax.f32 %v15538_v48, 0.0  ;;  %v20791_v62 = vld [vmem:[#allocation3 + $0x218] sm:$0xff]  ;;  %22993 = vst [vmem:[#allocation31_spill] sm:$0xff] %v20927_v36  ;;  %v20935_v38 = vld [vmem:[#allocation3 + $0x20] sm:$0xff] }
 0x2c9   : > { %v3190_v53 = vmax.f32 %v15546_v49, 0.0  ;;  %v20781_v54 = vld [vmem:[#allocation3 + $0x200] sm:$0xff]  ;;  %3175 = vst.msk [vmem:[#allocation3 + $0x278] sm:$0xff] %vm565_vm0, %v3166_v50  ;;  %v20873_v23 = vld [vmem:[#allocation3 + $0x308] sm:$0xff]  ;;  %v20915_v33 = vld [vmem:[#allocation3 + $0x157] sm:$0xff] }
 0x2ca   : > { %3200 = vst.msk [vmem:[#allocation3 + $0x368] sm:$0xff] %vm565_vm0, %v3191_v51  ;;  %v15541_v60 = vld [vmem:[%s20635_s2 + $0xb8] sm:$0xff]  ;;  %17412 = vmatmul.mubr.msk.f32.vlgmr.msra.gmra.mrb[16].mxu0 %vm565_vm0, %v20781_v54  ;;  %3174 = vst.msk [vmem:[#allocation3 + $0x260] sm:$0xff] %vm565_vm0, %v3165_v52  ;;  %v20830_v12 = vld [vmem:[#allocation3 + $0x2ef] sm:$0xff] }
 0x2cb   : > { %v15549_v61 = vld [vmem:[%s20635_s2 + $0xf8] sm:$0xff]  ;;  %3199 = vst.msk [vmem:[#allocation3 + $0x350] sm:$0xff] %vm565_vm0, %v3190_v53  ;;  %v15540_v63 = vld [vmem:[%s20635_s2 + $0xb0] sm:$0xff]  ;;  %17424 = vmatpush3.msra.mxu0 %v20625_v57  ;;  %17414 = vmatprep.mubr.msk.f32.mxu0 %vm565_vm0, %v20791_v62  ;;  %v3168_v2 = vmax.f32 %v15541_v60, 0.0  ;;  %v20867_v21 = vld [vmem:[#allocation3 + $0x2f0] sm:$0xff] }
 0x2cc   : > { %v15548_v0 = vld [vmem:[%s20635_s2 + $0xf0] sm:$0xff]  ;;  %v3193_v1 = vmax.f32 %v15549_v61, 0.0  ;;  %v3167_v3 = vmax.f32 %v15540_v63, 0.0  ;;  %17437 = vmatprep.subr.mxu0 %v20784_v59  ;;  %v20807_v6 = vld [vmem:[#allocation3 + $0x248] sm:$0xff]  ;;  %v20941_v40 = vld [vmem:[#allocation10 + $0x30] sm:$0xff] }
 0x2cd   : > { %v3192_v4 = vmax.f32 %v15548_v0, 0.0  ;;  %v20801_v5 = vld [vmem:[#allocation3 + $0x230] sm:$0xff]  ;;  %3177 = vst.msk [vmem:[#allocation3 + $0x2a8] sm:$0xff] %vm565_vm0, %v3168_v2  ;;  %v20837_v14 = vld [vmem:[#allocation3 + $0x307] sm:$0xff]  ;;  %v20883_v25 = vld [vmem:[#allocation3 + $0x338] sm:$0xff] }
 0x2ce   : > { %3202 = vst.msk [vmem:[#allocation3 + $0x398] sm:$0xff] %vm565_vm0, %v3193_v1  ;;  %17415 = vmatmul.mubr.msk.f32.gmra.mrb[18].mxu0 %vm565_vm0, %v20801_v5  ;;  %3176 = vst.msk [vmem:[#allocation3 + $0x290] sm:$0xff] %vm565_vm0, %v3167_v3  ;;  %v20843_v15 = vld [vmem:[#allocation3 + $0x31f] sm:$0xff]  ;;  %v20847_v16 = vld [vmem:[#allocation3 + $0x337] sm:$0xff] }
 0x2cf   : > { %3201 = vst.msk [vmem:[#allocation3 + $0x380] sm:$0xff] %vm565_vm0, %v3192_v4  ;;  %17417 = vmatprep.mubr.msk.f32.mxu0 %vm565_vm0, %v20807_v6  ;;  %v20879_v24 = vld [vmem:[#allocation3 + $0x320] sm:$0xff]  ;;  %v20919_v34 = vld [vmem:[#allocation3 + $0x16f] sm:$0xff]  ;;  %v20931_v37 = vld [vmem:[#allocation3 + $0x1b7] sm:$0xff] }
 0x2d0   : > { %v20817_v8 = vld [vmem:[#allocation3 + $0x278] sm:$0xff]  ;;  %v20923_v35 = vld [vmem:[#allocation3 + $0x187] sm:$0xff]  ;;  %22994 = vst [vmem:[#allocation32_spill] sm:$0xff] %v20931_v37  ;;  %v20945_v41 = vld [vmem:[#allocation3 + $0x50] sm:$0xff] }
 0x2d1   : > { %v20813_v7 = vld [vmem:[#allocation3 + $0x260] sm:$0xff]  ;;  %v20891_v27 = vld [vmem:[#allocation3 + $0x368] sm:$0xff]  ;;  %v20939_v39 = vld [vmem:[#allocation3 + $0x38] sm:$0xff] }
 0x2d2   : > { %17418 = vmatmul.mubr.msk.f32.gmra.mrb[20].mxu0 %vm565_vm0, %v20813_v7  ;;  %v20851_v17 = vld [vmem:[#allocation3 + $0x34f] sm:$0xff]  ;;  %v20855_v18 = vld [vmem:[#allocation3 + $0x367] sm:$0xff]  ;;  %v20959_v44 = vld [vmem:[#allocation3 + $0x98] sm:$0xff] }
 0x2d3   : > { %17420 = vmatprep.mubr.msk.f32.mxu0 %vm565_vm0, %v20817_v8  ;;  %v20887_v26 = vld [vmem:[#allocation3 + $0x350] sm:$0xff]  ;;  %v20951_v42 = vld [vmem:[#allocation3 + $0x68] sm:$0xff]  ;;  %v20955_v43 = vld [vmem:[#allocation3 + $0x80] sm:$0xff] }
 0x2d4   : > { %v20963_v45 = vld [vmem:[#allocation3 + $0xb0] sm:$0xff]  ;;  %v20967_v46 = vld [vmem:[#allocation3 + $0xc8] sm:$0xff]  ;;  %v20977_v48 = vld [vmem:[#allocation10 + $0x38] sm:$0xff] }
 0x2d5   : > { %v20821_v10 = vld [vmem:[#allocation3 + $0x290] sm:$0xff]  ;;  %v20975_v47 = vld [vmem:[#allocation3 + $0x128] sm:$0xff]  ;;  %v20981_v49 = vld [vmem:[#allocation3 + $0x140] sm:$0xff] }
 0x2d6   : > { %17421 = vmatmul.mubr.msk.f32.gmra.mrb[22].mxu0 %vm565_vm0, %v20821_v10  ;;  %v20861_v20 = vld [vmem:[#allocation3 + $0x37f] sm:$0xff]  ;;  %v20971_v58 = vld [vmem:[#allocation3 + $0x110] sm:$0xff]  ;;  %v20995_v52 = vld [vmem:[#allocation3 + $0x188] sm:$0xff] }
 0x2d7   : > { %17425 = vmatprep.mubr.msk.f32.mxu0 %vm565_vm0, %v3204_v9  ;;  %v20895_v28 = vld [vmem:[#allocation3 + $0x380] sm:$0xff]  ;;  %v20987_v50 = vld [vmem:[#allocation3 + $0x158] sm:$0xff]  ;;  %v20991_v51 = vld [vmem:[#allocation3 + $0x170] sm:$0xff] }
 0x2d8   : > { %v20999_v53 = vld [vmem:[#allocation3 + $0x1a0] sm:$0xff]  ;;  %v21003_v60 = vld [vmem:[#allocation3 + $0x1b8] sm:$0xff]  ;;  %v21045_v0 = vld [vmem:[#allocation3 + $0x2a8] sm:$0xff] }
 0x2d9   : > { %v21009_v61 = vld [vmem:[#allocation10 + $0x40] sm:$0xff]  ;;  %v21025_v63 = vld [vmem:[#allocation3 + $0x397] sm:$0xff]  ;;  %v21068_v2 = vld [vmem:[#allocation12] ss:$0 sm:$0xff] }
 0x2da   : > { %17426 = vmatmul.mubr.msk.f32.vlgmr.msra.gmra.mrb[16].mxu0 %vm565_vm0, %v20830_v12  ;;  %22995 = vst [vmem:[#allocation33_spill] sm:$0xff] %v21025_v63  ;;  %v21064_v1 = vld [vmem:[#allocation3 + $0x398] sm:$0xff] }
 0x2db   : > { %17438 = vmatpush3.msra.mxu0 %v20784_v59  ;;  %17428 = vmatprep.mubr.msk.f32.mxu0 %vm565_vm0, %v20837_v14 }
 0x2dc   : > { %17451 = vmatprep.subr.mxu0 %v20832_v13 }
 0x2de   : > { %17429 = vmatmul.mubr.msk.f32.gmra.mrb[18].mxu0 %vm565_vm0, %v20843_v15 }
 0x2df   : > { %17431 = vmatprep.mubr.msk.f32.mxu0 %vm565_vm0, %v20847_v16 }
 0x2e2   : > { %17432 = vmatmul.mubr.msk.f32.gmra.mrb[20].mxu0 %vm565_vm0, %v20851_v17 }
 0x2e3   : > { %17434 = vmatprep.mubr.msk.f32.mxu0 %vm565_vm0, %v20855_v18 }
 0x2e6   : > { %17435 = vmatmul.mubr.msk.f32.gmra.mrb[22].mxu0 %vm565_vm0, %v20861_v20 }
 0x2e7   : > { %17439 = vmatprep.mubr.msk.f32.mxu0 %vm565_vm0, %v20859_v19 }
 0x2ea   : > { %17440 = vmatmul.mubr.msk.f32.vlgmr.msra.gmra.mrb[16].mxu0 %vm565_vm0, %v20867_v21 }
 0x2eb   : > { %17452 = vmatpush3.msra.mxu0 %v20832_v13  ;;  %17442 = vmatprep.mubr.msk.f32.mxu0 %vm565_vm0, %v20873_v23 }
 0x2ec   : > { %17465 = vmatprep.subr.mxu0 %v20869_v22 }
 0x2ee   : > { %17443 = vmatmul.mubr.msk.f32.gmra.mrb[18].mxu0 %vm565_vm0, %v20879_v24 }
 0x2ef   : > { %17445 = vmatprep.mubr.msk.f32.mxu0 %vm565_vm0, %v20883_v25 }
 0x2f2   : > { %17446 = vmatmul.mubr.msk.f32.gmra.mrb[20].mxu0 %vm565_vm0, %v20887_v26 }
 0x2f3   : > { %17448 = vmatprep.mubr.msk.f32.mxu0 %vm565_vm0, %v20891_v27 }
 0x2f6   : > { %17449 = vmatmul.mubr.msk.f32.gmra.mrb[22].mxu0 %vm565_vm0, %v20895_v28 }
 0x2f7   : > { %17453 = vmatprep.mubr.msk.f32.mxu0 %vm565_vm0, %v20899_v29 }
 0x2fa   : > { %17454 = vmatmul.mubr.msk.f32.vlgmr.msra.gmra.mrb[16].mxu0 %vm565_vm0, %v20903_v30 }
 0x2fb   : > { %17466 = vmatpush3.msra.mxu0 %v20869_v22  ;;  %17456 = vmatprep.mubr.msk.f32.mxu0 %vm565_vm0, %v20909_v32 }
 0x2fc   : > { %17479 = vmatprep.subr.mxu0 %v20905_v31 }
 0x2fe   : > { %17457 = vmatmul.mubr.msk.f32.gmra.mrb[18].mxu0 %vm565_vm0, %v20915_v33 }
 0x2ff   : > { %17459 = vmatprep.mubr.msk.f32.mxu0 %vm565_vm0, %v20919_v34 }
 0x302   : > { %17460 = vmatmul.mubr.msk.f32.gmra.mrb[20].mxu0 %vm565_vm0, %v20923_v35 }
 0x303   : > { %17462 = vmatprep.mubr.msk.f32.mxu0 %vm565_vm0, %v20927_v36 }
 0x306   : > { %17463 = vmatmul.mubr.msk.f32.gmra.mrb[22].mxu0 %vm565_vm0, %v20931_v37 }
 0x307   : > { %17467 = vmatprep.mubr.msk.f32.mxu0 %vm565_vm0, %v20935_v38 }
 0x30a   : > { %17468 = vmatmul.mubr.msk.f32.vlgmr.msra.gmra.mrb[16].mxu0 %vm565_vm0, %v20939_v39 }
 0x30b   : > { %17480 = vmatpush3.msra.mxu0 %v20905_v31  ;;  %17470 = vmatprep.mubr.msk.f32.mxu0 %vm565_vm0, %v20945_v41 }
 0x30c   : > { %17493 = vmatprep.subr.mxu0 %v20941_v40 }
 0x30e   : > { %17471 = vmatmul.mubr.msk.f32.gmra.mrb[18].mxu0 %vm565_vm0, %v20951_v42 }
 0x30f   : > { %17473 = vmatprep.mubr.msk.f32.mxu0 %vm565_vm0, %v20955_v43 }
 0x312   : > { %17474 = vmatmul.mubr.msk.f32.gmra.mrb[20].mxu0 %vm565_vm0, %v20959_v44 }
 0x313   : > { %17476 = vmatprep.mubr.msk.f32.mxu0 %vm565_vm0, %v20963_v45 }
 0x316   : > { %17477 = vmatmul.mubr.msk.f32.gmra.mrb[22].mxu0 %vm565_vm0, %v20967_v46 }
 0x317   : > { %17481 = vmatprep.mubr.msk.f32.mxu0 %vm565_vm0, %v20971_v58 }
 0x31a   : > { %17482 = vmatmul.mubr.msk.f32.vlgmr.msra.gmra.mrb[16].mxu0 %vm565_vm0, %v20975_v47 }
 0x31b   : > { %17494 = vmatpush3.msra.mxu0 %v20941_v40  ;;  %17484 = vmatprep.mubr.msk.f32.mxu0 %vm565_vm0, %v20981_v49 }
 0x31c   : > { %17507 = vmatprep.subr.mxu0 %v20977_v48 }
 0x31e   : > { %17485 = vmatmul.mubr.msk.f32.gmra.mrb[18].mxu0 %vm565_vm0, %v20987_v50 }
 0x31f   : > { %17487 = vmatprep.mubr.msk.f32.mxu0 %vm565_vm0, %v20991_v51 }
 0x322   : > { %17488 = vmatmul.mubr.msk.f32.gmra.mrb[20].mxu0 %vm565_vm0, %v20995_v52 }
 0x323   : > { %17490 = vmatprep.mubr.msk.f32.mxu0 %vm565_vm0, %v20999_v53 }
 0x326   : > { %17491 = vmatmul.mubr.msk.f32.gmra.mrb[22].mxu0 %vm565_vm0, %v21003_v60 }
 0x327   : > { %17495 = vmatprep.mubr.msk.f32.mxu0 %vm565_vm0, %v20830_v12 }
 0x32a   : > { %17496 = vmatmul.mubr.msk.f32.vlgmr.msra.gmra.mrb[16].mxu0 %vm565_vm0, %v20837_v14 }
 0x32b   : > { %17508 = vmatpush3.msra.mxu0 %v20977_v48  ;;  %17498 = vmatprep.mubr.msk.f32.mxu0 %vm565_vm0, %v20843_v15 }
 0x32c   : > { %17521 = vmatprep.subr.mxu0 %v21009_v61 }
 0x32e   : > { %17499 = vmatmul.mubr.msk.f32.gmra.mrb[18].mxu0 %vm565_vm0, %v20847_v16 }
 0x32f   : > { %17501 = vmatprep.mubr.msk.f32.mxu0 %vm565_vm0, %v20851_v17 }
 0x332   : > { %17502 = vmatmul.mubr.msk.f32.gmra.mrb[20].mxu0 %vm565_vm0, %v20855_v18 }
 0x333   : > { %17504 = vmatprep.mubr.msk.f32.mxu0 %vm565_vm0, %v20861_v20 }
 0x336   : > { %17505 = vmatmul.mubr.msk.f32.gmra.mrb[22].mxu0 %vm565_vm0, %v21025_v63 }
 0x337   : > { %17509 = vmatprep.mubr.msk.f32.mxu0 %vm565_vm0, %v20781_v54 }
 0x33a   : > { %17510 = vmatmul.mubr.msk.f32.vlgmr.msra.gmra.mrb[16].mxu0 %vm565_vm0, %v20791_v62 }
 0x33b   : > { %17522 = vmatpush3.msra.mxu0 %v21009_v61  ;;  %17512 = vmatprep.mubr.msk.f32.mxu0 %vm565_vm0, %v20801_v5 }
 0x33c   : > { %17675 = vmatprep.subr.mxu0 %v20825_v11 }
 0x33e   : > { %17513 = vmatmul.mubr.msk.f32.gmra.mrb[18].mxu0 %vm565_vm0, %v20807_v6 }
 0x33f   : > { %17515 = vmatprep.mubr.msk.f32.mxu0 %vm565_vm0, %v20813_v7 }
 0x342   : > { %17516 = vmatmul.mubr.msk.f32.gmra.mrb[20].mxu0 %vm565_vm0, %v20817_v8 }
 0x343   : > { %17518 = vmatprep.mubr.msk.f32.mxu0 %vm565_vm0, %v20821_v10 }
 0x346   : > { %17519 = vmatmul.mubr.msk.f32.gmra.mrb[22].mxu0 %vm565_vm0, %v21045_v0 }
 0x347   : > { %17523 = vmatprep.mubr.msk.f32.mxu0 %vm565_vm0, %v20867_v21 }
 0x34a   : > { %17524 = vmatmul.mubr.msk.f32.vlgmr.msra.gmra.mrb[16].mxu0 %vm565_vm0, %v20873_v23 }
 0x34b   : > { %17526 = vmatprep.mubr.msk.f32.mxu0 %vm565_vm0, %v20879_v24  ;;  %17676 = vmatpush3.msra.mxu0 %v20825_v11 }
 0x34e   : > { %17527 = vmatmul.mubr.msk.f32.gmra.mrb[18].mxu0 %vm565_vm0, %v20883_v25 }
 0x34f   : > { %17529 = vmatprep.mubr.msk.f32.mxu0 %vm565_vm0, %v20887_v26 }
 0x352   : > { %17530 = vmatmul.mubr.msk.f32.gmra.mrb[20].mxu0 %vm565_vm0, %v20891_v27 }
 0x353   : > { %17532 = vmatprep.mubr.msk.f32.mxu0 %vm565_vm0, %v20895_v28 }
 0x356   : > { %17533 = vmatmul.mubr.msk.f32.gmra.mrb[22].mxu0 %vm565_vm0, %v21064_v1 }
 0x41d   : > { %v17525_v3 = vpop.f32.mrb[16].mxu0 }
 0x41e   : > { %v4518_v4 = vadd.f32 %v17525_v3, %v21068_v2  ;;  %v4464_v9 = vpop.f32.mrb[17].mxu0 }
 0x41f   : > { %v4517_v12 = vadd.f32 %v21068_v2, %v4464_v9 }
 0x420   : > { %v4526_v16 = vmax.f32 %v4518_v4, 0.0 }
 0x421   : > { %v4525_v14 = vmax.f32 %v4517_v12, 0.0  ;;  %v17528_v15 = vpop.f32.mrb[18].mxu0 }
 0x422   : > { %v4520_v17 = vadd.f32 %v17528_v15, %v21068_v2  ;;  %v4474_v18 = vpop.f32.mrb[19].mxu0 }
 0x423   : > { %v4519_v20 = vadd.f32 %v21068_v2, %v4474_v18  ;;  %17537 = vmatprep.mubr.msk.f32.mxu1 %vm565_vm0, %v4525_v14 }
 0x424   : > { %17538 = vmatmul.mubr.msk.f32.vlgmr.msra.gmra.mrb[16].mxu1 %vm565_vm0, %v4526_v16  ;;  %v4528_v3 = vmax.f32 %v4520_v17, 0.0 }
 0x425   : > { %v4527_v63 = vmax.f32 %v4519_v20, 0.0  ;;  %17550 = vmatpush3.msra.mxu1 %v20617_v55  ;;  %v17531_v37 = vpop.f32.mrb[20].mxu0  ;;  %v21147_v20 = vld [vmem:[#allocation3 + $0x279] sm:$0xff] }
 0x426   : > { %v4522_v36 = vadd.f32 %v17531_v37, %v21068_v2  ;;  %v4484_v9 = vpop.f32.mrb[21].mxu0  ;;  %17563 = vmatprep.subr.mxu1 %v20625_v57 }
 0x427   : > { %v4521_v4 = vadd.f32 %v21068_v2, %v4484_v9  ;;  %17540 = vmatprep.mubr.msk.f32.mxu1 %vm565_vm0, %v4527_v63  ;;  %v21143_v63 = vld [vmem:[#allocation3 + $0x261] sm:$0xff] }
 0x428   : > { %17541 = vmatmul.mubr.msk.f32.gmra.mrb[18].mxu1 %vm565_vm0, %v4528_v3  ;;  %v4530_v15 = vmax.f32 %v4522_v36, 0.0  ;;  %v21139_v36 = vld [vmem:[#allocation3 + $0x249] sm:$0xff]  ;;  %v21151_v3 = vld [vmem:[#allocation3 + $0x291] sm:$0xff]  ;;  %v21191_v9 = vld [vmem:[#allocation3 + $0x21] sm:$0xff] }
 0x429   : > { %v4529_v12 = vmax.f32 %v4521_v4, 0.0  ;;  %v17534_v14 = vpop.f32.mrb[22].mxu0  ;;  %v21195_v4 = vld [vmem:[#allocation3 + $0x39] sm:$0xff] }
 0x42a   : > { %v4524_v16 = vadd.f32 %v17534_v14, %v21068_v2  ;;  %v4494_v18 = vpop.f32.mrb[23].mxu0  ;;  %v21205_v14 = vld [vmem:[#allocation3 + $0x69] sm:$0xff] }
 0x42b   : > { %v4523_v55 = vadd.f32 %v21068_v2, %v4494_v18  ;;  %17543 = vmatprep.mubr.msk.f32.mxu1 %vm565_vm0, %v4529_v12  ;;  %v21199_v12 = vld [vmem:[#allocation3 + $0x51] sm:$0xff] }
 0x42c   : > { %17544 = vmatmul.mubr.msk.f32.gmra.mrb[20].mxu1 %vm565_vm0, %v4530_v15  ;;  %v4532_v17 = vmax.f32 %v4524_v16, 0.0  ;;  %v21209_v15 = vld [vmem:[#allocation3 + $0x81] sm:$0xff]  ;;  %v21213_v16 = vld [vmem:[#allocation3 + $0x99] sm:$0xff]  ;;  %v21217_v18 = vld [vmem:[#allocation3 + $0xb1] sm:$0xff] }
 0x42d   : > { %v4531_v37 = vmax.f32 %v4523_v55, 0.0  ;;  %v21221_v55 = vld [vmem:[#allocation3 + $0xc9] sm:$0xff] }
 0x42f   : > { %17546 = vmatprep.mubr.msk.f32.mxu1 %vm565_vm0, %v4531_v37 }
 0x430   : > { %17547 = vmatmul.mubr.msk.f32.gmra.mrb[22].mxu1 %vm565_vm0, %v4532_v17 }
 0x431   : > { %17551 = vmatprep.mubr.msk.f32.mxu1 %vm565_vm0, %v20859_v19  ;;  %v21135_v19 = vld [vmem:[#allocation3 + $0x231] sm:$0xff] }
 0x434   : > { %17552 = vmatmul.mubr.msk.f32.vlgmr.msra.gmra.mrb[24].mxu1 %vm565_vm0, %v20867_v21 }
 0x435   : > { %17564 = vmatpush3.msra.mxu1 %v20625_v57  ;;  %17554 = vmatprep.mubr.msk.f32.mxu1 %vm565_vm0, %v20873_v23  ;;  %v21125_v57 = vld [vmem:[#allocation3 + $0x201] sm:$0xff] }
 0x436   : > { %17577 = vmatprep.subr.mxu1 %v20784_v59 }
 0x438   : > { %17555 = vmatmul.mubr.msk.f32.gmra.mrb[26].mxu1 %vm565_vm0, %v20879_v24 }
 0x439   : > { %17557 = vmatprep.mubr.msk.f32.mxu1 %vm565_vm0, %v20883_v25 }
 0x43c   : > { %17558 = vmatmul.mubr.msk.f32.gmra.mrb[28].mxu1 %vm565_vm0, %v20887_v26 }
 0x43d   : > { %17560 = vmatprep.mubr.msk.f32.mxu1 %vm565_vm0, %v20891_v27 }
 0x440   : > { %17561 = vmatmul.mubr.msk.f32.gmra.mrb[30].mxu1 %vm565_vm0, %v20895_v28 }
 0x441   : > { %17565 = vmatprep.mubr.msk.f32.mxu1 %vm565_vm0, %v20621_v56  ;;  %v4976_v56 = vld [vmem:[#allocation3 + $0x1e9] sm:$0xff] }
 0x444   : > { %17566 = vmatmul.mubr.msk.f32.vlgmr.msra.gmra.mrb[24].mxu1 %vm565_vm0, %v20781_v54 }
 0x445   : > { %17578 = vmatpush3.msra.mxu1 %v20784_v59  ;;  %17568 = vmatprep.mubr.msk.f32.mxu1 %vm565_vm0, %v20791_v62  ;;  %v21129_v59 = vld [vmem:[#allocation3 + $0x219] sm:$0xff] }
 0x446   : > { %17591 = vmatprep.subr.mxu1 %v20832_v13 }
 0x448   : > { %17569 = vmatmul.mubr.msk.f32.gmra.mrb[26].mxu1 %vm565_vm0, %v20801_v5 }
 0x449   : > { %17571 = vmatprep.mubr.msk.f32.mxu1 %vm565_vm0, %v20807_v6 }
 0x44c   : > { %17572 = vmatmul.mubr.msk.f32.gmra.mrb[28].mxu1 %vm565_vm0, %v20813_v7 }
 0x44d   : > { %17574 = vmatprep.mubr.msk.f32.mxu1 %vm565_vm0, %v20817_v8 }
 0x450   : > { %17575 = vmatmul.mubr.msk.f32.gmra.mrb[30].mxu1 %vm565_vm0, %v20821_v10 }
 0x451   : > { %17579 = vmatprep.mubr.msk.f32.mxu1 %vm565_vm0, %v4976_v56 }
 0x454   : > { %17580 = vmatmul.mubr.msk.f32.vlgmr.msra.gmra.mrb[24].mxu1 %vm565_vm0, %v21125_v57 }
 0x455   : > { %17592 = vmatpush3.msra.mxu1 %v20832_v13  ;;  %17582 = vmatprep.mubr.msk.f32.mxu1 %vm565_vm0, %v21129_v59 }
 0x456   : > { %17605 = vmatprep.subr.mxu1 %v20869_v22 }
 0x458   : > { %17583 = vmatmul.mubr.msk.f32.gmra.mrb[26].mxu1 %vm565_vm0, %v21135_v19 }
 0x459   : > { %17585 = vmatprep.mubr.msk.f32.mxu1 %vm565_vm0, %v21139_v36 }
 0x45c   : > { %17586 = vmatmul.mubr.msk.f32.gmra.mrb[28].mxu1 %vm565_vm0, %v21143_v63 }
 0x45d   : > { %17588 = vmatprep.mubr.msk.f32.mxu1 %vm565_vm0, %v21147_v20 }
 0x460   : > { %17589 = vmatmul.mubr.msk.f32.gmra.mrb[30].mxu1 %vm565_vm0, %v21151_v3 }
 0x461   : > { %17593 = vmatprep.mubr.msk.f32.mxu1 %vm565_vm0, %v20935_v38 }
 0x464   : > { %17594 = vmatmul.mubr.msk.f32.vlgmr.msra.gmra.mrb[24].mxu1 %vm565_vm0, %v20939_v39 }
 0x465   : > { %17606 = vmatpush3.msra.mxu1 %v20869_v22  ;;  %17596 = vmatprep.mubr.msk.f32.mxu1 %vm565_vm0, %v20945_v41 }
 0x466   : > { %17619 = vmatprep.subr.mxu1 %v20905_v31 }
 0x468   : > { %17597 = vmatmul.mubr.msk.f32.gmra.mrb[26].mxu1 %vm565_vm0, %v20951_v42 }
 0x469   : > { %17599 = vmatprep.mubr.msk.f32.mxu1 %vm565_vm0, %v20955_v43 }
 0x46c   : > { %17600 = vmatmul.mubr.msk.f32.gmra.mrb[28].mxu1 %vm565_vm0, %v20959_v44 }
 0x46d   : > { %17602 = vmatprep.mubr.msk.f32.mxu1 %vm565_vm0, %v20963_v45 }
 0x470   : > { %17603 = vmatmul.mubr.msk.f32.gmra.mrb[30].mxu1 %vm565_vm0, %v20967_v46 }
 0x471   : > { %17607 = vmatprep.mubr.msk.f32.mxu1 %vm565_vm0, %v20971_v58 }
 0x474   : > { %17608 = vmatmul.mubr.msk.f32.vlgmr.msra.gmra.mrb[24].mxu1 %vm565_vm0, %v20975_v47 }
 0x475   : > { %17620 = vmatpush3.msra.mxu1 %v20905_v31  ;;  %17610 = vmatprep.mubr.msk.f32.mxu1 %vm565_vm0, %v20981_v49 }
 0x476   : > { %17633 = vmatprep.subr.mxu1 %v20941_v40 }
 0x478   : > { %17611 = vmatmul.mubr.msk.f32.gmra.mrb[26].mxu1 %vm565_vm0, %v20987_v50 }
 0x479   : > { %17613 = vmatprep.mubr.msk.f32.mxu1 %vm565_vm0, %v20991_v51 }
 0x47c   : > { %17614 = vmatmul.mubr.msk.f32.gmra.mrb[28].mxu1 %vm565_vm0, %v20995_v52 }
 0x47d   : > { %17616 = vmatprep.mubr.msk.f32.mxu1 %vm565_vm0, %v20999_v53 }
 0x480   : > { %17617 = vmatmul.mubr.msk.f32.gmra.mrb[30].mxu1 %vm565_vm0, %v21003_v60 }
 0x481   : > { %17621 = vmatprep.mubr.msk.f32.mxu1 %vm565_vm0, %v21191_v9 }
 0x484   : > { %17622 = vmatmul.mubr.msk.f32.vlgmr.msra.gmra.mrb[24].mxu1 %vm565_vm0, %v21195_v4 }
 0x485   : > { %17634 = vmatpush3.msra.mxu1 %v20941_v40  ;;  %17624 = vmatprep.mubr.msk.f32.mxu1 %vm565_vm0, %v21199_v12 }
 0x486   : > { %17647 = vmatprep.subr.mxu1 %v20977_v48 }
 0x488   : > { %17625 = vmatmul.mubr.msk.f32.gmra.mrb[26].mxu1 %vm565_vm0, %v21205_v14 }
 0x489   : > { %17627 = vmatprep.mubr.msk.f32.mxu1 %vm565_vm0, %v21209_v15 }
 0x48c   : > { %17628 = vmatmul.mubr.msk.f32.gmra.mrb[28].mxu1 %vm565_vm0, %v21213_v16 }
 0x48d   : > { %17630 = vmatprep.mubr.msk.f32.mxu1 %vm565_vm0, %v21217_v18 }
 0x490   : > { %17631 = vmatmul.mubr.msk.f32.gmra.mrb[30].mxu1 %vm565_vm0, %v21221_v55 }
 0x491   : > { %17635 = vmatprep.mubr.msk.f32.mxu1 %vm565_vm0, %v20781_v54  ;;  %v21276_v54 = vld [vmem:[#allocation3 + $0x2a9] sm:$0xff] }
 0x492   : > { %22996 = vst [vmem:[#allocation34_spill] sm:$0xff] %v21276_v54 }
 0x494   : > { %17636 = vmatmul.mubr.msk.f32.vlgmr.msra.gmra.mrb[24].mxu1 %vm565_vm0, %v20791_v62  ;;  %v21280_v62 = vld [vmem:[#allocation15] ss:$0 sm:$0xff] }
 0x495   : > { %17648 = vmatpush3.msra.mxu1 %v20977_v48  ;;  %17638 = vmatprep.mubr.msk.f32.mxu1 %vm565_vm0, %v20801_v5  ;;  %v4534_v5 = vld [vmem:[%s20635_s2 + $0x8] sm:$0xff] }
 0x496   : > { %17661 = vmatprep.subr.mxu1 %v21009_v61 }
 0x498   : > { %17639 = vmatmul.mubr.msk.f32.gmra.mrb[26].mxu1 %vm565_vm0, %v20807_v6 }
 0x499   : > { %17641 = vmatprep.mubr.msk.f32.mxu1 %vm565_vm0, %v20813_v7 }
 0x49c   : > { %17642 = vmatmul.mubr.msk.f32.gmra.mrb[28].mxu1 %vm565_vm0, %v20817_v8  ;;  %v4533_v8 = vld [vmem:[%s20635_s2] sm:$0xff] }
 0x49d   : > { %17644 = vmatprep.mubr.msk.f32.mxu1 %vm565_vm0, %v20821_v10 }
 0x4a0   : > { %17645 = vmatmul.mubr.msk.f32.gmra.mrb[30].mxu1 %vm565_vm0, %v21045_v0 }
 0x4a1   : > { %17649 = vmatprep.mubr.msk.f32.mxu1 %vm565_vm0, %v20867_v21 }
 0x4a4   : > { %17650 = vmatmul.mubr.msk.f32.vlgmr.msra.gmra.mrb[24].mxu1 %vm565_vm0, %v20873_v23 }
 0x4a5   : > { %17662 = vmatpush3.msra.mxu1 %v21009_v61  ;;  %17652 = vmatprep.mubr.msk.f32.mxu1 %vm565_vm0, %v20879_v24 }
 0x4a6   : > { %17815 = vmatprep.subr.mxu1 %v20825_v11 }
 0x4a8   : > { %17653 = vmatmul.mubr.msk.f32.gmra.mrb[26].mxu1 %vm565_vm0, %v20883_v25  ;;  %v4536_v25 = vld [vmem:[%s20635_s2 + $0x18] sm:$0xff] }
 0x4a9   : > { %17655 = vmatprep.mubr.msk.f32.mxu1 %vm565_vm0, %v20887_v26 }
 0x4ac   : > { %17656 = vmatmul.mubr.msk.f32.gmra.mrb[28].mxu1 %vm565_vm0, %v20891_v27 }
 0x4ad   : > { %17658 = vmatprep.mubr.msk.f32.mxu1 %vm565_vm0, %v20895_v28  ;;  %v4535_v28 = vld [vmem:[%s20635_s2 + $0x10] sm:$0xff] }
 0x4b0   : > { %17659 = vmatmul.mubr.msk.f32.gmra.mrb[30].mxu1 %vm565_vm0, %v21064_v1 }
 0x4b1   : > { %17663 = vmatprep.mubr.msk.f32.mxu1 %vm565_vm0, %v21125_v57 }
 0x4b4   : > { %17664 = vmatmul.mubr.msk.f32.vlgmr.msra.gmra.mrb[24].mxu1 %vm565_vm0, %v21129_v59  ;;  %v4538_v59 = vld [vmem:[%s20635_s2 + $0x28] sm:$0xff] }
 0x4b5   : > { %17666 = vmatprep.mubr.msk.f32.mxu1 %vm565_vm0, %v21135_v19  ;;  %17816 = vmatpush3.msra.mxu1 %v20825_v11 }
 0x4b8   : > { %17667 = vmatmul.mubr.msk.f32.gmra.mrb[26].mxu1 %vm565_vm0, %v21139_v36 }
 0x4b9   : > { %17669 = vmatprep.mubr.msk.f32.mxu1 %vm565_vm0, %v21143_v63  ;;  %v4537_v63 = vld [vmem:[%s20635_s2 + $0x20] sm:$0xff] }
 0x4bc   : > { %17670 = vmatmul.mubr.msk.f32.gmra.mrb[28].mxu1 %vm565_vm0, %v21147_v20 }
 0x4bd   : > { %17672 = vmatprep.mubr.msk.f32.mxu1 %vm565_vm0, %v21151_v3 }
 0x4c0   : > { %17673 = vmatmul.mubr.msk.f32.gmra.mrb[30].mxu1 %vm565_vm0, %v21276_v54 }
 0x4f7   : > { %v17539_v6 = vpop.f32.mrb[16].mxu1 }
 0x4f8   : > { %v4671_v7 = vadd.f32 %v17539_v6, %v4534_v5  ;;  %v4631_v10 = vpop.f32.mrb[17].mxu1 }
 0x4f9   : > { %v4670_v21 = vadd.f32 %v4631_v10, %v4533_v8  ;;  %v4540_v8 = vld [vmem:[%s20635_s2 + $0x38] sm:$0xff] }
 0x4fa   : > { %v4685_v23 = vadd.f32 %v21280_v62, %v4671_v7 }
 0x4fb   : > { %v4684_v24 = vadd.f32 %v21280_v62, %v4670_v21  ;;  %v17542_v26 = vpop.f32.mrb[18].mxu1 }
 0x4fc   : > { %4693 = vst.msk [vmem:[%s20635_s2 + $0x8] sm:$0xff] %vm565_vm0, %v4685_v23  ;;  %v4673_v27 = vadd.f32 %v17542_v26, %v4536_v25  ;;  %v4641_v37 = vpop.f32.mrb[19].mxu1  ;;  %v4539_v25 = vld [vmem:[%s20635_s2 + $0x30] sm:$0xff] }
 0x4fd   : > { %4692 = vst.msk [vmem:[%s20635_s2] sm:$0xff] %vm565_vm0, %v4684_v24  ;;  %v4672_v17 = vadd.f32 %v4641_v37, %v4535_v28  ;;  %v21310_v37 = vld [vmem:[#allocation3 + $0x38] sm:$0xff] }
 0x4fe   : > { %v4687_v56 = vadd.f32 %v21280_v62, %v4673_v27 }
 0x4ff   : > { %v4686_v57 = vadd.f32 %v21280_v62, %v4672_v17  ;;  %v17545_v19 = vpop.f32.mrb[20].mxu1  ;;  %v21312_v17 = vld [vmem:[#allocation3 + $0x39] sm:$0xff] }
 0x500   : > { %4695 = vst.msk [vmem:[%s20635_s2 + $0x18] sm:$0xff] %vm565_vm0, %v4687_v56  ;;  %v4675_v36 = vadd.f32 %v17545_v19, %v4538_v59  ;;  %v4651_v20 = vpop.f32.mrb[21].mxu1  ;;  %22997 = vst [vmem:[#allocation35_spill] sm:$0xff] %v21312_v17 }
 0x501   : > { %4694 = vst.msk [vmem:[%s20635_s2 + $0x10] sm:$0xff] %vm565_vm0, %v4686_v57  ;;  %v4674_v3 = vadd.f32 %v4651_v20, %v4537_v63  ;;  %v21315_v57 = vld [vmem:[#allocation3 + $0x20] sm:$0xff] }
 0x502   : > { %v4689_v5 = vadd.f32 %v21280_v62, %v4675_v36 }
 0x503   : > { %v9131_v6 = vld [vmem:[%s20635_s2 + $0x8] sm:$0xff]  ;;  %v4688_v7 = vadd.f32 %v21280_v62, %v4674_v3  ;;  %v17548_v10 = vpop.f32.mrb[22].mxu1  ;;  %v21326_v3 = vld [vmem:[#allocation3 + $0x68] sm:$0xff] }
 0x504   : > { %v9139_v21 = vmax.f32 %v9131_v6, 0.0  ;;  %v9130_v23 = vld [vmem:[%s20635_s2] sm:$0xff]  ;;  %4697 = vst.msk [vmem:[%s20635_s2 + $0x28] sm:$0xff] %vm565_vm0, %v4689_v5  ;;  %v4677_v24 = vadd.f32 %v17548_v10, %v4540_v8  ;;  %v4661_v26 = vpop.f32.mrb[23].mxu1 }
 0x505   : > { %v9138_v27 = vmax.f32 %v9130_v23, 0.0  ;;  %4696 = vst.msk [vmem:[%s20635_s2 + $0x20] sm:$0xff] %vm565_vm0, %v4688_v7  ;;  %v4676_v28 = vadd.f32 %v4661_v26, %v4539_v25  ;;  %v21328_v5 = vld [vmem:[#allocation3 + $0x69] sm:$0xff]  ;;  %v21332_v7 = vld [vmem:[#allocation3 + $0x51] sm:$0xff]  ;;  %v21340_v25 = vld [vmem:[#allocation3 + $0x99] sm:$0xff] }
 0x506   : > { %v4691_v56 = vadd.f32 %v21280_v62, %v4677_v24  ;;  %9147 = vst.msk [vmem:[#allocation3 + $0x38] sm:$0xff] %vm565_vm0, %v9139_v21  ;;  %22998 = vst [vmem:[#allocation36_spill] sm:$0xff] %v21328_v5  ;;  %v21330_v6 = vld [vmem:[#allocation3 + $0x50] sm:$0xff]  ;;  %v21338_v24 = vld [vmem:[#allocation3 + $0x98] sm:$0xff] }
 0x507   : > { %v9133_v59 = vld [vmem:[%s20635_s2 + $0x18] sm:$0xff]  ;;  %v4690_v19 = vadd.f32 %v21280_v62, %v4676_v28  ;;  %9146 = vst.msk [vmem:[#allocation3 + $0x20] sm:$0xff] %vm565_vm0, %v9138_v27  ;;  %22999 = vst [vmem:[#allocation37_spill] sm:$0xff] %v21332_v7 }
 0x508   : > { %v9141_v36 = vmax.f32 %v9133_v59, 0.0  ;;  %v9132_v63 = vld [vmem:[%s20635_s2 + $0x10] sm:$0xff]  ;;  %4699 = vst.msk [vmem:[%s20635_s2 + $0x38] sm:$0xff] %vm565_vm0, %v4691_v56  ;;  %23000 = vst [vmem:[#allocation38_spill] sm:$0xff] %v21340_v25  ;;  %v21348_v56 = vld [vmem:[#allocation10 + $0x8] sm:$0xff] }
 0x509   : > { %v9140_v20 = vmax.f32 %v9132_v63, 0.0  ;;  %4698 = vst.msk [vmem:[%s20635_s2 + $0x30] sm:$0xff] %vm565_vm0, %v4690_v19  ;;  %v21342_v26 = vld [vmem:[#allocation3 + $0x80] sm:$0xff]  ;;  %17689 = vmatprep.subr.mxu0 %v21348_v56  ;;  %17829 = vmatprep.subr.mxu1 %v21348_v56  ;;  %v21354_v63 = vld [vmem:[#allocation3 + $0xc8] sm:$0xff] }
 0x50a   : > { %9149 = vst.msk [vmem:[#allocation3 + $0x68] sm:$0xff] %vm565_vm0, %v9141_v36  ;;  %v21344_v27 = vld [vmem:[#allocation3 + $0x81] sm:$0xff] }
 0x50b   : > { %v9135_v8 = vld [vmem:[%s20635_s2 + $0x28] sm:$0xff]  ;;  %9148 = vst.msk [vmem:[#allocation3 + $0x50] sm:$0xff] %vm565_vm0, %v9140_v20  ;;  %23001 = vst [vmem:[#allocation39_spill] sm:$0xff] %v21344_v27  ;;  %v21356_v20 = vld [vmem:[#allocation3 + $0xc9] sm:$0xff] }
 0x50c   : > { %v9143_v10 = vmax.f32 %v9135_v8, 0.0  ;;  %v9134_v21 = vld [vmem:[%s20635_s2 + $0x20] sm:$0xff]  ;;  %23002 = vst [vmem:[#allocation40_spill] sm:$0xff] %v21356_v20 }
 0x50d   : > { %v9142_v23 = vmax.f32 %v9134_v21, 0.0  ;;  %v21358_v8 = vld [vmem:[#allocation3 + $0xb0] sm:$0xff] }
 0x50e   : > { %9151 = vst.msk [vmem:[#allocation3 + $0x98] sm:$0xff] %vm565_vm0, %v9143_v10  ;;  %v21360_v21 = vld [vmem:[#allocation3 + $0xb1] sm:$0xff] }
 0x50f   : > { %v9137_v28 = vld [vmem:[%s20635_s2 + $0x38] sm:$0xff]  ;;  %9150 = vst.msk [vmem:[#allocation3 + $0x80] sm:$0xff] %vm565_vm0, %v9142_v23  ;;  %23003 = vst [vmem:[#allocation41_spill] sm:$0xff] %v21360_v21 }
 0x510   : > { %v9145_v59 = vmax.f32 %v9137_v28, 0.0  ;;  %v9136_v19 = vld [vmem:[%s20635_s2 + $0x30] sm:$0xff]  ;;  %v21369_v21 = vld [vmem:[#allocation10] sm:$0xff] }
 0x511   : > { %v9144_v36 = vmax.f32 %v9136_v19, 0.0 }
 0x512   : > { %9153 = vst.msk [vmem:[#allocation3 + $0xc8] sm:$0xff] %vm565_vm0, %v9145_v59 }
 0x513   : > { %9152 = vst.msk [vmem:[#allocation3 + $0xb0] sm:$0xff] %vm565_vm0, %v9144_v36 }
 0x587   : > { %v17665_v10 = vpop.f32.mrb[24].mxu1 }
 0x588   : > { %v5999_v23 = vadd.f32 %v17665_v10, %v21068_v2  ;;  %v5951_v28 = vpop.f32.mrb[25].mxu1 }
 0x589   : > { %v5998_v25 = vadd.f32 %v21068_v2, %v5951_v28 }
 0x58a   : > { %v6007_v5 = vmax.f32 %v5999_v23, 0.0 }
 0x58b   : > { %v6006_v27 = vmax.f32 %v5998_v25, 0.0  ;;  %v17668_v19 = vpop.f32.mrb[26].mxu1 }
 0x58c   : > { %v6001_v7 = vadd.f32 %v17668_v19, %v21068_v2  ;;  %v5961_v20 = vpop.f32.mrb[27].mxu1 }
 0x58d   : > { %v6000_v17 = vadd.f32 %v21068_v2, %v5961_v20  ;;  %17677 = vmatprep.mubr.msk.f32.mxu0 %vm565_vm0, %v6006_v27 }
 0x58e   : > { %17678 = vmatmul.mubr.msk.f32.vlgmr.msra.gmra.mrb[24].mxu0 %vm565_vm0, %v6007_v5  ;;  %v6009_v10 = vmax.f32 %v6001_v7, 0.0 }
 0x58f   : > { %v6008_v59 = vmax.f32 %v6000_v17, 0.0  ;;  %17690 = vmatpush3.msra.mxu0 %v21348_v56  ;;  %v17671_v36 = vpop.f32.mrb[28].mxu1 }
 0x590   : > { %v6003_v25 = vadd.f32 %v17671_v36, %v21068_v2  ;;  %v5971_v28 = vpop.f32.mrb[29].mxu1  ;;  %17703 = vmatprep.subr.mxu0 %v21369_v21 }
 0x591   : > { %v6002_v23 = vadd.f32 %v21068_v2, %v5971_v28  ;;  %17680 = vmatprep.mubr.msk.f32.mxu0 %vm565_vm0, %v6008_v59  ;;  %v21386_v59 = vld [vmem:[#allocation10 + $0x10] sm:$0xff] }
 0x592   : > { %17681 = vmatmul.mubr.msk.f32.gmra.mrb[26].mxu0 %vm565_vm0, %v6009_v10  ;;  %v6011_v19 = vmax.f32 %v6003_v25, 0.0  ;;  %v7040_v10 = vld [vmem:[#allocation3 + $0x187] sm:$0xff]  ;;  %v7042_v25 = vld [vmem:[#allocation3 + $0x1b7] sm:$0xff]  ;;  %v7043_v28 = vld [vmem:[#allocation3 + $0x1cf] sm:$0xff] }
 0x593   : > { %v6010_v27 = vmax.f32 %v6002_v23, 0.0  ;;  %v17674_v20 = vpop.f32.mrb[30].mxu1  ;;  %v21549_v23 = vld [vmem:[#allocation3 + $0x140] sm:$0xff] }
 0x594   : > { %v6005_v17 = vadd.f32 %v17674_v20, %v21068_v2  ;;  %v5981_v5 = vpop.f32.mrb[31].mxu1  ;;  %v21558_v20 = vld [vmem:[#allocation3 + $0x170] sm:$0xff] }
 0x595   : > { %v6004_v54 = vadd.f32 %v21068_v2, %v5981_v5  ;;  %17683 = vmatprep.mubr.msk.f32.mxu0 %vm565_vm0, %v6010_v27  ;;  %v21553_v27 = vld [vmem:[#allocation3 + $0x158] sm:$0xff] }
 0x596   : > { %17684 = vmatmul.mubr.msk.f32.gmra.mrb[28].mxu0 %vm565_vm0, %v6011_v19  ;;  %v6013_v36 = vmax.f32 %v6005_v17, 0.0  ;;  %v21562_v19 = vld [vmem:[#allocation3 + $0x188] sm:$0xff]  ;;  %v21566_v17 = vld [vmem:[#allocation3 + $0x1a0] sm:$0xff]  ;;  %v21570_v5 = vld [vmem:[#allocation3 + $0x1b8] sm:$0xff] }
 0x597   : > { %v6012_v7 = vmax.f32 %v6004_v54, 0.0  ;;  %v7039_v54 = vld [vmem:[#allocation3 + $0x16f] sm:$0xff] }
 0x599   : > { %17686 = vmatprep.mubr.msk.f32.mxu0 %vm565_vm0, %v6012_v7  ;;  %v15705_v7 = vld [vmem:[%s20635_s2 + $0x48] sm:$0xff] }
 0x59a   : > { %17687 = vmatmul.mubr.msk.f32.gmra.mrb[30].mxu0 %vm565_vm0, %v6013_v36 }
 0x59b   : > { %17691 = vmatprep.mubr.msk.f32.mxu0 %vm565_vm0, %v20935_v38  ;;  %v6602_v38 = vld [vmem:[#allocation3 + $0x367] sm:$0xff] }
 0x59e   : > { %17692 = vmatmul.mubr.msk.f32.vlgmr.msra.gmra.mrb[32].mxu0 %vm565_vm0, %v20939_v39  ;;  %v6603_v39 = vld [vmem:[#allocation3 + $0x37f] sm:$0xff] }
 0x59f   : > { %17704 = vmatpush3.msra.mxu0 %v21369_v21  ;;  %17694 = vmatprep.mubr.msk.f32.mxu0 %vm565_vm0, %v20945_v41  ;;  %v23006_v41 = vld [vmem:[#allocation33_spill] sm:$0xff] }
 0x5a0   : > { %17717 = vmatprep.subr.mxu0 %v21386_v59 }
 0x5a2   : > { %17695 = vmatmul.mubr.msk.f32.gmra.mrb[34].mxu0 %vm565_vm0, %v20951_v42  ;;  %v21455_v42 = vld [vmem:[#allocation3 + $0x218] sm:$0xff] }
 0x5a3   : > { %17697 = vmatprep.mubr.msk.f32.mxu0 %vm565_vm0, %v20955_v43  ;;  %v21459_v43 = vld [vmem:[#allocation3 + $0x230] sm:$0xff] }
 0x5a6   : > { %17698 = vmatmul.mubr.msk.f32.gmra.mrb[36].mxu0 %vm565_vm0, %v20959_v44  ;;  %v21465_v44 = vld [vmem:[#allocation3 + $0x248] sm:$0xff] }
 0x5a7   : > { %17700 = vmatprep.mubr.msk.f32.mxu0 %vm565_vm0, %v20963_v45  ;;  %v21469_v45 = vld [vmem:[#allocation3 + $0x260] sm:$0xff] }
 0x5aa   : > { %17701 = vmatmul.mubr.msk.f32.gmra.mrb[38].mxu0 %vm565_vm0, %v20967_v46  ;;  %v21473_v46 = vld [vmem:[#allocation3 + $0x278] sm:$0xff] }
 0x5ab   : > { %17705 = vmatprep.mubr.msk.f32.mxu0 %vm565_vm0, %v20899_v29  ;;  %v23004_v29 = vld [vmem:[#allocation31_spill] sm:$0xff] }
 0x5ae   : > { %17706 = vmatmul.mubr.msk.f32.vlgmr.msra.gmra.mrb[32].mxu0 %vm565_vm0, %v20903_v30  ;;  %v23005_v30 = vld [vmem:[#allocation32_spill] sm:$0xff] }
 0x5af   : > { %17718 = vmatpush3.msra.mxu0 %v21386_v59  ;;  %17708 = vmatprep.mubr.msk.f32.mxu0 %vm565_vm0, %v20909_v32  ;;  %v6598_v32 = vld [vmem:[#allocation3 + $0x307] sm:$0xff] }
 0x5b0   : > { %17731 = vmatprep.subr.mxu0 %v20832_v13 }
 0x5b2   : > { %17709 = vmatmul.mubr.msk.f32.gmra.mrb[34].mxu0 %vm565_vm0, %v20915_v33  ;;  %v6599_v33 = vld [vmem:[#allocation3 + $0x31f] sm:$0xff] }
 0x5b3   : > { %17711 = vmatprep.mubr.msk.f32.mxu0 %vm565_vm0, %v20919_v34  ;;  %v6600_v34 = vld [vmem:[#allocation3 + $0x337] sm:$0xff] }
 0x5b6   : > { %17712 = vmatmul.mubr.msk.f32.gmra.mrb[36].mxu0 %vm565_vm0, %v20923_v35  ;;  %v6601_v35 = vld [vmem:[#allocation3 + $0x34f] sm:$0xff] }
 0x5b7   : > { %17714 = vmatprep.mubr.msk.f32.mxu0 %vm565_vm0, %v23004_v29 }
 0x5ba   : > { %17715 = vmatmul.mubr.msk.f32.gmra.mrb[38].mxu0 %vm565_vm0, %v23005_v30  ;;  %v15704_v30 = vld [vmem:[%s20635_s2 + $0x40] sm:$0xff] }
 0x5bb   : > { %17719 = vmatprep.mubr.msk.f32.mxu0 %vm565_vm0, %v20971_v58  ;;  %v21483_v58 = vld [vmem:[#allocation3 + $0x2f0] sm:$0xff] }
 0x5be   : > { %17720 = vmatmul.mubr.msk.f32.vlgmr.msra.gmra.mrb[32].mxu0 %vm565_vm0, %v20975_v47  ;;  %v21487_v47 = vld [vmem:[#allocation3 + $0x308] sm:$0xff] }
 0x5bf   : > { %17732 = vmatpush3.msra.mxu0 %v20832_v13  ;;  %17722 = vmatprep.mubr.msk.f32.mxu0 %vm565_vm0, %v20981_v49  ;;  %v6597_v13 = vld [vmem:[#allocation3 + $0x2ef] sm:$0xff]  ;;  %v21491_v49 = vld [vmem:[#allocation3 + $0x320] sm:$0xff] }
 0x5c0   : > { %17745 = vmatprep.subr.mxu0 %v20869_v22 }
 0x5c2   : > { %17723 = vmatmul.mubr.msk.f32.gmra.mrb[34].mxu0 %vm565_vm0, %v20987_v50  ;;  %v21497_v50 = vld [vmem:[#allocation3 + $0x338] sm:$0xff] }
 0x5c3   : > { %17725 = vmatprep.mubr.msk.f32.mxu0 %vm565_vm0, %v20991_v51  ;;  %v21501_v51 = vld [vmem:[#allocation3 + $0x350] sm:$0xff] }
 0x5c6   : > { %17726 = vmatmul.mubr.msk.f32.gmra.mrb[36].mxu0 %vm565_vm0, %v20995_v52  ;;  %v21505_v52 = vld [vmem:[#allocation3 + $0x368] sm:$0xff] }
 0x5c7   : > { %17728 = vmatprep.mubr.msk.f32.mxu0 %vm565_vm0, %v20999_v53  ;;  %v7036_v53 = vld [vmem:[#allocation3 + $0x127] sm:$0xff] }
 0x5ca   : > { %17729 = vmatmul.mubr.msk.f32.gmra.mrb[38].mxu0 %vm565_vm0, %v21003_v60  ;;  %v7037_v60 = vld [vmem:[#allocation3 + $0x13f] sm:$0xff] }
 0x5cb   : > { %17733 = vmatprep.mubr.msk.f32.mxu0 %vm565_vm0, %v6597_v13 }
 0x5ce   : > { %17734 = vmatmul.mubr.msk.f32.vlgmr.msra.gmra.mrb[32].mxu0 %vm565_vm0, %v6598_v32 }
 0x5cf   : > { %17746 = vmatpush3.msra.mxu0 %v20869_v22  ;;  %17736 = vmatprep.mubr.msk.f32.mxu0 %vm565_vm0, %v6599_v33  ;;  %v21451_v22 = vld [vmem:[#allocation3 + $0x200] sm:$0xff] }
 0x5d0   : > { %17759 = vmatprep.subr.mxu0 %v20905_v31 }
 0x5d2   : > { %17737 = vmatmul.mubr.msk.f32.gmra.mrb[34].mxu0 %vm565_vm0, %v6600_v34 }
 0x5d3   : > { %17739 = vmatprep.mubr.msk.f32.mxu0 %vm565_vm0, %v6601_v35  ;;  %v15707_v35 = vld [vmem:[%s20635_s2 + $0x58] sm:$0xff] }
 0x5d6   : > { %17740 = vmatmul.mubr.msk.f32.gmra.mrb[36].mxu0 %vm565_vm0, %v6602_v38 }
 0x5d7   : > { %17742 = vmatprep.mubr.msk.f32.mxu0 %vm565_vm0, %v6603_v39 }
 0x5da   : > { %17743 = vmatmul.mubr.msk.f32.gmra.mrb[38].mxu0 %vm565_vm0, %v23006_v41  ;;  %v15706_v41 = vld [vmem:[%s20635_s2 + $0x50] sm:$0xff] }
 0x5db   : > { %17747 = vmatprep.mubr.msk.f32.mxu0 %vm565_vm0, %v21451_v22 }
 0x5de   : > { %17748 = vmatmul.mubr.msk.f32.vlgmr.msra.gmra.mrb[32].mxu0 %vm565_vm0, %v21455_v42 }
 0x5df   : > { %17760 = vmatpush3.msra.mxu0 %v20905_v31  ;;  %17750 = vmatprep.mubr.msk.f32.mxu0 %vm565_vm0, %v21459_v43  ;;  %v21477_v31 = vld [vmem:[#allocation3 + $0x290] sm:$0xff] }
 0x5e0   : > { %17773 = vmatprep.subr.mxu0 %v20941_v40 }
 0x5e2   : > { %17751 = vmatmul.mubr.msk.f32.gmra.mrb[34].mxu0 %vm565_vm0, %v21465_v44 }
 0x5e3   : > { %17753 = vmatprep.mubr.msk.f32.mxu0 %vm565_vm0, %v21469_v45 }
 0x5e6   : > { %17754 = vmatmul.mubr.msk.f32.gmra.mrb[36].mxu0 %vm565_vm0, %v21473_v46 }
 0x5e7   : > { %17756 = vmatprep.mubr.msk.f32.mxu0 %vm565_vm0, %v21477_v31 }
 0x5ea   : > { %17757 = vmatmul.mubr.msk.f32.gmra.mrb[38].mxu0 %vm565_vm0, %v21045_v0  ;;  %v7038_v0 = vld [vmem:[#allocation3 + $0x157] sm:$0xff] }
 0x5eb   : > { %17761 = vmatprep.mubr.msk.f32.mxu0 %vm565_vm0, %v21483_v58 }
 0x5ee   : > { %17762 = vmatmul.mubr.msk.f32.vlgmr.msra.gmra.mrb[32].mxu0 %vm565_vm0, %v21487_v47 }
 0x5ef   : > { %17774 = vmatpush3.msra.mxu0 %v20941_v40  ;;  %17764 = vmatprep.mubr.msk.f32.mxu0 %vm565_vm0, %v21491_v49  ;;  %v21509_v40 = vld [vmem:[#allocation3 + $0x380] sm:$0xff] }
 0x5f0   : > { %17787 = vmatprep.subr.mxu0 %v20977_v48 }
 0x5f2   : > { %17765 = vmatmul.mubr.msk.f32.gmra.mrb[34].mxu0 %vm565_vm0, %v21497_v50 }
 0x5f3   : > { %17767 = vmatprep.mubr.msk.f32.mxu0 %vm565_vm0, %v21501_v51 }
 0x5f6   : > { %17768 = vmatmul.mubr.msk.f32.gmra.mrb[36].mxu0 %vm565_vm0, %v21505_v52 }
 0x5f7   : > { %17770 = vmatprep.mubr.msk.f32.mxu0 %vm565_vm0, %v21509_v40 }
 0x5fa   : > { %17771 = vmatmul.mubr.msk.f32.gmra.mrb[38].mxu0 %vm565_vm0, %v21064_v1  ;;  %v7041_v1 = vld [vmem:[#allocation3 + $0x19f] sm:$0xff] }
 0x5fb   : > { %17775 = vmatprep.mubr.msk.f32.mxu0 %vm565_vm0, %v7036_v53 }
 0x5fe   : > { %17776 = vmatmul.mubr.msk.f32.vlgmr.msra.gmra.mrb[32].mxu0 %vm565_vm0, %v7037_v60 }
 0x5ff   : > { %17788 = vmatpush3.msra.mxu0 %v20977_v48  ;;  %17778 = vmatprep.mubr.msk.f32.mxu0 %vm565_vm0, %v7038_v0  ;;  %v21541_v48 = vld [vmem:[#allocation3 + $0xe0] sm:$0xff] }
 0x600   : > { %17801 = vmatprep.subr.mxu0 %v21009_v61 }
 0x602   : > { %17779 = vmatmul.mubr.msk.f32.gmra.mrb[34].mxu0 %vm565_vm0, %v7039_v54 }
 0x603   : > { %17781 = vmatprep.mubr.msk.f32.mxu0 %vm565_vm0, %v7040_v10  ;;  %v15709_v10 = vld [vmem:[%s20635_s2 + $0x68] sm:$0xff] }
 0x606   : > { %17782 = vmatmul.mubr.msk.f32.gmra.mrb[36].mxu0 %vm565_vm0, %v7041_v1 }
 0x607   : > { %17784 = vmatprep.mubr.msk.f32.mxu0 %vm565_vm0, %v7042_v25 }
 0x60a   : > { %17785 = vmatmul.mubr.msk.f32.gmra.mrb[38].mxu0 %vm565_vm0, %v7043_v28  ;;  %v15708_v28 = vld [vmem:[%s20635_s2 + $0x60] sm:$0xff] }
 0x60b   : > { %17789 = vmatprep.mubr.msk.f32.mxu0 %vm565_vm0, %v21310_v37 }
 0x60e   : > { %17790 = vmatmul.mubr.msk.f32.vlgmr.msra.gmra.mrb[32].mxu0 %vm565_vm0, %v21330_v6 }
 0x60f   : > { %17802 = vmatpush3.msra.mxu0 %v21009_v61  ;;  %17792 = vmatprep.mubr.msk.f32.mxu0 %vm565_vm0, %v21326_v3  ;;  %v21545_v61 = vld [vmem:[#allocation3 + $0x128] sm:$0xff] }
 0x610   : > { %17955 = vmatprep.subr.mxu0 %v20825_v11 }
 0x612   : > { %17793 = vmatmul.mubr.msk.f32.gmra.mrb[34].mxu0 %vm565_vm0, %v21342_v26 }
 0x613   : > { %17795 = vmatprep.mubr.msk.f32.mxu0 %vm565_vm0, %v21338_v24 }
 0x616   : > { %17796 = vmatmul.mubr.msk.f32.gmra.mrb[36].mxu0 %vm565_vm0, %v21358_v8 }
 0x617   : > { %17798 = vmatprep.mubr.msk.f32.mxu0 %vm565_vm0, %v21354_v63 }
 0x61a   : > { %17799 = vmatmul.mubr.msk.f32.gmra.mrb[38].mxu0 %vm565_vm0, %v21541_v48 }
 0x61b   : > { %17803 = vmatprep.mubr.msk.f32.mxu0 %vm565_vm0, %v21545_v61 }
 0x61e   : > { %17804 = vmatmul.mubr.msk.f32.vlgmr.msra.gmra.mrb[32].mxu0 %vm565_vm0, %v21549_v23 }
 0x61f   : > { %17806 = vmatprep.mubr.msk.f32.mxu0 %vm565_vm0, %v21553_v27  ;;  %17956 = vmatpush3.msra.mxu0 %v20825_v11  ;;  %v21574_v11 = vld [vmem:[#allocation3 + $0x1d0] sm:$0xff] }
 0x622   : > { %17807 = vmatmul.mubr.msk.f32.gmra.mrb[34].mxu0 %vm565_vm0, %v21558_v20 }
 0x623   : > { %17809 = vmatprep.mubr.msk.f32.mxu0 %vm565_vm0, %v21562_v19 }
 0x626   : > { %17810 = vmatmul.mubr.msk.f32.gmra.mrb[36].mxu0 %vm565_vm0, %v21566_v17 }
 0x627   : > { %17812 = vmatprep.mubr.msk.f32.mxu0 %vm565_vm0, %v21570_v5 }
 0x62a   : > { %17813 = vmatmul.mubr.msk.f32.gmra.mrb[38].mxu0 %vm565_vm0, %v21574_v11 }
 0x661   : > { %v17679_v36 = vpop.f32.mrb[24].mxu0 }
 0x662   : > { %v6152_v29 = vadd.f32 %v17679_v36, %v15705_v7  ;;  %v6112_v13 = vpop.f32.mrb[25].mxu0 }
 0x663   : > { %v6151_v32 = vadd.f32 %v15704_v30, %v6112_v13 }
 0x664   : > { %v6160_v33 = vadd.f32 %v21280_v62, %v6152_v29 }
 0x665   : > { %v6159_v34 = vadd.f32 %v21280_v62, %v6151_v32  ;;  %v17682_v38 = vpop.f32.mrb[26].mxu0  ;;  %v15711_v32 = vld [vmem:[%s20635_s2 + $0x78] sm:$0xff] }
 0x666   : > { %15721 = vst.msk [vmem:[%s20635_s2 + $0x48] sm:$0xff] %vm565_vm0, %v6160_v33  ;;  %v6154_v39 = vadd.f32 %v17682_v38, %v15707_v35  ;;  %v6122_v53 = vpop.f32.mrb[27].mxu0 }
 0x667   : > { %15720 = vst.msk [vmem:[%s20635_s2 + $0x40] sm:$0xff] %vm565_vm0, %v6159_v34  ;;  %v6153_v60 = vadd.f32 %v15706_v41, %v6122_v53 }
 0x668   : > { %v6162_v0 = vadd.f32 %v21280_v62, %v6154_v39  ;;  %v15710_v39 = vld [vmem:[%s20635_s2 + $0x70] sm:$0xff] }
 0x669   : > { %v6161_v54 = vadd.f32 %v21280_v62, %v6153_v60  ;;  %v17685_v1 = vpop.f32.mrb[28].mxu0 }
 0x66a   : > { %15723 = vst.msk [vmem:[%s20635_s2 + $0x58] sm:$0xff] %vm565_vm0, %v6162_v0  ;;  %v6156_v25 = vadd.f32 %v17685_v1, %v15709_v10  ;;  %v6132_v7 = vpop.f32.mrb[29].mxu0 }
 0x66b   : > { %15722 = vst.msk [vmem:[%s20635_s2 + $0x50] sm:$0xff] %vm565_vm0, %v6161_v54  ;;  %v6155_v36 = vadd.f32 %v15708_v28, %v6132_v7  ;;  %v7661_v54 = vld [vmem:[#allocation3 + $0x110] sm:$0xff] }
 0x66c   : > { %v6164_v29 = vadd.f32 %v21280_v62, %v6156_v25 }
 0x66d   : > { %v15921_v30 = vld [vmem:[%s20635_s2 + $0x48] sm:$0xff]  ;;  %v6163_v13 = vadd.f32 %v21280_v62, %v6155_v36  ;;  %v17688_v33 = vpop.f32.mrb[30].mxu0 }
 0x66e   : > { %v9163_v34 = vmax.f32 %v15921_v30, 0.0  ;;  %v15920_v35 = vld [vmem:[%s20635_s2 + $0x40] sm:$0xff]  ;;  %15725 = vst.msk [vmem:[%s20635_s2 + $0x68] sm:$0xff] %vm565_vm0, %v6164_v29  ;;  %v6158_v38 = vadd.f32 %v17688_v33, %v15711_v32  ;;  %v6142_v41 = vpop.f32.mrb[31].mxu0 }
 0x66f   : > { %v9162_v53 = vmax.f32 %v15920_v35, 0.0  ;;  %15724 = vst.msk [vmem:[%s20635_s2 + $0x60] sm:$0xff] %vm565_vm0, %v6163_v13  ;;  %v6157_v60 = vadd.f32 %v15710_v39, %v6142_v41 }
 0x670   : > { %v6166_v0 = vadd.f32 %v21280_v62, %v6158_v38  ;;  %9171 = vst.msk [vmem:[#allocation3 + $0x128] sm:$0xff] %vm565_vm0, %v9163_v34 }
 0x671   : > { %v15923_v10 = vld [vmem:[%s20635_s2 + $0x58] sm:$0xff]  ;;  %v6165_v1 = vadd.f32 %v21280_v62, %v6157_v60  ;;  %9170 = vst.msk [vmem:[#allocation3 + $0x110] sm:$0xff] %vm565_vm0, %v9162_v53 }
 0x672   : > { %v9165_v25 = vmax.f32 %v15923_v10, 0.0  ;;  %v15922_v28 = vld [vmem:[%s20635_s2 + $0x50] sm:$0xff]  ;;  %15727 = vst.msk [vmem:[%s20635_s2 + $0x78] sm:$0xff] %vm565_vm0, %v6166_v0 }
 0x673   : > { %v9164_v7 = vmax.f32 %v15922_v28, 0.0  ;;  %15726 = vst.msk [vmem:[%s20635_s2 + $0x70] sm:$0xff] %vm565_vm0, %v6165_v1 }
 0x674   : > { %9173 = vst.msk [vmem:[#allocation3 + $0x158] sm:$0xff] %vm565_vm0, %v9165_v25 }
 0x675   : > { %v15925_v36 = vld [vmem:[%s20635_s2 + $0x68] sm:$0xff]  ;;  %9172 = vst.msk [vmem:[#allocation3 + $0x140] sm:$0xff] %vm565_vm0, %v9164_v7 }
 0x676   : > { %v9167_v29 = vmax.f32 %v15925_v36, 0.0  ;;  %v15924_v30 = vld [vmem:[%s20635_s2 + $0x60] sm:$0xff] }
 0x677   : > { %v9166_v13 = vmax.f32 %v15924_v30, 0.0 }
 0x678   : > { %9175 = vst.msk [vmem:[#allocation3 + $0x188] sm:$0xff] %vm565_vm0, %v9167_v29 }
 0x679   : > { %v15927_v32 = vld [vmem:[%s20635_s2 + $0x78] sm:$0xff]  ;;  %9174 = vst.msk [vmem:[#allocation3 + $0x170] sm:$0xff] %vm565_vm0, %v9166_v13 }
 0x67a   : > { %v9169_v33 = vmax.f32 %v15927_v32, 0.0  ;;  %v15926_v34 = vld [vmem:[%s20635_s2 + $0x70] sm:$0xff] }
 0x67b   : > { %v9168_v35 = vmax.f32 %v15926_v34, 0.0 }
 0x67c   : > { %9177 = vst.msk [vmem:[#allocation3 + $0x1b8] sm:$0xff] %vm565_vm0, %v9169_v33 }
 0x67d   : > { %9176 = vst.msk [vmem:[#allocation3 + $0x1a0] sm:$0xff] %vm565_vm0, %v9168_v35 }
 0x6f1   : > { %v17805_v38 = vpop.f32.mrb[32].mxu0 }
 0x6f2   : > { %v7476_v39 = vadd.f32 %v17805_v38, %v21068_v2  ;;  %v7428_v41 = vpop.f32.mrb[33].mxu0 }
 0x6f3   : > { %v7475_v53 = vadd.f32 %v21068_v2, %v7428_v41 }
 0x6f4   : > { %v7484_v10 = vmax.f32 %v7476_v39, 0.0 }
 0x6f5   : > { %v7483_v60 = vmax.f32 %v7475_v53, 0.0  ;;  %v17808_v0 = vpop.f32.mrb[34].mxu0 }
 0x6f6   : > { %v7478_v1 = vadd.f32 %v17808_v0, %v21068_v2  ;;  %v7438_v25 = vpop.f32.mrb[35].mxu0 }
 0x6f7   : > { %v7477_v28 = vadd.f32 %v21068_v2, %v7438_v25  ;;  %17817 = vmatprep.mubr.msk.f32.mxu1 %vm565_vm0, %v7483_v60  ;;  %v15804_v60 = vld [vmem:[%s20635_s2 + $0xa0] sm:$0xff] }
 0x6f8   : > { %17818 = vmatmul.mubr.msk.f32.vlgmr.msra.gmra.mrb[32].mxu1 %vm565_vm0, %v7484_v10  ;;  %v7486_v29 = vmax.f32 %v7478_v1, 0.0 }
 0x6f9   : > { %v7485_v7 = vmax.f32 %v7477_v28, 0.0  ;;  %17830 = vmatpush3.msra.mxu1 %v21348_v56  ;;  %v17811_v36 = vpop.f32.mrb[36].mxu0 }
 0x6fa   : > { %v7480_v30 = vadd.f32 %v17811_v36, %v21068_v2  ;;  %v7448_v13 = vpop.f32.mrb[37].mxu0  ;;  %17843 = vmatprep.subr.mxu1 %v21369_v21 }
 0x6fb   : > { %v7479_v32 = vadd.f32 %v21068_v2, %v7448_v13  ;;  %17820 = vmatprep.mubr.msk.f32.mxu1 %vm565_vm0, %v7485_v7  ;;  %v15807_v7 = vld [vmem:[%s20635_s2 + $0xb8] sm:$0xff] }
 0x6fc   : > { %17821 = vmatmul.mubr.msk.f32.gmra.mrb[34].mxu1 %vm565_vm0, %v7486_v29  ;;  %v7488_v35 = vmax.f32 %v7480_v30, 0.0 }
 0x6fd   : > { %v7487_v33 = vmax.f32 %v7479_v32, 0.0  ;;  %v17814_v34 = vpop.f32.mrb[38].mxu0  ;;  %v15806_v32 = vld [vmem:[%s20635_s2 + $0xb0] sm:$0xff] }
 0x6fe   : > { %v7482_v38 = vadd.f32 %v17814_v34, %v21068_v2  ;;  %v7458_v39 = vpop.f32.mrb[39].mxu0 }
 0x6ff   : > { %v7481_v56 = vadd.f32 %v21068_v2, %v7458_v39  ;;  %17823 = vmatprep.mubr.msk.f32.mxu1 %vm565_vm0, %v7487_v33  ;;  %v8082_v2 = vld [vmem:[#allocation10 + $0x18] sm:$0xff] }
 0x700   : > { %17824 = vmatmul.mubr.msk.f32.gmra.mrb[36].mxu1 %vm565_vm0, %v7488_v35  ;;  %v7490_v53 = vmax.f32 %v7482_v38, 0.0 }
 0x701   : > { %v7489_v41 = vmax.f32 %v7481_v56, 0.0 }
 0x703   : > { %17826 = vmatprep.mubr.msk.f32.mxu1 %vm565_vm0, %v7489_v41 }
 0x704   : > { %17827 = vmatmul.mubr.msk.f32.gmra.mrb[38].mxu1 %vm565_vm0, %v7490_v53 }
 0x705   : > { %17831 = vmatprep.mubr.msk.f32.mxu1 %vm565_vm0, %v7661_v54 }
 0x708   : > { %17832 = vmatmul.mubr.msk.f32.vlgmr.msra.gmra.mrb[40].mxu1 %vm565_vm0, %v21545_v61 }
 0x709   : > { %17844 = vmatpush3.msra.mxu1 %v21369_v21  ;;  %17834 = vmatprep.mubr.msk.f32.mxu1 %vm565_vm0, %v21549_v23  ;;  %v8369_v21 = vld [vmem:[#allocation3 + $0x249] sm:$0xff] }
 0x70a   : > { %17857 = vmatprep.subr.mxu1 %v21386_v59 }
 0x70c   : > { %17835 = vmatmul.mubr.msk.f32.gmra.mrb[42].mxu1 %vm565_vm0, %v21553_v27 }
 0x70d   : > { %17837 = vmatprep.mubr.msk.f32.mxu1 %vm565_vm0, %v21558_v20 }
 0x710   : > { %17838 = vmatmul.mubr.msk.f32.gmra.mrb[44].mxu1 %vm565_vm0, %v21562_v19 }
 0x711   : > { %17840 = vmatprep.mubr.msk.f32.mxu1 %vm565_vm0, %v21566_v17 }
 0x714   : > { %17841 = vmatmul.mubr.msk.f32.gmra.mrb[46].mxu1 %vm565_vm0, %v21570_v5 }
 0x715   : > { %17845 = vmatprep.mubr.msk.f32.mxu1 %vm565_vm0, %v21315_v57  ;;  %v8228_v57 = vld [vmem:[#allocation10 + $0x20] sm:$0xff] }
 0x718   : > { %17846 = vmatmul.mubr.msk.f32.vlgmr.msra.gmra.mrb[40].mxu1 %vm565_vm0, %v21310_v37 }
 0x719   : > { %17858 = vmatpush3.msra.mxu1 %v21386_v59  ;;  %17848 = vmatprep.mubr.msk.f32.mxu1 %vm565_vm0, %v21330_v6  ;;  %v8370_v59 = vld [vmem:[#allocation3 + $0x261] sm:$0xff] }
 0x71a   : > { %17871 = vmatprep.subr.mxu1 %v8082_v2 }
 0x71c   : > { %17849 = vmatmul.mubr.msk.f32.gmra.mrb[42].mxu1 %vm565_vm0, %v21326_v3 }
 0x71d   : > { %17851 = vmatprep.mubr.msk.f32.mxu1 %vm565_vm0, %v21342_v26 }
 0x720   : > { %17852 = vmatmul.mubr.msk.f32.gmra.mrb[44].mxu1 %vm565_vm0, %v21338_v24 }
 0x721   : > { %17854 = vmatprep.mubr.msk.f32.mxu1 %vm565_vm0, %v21358_v8 }
 0x724   : > { %17855 = vmatmul.mubr.msk.f32.gmra.mrb[46].mxu1 %vm565_vm0, %v21354_v63 }
 0x725   : > { %17859 = vmatprep.mubr.msk.f32.mxu1 %vm565_vm0, %v21191_v9  ;;  %v8374_v9 = vld [vmem:[#allocation10 + $0x28] sm:$0xff] }
 0x728   : > { %17860 = vmatmul.mubr.msk.f32.vlgmr.msra.gmra.mrb[40].mxu1 %vm565_vm0, %v21195_v4  ;;  %v8081_v4 = vld [vmem:[#allocation3 + $0x2a8] sm:$0xff] }
 0x729   : > { %17872 = vmatpush3.msra.mxu1 %v8082_v2  ;;  %17862 = vmatprep.mubr.msk.f32.mxu1 %vm565_vm0, %v21199_v12  ;;  %v8520_v12 = vld [vmem:[#allocation10 + $0x30] sm:$0xff] }
 0x72a   : > { %17885 = vmatprep.subr.mxu1 %v8228_v57 }
 0x72c   : > { %17863 = vmatmul.mubr.msk.f32.gmra.mrb[42].mxu1 %vm565_vm0, %v21205_v14  ;;  %v8227_v14 = vld [vmem:[#allocation3 + $0x398] sm:$0xff] }
 0x72d   : > { %17865 = vmatprep.mubr.msk.f32.mxu1 %vm565_vm0, %v21209_v15  ;;  %v8366_v15 = vld [vmem:[#allocation3 + $0x201] sm:$0xff] }
 0x730   : > { %17866 = vmatmul.mubr.msk.f32.gmra.mrb[44].mxu1 %vm565_vm0, %v21213_v16  ;;  %v8367_v16 = vld [vmem:[#allocation3 + $0x219] sm:$0xff] }
 0x731   : > { %17868 = vmatprep.mubr.msk.f32.mxu1 %vm565_vm0, %v21217_v18  ;;  %v8666_v18 = vld [vmem:[#allocation10 + $0x38] sm:$0xff] }
 0x734   : > { %17869 = vmatmul.mubr.msk.f32.gmra.mrb[46].mxu1 %vm565_vm0, %v21221_v55  ;;  %v8368_v55 = vld [vmem:[#allocation3 + $0x231] sm:$0xff] }
 0x735   : > { %17873 = vmatprep.mubr.msk.f32.mxu1 %vm565_vm0, %v21451_v22  ;;  %v8371_v22 = vld [vmem:[#allocation3 + $0x279] sm:$0xff] }
 0x738   : > { %17874 = vmatmul.mubr.msk.f32.vlgmr.msra.gmra.mrb[40].mxu1 %vm565_vm0, %v21455_v42  ;;  %v8372_v42 = vld [vmem:[#allocation3 + $0x291] sm:$0xff] }
 0x739   : > { %17886 = vmatpush3.msra.mxu1 %v8228_v57  ;;  %17876 = vmatprep.mubr.msk.f32.mxu1 %vm565_vm0, %v21459_v43  ;;  %v23007_v43 = vld [vmem:[#allocation34_spill] sm:$0xff] }
 0x73a   : > { %17899 = vmatprep.subr.mxu1 %v8374_v9 }
 0x73c   : > { %17877 = vmatmul.mubr.msk.f32.gmra.mrb[42].mxu1 %vm565_vm0, %v21465_v44  ;;  %v8812_v44 = vld [vmem:[#allocation10 + $0x40] sm:$0xff] }
 0x73d   : > { %17879 = vmatprep.mubr.msk.f32.mxu1 %vm565_vm0, %v21469_v45  ;;  %v8811_v45 = vld [vmem:[#allocation3 + $0xe1] sm:$0xff] }
 0x740   : > { %17880 = vmatmul.mubr.msk.f32.gmra.mrb[44].mxu1 %vm565_vm0, %v21473_v46  ;;  %v15801_v46 = vld [vmem:[%s20635_s2 + $0x88] sm:$0xff] }
 0x741   : > { %17882 = vmatprep.mubr.msk.f32.mxu1 %vm565_vm0, %v21477_v31 }
 0x744   : > { %17883 = vmatmul.mubr.msk.f32.gmra.mrb[46].mxu1 %vm565_vm0, %v8081_v4 }
 0x745   : > { %17887 = vmatprep.mubr.msk.f32.mxu1 %vm565_vm0, %v21483_v58 }
 0x748   : > { %17888 = vmatmul.mubr.msk.f32.vlgmr.msra.gmra.mrb[40].mxu1 %vm565_vm0, %v21487_v47  ;;  %v15800_v47 = vld [vmem:[%s20635_s2 + $0x80] sm:$0xff] }
 0x749   : > { %17900 = vmatpush3.msra.mxu1 %v8374_v9  ;;  %17890 = vmatprep.mubr.msk.f32.mxu1 %vm565_vm0, %v21491_v49 }
 0x74a   : > { %17913 = vmatprep.subr.mxu1 %v8520_v12 }
 0x74c   : > { %17891 = vmatmul.mubr.msk.f32.gmra.mrb[42].mxu1 %vm565_vm0, %v21497_v50 }
 0x74d   : > { %17893 = vmatprep.mubr.msk.f32.mxu1 %vm565_vm0, %v21501_v51 }
 0x750   : > { %17894 = vmatmul.mubr.msk.f32.gmra.mrb[44].mxu1 %vm565_vm0, %v21505_v52 }
 0x751   : > { %17896 = vmatprep.mubr.msk.f32.mxu1 %vm565_vm0, %v21509_v40  ;;  %v15803_v40 = vld [vmem:[%s20635_s2 + $0x98] sm:$0xff] }
 0x754   : > { %17897 = vmatmul.mubr.msk.f32.gmra.mrb[46].mxu1 %vm565_vm0, %v8227_v14 }
 0x755   : > { %17901 = vmatprep.mubr.msk.f32.mxu1 %vm565_vm0, %v8366_v15 }
 0x758   : > { %17902 = vmatmul.mubr.msk.f32.vlgmr.msra.gmra.mrb[40].mxu1 %vm565_vm0, %v8367_v16 }
 0x759   : > { %17914 = vmatpush3.msra.mxu1 %v8520_v12  ;;  %17904 = vmatprep.mubr.msk.f32.mxu1 %vm565_vm0, %v8368_v55 }
 0x75a   : > { %17927 = vmatprep.subr.mxu1 %v8666_v18 }
 0x75c   : > { %17905 = vmatmul.mubr.msk.f32.gmra.mrb[42].mxu1 %vm565_vm0, %v8369_v21  ;;  %v19291_v21 = vld [vmem:[#allocation12] ss:$0 sm:$0xff] }
 0x75d   : > { %17907 = vmatprep.mubr.msk.f32.mxu1 %vm565_vm0, %v8370_v59 }
 0x760   : > { %17908 = vmatmul.mubr.msk.f32.gmra.mrb[44].mxu1 %vm565_vm0, %v8371_v22 }
 0x761   : > { %17910 = vmatprep.mubr.msk.f32.mxu1 %vm565_vm0, %v8372_v42 }
 0x764   : > { %17911 = vmatmul.mubr.msk.f32.gmra.mrb[46].mxu1 %vm565_vm0, %v23007_v43 }
 0x765   : > { %17915 = vmatprep.mubr.msk.f32.mxu1 %vm565_vm0, %v21310_v37  ;;  %v23008_v37 = vld [vmem:[#allocation35_spill] sm:$0xff] }
 0x768   : > { %17916 = vmatmul.mubr.msk.f32.vlgmr.msra.gmra.mrb[40].mxu1 %vm565_vm0, %v21330_v6  ;;  %v23010_v6 = vld [vmem:[#allocation36_spill] sm:$0xff] }
 0x769   : > { %17928 = vmatpush3.msra.mxu1 %v8666_v18  ;;  %17918 = vmatprep.mubr.msk.f32.mxu1 %vm565_vm0, %v21326_v3  ;;  %v23009_v3 = vld [vmem:[#allocation37_spill] sm:$0xff] }
 0x76a   : > { %17941 = vmatprep.subr.mxu1 %v8812_v44  ;;  %v21828_v18 = vld [vmem:[#allocation16 + $0x8] sm:$0xff] }
 0x76b   : > { %17969 = vmatprep.subr.mxu0 %v21828_v18 }
 0x76c   : > { %17919 = vmatmul.mubr.msk.f32.gmra.mrb[42].mxu1 %vm565_vm0, %v21342_v26  ;;  %v23012_v26 = vld [vmem:[#allocation38_spill] sm:$0xff] }
 0x76d   : > { %17921 = vmatprep.mubr.msk.f32.mxu1 %vm565_vm0, %v21338_v24  ;;  %v23011_v24 = vld [vmem:[#allocation39_spill] sm:$0xff] }
 0x770   : > { %17922 = vmatmul.mubr.msk.f32.gmra.mrb[44].mxu1 %vm565_vm0, %v21358_v8  ;;  %v23014_v8 = vld [vmem:[#allocation40_spill] sm:$0xff] }
 0x771   : > { %17924 = vmatprep.mubr.msk.f32.mxu1 %vm565_vm0, %v21354_v63  ;;  %v23013_v63 = vld [vmem:[#allocation41_spill] sm:$0xff] }
 0x774   : > { %17925 = vmatmul.mubr.msk.f32.gmra.mrb[46].mxu1 %vm565_vm0, %v21541_v48 }
 0x775   : > { %17929 = vmatprep.mubr.msk.f32.mxu1 %vm565_vm0, %v21545_v61 }
 0x778   : > { %17930 = vmatmul.mubr.msk.f32.vlgmr.msra.gmra.mrb[40].mxu1 %vm565_vm0, %v21549_v23  ;;  %v15802_v23 = vld [vmem:[%s20635_s2 + $0x90] sm:$0xff] }
 0x779   : > { %17942 = vmatpush3.msra.mxu1 %v8812_v44  ;;  %17932 = vmatprep.mubr.msk.f32.mxu1 %vm565_vm0, %v21553_v27 }
 0x77c   : > { %17933 = vmatmul.mubr.msk.f32.gmra.mrb[42].mxu1 %vm565_vm0, %v21558_v20 }
 0x77d   : > { %17935 = vmatprep.mubr.msk.f32.mxu1 %vm565_vm0, %v21562_v19 }
 0x780   : > { %17936 = vmatmul.mubr.msk.f32.gmra.mrb[44].mxu1 %vm565_vm0, %v21566_v17 }
 0x781   : > { %17938 = vmatprep.mubr.msk.f32.mxu1 %vm565_vm0, %v21570_v5  ;;  %v15805_v5 = vld [vmem:[%s20635_s2 + $0xa8] sm:$0xff] }
 0x784   : > { %17939 = vmatmul.mubr.msk.f32.gmra.mrb[46].mxu1 %vm565_vm0, %v21574_v11 }
 0x785   : > { %17943 = vmatprep.mubr.msk.f32.mxu1 %vm565_vm0, %v23008_v37 }
 0x788   : > { %17944 = vmatmul.mubr.msk.f32.vlgmr.msra.gmra.mrb[40].mxu1 %vm565_vm0, %v23009_v3 }
 0x789   : > { %17946 = vmatprep.mubr.msk.f32.mxu1 %vm565_vm0, %v23010_v6 }
 0x78c   : > { %17947 = vmatmul.mubr.msk.f32.gmra.mrb[42].mxu1 %vm565_vm0, %v23011_v24 }
 0x78d   : > { %17949 = vmatprep.mubr.msk.f32.mxu1 %vm565_vm0, %v23012_v26 }
 0x790   : > { %17950 = vmatmul.mubr.msk.f32.gmra.mrb[44].mxu1 %vm565_vm0, %v23013_v63 }
 0x791   : > { %17952 = vmatprep.mubr.msk.f32.mxu1 %vm565_vm0, %v23014_v8 }
 0x794   : > { %17953 = vmatmul.mubr.msk.f32.gmra.mrb[46].mxu1 %vm565_vm0, %v8811_v45 }
 0x7cb   : > { %v17819_v31 = vpop.f32.mrb[32].mxu1 }
 0x7cc   : > { %v7629_v58 = vadd.f32 %v17819_v31, %v15801_v46  ;;  %v7589_v49 = vpop.f32.mrb[33].mxu1 }
 0x7cd   : > { %v7628_v50 = vadd.f32 %v15800_v47, %v7589_v49 }
 0x7ce   : > { %v7637_v51 = vadd.f32 %v21280_v62, %v7629_v58 }
 0x7cf   : > { %v7636_v52 = vadd.f32 %v21280_v62, %v7628_v50  ;;  %v17822_v48 = vpop.f32.mrb[34].mxu1 }
 0x7d0   : > { %15817 = vst.msk [vmem:[%s20635_s2 + $0x88] sm:$0xff] %vm565_vm0, %v7637_v51  ;;  %v7631_v61 = vadd.f32 %v17822_v48, %v15803_v40  ;;  %v7599_v27 = vpop.f32.mrb[35].mxu1 }
 0x7d1   : > { %15816 = vst.msk [vmem:[%s20635_s2 + $0x80] sm:$0xff] %vm565_vm0, %v7636_v52  ;;  %v7630_v20 = vadd.f32 %v15802_v23, %v7599_v27 }
 0x7d2   : > { %v7639_v19 = vadd.f32 %v21280_v62, %v7631_v61  ;;  %v21838_v61 = vld [vmem:[#allocation3 + $0x1e8] sm:$0xff] }
 0x7d3   : > { %v7638_v17 = vadd.f32 %v21280_v62, %v7630_v20  ;;  %v17825_v11 = vpop.f32.mrb[36].mxu1 }
 0x7d4   : > { %15819 = vst.msk [vmem:[%s20635_s2 + $0x98] sm:$0xff] %vm565_vm0, %v7639_v19  ;;  %v7633_v54 = vadd.f32 %v17825_v11, %v15805_v5  ;;  %v7609_v0 = vpop.f32.mrb[37].mxu1 }
 0x7d5   : > { %15818 = vst.msk [vmem:[%s20635_s2 + $0x90] sm:$0xff] %vm565_vm0, %v7638_v17  ;;  %v7632_v10 = vadd.f32 %v15804_v60, %v7609_v0  ;;  %v9226_v60 = vld [vmem:[#allocation3 + $0x2d7] sm:$0xff]  ;;  %v21876_v0 = vld [vmem:[#allocation16 + $0x10] sm:$0xff] }
 0x7d6   : > { %v7641_v1 = vadd.f32 %v21280_v62, %v7633_v54  ;;  %v21872_v54 = vld [vmem:[#allocation16] sm:$0xff] }
 0x7d7   : > { %v15929_v25 = vld [vmem:[%s20635_s2 + $0x88] sm:$0xff]  ;;  %v7640_v28 = vadd.f32 %v21280_v62, %v7632_v10  ;;  %v17828_v36 = vpop.f32.mrb[38].mxu1 }
 0x7d8   : > { %v9187_v29 = vmax.f32 %v15929_v25, 0.0  ;;  %v15928_v30 = vld [vmem:[%s20635_s2 + $0x80] sm:$0xff]  ;;  %15821 = vst.msk [vmem:[%s20635_s2 + $0xa8] sm:$0xff] %vm565_vm0, %v7641_v1  ;;  %v7635_v13 = vadd.f32 %v17828_v36, %v15807_v7  ;;  %v7619_v33 = vpop.f32.mrb[39].mxu1  ;;  %v15897_v10 = vld [vmem:[%s20635_s2 + $0xc8] sm:$0xff] }
 0x7d9   : > { %v9186_v34 = vmax.f32 %v15928_v30, 0.0  ;;  %15820 = vst.msk [vmem:[%s20635_s2 + $0xa0] sm:$0xff] %vm565_vm0, %v7640_v28  ;;  %v7634_v35 = vadd.f32 %v15806_v32, %v7619_v33  ;;  %v15896_v28 = vld [vmem:[%s20635_s2 + $0xc0] sm:$0xff]  ;;  %v15899_v32 = vld [vmem:[%s20635_s2 + $0xd8] sm:$0xff] }
 0x7da   : > { %9195 = vst.msk [vmem:[#allocation3 + $0x218] sm:$0xff] %vm565_vm0, %v9187_v29  ;;  %v7643_v38 = vadd.f32 %v21280_v62, %v7635_v13  ;;  %v19292_v29 = vld [vmem:[#allocation15] ss:$0 sm:$0xff] }
 0x7db   : > { %9194 = vst.msk [vmem:[#allocation3 + $0x200] sm:$0xff] %vm565_vm0, %v9186_v34  ;;  %v15931_v39 = vld [vmem:[%s20635_s2 + $0x98] sm:$0xff]  ;;  %v7642_v56 = vadd.f32 %v21280_v62, %v7634_v35  ;;  %v15898_v35 = vld [vmem:[%s20635_s2 + $0xd0] sm:$0xff] }
 0x7dc   : > { %v9189_v41 = vmax.f32 %v15931_v39, 0.0  ;;  %v15930_v53 = vld [vmem:[%s20635_s2 + $0x90] sm:$0xff]  ;;  %15823 = vst.msk [vmem:[%s20635_s2 + $0xb8] sm:$0xff] %vm565_vm0, %v7643_v38 }
 0x7dd   : > { %v9188_v2 = vmax.f32 %v15930_v53, 0.0  ;;  %15822 = vst.msk [vmem:[%s20635_s2 + $0xb0] sm:$0xff] %vm565_vm0, %v7642_v56  ;;  %v15901_v53 = vld [vmem:[%s20635_s2 + $0xe8] sm:$0xff] }
 0x7de   : > { %9197 = vst.msk [vmem:[#allocation3 + $0x248] sm:$0xff] %vm565_vm0, %v9189_v41 }
 0x7df   : > { %9196 = vst.msk [vmem:[#allocation3 + $0x230] sm:$0xff] %vm565_vm0, %v9188_v2  ;;  %v15933_v57 = vld [vmem:[%s20635_s2 + $0xa8] sm:$0xff] }
 0x7e0   : > { %v9191_v9 = vmax.f32 %v15933_v57, 0.0  ;;  %v15932_v4 = vld [vmem:[%s20635_s2 + $0xa0] sm:$0xff] }
 0x7e1   : > { %v9190_v12 = vmax.f32 %v15932_v4, 0.0  ;;  %v21848_v27 = vld [vmem:[#allocation3 + $0x218] sm:$0xff] }
 0x7e2   : > { %9199 = vst.msk [vmem:[#allocation3 + $0x278] sm:$0xff] %vm565_vm0, %v9191_v9  ;;  %v21844_v23 = vld [vmem:[#allocation3 + $0x200] sm:$0xff]  ;;  %v15900_v9 = vld [vmem:[%s20635_s2 + $0xe0] sm:$0xff] }
 0x7e3   : > { %9198 = vst.msk [vmem:[#allocation3 + $0x260] sm:$0xff] %vm565_vm0, %v9190_v12  ;;  %v15935_v62 = vld [vmem:[%s20635_s2 + $0xb8] sm:$0xff] }
 0x7e4   : > { %v9193_v14 = vmax.f32 %v15935_v62, 0.0  ;;  %v15934_v15 = vld [vmem:[%s20635_s2 + $0xb0] sm:$0xff] }
 0x7e5   : > { %v9192_v16 = vmax.f32 %v15934_v15, 0.0  ;;  %v21856_v19 = vld [vmem:[#allocation3 + $0x248] sm:$0xff] }
 0x7e6   : > { %9201 = vst.msk [vmem:[#allocation3 + $0x2a8] sm:$0xff] %vm565_vm0, %v9193_v14  ;;  %v21852_v20 = vld [vmem:[#allocation3 + $0x230] sm:$0xff] }
 0x7e7   : > { %9200 = vst.msk [vmem:[#allocation3 + $0x290] sm:$0xff] %vm565_vm0, %v9192_v16  ;;  %v15903_v16 = vld [vmem:[%s20635_s2 + $0xf8] sm:$0xff] }
 0x7e9   : > { %v21864_v5 = vld [vmem:[#allocation3 + $0x278] sm:$0xff] }
 0x7ea   : > { %v21860_v17 = vld [vmem:[#allocation3 + $0x260] sm:$0xff] }
 0x7ee   : > { %v21868_v11 = vld [vmem:[#allocation3 + $0x290] sm:$0xff] }
 0x85b   : > { %v17945_v55 = vpop.f32.mrb[40].mxu1 }
 0x85c   : > { %v8951_v59 = vadd.f32 %v19291_v21, %v17945_v55  ;;  %v8903_v22 = vpop.f32.mrb[41].mxu1 }
 0x85d   : > { %v8950_v42 = vadd.f32 %v19291_v21, %v8903_v22 }
 0x85e   : > { %v8959_v37 = vmax.f32 %v8951_v59, 0.0 }
 0x85f   : > { %v8958_v43 = vmax.f32 %v8950_v42, 0.0  ;;  %v17948_v44 = vpop.f32.mrb[42].mxu1  ;;  %v15902_v42 = vld [vmem:[%s20635_s2 + $0xf0] sm:$0xff] }
 0x860   : > { %v8953_v3 = vadd.f32 %v19291_v21, %v17948_v44  ;;  %v8913_v6 = vpop.f32.mrb[43].mxu1 }
 0x861   : > { %v8952_v24 = vadd.f32 %v19291_v21, %v8913_v6  ;;  %17957 = vmatprep.mubr.msk.f32.mxu0 %vm565_vm0, %v8958_v43 }
 0x862   : > { %17958 = vmatmul.mubr.msk.f32.vlgmr.msra.gmra.mrb[40].mxu0 %vm565_vm0, %v8959_v37  ;;  %v8961_v8 = vmax.f32 %v8953_v3, 0.0 }
 0x863   : > { %v8960_v26 = vmax.f32 %v8952_v24, 0.0  ;;  %v17951_v63 = vpop.f32.mrb[44].mxu1  ;;  %17970 = vmatpush3.msra.mxu0 %v21828_v18 }
 0x864   : > { %v8955_v45 = vadd.f32 %v19291_v21, %v17951_v63  ;;  %v8923_v46 = vpop.f32.mrb[45].mxu1  ;;  %17983 = vmatprep.subr.mxu0 %v21872_v54 }
 0x865   : > { %v8954_v31 = vadd.f32 %v19291_v21, %v8923_v46  ;;  %17960 = vmatprep.mubr.msk.f32.mxu0 %vm565_vm0, %v8960_v26  ;;  %v21913_v46 = vld [vmem:[#allocation19] sm:$0xff] }
 0x866   : > { %17961 = vmatmul.mubr.msk.f32.gmra.mrb[42].mxu0 %vm565_vm0, %v8961_v8  ;;  %v8963_v49 = vmax.f32 %v8955_v45, 0.0  ;;  %18095 = vmatprep.subr.mxu1 %v21913_v46 }
 0x867   : > { %v8962_v58 = vmax.f32 %v8954_v31, 0.0  ;;  %v17954_v47 = vpop.f32.mrb[46].mxu1  ;;  %18096 = vmatpush3.msra.mxu1 %v21913_v46 }
 0x868   : > { %v8957_v50 = vadd.f32 %v19291_v21, %v17954_v47  ;;  %v8933_v51 = vpop.f32.mrb[47].mxu1  ;;  %18109 = vmatprep.subr.mxu1 %v21828_v18 }
 0x869   : > { %v8956_v52 = vadd.f32 %v19291_v21, %v8933_v51  ;;  %17963 = vmatprep.mubr.msk.f32.mxu0 %vm565_vm0, %v8962_v58 }
 0x86a   : > { %17964 = vmatmul.mubr.msk.f32.gmra.mrb[44].mxu0 %vm565_vm0, %v8963_v49  ;;  %v8965_v48 = vmax.f32 %v8957_v50, 0.0  ;;  %v21921_v50 = vld [vmem:[#allocation16 + $0x18] sm:$0xff] }
 0x86b   : > { %v8964_v40 = vmax.f32 %v8956_v52, 0.0 }
 0x86d   : > { %17966 = vmatprep.mubr.msk.f32.mxu0 %vm565_vm0, %v8964_v40 }
 0x86e   : > { %17967 = vmatmul.mubr.msk.f32.gmra.mrb[46].mxu0 %vm565_vm0, %v8965_v48 }
 0x86f   : > { %17971 = vmatprep.mubr.msk.f32.mxu0 %vm565_vm0, %v21838_v61 }
 0x872   : > { %17972 = vmatmul.mubr.msk.f32.vlgmr.msra.gmra.mrb[48].mxu0 %vm565_vm0, %v21844_v23 }
 0x873   : > { %17974 = vmatprep.mubr.msk.f32.mxu0 %vm565_vm0, %v21848_v27  ;;  %17984 = vmatpush3.msra.mxu0 %v21872_v54 }
 0x874   : > { %17997 = vmatprep.subr.mxu0 %v21876_v0 }
 0x876   : > { %17975 = vmatmul.mubr.msk.f32.gmra.mrb[50].mxu0 %vm565_vm0, %v21852_v20 }
 0x877   : > { %17977 = vmatprep.mubr.msk.f32.mxu0 %vm565_vm0, %v21856_v19 }
 0x87a   : > { %17978 = vmatmul.mubr.msk.f32.gmra.mrb[52].mxu0 %vm565_vm0, %v21860_v17 }
 0x87b   : > { %17980 = vmatprep.mubr.msk.f32.mxu0 %vm565_vm0, %v21864_v5 }
 0x87e   : > { %17981 = vmatmul.mubr.msk.f32.gmra.mrb[54].mxu0 %vm565_vm0, %v21868_v11 }
 0x87f   : > { %17985 = vmatprep.mubr.msk.f32.mxu0 %vm565_vm0, %v9226_v60 }
 0x935   : > { %v17959_v1 = vpop.f32.mrb[40].mxu0 }
 0x936   : > { %v9104_v25 = vadd.f32 %v17959_v1, %v15897_v10  ;;  %v9064_v7 = vpop.f32.mrb[41].mxu0 }
 0x937   : > { %v9103_v36 = vadd.f32 %v15896_v28, %v9064_v7  ;;  %v21953_v7 = vld [vmem:[#allocation3 + $0x2d8] sm:$0xff] }
 0x938   : > { %v9112_v30 = vadd.f32 %v19292_v29, %v9104_v25 }
 0x939   : > { %v9111_v13 = vadd.f32 %v19292_v29, %v9103_v36  ;;  %v17962_v33 = vpop.f32.mrb[42].mxu0 }
 0x93a   : > { %15913 = vst.msk [vmem:[%s20635_s2 + $0xc8] sm:$0xff] %vm565_vm0, %v9112_v30  ;;  %v9106_v34 = vadd.f32 %v17962_v33, %v15899_v32  ;;  %v9074_v38 = vpop.f32.mrb[43].mxu0  ;;  %v21963_v30 = vld [vmem:[#allocation16 + $0x20] sm:$0xff] }
 0x93b   : > { %15912 = vst.msk [vmem:[%s20635_s2 + $0xc0] sm:$0xff] %vm565_vm0, %v9111_v13  ;;  %v9105_v39 = vadd.f32 %v15898_v35, %v9074_v38 }
 0x93c   : > { %v9114_v56 = vadd.f32 %v19292_v29, %v9106_v34 }
 0x93d   : > { %v9113_v41 = vadd.f32 %v19292_v29, %v9105_v39  ;;  %v17965_v2 = vpop.f32.mrb[44].mxu0  ;;  %v21993_v39 = vld [vmem:[#allocation3 + $0x10f] sm:$0xff] }
 0x93e   : > { %15915 = vst.msk [vmem:[%s20635_s2 + $0xd8] sm:$0xff] %vm565_vm0, %v9114_v56  ;;  %v9108_v57 = vadd.f32 %v17965_v2, %v15901_v53  ;;  %v9084_v4 = vpop.f32.mrb[45].mxu0  ;;  %v21997_v56 = vld [vmem:[#allocation3 + $0x127] sm:$0xff]  ;;  %v22003_v53 = vld [vmem:[#allocation3 + $0x13f] sm:$0xff]  ;;  %v22009_v2 = vld [vmem:[#allocation3 + $0x157] sm:$0xff] }
 0x93f   : > { %15914 = vst.msk [vmem:[%s20635_s2 + $0xd0] sm:$0xff] %vm565_vm0, %v9113_v41  ;;  %v9107_v12 = vadd.f32 %v15900_v9, %v9084_v4  ;;  %v21999_v41 = vld [vmem:[#allocation16 + $0x28] sm:$0xff]  ;;  %v22017_v9 = vld [vmem:[#allocation3 + $0x187] sm:$0xff] }
 0x940   : > { %v9116_v62 = vadd.f32 %v19292_v29, %v9108_v57  ;;  %v22013_v57 = vld [vmem:[#allocation3 + $0x16f] sm:$0xff]  ;;  %v22021_v4 = vld [vmem:[#allocation3 + $0x19f] sm:$0xff] }
 0x941   : > { %v15937_v14 = vld [vmem:[%s20635_s2 + $0xc8] sm:$0xff]  ;;  %v9115_v15 = vadd.f32 %v19292_v29, %v9107_v12  ;;  %v17968_v55 = vpop.f32.mrb[46].mxu0  ;;  %23022 = vst [vmem:[#allocation39_spill] sm:$0xff] %v22021_v4 }
 0x942   : > { %v9211_v21 = vmax.f32 %v15937_v14, 0.0  ;;  %v15936_v59 = vld [vmem:[%s20635_s2 + $0xc0] sm:$0xff]  ;;  %15917 = vst.msk [vmem:[%s20635_s2 + $0xe8] sm:$0xff] %vm565_vm0, %v9116_v62  ;;  %v9110_v22 = vadd.f32 %v17968_v55, %v15903_v16  ;;  %v9094_v43 = vpop.f32.mrb[47].mxu0  ;;  %v22025_v12 = vld [vmem:[#allocation3 + $0x1b7] sm:$0xff]  ;;  %v22029_v62 = vld [vmem:[#allocation3 + $0x20] sm:$0xff] }
 0x943   : > { %v9210_v44 = vmax.f32 %v15936_v59, 0.0  ;;  %15916 = vst.msk [vmem:[%s20635_s2 + $0xe0] sm:$0xff] %vm565_vm0, %v9115_v15  ;;  %v9109_v37 = vadd.f32 %v15902_v42, %v9094_v43  ;;  %23023 = vst [vmem:[#allocation38_spill] sm:$0xff] %v22025_v12  ;;  %v22033_v14 = vld [vmem:[#allocation3 + $0x38] sm:$0xff]  ;;  %v22035_v15 = vld [vmem:[#allocation16 + $0x30] sm:$0xff] }
 0x944   : > { %9219 = vst.msk [vmem:[#allocation3 + $0x308] sm:$0xff] %vm565_vm0, %v9211_v21  ;;  %v9118_v3 = vadd.f32 %v19292_v29, %v9110_v22  ;;  %v22039_v16 = vld [vmem:[#allocation3 + $0x50] sm:$0xff]  ;;  %v22045_v55 = vld [vmem:[#allocation3 + $0x68] sm:$0xff]  ;;  %v22049_v21 = vld [vmem:[#allocation3 + $0x80] sm:$0xff] }
 0x945   : > { %9218 = vst.msk [vmem:[#allocation3 + $0x2f0] sm:$0xff] %vm565_vm0, %v9210_v44  ;;  %v15939_v6 = vld [vmem:[%s20635_s2 + $0xd8] sm:$0xff]  ;;  %v9117_v24 = vadd.f32 %v19292_v29, %v9109_v37  ;;  %v22053_v59 = vld [vmem:[#allocation3 + $0x98] sm:$0xff]  ;;  %v22057_v22 = vld [vmem:[#allocation3 + $0xb0] sm:$0xff] }
 0x946   : > { %v9213_v26 = vmax.f32 %v15939_v6, 0.0  ;;  %v15938_v63 = vld [vmem:[%s20635_s2 + $0xd0] sm:$0xff]  ;;  %15919 = vst.msk [vmem:[%s20635_s2 + $0xf8] sm:$0xff] %vm565_vm0, %v9118_v3  ;;  %v22061_v42 = vld [vmem:[#allocation3 + $0xc8] sm:$0xff]  ;;  %v22065_v43 = vld [vmem:[#allocation3 + $0x110] sm:$0xff] }
 0x947   : > { %v9212_v8 = vmax.f32 %v15938_v63, 0.0  ;;  %15918 = vst.msk [vmem:[%s20635_s2 + $0xf0] sm:$0xff] %vm565_vm0, %v9117_v24  ;;  %v22069_v44 = vld [vmem:[#allocation3 + $0x128] sm:$0xff]  ;;  %v22075_v3 = vld [vmem:[#allocation3 + $0x140] sm:$0xff]  ;;  %v22081_v6 = vld [vmem:[#allocation3 + $0x158] sm:$0xff] }
 0x948   : > { %9221 = vst.msk [vmem:[#allocation3 + $0x338] sm:$0xff] %vm565_vm0, %v9213_v26  ;;  %v22071_v37 = vld [vmem:[#allocation16 + $0x38] sm:$0xff]  ;;  %v22093_v63 = vld [vmem:[#allocation3 + $0x1a0] sm:$0xff] }
 0x949   : > { %9220 = vst.msk [vmem:[#allocation3 + $0x320] sm:$0xff] %vm565_vm0, %v9212_v8  ;;  %v15941_v45 = vld [vmem:[%s20635_s2 + $0xe8] sm:$0xff]  ;;  %v22089_v26 = vld [vmem:[#allocation3 + $0x188] sm:$0xff] }
 0x94a   : > { %v9215_v31 = vmax.f32 %v15941_v45, 0.0  ;;  %v15940_v58 = vld [vmem:[%s20635_s2 + $0xe0] sm:$0xff]  ;;  %v22097_v8 = vld [vmem:[#allocation3 + $0x1b8] sm:$0xff] }
 0x94b   : > { %v9214_v47 = vmax.f32 %v15940_v58, 0.0  ;;  %v21928_v52 = vld [vmem:[#allocation3 + $0x307] sm:$0xff]  ;;  %v22085_v24 = vld [vmem:[#allocation3 + $0x170] sm:$0xff] }
 0x94c   : > { %9223 = vst.msk [vmem:[#allocation3 + $0x368] sm:$0xff] %vm565_vm0, %v9215_v31  ;;  %v21919_v49 = vld [vmem:[#allocation3 + $0x2ef] sm:$0xff]  ;;  %23016 = vst [vmem:[#allocation32_spill] sm:$0xff] %v21928_v52 }
 0x94d   : > { %23015 = vst [vmem:[#allocation31_spill] sm:$0xff] %v21919_v49  ;;  %9222 = vst.msk [vmem:[#allocation3 + $0x350] sm:$0xff] %vm565_vm0, %v9214_v47  ;;  %v15943_v51 = vld [vmem:[%s20635_s2 + $0xf8] sm:$0xff]  ;;  %17986 = vmatmul.mubr.msk.f32.vlgmr.msra.gmra.mrb[48].mxu0 %vm565_vm0, %v21919_v49  ;;  %v21961_v29 = vld [vmem:[#allocation3 + $0x2f0] sm:$0xff] }
 0x94e   : > { %v9217_v40 = vmax.f32 %v15943_v51, 0.0  ;;  %v15942_v48 = vld [vmem:[%s20635_s2 + $0xf0] sm:$0xff]  ;;  %17998 = vmatpush3.msra.mxu0 %v21876_v0  ;;  %17988 = vmatprep.mubr.msk.f32.mxu0 %vm565_vm0, %v21928_v52  ;;  %v21967_v13 = vld [vmem:[#allocation3 + $0x308] sm:$0xff] }
 0x94f   : > { %v9216_v60 = vmax.f32 %v15942_v48, 0.0  ;;  %18011 = vmatprep.subr.mxu0 %v21921_v50  ;;  %v21941_v1 = vld [vmem:[#allocation3 + $0x337] sm:$0xff]  ;;  %v22139_v58 = vld [vmem:[#allocation3 + $0x2a8] sm:$0xff] }
 0x950   : > { %9225 = vst.msk [vmem:[#allocation3 + $0x398] sm:$0xff] %vm565_vm0, %v9217_v40  ;;  %v21936_v10 = vld [vmem:[#allocation3 + $0x31f] sm:$0xff]  ;;  %23018 = vst [vmem:[#allocation34_spill] sm:$0xff] %v21941_v1  ;;  %v22103_v45 = vld [vmem:[#allocation16 + $0x40] sm:$0xff] }
 0x951   : > { %23017 = vst [vmem:[#allocation33_spill] sm:$0xff] %v21936_v10  ;;  %9224 = vst.msk [vmem:[#allocation3 + $0x380] sm:$0xff] %vm565_vm0, %v9216_v60  ;;  %17989 = vmatmul.mubr.msk.f32.gmra.mrb[50].mxu0 %vm565_vm0, %v21936_v10  ;;  %v21973_v32 = vld [vmem:[#allocation3 + $0x320] sm:$0xff]  ;;  %v21977_v33 = vld [vmem:[#allocation3 + $0x338] sm:$0xff] }
 0x952   : > { %17991 = vmatprep.mubr.msk.f32.mxu0 %vm565_vm0, %v21941_v1  ;;  %v22163_v51 = vld [vmem:[#allocation18] ss:$0 sm:$0xff] }
 0x953   : > { %v21949_v28 = vld [vmem:[#allocation3 + $0x367] sm:$0xff] }
 0x954   : > { %v21945_v25 = vld [vmem:[#allocation3 + $0x34f] sm:$0xff]  ;;  %23020 = vst [vmem:[#allocation37_spill] sm:$0xff] %v21949_v28 }
 0x955   : > { %23019 = vst [vmem:[#allocation35_spill] sm:$0xff] %v21945_v25  ;;  %17992 = vmatmul.mubr.msk.f32.gmra.mrb[52].mxu0 %vm565_vm0, %v21945_v25  ;;  %v21981_v34 = vld [vmem:[#allocation3 + $0x350] sm:$0xff]  ;;  %v21985_v35 = vld [vmem:[#allocation3 + $0x368] sm:$0xff] }
 0x956   : > { %17994 = vmatprep.mubr.msk.f32.mxu0 %vm565_vm0, %v21949_v28 }
 0x957   : > { %v22119_v31 = vld [vmem:[#allocation3 + $0x397] sm:$0xff] }
 0x958   : > { %v21955_v36 = vld [vmem:[#allocation3 + $0x37f] sm:$0xff]  ;;  %23024 = vst [vmem:[#allocation41_spill] sm:$0xff] %v22119_v31 }
 0x959   : > { %23021 = vst [vmem:[#allocation36_spill] sm:$0xff] %v21955_v36  ;;  %17995 = vmatmul.mubr.msk.f32.gmra.mrb[54].mxu0 %vm565_vm0, %v21955_v36  ;;  %v21989_v38 = vld [vmem:[#allocation3 + $0x380] sm:$0xff]  ;;  %v22159_v47 = vld [vmem:[#allocation3 + $0x398] sm:$0xff] }
 0x95a   : > { %17999 = vmatprep.mubr.msk.f32.mxu0 %vm565_vm0, %v21953_v7 }
 0x95d   : > { %18000 = vmatmul.mubr.msk.f32.vlgmr.msra.gmra.mrb[48].mxu0 %vm565_vm0, %v21961_v29 }
 0x95e   : > { %18012 = vmatpush3.msra.mxu0 %v21921_v50  ;;  %18002 = vmatprep.mubr.msk.f32.mxu0 %vm565_vm0, %v21967_v13 }
 0x95f   : > { %18025 = vmatprep.subr.mxu0 %v21963_v30 }
 0x961   : > { %18003 = vmatmul.mubr.msk.f32.gmra.mrb[50].mxu0 %vm565_vm0, %v21973_v32 }
 0x962   : > { %18005 = vmatprep.mubr.msk.f32.mxu0 %vm565_vm0, %v21977_v33 }
 0x965   : > { %18006 = vmatmul.mubr.msk.f32.gmra.mrb[52].mxu0 %vm565_vm0, %v21981_v34 }
 0x966   : > { %18008 = vmatprep.mubr.msk.f32.mxu0 %vm565_vm0, %v21985_v35 }
 0x969   : > { %18009 = vmatmul.mubr.msk.f32.gmra.mrb[54].mxu0 %vm565_vm0, %v21989_v38 }
 0x96a   : > { %18013 = vmatprep.mubr.msk.f32.mxu0 %vm565_vm0, %v21993_v39 }
 0x96d   : > { %18014 = vmatmul.mubr.msk.f32.vlgmr.msra.gmra.mrb[48].mxu0 %vm565_vm0, %v21997_v56 }
 0x96e   : > { %18026 = vmatpush3.msra.mxu0 %v21963_v30  ;;  %18016 = vmatprep.mubr.msk.f32.mxu0 %vm565_vm0, %v22003_v53 }
 0x96f   : > { %18039 = vmatprep.subr.mxu0 %v21999_v41 }
 0x971   : > { %18017 = vmatmul.mubr.msk.f32.gmra.mrb[50].mxu0 %vm565_vm0, %v22009_v2 }
 0x972   : > { %18019 = vmatprep.mubr.msk.f32.mxu0 %vm565_vm0, %v22013_v57 }
 0x975   : > { %18020 = vmatmul.mubr.msk.f32.gmra.mrb[52].mxu0 %vm565_vm0, %v22017_v9 }
 0x976   : > { %18022 = vmatprep.mubr.msk.f32.mxu0 %vm565_vm0, %v22021_v4 }
 0x979   : > { %18023 = vmatmul.mubr.msk.f32.gmra.mrb[54].mxu0 %vm565_vm0, %v22025_v12 }
 0x97a   : > { %18027 = vmatprep.mubr.msk.f32.mxu0 %vm565_vm0, %v22029_v62 }
 0x97d   : > { %18028 = vmatmul.mubr.msk.f32.vlgmr.msra.gmra.mrb[48].mxu0 %vm565_vm0, %v22033_v14 }
 0x97e   : > { %18040 = vmatpush3.msra.mxu0 %v21999_v41  ;;  %18030 = vmatprep.mubr.msk.f32.mxu0 %vm565_vm0, %v22039_v16 }
 0x97f   : > { %18053 = vmatprep.subr.mxu0 %v22035_v15 }
 0x981   : > { %18031 = vmatmul.mubr.msk.f32.gmra.mrb[50].mxu0 %vm565_vm0, %v22045_v55 }
 0x982   : > { %18033 = vmatprep.mubr.msk.f32.mxu0 %vm565_vm0, %v22049_v21 }
 0x985   : > { %18034 = vmatmul.mubr.msk.f32.gmra.mrb[52].mxu0 %vm565_vm0, %v22053_v59 }
 0x986   : > { %18036 = vmatprep.mubr.msk.f32.mxu0 %vm565_vm0, %v22057_v22 }
 0x989   : > { %18037 = vmatmul.mubr.msk.f32.gmra.mrb[54].mxu0 %vm565_vm0, %v22061_v42 }
 0x98a   : > { %18041 = vmatprep.mubr.msk.f32.mxu0 %vm565_vm0, %v22065_v43 }
 0x98d   : > { %18042 = vmatmul.mubr.msk.f32.vlgmr.msra.gmra.mrb[48].mxu0 %vm565_vm0, %v22069_v44 }
 0x98e   : > { %18054 = vmatpush3.msra.mxu0 %v22035_v15  ;;  %18044 = vmatprep.mubr.msk.f32.mxu0 %vm565_vm0, %v22075_v3 }
 0x98f   : > { %18067 = vmatprep.subr.mxu0 %v22071_v37 }
 0x991   : > { %18045 = vmatmul.mubr.msk.f32.gmra.mrb[50].mxu0 %vm565_vm0, %v22081_v6 }
 0x992   : > { %18047 = vmatprep.mubr.msk.f32.mxu0 %vm565_vm0, %v22085_v24 }
 0x995   : > { %18048 = vmatmul.mubr.msk.f32.gmra.mrb[52].mxu0 %vm565_vm0, %v22089_v26 }
 0x996   : > { %18050 = vmatprep.mubr.msk.f32.mxu0 %vm565_vm0, %v22093_v63 }
 0x999   : > { %18051 = vmatmul.mubr.msk.f32.gmra.mrb[54].mxu0 %vm565_vm0, %v22097_v8 }
 0x99a   : > { %18055 = vmatprep.mubr.msk.f32.mxu0 %vm565_vm0, %v21919_v49 }
 0x99d   : > { %18056 = vmatmul.mubr.msk.f32.vlgmr.msra.gmra.mrb[48].mxu0 %vm565_vm0, %v21928_v52 }
 0x99e   : > { %18068 = vmatpush3.msra.mxu0 %v22071_v37  ;;  %18058 = vmatprep.mubr.msk.f32.mxu0 %vm565_vm0, %v21936_v10 }
 0x99f   : > { %18081 = vmatprep.subr.mxu0 %v22103_v45 }
 0x9a1   : > { %18059 = vmatmul.mubr.msk.f32.gmra.mrb[50].mxu0 %vm565_vm0, %v21941_v1 }
 0x9a2   : > { %18061 = vmatprep.mubr.msk.f32.mxu0 %vm565_vm0, %v21945_v25 }
 0x9a5   : > { %18062 = vmatmul.mubr.msk.f32.gmra.mrb[52].mxu0 %vm565_vm0, %v21949_v28 }
 0x9a6   : > { %18064 = vmatprep.mubr.msk.f32.mxu0 %vm565_vm0, %v21955_v36 }
 0x9a9   : > { %18065 = vmatmul.mubr.msk.f32.gmra.mrb[54].mxu0 %vm565_vm0, %v22119_v31 }
 0x9aa   : > { %18069 = vmatprep.mubr.msk.f32.mxu0 %vm565_vm0, %v21844_v23 }
 0x9ad   : > { %18070 = vmatmul.mubr.msk.f32.vlgmr.msra.gmra.mrb[48].mxu0 %vm565_vm0, %v21848_v27 }
 0x9ae   : > { %18082 = vmatpush3.msra.mxu0 %v22103_v45  ;;  %18072 = vmatprep.mubr.msk.f32.mxu0 %vm565_vm0, %v21852_v20 }
 0x9af   : > { %18235 = vmatprep.subr.mxu0 %v21913_v46 }
 0x9b1   : > { %18073 = vmatmul.mubr.msk.f32.gmra.mrb[50].mxu0 %vm565_vm0, %v21856_v19 }
 0x9b2   : > { %18075 = vmatprep.mubr.msk.f32.mxu0 %vm565_vm0, %v21860_v17 }
 0x9b5   : > { %18076 = vmatmul.mubr.msk.f32.gmra.mrb[52].mxu0 %vm565_vm0, %v21864_v5 }
 0x9b6   : > { %18078 = vmatprep.mubr.msk.f32.mxu0 %vm565_vm0, %v21868_v11 }
 0x9b9   : > { %18079 = vmatmul.mubr.msk.f32.gmra.mrb[54].mxu0 %vm565_vm0, %v22139_v58 }
 0x9ba   : > { %18083 = vmatprep.mubr.msk.f32.mxu0 %vm565_vm0, %v21961_v29 }
 0x9bd   : > { %18084 = vmatmul.mubr.msk.f32.vlgmr.msra.gmra.mrb[48].mxu0 %vm565_vm0, %v21967_v13 }
 0x9be   : > { %18086 = vmatprep.mubr.msk.f32.mxu0 %vm565_vm0, %v21973_v32  ;;  %18236 = vmatpush3.msra.mxu0 %v21913_v46 }
 0x9bf   : > { %18249 = vmatprep.subr.mxu0 %v21828_v18 }
 0x9c1   : > { %18087 = vmatmul.mubr.msk.f32.gmra.mrb[50].mxu0 %vm565_vm0, %v21977_v33 }
 0x9c2   : > { %18089 = vmatprep.mubr.msk.f32.mxu0 %vm565_vm0, %v21981_v34 }
 0x9c5   : > { %18090 = vmatmul.mubr.msk.f32.gmra.mrb[52].mxu0 %vm565_vm0, %v21985_v35 }
 0x9c6   : > { %18092 = vmatprep.mubr.msk.f32.mxu0 %vm565_vm0, %v21989_v38 }
 0x9c9   : > { %18093 = vmatmul.mubr.msk.f32.gmra.mrb[54].mxu0 %vm565_vm0, %v22159_v47 }
 0xa90   : > { %v18085_v40 = vpop.f32.mrb[48].mxu0 }
 0xa91   : > { %v10539_v48 = vadd.f32 %v18085_v40, %v22163_v51  ;;  %v10485_v60 = vpop.f32.mrb[49].mxu0 }
 0xa92   : > { %v10538_v31 = vadd.f32 %v22163_v51, %v10485_v60 }
 0xa93   : > { %v10547_v25 = vmax.f32 %v10539_v48, 0.0 }
 0xa94   : > { %v10546_v36 = vmax.f32 %v10538_v31, 0.0  ;;  %v18088_v28 = vpop.f32.mrb[50].mxu0 }
 0xa95   : > { %v10541_v1 = vadd.f32 %v18088_v28, %v22163_v51  ;;  %v10495_v10 = vpop.f32.mrb[51].mxu0 }
 0xa96   : > { %v10540_v52 = vadd.f32 %v22163_v51, %v10495_v10  ;;  %18097 = vmatprep.mubr.msk.f32.mxu1 %vm565_vm0, %v10546_v36 }
 0xa97   : > { %18098 = vmatmul.mubr.msk.f32.vlgmr.msra.gmra.mrb[48].mxu1 %vm565_vm0, %v10547_v25  ;;  %v10549_v40 = vmax.f32 %v10541_v1, 0.0 }
 0xa98   : > { %v10548_v49 = vmax.f32 %v10540_v52, 0.0  ;;  %18110 = vmatpush3.msra.mxu1 %v21828_v18  ;;  %v18091_v12 = vpop.f32.mrb[52].mxu0 }
 0xa99   : > { %v10543_v4 = vadd.f32 %v18091_v12, %v22163_v51  ;;  %v10505_v60 = vpop.f32.mrb[53].mxu0  ;;  %18123 = vmatprep.subr.mxu1 %v21872_v54 }
 0xa9a   : > { %v10542_v31 = vadd.f32 %v22163_v51, %v10505_v60  ;;  %18100 = vmatprep.mubr.msk.f32.mxu1 %vm565_vm0, %v10548_v49  ;;  %v22220_v49 = vld [vmem:[#allocation3 + $0x201] sm:$0xff] }
 0xa9b   : > { %18101 = vmatmul.mubr.msk.f32.gmra.mrb[50].mxu1 %vm565_vm0, %v10549_v40  ;;  %v10551_v36 = vmax.f32 %v10543_v4, 0.0  ;;  %v22230_v4 = vld [vmem:[#allocation3 + $0x231] sm:$0xff]  ;;  %v22234_v40 = vld [vmem:[#allocation3 + $0x249] sm:$0xff]  ;;  %v22238_v60 = vld [vmem:[#allocation3 + $0x261] sm:$0xff] }
 0xa9c   : > { %v10550_v10 = vmax.f32 %v10542_v31, 0.0  ;;  %v18094_v28 = vpop.f32.mrb[54].mxu0  ;;  %v22242_v31 = vld [vmem:[#allocation3 + $0x279] sm:$0xff] }
 0xa9d   : > { %v10545_v52 = vadd.f32 %v18094_v28, %v22163_v51  ;;  %v10515_v25 = vpop.f32.mrb[55].mxu0  ;;  %v22286_v28 = vld [vmem:[#allocation3 + $0x21] sm:$0xff] }
 0xa9e   : > { %v10544_v48 = vadd.f32 %v22163_v51, %v10515_v25  ;;  %18103 = vmatprep.mubr.msk.f32.mxu1 %vm565_vm0, %v10550_v10  ;;  %v22246_v10 = vld [vmem:[#allocation3 + $0x291] sm:$0xff]  ;;  %v22300_v25 = vld [vmem:[#allocation3 + $0x69] sm:$0xff] }
 0xa9f   : > { %18104 = vmatmul.mubr.msk.f32.gmra.mrb[52].mxu1 %vm565_vm0, %v10551_v36  ;;  %v10553_v12 = vmax.f32 %v10545_v52, 0.0  ;;  %v22290_v36 = vld [vmem:[#allocation3 + $0x39] sm:$0xff]  ;;  %v22294_v52 = vld [vmem:[#allocation3 + $0x51] sm:$0xff] }
 0xaa0   : > { %v10552_v1 = vmax.f32 %v10544_v48, 0.0  ;;  %v22304_v48 = vld [vmem:[#allocation3 + $0x81] sm:$0xff] }
 0xaa2   : > { %18106 = vmatprep.mubr.msk.f32.mxu1 %vm565_vm0, %v10552_v1  ;;  %v22308_v1 = vld [vmem:[#allocation3 + $0x99] sm:$0xff] }
 0xaa3   : > { %18107 = vmatmul.mubr.msk.f32.gmra.mrb[54].mxu1 %vm565_vm0, %v10553_v12  ;;  %v22312_v12 = vld [vmem:[#allocation3 + $0xb1] sm:$0xff] }
 0xaa4   : > { %18111 = vmatprep.mubr.msk.f32.mxu1 %vm565_vm0, %v21953_v7  ;;  %v22224_v7 = vld [vmem:[#allocation3 + $0x219] sm:$0xff]  ;;  %23025 = vst [vmem:[#allocation40_spill] sm:$0xff] %v22312_v12 }
 0xaa7   : > { %18112 = vmatmul.mubr.msk.f32.vlgmr.msra.gmra.mrb[56].mxu1 %vm565_vm0, %v21961_v29 }
 0xaa8   : > { %18124 = vmatpush3.msra.mxu1 %v21872_v54  ;;  %18114 = vmatprep.mubr.msk.f32.mxu1 %vm565_vm0, %v21967_v13 }
 0xaa9   : > { %18137 = vmatprep.subr.mxu1 %v21876_v0 }
 0xaab   : > { %18115 = vmatmul.mubr.msk.f32.gmra.mrb[58].mxu1 %vm565_vm0, %v21973_v32 }
 0xaac   : > { %18117 = vmatprep.mubr.msk.f32.mxu1 %vm565_vm0, %v21977_v33 }
 0xaaf   : > { %18118 = vmatmul.mubr.msk.f32.gmra.mrb[60].mxu1 %vm565_vm0, %v21981_v34 }
 0xab0   : > { %18120 = vmatprep.mubr.msk.f32.mxu1 %vm565_vm0, %v21985_v35 }
 0xab3   : > { %18121 = vmatmul.mubr.msk.f32.gmra.mrb[62].mxu1 %vm565_vm0, %v21989_v38 }
 0xab4   : > { %18125 = vmatprep.mubr.msk.f32.mxu1 %vm565_vm0, %v21838_v61  ;;  %v10997_v61 = vld [vmem:[#allocation3 + $0x1e9] sm:$0xff] }
 0xab7   : > { %18126 = vmatmul.mubr.msk.f32.vlgmr.msra.gmra.mrb[56].mxu1 %vm565_vm0, %v21844_v23 }
 0xab8   : > { %18138 = vmatpush3.msra.mxu1 %v21876_v0  ;;  %18128 = vmatprep.mubr.msk.f32.mxu1 %vm565_vm0, %v21848_v27 }
 0xab9   : > { %18151 = vmatprep.subr.mxu1 %v21921_v50 }
 0xabb   : > { %18129 = vmatmul.mubr.msk.f32.gmra.mrb[58].mxu1 %vm565_vm0, %v21852_v20 }
 0xabc   : > { %18131 = vmatprep.mubr.msk.f32.mxu1 %vm565_vm0, %v21856_v19 }
 0xabf   : > { %18132 = vmatmul.mubr.msk.f32.gmra.mrb[60].mxu1 %vm565_vm0, %v21860_v17 }
 0xac0   : > { %18134 = vmatprep.mubr.msk.f32.mxu1 %vm565_vm0, %v21864_v5 }
 0xac3   : > { %18135 = vmatmul.mubr.msk.f32.gmra.mrb[62].mxu1 %vm565_vm0, %v21868_v11 }
 0xac4   : > { %18139 = vmatprep.mubr.msk.f32.mxu1 %vm565_vm0, %v10997_v61  ;;  %v22316_v61 = vld [vmem:[#allocation3 + $0xc9] sm:$0xff] }
 0xac5   : > { %23026 = vst [vmem:[#allocation42_spill] sm:$0xff] %v22316_v61 }
 0xac7   : > { %18140 = vmatmul.mubr.msk.f32.vlgmr.msra.gmra.mrb[56].mxu1 %vm565_vm0, %v22220_v49 }
 0xac8   : > { %18152 = vmatpush3.msra.mxu1 %v21921_v50  ;;  %18142 = vmatprep.mubr.msk.f32.mxu1 %vm565_vm0, %v22224_v7 }
 0xac9   : > { %18165 = vmatprep.subr.mxu1 %v21963_v30 }
 0xacb   : > { %18143 = vmatmul.mubr.msk.f32.gmra.mrb[58].mxu1 %vm565_vm0, %v22230_v4 }
 0xacc   : > { %18145 = vmatprep.mubr.msk.f32.mxu1 %vm565_vm0, %v22234_v40 }
 0xacf   : > { %18146 = vmatmul.mubr.msk.f32.gmra.mrb[60].mxu1 %vm565_vm0, %v22238_v60 }
 0xad0   : > { %18148 = vmatprep.mubr.msk.f32.mxu1 %vm565_vm0, %v22242_v31 }
 0xad3   : > { %18149 = vmatmul.mubr.msk.f32.gmra.mrb[62].mxu1 %vm565_vm0, %v22246_v10 }
 0xad4   : > { %18153 = vmatprep.mubr.msk.f32.mxu1 %vm565_vm0, %v22029_v62 }
 0xad7   : > { %18154 = vmatmul.mubr.msk.f32.vlgmr.msra.gmra.mrb[56].mxu1 %vm565_vm0, %v22033_v14 }
 0xad8   : > { %18166 = vmatpush3.msra.mxu1 %v21963_v30  ;;  %18156 = vmatprep.mubr.msk.f32.mxu1 %vm565_vm0, %v22039_v16 }
 0xad9   : > { %18179 = vmatprep.subr.mxu1 %v21999_v41 }
 0xadb   : > { %18157 = vmatmul.mubr.msk.f32.gmra.mrb[58].mxu1 %vm565_vm0, %v22045_v55 }
 0xadc   : > { %18159 = vmatprep.mubr.msk.f32.mxu1 %vm565_vm0, %v22049_v21 }
 0xadf   : > { %18160 = vmatmul.mubr.msk.f32.gmra.mrb[60].mxu1 %vm565_vm0, %v22053_v59 }
 0xae0   : > { %18162 = vmatprep.mubr.msk.f32.mxu1 %vm565_vm0, %v22057_v22 }
 0xae3   : > { %18163 = vmatmul.mubr.msk.f32.gmra.mrb[62].mxu1 %vm565_vm0, %v22061_v42 }
 0xae4   : > { %18167 = vmatprep.mubr.msk.f32.mxu1 %vm565_vm0, %v22065_v43 }
 0xae7   : > { %18168 = vmatmul.mubr.msk.f32.vlgmr.msra.gmra.mrb[56].mxu1 %vm565_vm0, %v22069_v44 }
 0xae8   : > { %18180 = vmatpush3.msra.mxu1 %v21999_v41  ;;  %18170 = vmatprep.mubr.msk.f32.mxu1 %vm565_vm0, %v22075_v3 }
 0xae9   : > { %18193 = vmatprep.subr.mxu1 %v22035_v15 }
 0xaeb   : > { %18171 = vmatmul.mubr.msk.f32.gmra.mrb[58].mxu1 %vm565_vm0, %v22081_v6 }
 0xaec   : > { %18173 = vmatprep.mubr.msk.f32.mxu1 %vm565_vm0, %v22085_v24 }
 0xaef   : > { %18174 = vmatmul.mubr.msk.f32.gmra.mrb[60].mxu1 %vm565_vm0, %v22089_v26 }
 0xaf0   : > { %18176 = vmatprep.mubr.msk.f32.mxu1 %vm565_vm0, %v22093_v63 }
 0xaf3   : > { %18177 = vmatmul.mubr.msk.f32.gmra.mrb[62].mxu1 %vm565_vm0, %v22097_v8 }
 0xaf4   : > { %18181 = vmatprep.mubr.msk.f32.mxu1 %vm565_vm0, %v22286_v28 }
 0xaf7   : > { %18182 = vmatmul.mubr.msk.f32.vlgmr.msra.gmra.mrb[56].mxu1 %vm565_vm0, %v22290_v36 }
 0xaf8   : > { %18194 = vmatpush3.msra.mxu1 %v22035_v15  ;;  %18184 = vmatprep.mubr.msk.f32.mxu1 %vm565_vm0, %v22294_v52 }
 0xaf9   : > { %18207 = vmatprep.subr.mxu1 %v22071_v37 }
 0xafb   : > { %18185 = vmatmul.mubr.msk.f32.gmra.mrb[58].mxu1 %vm565_vm0, %v22300_v25 }
 0xafc   : > { %18187 = vmatprep.mubr.msk.f32.mxu1 %vm565_vm0, %v22304_v48 }
 0xaff   : > { %18188 = vmatmul.mubr.msk.f32.gmra.mrb[60].mxu1 %vm565_vm0, %v22308_v1 }
 0xb00   : > { %18190 = vmatprep.mubr.msk.f32.mxu1 %vm565_vm0, %v22312_v12 }
 0xb03   : > { %18191 = vmatmul.mubr.msk.f32.gmra.mrb[62].mxu1 %vm565_vm0, %v22316_v61  ;;  %v10560_v61 = vld [vmem:[%s20635_s2 + $0x30] sm:$0xff] }
 0xb04   : > { %18195 = vmatprep.mubr.msk.f32.mxu1 %vm565_vm0, %v21844_v23  ;;  %v22371_v23 = vld [vmem:[#allocation3 + $0x2a9] sm:$0xff] }
 0xb05   : > { %23027 = vst [vmem:[#allocation43_spill] sm:$0xff] %v22371_v23 }
 0xb07   : > { %18196 = vmatmul.mubr.msk.f32.vlgmr.msra.gmra.mrb[56].mxu1 %vm565_vm0, %v21848_v27  ;;  %v22375_v27 = vld [vmem:[#allocation21] ss:$0 sm:$0xff] }
 0xb08   : > { %18208 = vmatpush3.msra.mxu1 %v22071_v37  ;;  %18198 = vmatprep.mubr.msk.f32.mxu1 %vm565_vm0, %v21852_v20  ;;  %v10555_v20 = vld [vmem:[%s20635_s2 + $0x8] sm:$0xff] }
 0xb09   : > { %18221 = vmatprep.subr.mxu1 %v22103_v45 }
 0xb0b   : > { %18199 = vmatmul.mubr.msk.f32.gmra.mrb[58].mxu1 %vm565_vm0, %v21856_v19 }
 0xb0c   : > { %18201 = vmatprep.mubr.msk.f32.mxu1 %vm565_vm0, %v21860_v17 }
 0xb0f   : > { %18202 = vmatmul.mubr.msk.f32.gmra.mrb[60].mxu1 %vm565_vm0, %v21864_v5  ;;  %v10554_v5 = vld [vmem:[%s20635_s2] sm:$0xff] }
 0xb10   : > { %18204 = vmatprep.mubr.msk.f32.mxu1 %vm565_vm0, %v21868_v11 }
 0xb13   : > { %18205 = vmatmul.mubr.msk.f32.gmra.mrb[62].mxu1 %vm565_vm0, %v22139_v58 }
 0xb14   : > { %18209 = vmatprep.mubr.msk.f32.mxu1 %vm565_vm0, %v21961_v29 }
 0xb17   : > { %18210 = vmatmul.mubr.msk.f32.vlgmr.msra.gmra.mrb[56].mxu1 %vm565_vm0, %v21967_v13 }
 0xb18   : > { %18222 = vmatpush3.msra.mxu1 %v22103_v45  ;;  %18212 = vmatprep.mubr.msk.f32.mxu1 %vm565_vm0, %v21973_v32 }
 0xb19   : > { %18375 = vmatprep.subr.mxu1 %v21913_v46 }
 0xb1b   : > { %18213 = vmatmul.mubr.msk.f32.gmra.mrb[58].mxu1 %vm565_vm0, %v21977_v33 }
 0xb1c   : > { %18215 = vmatprep.mubr.msk.f32.mxu1 %vm565_vm0, %v21981_v34 }
 0xb1f   : > { %18216 = vmatmul.mubr.msk.f32.gmra.mrb[60].mxu1 %vm565_vm0, %v21985_v35 }
 0xb20   : > { %18218 = vmatprep.mubr.msk.f32.mxu1 %vm565_vm0, %v21989_v38 }
 0xb23   : > { %18219 = vmatmul.mubr.msk.f32.gmra.mrb[62].mxu1 %vm565_vm0, %v22159_v47 }
 0xb24   : > { %18223 = vmatprep.mubr.msk.f32.mxu1 %vm565_vm0, %v22220_v49 }
 0xb27   : > { %18224 = vmatmul.mubr.msk.f32.vlgmr.msra.gmra.mrb[56].mxu1 %vm565_vm0, %v22224_v7 }
 0xb28   : > { %18226 = vmatprep.mubr.msk.f32.mxu1 %vm565_vm0, %v22230_v4  ;;  %18376 = vmatpush3.msra.mxu1 %v21913_v46 }
 0xb2b   : > { %18227 = vmatmul.mubr.msk.f32.gmra.mrb[58].mxu1 %vm565_vm0, %v22234_v40  ;;  %v10557_v40 = vld [vmem:[%s20635_s2 + $0x18] sm:$0xff] }
 0xb2c   : > { %18229 = vmatprep.mubr.msk.f32.mxu1 %vm565_vm0, %v22238_v60 }
 0xb2f   : > { %18230 = vmatmul.mubr.msk.f32.gmra.mrb[60].mxu1 %vm565_vm0, %v22242_v31 }
 0xb30   : > { %18232 = vmatprep.mubr.msk.f32.mxu1 %vm565_vm0, %v22246_v10  ;;  %v10556_v10 = vld [vmem:[%s20635_s2 + $0x10] sm:$0xff] }
 0xb33   : > { %18233 = vmatmul.mubr.msk.f32.gmra.mrb[62].mxu1 %vm565_vm0, %v22371_v23 }
 0xb6a   : > { %v18099_v19 = vpop.f32.mrb[48].mxu1 }
 0xb6b   : > { %v10692_v17 = vadd.f32 %v18099_v19, %v10555_v20  ;;  %v10652_v11 = vpop.f32.mrb[49].mxu1 }
 0xb6c   : > { %v10691_v49 = vadd.f32 %v10652_v11, %v10554_v5  ;;  %v10559_v5 = vld [vmem:[%s20635_s2 + $0x28] sm:$0xff] }
 0xb6d   : > { %v10706_v7 = vadd.f32 %v22375_v27, %v10692_v17 }
 0xb6e   : > { %v10705_v4 = vadd.f32 %v22375_v27, %v10691_v49  ;;  %v18102_v60 = vpop.f32.mrb[50].mxu1 }
 0xb6f   : > { %10714 = vst.msk [vmem:[%s20635_s2 + $0x8] sm:$0xff] %vm565_vm0, %v10706_v7  ;;  %v10694_v31 = vadd.f32 %v18102_v60, %v10557_v40  ;;  %v10662_v23 = vpop.f32.mrb[51].mxu1  ;;  %v10558_v7 = vld [vmem:[%s20635_s2 + $0x20] sm:$0xff] }
 0xb70   : > { %10713 = vst.msk [vmem:[%s20635_s2] sm:$0xff] %vm565_vm0, %v10705_v4  ;;  %v10693_v20 = vadd.f32 %v10662_v23, %v10556_v10 }
 0xb71   : > { %v10708_v19 = vadd.f32 %v22375_v27, %v10694_v31  ;;  %v10561_v31 = vld [vmem:[%s20635_s2 + $0x38] sm:$0xff] }
 0xb72   : > { %v10707_v17 = vadd.f32 %v22375_v27, %v10693_v20  ;;  %v18105_v11 = vpop.f32.mrb[52].mxu1 }
 0xb73   : > { %10716 = vst.msk [vmem:[%s20635_s2 + $0x18] sm:$0xff] %vm565_vm0, %v10708_v19  ;;  %v10696_v49 = vadd.f32 %v18105_v11, %v10559_v5  ;;  %v10672_v40 = vpop.f32.mrb[53].mxu1 }
 0xb74   : > { %10715 = vst.msk [vmem:[%s20635_s2 + $0x10] sm:$0xff] %vm565_vm0, %v10707_v17  ;;  %v10695_v4 = vadd.f32 %v10672_v40, %v10558_v7 }
 0xb75   : > { %v10710_v23 = vadd.f32 %v22375_v27, %v10696_v49 }
 0xb76   : > { %v10709_v60 = vadd.f32 %v22375_v27, %v10695_v4  ;;  %v18108_v10 = vpop.f32.mrb[54].mxu1 }
 0xb77   : > { %10718 = vst.msk [vmem:[%s20635_s2 + $0x28] sm:$0xff] %vm565_vm0, %v10710_v23  ;;  %v10698_v20 = vadd.f32 %v18108_v10, %v10561_v31  ;;  %v10682_v12 = vpop.f32.mrb[55].mxu1 }
 0xb78   : > { %10717 = vst.msk [vmem:[%s20635_s2 + $0x20] sm:$0xff] %vm565_vm0, %v10709_v60  ;;  %v10697_v19 = vadd.f32 %v10682_v12, %v10560_v61 }
 0xb79   : > { %v10712_v5 = vadd.f32 %v22375_v27, %v10698_v20 }
 0xb7a   : > { %v10711_v11 = vadd.f32 %v22375_v27, %v10697_v19 }
 0xb7b   : > { %10720 = vst.msk [vmem:[%s20635_s2 + $0x38] sm:$0xff] %vm565_vm0, %v10712_v5 }
 0xb7c   : > { %10719 = vst.msk [vmem:[%s20635_s2 + $0x30] sm:$0xff] %vm565_vm0, %v10711_v11 }
 0xbfa   : > { %v18225_v17 = vpop.f32.mrb[56].mxu1 }
 0xbfb   : > { %v12020_v49 = vadd.f32 %v18225_v17, %v22163_v51  ;;  %v11972_v7 = vpop.f32.mrb[57].mxu1 }
 0xbfc   : > { %v12019_v40 = vadd.f32 %v22163_v51, %v11972_v7 }
 0xbfd   : > { %v12028_v31 = vmax.f32 %v12020_v49, 0.0 }
 0xbfe   : > { %v12027_v4 = vmax.f32 %v12019_v40, 0.0  ;;  %v18228_v23 = vpop.f32.mrb[58].mxu1 }
 0xbff   : > { %v12022_v60 = vadd.f32 %v18228_v23, %v22163_v51  ;;  %v11982_v12 = vpop.f32.mrb[59].mxu1 }
 0xc00   : > { %v12021_v61 = vadd.f32 %v22163_v51, %v11982_v12  ;;  %18237 = vmatprep.mubr.msk.f32.mxu0 %vm565_vm0, %v12027_v4  ;;  %v23034_v12 = vld [vmem:[#allocation35_spill] sm:$0xff] }
 0xc01   : > { %18238 = vmatmul.mubr.msk.f32.vlgmr.msra.gmra.mrb[56].mxu0 %vm565_vm0, %v12028_v31  ;;  %v12030_v19 = vmax.f32 %v12022_v60, 0.0 }
 0xc02   : > { %v12029_v10 = vmax.f32 %v12021_v61, 0.0  ;;  %18250 = vmatpush3.msra.mxu0 %v21828_v18  ;;  %v18231_v20 = vpop.f32.mrb[60].mxu1  ;;  %v23035_v61 = vld [vmem:[#allocation37_spill] sm:$0xff] }
 0xc03   : > { %v12024_v5 = vadd.f32 %v18231_v20, %v22163_v51  ;;  %v11992_v11 = vpop.f32.mrb[61].mxu1  ;;  %18263 = vmatprep.subr.mxu0 %v21872_v54  ;;  %v23037_v20 = vld [vmem:[#allocation41_spill] sm:$0xff] }
 0xc04   : > { %v12023_v17 = vadd.f32 %v22163_v51, %v11992_v11  ;;  %18240 = vmatprep.mubr.msk.f32.mxu0 %vm565_vm0, %v12029_v10  ;;  %v23036_v10 = vld [vmem:[#allocation36_spill] sm:$0xff]  ;;  %v22513_v11 = vld [vmem:[#allocation3 + $0x248] sm:$0xff] }
 0xc05   : > { %18241 = vmatmul.mubr.msk.f32.gmra.mrb[58].mxu0 %vm565_vm0, %v12030_v19  ;;  %v12032_v40 = vmax.f32 %v12024_v5, 0.0  ;;  %v22503_v19 = vld [vmem:[#allocation3 + $0x218] sm:$0xff]  ;;  %v22507_v5 = vld [vmem:[#allocation3 + $0x230] sm:$0xff] }
 0xc06   : > { %v12031_v49 = vmax.f32 %v12023_v17, 0.0  ;;  %v18234_v7 = vpop.f32.mrb[62].mxu1  ;;  %v22517_v17 = vld [vmem:[#allocation3 + $0x260] sm:$0xff] }
 0xc07   : > { %v12026_v4 = vadd.f32 %v18234_v7, %v22163_v51  ;;  %v12002_v23 = vpop.f32.mrb[63].mxu1 }
 0xc08   : > { %v12025_v18 = vadd.f32 %v22163_v51, %v12002_v23  ;;  %18243 = vmatprep.mubr.msk.f32.mxu0 %vm565_vm0, %v12031_v49  ;;  %v22521_v49 = vld [vmem:[#allocation3 + $0x278] sm:$0xff] }
 0xc09   : > { %18244 = vmatmul.mubr.msk.f32.gmra.mrb[60].mxu0 %vm565_vm0, %v12032_v40  ;;  %v12034_v60 = vmax.f32 %v12026_v4, 0.0  ;;  %v13688_v23 = vld [vmem:[#allocation16 + $0x8] sm:$0xff] }
 0xc0a   : > { %v12033_v31 = vmax.f32 %v12025_v18, 0.0  ;;  %18389 = vmatprep.subr.mxu1 %v13688_v23 }
 0xc0c   : > { %18246 = vmatprep.mubr.msk.f32.mxu0 %vm565_vm0, %v12033_v31 }
 0xc0d   : > { %18247 = vmatmul.mubr.msk.f32.gmra.mrb[62].mxu0 %vm565_vm0, %v12034_v60 }
 0xc0e   : > { %18251 = vmatprep.mubr.msk.f32.mxu0 %vm565_vm0, %v22029_v62  ;;  %v23032_v62 = vld [vmem:[#allocation33_spill] sm:$0xff] }
 0xc11   : > { %18252 = vmatmul.mubr.msk.f32.vlgmr.msra.gmra.mrb[64].mxu0 %vm565_vm0, %v22033_v14 }
 0xc12   : > { %18264 = vmatpush3.msra.mxu0 %v21872_v54  ;;  %18254 = vmatprep.mubr.msk.f32.mxu0 %vm565_vm0, %v22039_v16  ;;  %v23028_v54 = vld [vmem:[#allocation39_spill] sm:$0xff] }
 0xc13   : > { %18277 = vmatprep.subr.mxu0 %v21876_v0 }
 0xc15   : > { %18255 = vmatmul.mubr.msk.f32.gmra.mrb[66].mxu0 %vm565_vm0, %v22045_v55 }
 0xc16   : > { %18257 = vmatprep.mubr.msk.f32.mxu0 %vm565_vm0, %v22049_v21 }
 0xc19   : > { %18258 = vmatmul.mubr.msk.f32.gmra.mrb[68].mxu0 %vm565_vm0, %v22053_v59 }
 0xc1a   : > { %18260 = vmatprep.mubr.msk.f32.mxu0 %vm565_vm0, %v22057_v22 }
 0xc1d   : > { %18261 = vmatmul.mubr.msk.f32.gmra.mrb[70].mxu0 %vm565_vm0, %v22061_v42 }
 0xc1e   : > { %18265 = vmatprep.mubr.msk.f32.mxu0 %vm565_vm0, %v21993_v39  ;;  %v23029_v39 = vld [vmem:[#allocation38_spill] sm:$0xff] }
 0xc21   : > { %18266 = vmatmul.mubr.msk.f32.vlgmr.msra.gmra.mrb[64].mxu0 %vm565_vm0, %v21997_v56 }
 0xc22   : > { %18278 = vmatpush3.msra.mxu0 %v21876_v0  ;;  %18268 = vmatprep.mubr.msk.f32.mxu0 %vm565_vm0, %v22003_v53  ;;  %v23030_v0 = vld [vmem:[#allocation31_spill] sm:$0xff] }
 0xc23   : > { %18291 = vmatprep.subr.mxu0 %v21921_v50 }
 0xc25   : > { %18269 = vmatmul.mubr.msk.f32.gmra.mrb[66].mxu0 %vm565_vm0, %v22009_v2 }
 0xc26   : > { %18271 = vmatprep.mubr.msk.f32.mxu0 %vm565_vm0, %v22013_v57 }
 0xc29   : > { %18272 = vmatmul.mubr.msk.f32.gmra.mrb[68].mxu0 %vm565_vm0, %v22017_v9 }
 0xc2a   : > { %18274 = vmatprep.mubr.msk.f32.mxu0 %vm565_vm0, %v23028_v54 }
 0xc2d   : > { %18275 = vmatmul.mubr.msk.f32.gmra.mrb[70].mxu0 %vm565_vm0, %v23029_v39 }
 0xc2e   : > { %18279 = vmatprep.mubr.msk.f32.mxu0 %vm565_vm0, %v22065_v43  ;;  %v23033_v43 = vld [vmem:[#allocation34_spill] sm:$0xff] }
 0xc31   : > { %18280 = vmatmul.mubr.msk.f32.vlgmr.msra.gmra.mrb[64].mxu0 %vm565_vm0, %v22069_v44 }
 0xc32   : > { %18292 = vmatpush3.msra.mxu0 %v21921_v50  ;;  %18282 = vmatprep.mubr.msk.f32.mxu0 %vm565_vm0, %v22075_v3  ;;  %v23031_v50 = vld [vmem:[#allocation32_spill] sm:$0xff] }
 0xc33   : > { %18305 = vmatprep.subr.mxu0 %v21963_v30 }
 0xc35   : > { %18283 = vmatmul.mubr.msk.f32.gmra.mrb[66].mxu0 %vm565_vm0, %v22081_v6 }
 0xc36   : > { %18285 = vmatprep.mubr.msk.f32.mxu0 %vm565_vm0, %v22085_v24 }
 0xc39   : > { %18286 = vmatmul.mubr.msk.f32.gmra.mrb[68].mxu0 %vm565_vm0, %v22089_v26 }
 0xc3a   : > { %18288 = vmatprep.mubr.msk.f32.mxu0 %vm565_vm0, %v22093_v63 }
 0xc3d   : > { %18289 = vmatmul.mubr.msk.f32.gmra.mrb[70].mxu0 %vm565_vm0, %v22097_v8 }
 0xc3e   : > { %18293 = vmatprep.mubr.msk.f32.mxu0 %vm565_vm0, %v23030_v0 }
 0xc41   : > { %18294 = vmatmul.mubr.msk.f32.vlgmr.msra.gmra.mrb[64].mxu0 %vm565_vm0, %v23031_v50 }
 0xc42   : > { %18306 = vmatpush3.msra.mxu0 %v21963_v30  ;;  %18296 = vmatprep.mubr.msk.f32.mxu0 %vm565_vm0, %v23032_v62  ;;  %v22499_v30 = vld [vmem:[#allocation3 + $0x200] sm:$0xff] }
 0xc43   : > { %18319 = vmatprep.subr.mxu0 %v21999_v41 }
 0xc45   : > { %18297 = vmatmul.mubr.msk.f32.gmra.mrb[66].mxu0 %vm565_vm0, %v23033_v43 }
 0xc46   : > { %18299 = vmatprep.mubr.msk.f32.mxu0 %vm565_vm0, %v23034_v12 }
 0xc49   : > { %18300 = vmatmul.mubr.msk.f32.gmra.mrb[68].mxu0 %vm565_vm0, %v23035_v61  ;;  %v13679_v61 = vld [vmem:[#allocation16] sm:$0xff] }
 0xc4a   : > { %18302 = vmatprep.mubr.msk.f32.mxu0 %vm565_vm0, %v23036_v10 }
 0xc4d   : > { %18303 = vmatmul.mubr.msk.f32.gmra.mrb[70].mxu0 %vm565_vm0, %v23037_v20 }
 0xc4e   : > { %18307 = vmatprep.mubr.msk.f32.mxu0 %vm565_vm0, %v22499_v30 }
 0xc51   : > { %18308 = vmatmul.mubr.msk.f32.vlgmr.msra.gmra.mrb[64].mxu0 %vm565_vm0, %v22503_v19 }
 0xc52   : > { %18320 = vmatpush3.msra.mxu0 %v21999_v41  ;;  %18310 = vmatprep.mubr.msk.f32.mxu0 %vm565_vm0, %v22507_v5  ;;  %v22525_v41 = vld [vmem:[#allocation3 + $0x290] sm:$0xff] }
 0xc53   : > { %18333 = vmatprep.subr.mxu0 %v22035_v15 }
 0xc55   : > { %18311 = vmatmul.mubr.msk.f32.gmra.mrb[66].mxu0 %vm565_vm0, %v22513_v11 }
 0xc56   : > { %18313 = vmatprep.mubr.msk.f32.mxu0 %vm565_vm0, %v22517_v17 }
 0xc59   : > { %18314 = vmatmul.mubr.msk.f32.gmra.mrb[68].mxu0 %vm565_vm0, %v22521_v49 }
 0xc5a   : > { %18316 = vmatprep.mubr.msk.f32.mxu0 %vm565_vm0, %v22525_v41 }
 0xc5d   : > { %18317 = vmatmul.mubr.msk.f32.gmra.mrb[70].mxu0 %vm565_vm0, %v22139_v58  ;;  %v16104_v58 = vld [vmem:[%s20635_s2 + $0x70] sm:$0xff] }
 0xc5e   : > { %18321 = vmatprep.mubr.msk.f32.mxu0 %vm565_vm0, %v21961_v29  ;;  %v13063_v29 = vld [vmem:[#allocation3 + $0x1cf] sm:$0xff] }
 0xc61   : > { %18322 = vmatmul.mubr.msk.f32.vlgmr.msra.gmra.mrb[64].mxu0 %vm565_vm0, %v21967_v13  ;;  %v22582_v13 = vld [vmem:[#allocation3 + $0xe0] sm:$0xff] }
 0xc62   : > { %18334 = vmatpush3.msra.mxu0 %v22035_v15  ;;  %18324 = vmatprep.mubr.msk.f32.mxu0 %vm565_vm0, %v21973_v32  ;;  %v22601_v32 = vld [vmem:[#allocation3 + $0x1d0] sm:$0xff]  ;;  %v16100_v15 = vld [vmem:[%s20635_s2 + $0x50] sm:$0xff] }
 0xc63   : > { %18347 = vmatprep.subr.mxu0 %v22071_v37 }
 0xc65   : > { %18325 = vmatmul.mubr.msk.f32.gmra.mrb[66].mxu0 %vm565_vm0, %v21977_v33 }
 0xc66   : > { %18327 = vmatprep.mubr.msk.f32.mxu0 %vm565_vm0, %v21981_v34 }
 0xc69   : > { %18328 = vmatmul.mubr.msk.f32.gmra.mrb[68].mxu0 %vm565_vm0, %v21985_v35  ;;  %v16098_v35 = vld [vmem:[%s20635_s2 + $0x40] sm:$0xff] }
 0xc6a   : > { %18330 = vmatprep.mubr.msk.f32.mxu0 %vm565_vm0, %v21989_v38 }
 0xc6d   : > { %18331 = vmatmul.mubr.msk.f32.gmra.mrb[70].mxu0 %vm565_vm0, %v22159_v47 }
 0xc6e   : > { %18335 = vmatprep.mubr.msk.f32.mxu0 %vm565_vm0, %v21997_v56 }
 0xc71   : > { %18336 = vmatmul.mubr.msk.f32.vlgmr.msra.gmra.mrb[64].mxu0 %vm565_vm0, %v22003_v53 }
 0xc72   : > { %18348 = vmatpush3.msra.mxu0 %v22071_v37  ;;  %18338 = vmatprep.mubr.msk.f32.mxu0 %vm565_vm0, %v22009_v2  ;;  %v16102_v37 = vld [vmem:[%s20635_s2 + $0x60] sm:$0xff] }
 0xc73   : > { %18361 = vmatprep.subr.mxu0 %v22103_v45 }
 0xc75   : > { %18339 = vmatmul.mubr.msk.f32.gmra.mrb[66].mxu0 %vm565_vm0, %v22013_v57  ;;  %v16101_v57 = vld [vmem:[%s20635_s2 + $0x58] sm:$0xff] }
 0xc76   : > { %18341 = vmatprep.mubr.msk.f32.mxu0 %vm565_vm0, %v22017_v9 }
 0xc79   : > { %18342 = vmatmul.mubr.msk.f32.gmra.mrb[68].mxu0 %vm565_vm0, %v23028_v54 }
 0xc7a   : > { %18344 = vmatprep.mubr.msk.f32.mxu0 %vm565_vm0, %v23029_v39 }
 0xc7d   : > { %18345 = vmatmul.mubr.msk.f32.gmra.mrb[70].mxu0 %vm565_vm0, %v13063_v29 }
 0xc7e   : > { %18349 = vmatprep.mubr.msk.f32.mxu0 %vm565_vm0, %v22033_v14 }
 0xc81   : > { %18350 = vmatmul.mubr.msk.f32.vlgmr.msra.gmra.mrb[64].mxu0 %vm565_vm0, %v22039_v16 }
 0xc82   : > { %18362 = vmatpush3.msra.mxu0 %v22103_v45  ;;  %18352 = vmatprep.mubr.msk.f32.mxu0 %vm565_vm0, %v22045_v55 }
 0xc83   : > { %18515 = vmatprep.subr.mxu0 %v21913_v46 }
 0xc85   : > { %18353 = vmatmul.mubr.msk.f32.gmra.mrb[66].mxu0 %vm565_vm0, %v22049_v21 }
 0xc86   : > { %18355 = vmatprep.mubr.msk.f32.mxu0 %vm565_vm0, %v22053_v59 }
 0xc89   : > { %18356 = vmatmul.mubr.msk.f32.gmra.mrb[68].mxu0 %vm565_vm0, %v22057_v22  ;;  %v16103_v22 = vld [vmem:[%s20635_s2 + $0x68] sm:$0xff] }
 0xc8a   : > { %18358 = vmatprep.mubr.msk.f32.mxu0 %vm565_vm0, %v22061_v42 }
 0xc8d   : > { %18359 = vmatmul.mubr.msk.f32.gmra.mrb[70].mxu0 %vm565_vm0, %v22582_v13 }
 0xc8e   : > { %18363 = vmatprep.mubr.msk.f32.mxu0 %vm565_vm0, %v22069_v44 }
 0xc91   : > { %18364 = vmatmul.mubr.msk.f32.vlgmr.msra.gmra.mrb[64].mxu0 %vm565_vm0, %v22075_v3 }
 0xc92   : > { %18366 = vmatprep.mubr.msk.f32.mxu0 %vm565_vm0, %v22081_v6  ;;  %18516 = vmatpush3.msra.mxu0 %v21913_v46  ;;  %v16099_v46 = vld [vmem:[%s20635_s2 + $0x48] sm:$0xff] }
 0xc95   : > { %18367 = vmatmul.mubr.msk.f32.gmra.mrb[66].mxu0 %vm565_vm0, %v22085_v24 }
 0xc96   : > { %18369 = vmatprep.mubr.msk.f32.mxu0 %vm565_vm0, %v22089_v26 }
 0xc99   : > { %18370 = vmatmul.mubr.msk.f32.gmra.mrb[68].mxu0 %vm565_vm0, %v22093_v63  ;;  %v16105_v63 = vld [vmem:[%s20635_s2 + $0x78] sm:$0xff] }
 0xc9a   : > { %18372 = vmatprep.mubr.msk.f32.mxu0 %vm565_vm0, %v22097_v8 }
 0xc9d   : > { %18373 = vmatmul.mubr.msk.f32.gmra.mrb[70].mxu0 %vm565_vm0, %v22601_v32 }
 0xcd4   : > { %v18239_v33 = vpop.f32.mrb[56].mxu0 }
 0xcd5   : > { %v12173_v34 = vadd.f32 %v18239_v33, %v16099_v46  ;;  %v12133_v38 = vpop.f32.mrb[57].mxu0 }
 0xcd6   : > { %v12172_v56 = vadd.f32 %v16098_v35, %v12133_v38 }
 0xcd7   : > { %v12181_v53 = vadd.f32 %v22375_v27, %v12173_v34 }
 0xcd8   : > { %v12180_v2 = vadd.f32 %v22375_v27, %v12172_v56  ;;  %v18242_v9 = vpop.f32.mrb[58].mxu0 }
 0xcd9   : > { %16115 = vst.msk [vmem:[%s20635_s2 + $0x48] sm:$0xff] %vm565_vm0, %v12181_v53  ;;  %v12175_v14 = vadd.f32 %v18242_v9, %v16101_v57  ;;  %v12143_v16 = vpop.f32.mrb[59].mxu0 }
 0xcda   : > { %16114 = vst.msk [vmem:[%s20635_s2 + $0x40] sm:$0xff] %vm565_vm0, %v12180_v2  ;;  %v12174_v55 = vadd.f32 %v16100_v15, %v12143_v16  ;;  %v13680_v15 = vld [vmem:[#allocation3 + $0x110] sm:$0xff]  ;;  %v22654_v16 = vld [vmem:[#allocation3 + $0x128] sm:$0xff] }
 0xcdb   : > { %v12183_v21 = vadd.f32 %v22375_v27, %v12175_v14 }
 0xcdc   : > { %v12182_v59 = vadd.f32 %v22375_v27, %v12174_v55  ;;  %v18245_v42 = vpop.f32.mrb[60].mxu0  ;;  %v13955_v55 = vld [vmem:[#allocation16 + $0x10] sm:$0xff] }
 0xcdd   : > { %16117 = vst.msk [vmem:[%s20635_s2 + $0x58] sm:$0xff] %vm565_vm0, %v12183_v21  ;;  %v12177_v44 = vadd.f32 %v18245_v42, %v16103_v22  ;;  %v12153_v3 = vpop.f32.mrb[61].mxu0  ;;  %v22662_v21 = vld [vmem:[#allocation3 + $0x158] sm:$0xff]  ;;  %v22670_v22 = vld [vmem:[#allocation3 + $0x188] sm:$0xff]  ;;  %v22674_v42 = vld [vmem:[#allocation3 + $0x1a0] sm:$0xff] }
 0xcde   : > { %16116 = vst.msk [vmem:[%s20635_s2 + $0x50] sm:$0xff] %vm565_vm0, %v12182_v59  ;;  %v12176_v6 = vadd.f32 %v16102_v37, %v12153_v3  ;;  %v22666_v59 = vld [vmem:[#allocation3 + $0x170] sm:$0xff]  ;;  %v13671_v37 = vld [vmem:[#allocation3 + $0x20] sm:$0xff]  ;;  %v22683_v3 = vld [vmem:[#allocation3 + $0x38] sm:$0xff] }
 0xcdf   : > { %v12185_v24 = vadd.f32 %v22375_v27, %v12177_v44  ;;  %v22678_v44 = vld [vmem:[#allocation3 + $0x1b8] sm:$0xff] }
 0xce0   : > { %v12184_v26 = vadd.f32 %v22375_v27, %v12176_v6  ;;  %v18248_v8 = vpop.f32.mrb[62].mxu0  ;;  %v14101_v6 = vld [vmem:[#allocation16 + $0x18] sm:$0xff] }
 0xce1   : > { %16119 = vst.msk [vmem:[%s20635_s2 + $0x68] sm:$0xff] %vm565_vm0, %v12185_v24  ;;  %v12179_v45 = vadd.f32 %v18248_v8, %v16105_v63  ;;  %v12163_v47 = vpop.f32.mrb[63].mxu0  ;;  %v22687_v24 = vld [vmem:[#allocation3 + $0x50] sm:$0xff]  ;;  %v22695_v63 = vld [vmem:[#allocation3 + $0x80] sm:$0xff]  ;;  %v22699_v8 = vld [vmem:[#allocation3 + $0x98] sm:$0xff] }
 0xce2   : > { %16118 = vst.msk [vmem:[%s20635_s2 + $0x60] sm:$0xff] %vm565_vm0, %v12184_v26  ;;  %v12178_v7 = vadd.f32 %v16104_v58, %v12163_v47  ;;  %v22691_v26 = vld [vmem:[#allocation3 + $0x68] sm:$0xff]  ;;  %v14247_v47 = vld [vmem:[#allocation16 + $0x20] sm:$0xff] }
 0xce3   : > { %v12187_v40 = vadd.f32 %v22375_v27, %v12179_v45  ;;  %v22703_v45 = vld [vmem:[#allocation3 + $0xb0] sm:$0xff]  ;;  %v22707_v58 = vld [vmem:[#allocation3 + $0xc8] sm:$0xff] }
 0xce4   : > { %v12186_v4 = vadd.f32 %v22375_v27, %v12178_v7  ;;  %v23038_v7 = vld [vmem:[#allocation40_spill] sm:$0xff] }
 0xce5   : > { %16121 = vst.msk [vmem:[%s20635_s2 + $0x78] sm:$0xff] %vm565_vm0, %v12187_v40  ;;  %v14386_v40 = vld [vmem:[#allocation3 + $0x219] sm:$0xff] }
 0xce6   : > { %16120 = vst.msk [vmem:[%s20635_s2 + $0x70] sm:$0xff] %vm565_vm0, %v12186_v4  ;;  %v14685_v4 = vld [vmem:[#allocation16 + $0x38] sm:$0xff] }
 0xd64   : > { %v18365_v18 = vpop.f32.mrb[64].mxu0 }
 0xd65   : > { %v13495_v31 = vadd.f32 %v18365_v18, %v22163_v51  ;;  %v13447_v60 = vpop.f32.mrb[65].mxu0  ;;  %v14388_v18 = vld [vmem:[#allocation3 + $0x249] sm:$0xff] }
 0xd66   : > { %v13494_v54 = vadd.f32 %v22163_v51, %v13447_v60  ;;  %v14390_v60 = vld [vmem:[#allocation3 + $0x279] sm:$0xff] }
 0xd67   : > { %v13503_v50 = vmax.f32 %v13495_v31, 0.0  ;;  %v14389_v31 = vld [vmem:[#allocation3 + $0x261] sm:$0xff] }
 0xd68   : > { %v13502_v39 = vmax.f32 %v13494_v54, 0.0  ;;  %v18368_v0 = vpop.f32.mrb[66].mxu0  ;;  %v14391_v54 = vld [vmem:[#allocation3 + $0x291] sm:$0xff] }
 0xd69   : > { %v13497_v62 = vadd.f32 %v18368_v0, %v22163_v51  ;;  %v13457_v43 = vpop.f32.mrb[67].mxu0  ;;  %v14831_v0 = vld [vmem:[#allocation16 + $0x40] sm:$0xff] }
 0xd6a   : > { %v13496_v12 = vadd.f32 %v22163_v51, %v13457_v43  ;;  %18377 = vmatprep.mubr.msk.f32.mxu1 %vm565_vm0, %v13502_v39  ;;  %v23040_v39 = vld [vmem:[#allocation43_spill] sm:$0xff]  ;;  %v14826_v43 = vld [vmem:[#allocation3 + $0x81] sm:$0xff] }
 0xd6b   : > { %18378 = vmatmul.mubr.msk.f32.vlgmr.msra.gmra.mrb[64].mxu1 %vm565_vm0, %v13503_v50  ;;  %v13505_v29 = vmax.f32 %v13497_v62, 0.0  ;;  %v14824_v50 = vld [vmem:[#allocation3 + $0x51] sm:$0xff]  ;;  %v14825_v62 = vld [vmem:[#allocation3 + $0x69] sm:$0xff] }
 0xd6c   : > { %v13504_v10 = vmax.f32 %v13496_v12, 0.0  ;;  %18390 = vmatpush3.msra.mxu1 %v13688_v23  ;;  %v18371_v20 = vpop.f32.mrb[68].mxu0  ;;  %v14387_v23 = vld [vmem:[#allocation3 + $0x231] sm:$0xff]  ;;  %v14827_v12 = vld [vmem:[#allocation3 + $0x99] sm:$0xff] }
 0xd6d   : > { %v13499_v46 = vadd.f32 %v18371_v20, %v22163_v51  ;;  %v13467_v33 = vpop.f32.mrb[69].mxu0  ;;  %18403 = vmatprep.subr.mxu1 %v13679_v61  ;;  %v16195_v20 = vld [vmem:[%s20635_s2 + $0x88] sm:$0xff] }
 0xd6e   : > { %v13498_v34 = vadd.f32 %v22163_v51, %v13467_v33  ;;  %18380 = vmatprep.mubr.msk.f32.mxu1 %vm565_vm0, %v13504_v10  ;;  %v14830_v10 = vld [vmem:[#allocation3 + $0xe1] sm:$0xff]  ;;  %v16194_v33 = vld [vmem:[%s20635_s2 + $0x80] sm:$0xff] }
 0xd6f   : > { %18381 = vmatmul.mubr.msk.f32.gmra.mrb[66].mxu1 %vm565_vm0, %v13505_v29  ;;  %v13507_v56 = vmax.f32 %v13499_v46, 0.0 }
 0xd70   : > { %v13506_v35 = vmax.f32 %v13498_v34, 0.0  ;;  %v18374_v38 = vpop.f32.mrb[70].mxu0 }
 0xd71   : > { %v13501_v53 = vadd.f32 %v18374_v38, %v22163_v51  ;;  %v13477_v2 = vpop.f32.mrb[71].mxu0 }
 0xd72   : > { %v13500_v57 = vadd.f32 %v22163_v51, %v13477_v2  ;;  %18383 = vmatprep.mubr.msk.f32.mxu1 %vm565_vm0, %v13506_v35  ;;  %v22658_v51 = vld [vmem:[#allocation3 + $0x140] sm:$0xff] }
 0xd73   : > { %18384 = vmatmul.mubr.msk.f32.gmra.mrb[68].mxu1 %vm565_vm0, %v13507_v56  ;;  %v13509_v14 = vmax.f32 %v13501_v53, 0.0  ;;  %v16197_v53 = vld [vmem:[%s20635_s2 + $0x98] sm:$0xff] }
 0xd74   : > { %v13508_v9 = vmax.f32 %v13500_v57, 0.0 }
 0xd76   : > { %18386 = vmatprep.mubr.msk.f32.mxu1 %vm565_vm0, %v13508_v9  ;;  %v16196_v9 = vld [vmem:[%s20635_s2 + $0x90] sm:$0xff] }
 0xd77   : > { %18387 = vmatmul.mubr.msk.f32.gmra.mrb[70].mxu1 %vm565_vm0, %v13509_v14 }
 0xd78   : > { %18391 = vmatprep.mubr.msk.f32.mxu1 %vm565_vm0, %v13680_v15 }
 0xd7b   : > { %18392 = vmatmul.mubr.msk.f32.vlgmr.msra.gmra.mrb[72].mxu1 %vm565_vm0, %v22654_v16 }
 0xd7c   : > { %18404 = vmatpush3.msra.mxu1 %v13679_v61  ;;  %18394 = vmatprep.mubr.msk.f32.mxu1 %vm565_vm0, %v22658_v51  ;;  %v14828_v61 = vld [vmem:[#allocation3 + $0xb1] sm:$0xff] }
 0xd7d   : > { %18417 = vmatprep.subr.mxu1 %v13955_v55 }
 0xd7f   : > { %18395 = vmatmul.mubr.msk.f32.gmra.mrb[74].mxu1 %vm565_vm0, %v22662_v21 }
 0xd80   : > { %18397 = vmatprep.mubr.msk.f32.mxu1 %vm565_vm0, %v22666_v59 }
 0xd83   : > { %18398 = vmatmul.mubr.msk.f32.gmra.mrb[76].mxu1 %vm565_vm0, %v22670_v22 }
 0xd84   : > { %18400 = vmatprep.mubr.msk.f32.mxu1 %vm565_vm0, %v22674_v42 }
 0xd87   : > { %18401 = vmatmul.mubr.msk.f32.gmra.mrb[78].mxu1 %vm565_vm0, %v22678_v44 }
 0xd88   : > { %18405 = vmatprep.mubr.msk.f32.mxu1 %vm565_vm0, %v13671_v37 }
 0xd8b   : > { %18406 = vmatmul.mubr.msk.f32.vlgmr.msra.gmra.mrb[72].mxu1 %vm565_vm0, %v22683_v3 }
 0xd8c   : > { %18418 = vmatpush3.msra.mxu1 %v13955_v55  ;;  %18408 = vmatprep.mubr.msk.f32.mxu1 %vm565_vm0, %v22687_v24 }
 0xd8d   : > { %18431 = vmatprep.subr.mxu1 %v14101_v6 }
 0xd8f   : > { %18409 = vmatmul.mubr.msk.f32.gmra.mrb[74].mxu1 %vm565_vm0, %v22691_v26 }
 0xd90   : > { %18411 = vmatprep.mubr.msk.f32.mxu1 %vm565_vm0, %v22695_v63 }
 0xd93   : > { %18412 = vmatmul.mubr.msk.f32.gmra.mrb[76].mxu1 %vm565_vm0, %v22699_v8 }
 0xd94   : > { %18414 = vmatprep.mubr.msk.f32.mxu1 %vm565_vm0, %v22703_v45 }
 0xd97   : > { %18415 = vmatmul.mubr.msk.f32.gmra.mrb[78].mxu1 %vm565_vm0, %v22707_v58 }
 0xd98   : > { %18419 = vmatprep.mubr.msk.f32.mxu1 %vm565_vm0, %v22286_v28  ;;  %v23039_v28 = vld [vmem:[#allocation42_spill] sm:$0xff] }
 0xd9b   : > { %18420 = vmatmul.mubr.msk.f32.vlgmr.msra.gmra.mrb[72].mxu1 %vm565_vm0, %v22290_v36  ;;  %v14393_v36 = vld [vmem:[#allocation16 + $0x28] sm:$0xff] }
 0xd9c   : > { %18432 = vmatpush3.msra.mxu1 %v14101_v6  ;;  %18422 = vmatprep.mubr.msk.f32.mxu1 %vm565_vm0, %v22294_v52  ;;  %v14100_v52 = vld [vmem:[#allocation3 + $0x2a8] sm:$0xff] }
 0xd9d   : > { %18445 = vmatprep.subr.mxu1 %v14247_v47  ;;  %v16201_v6 = vld [vmem:[%s20635_s2 + $0xb8] sm:$0xff] }
 0xd9f   : > { %18423 = vmatmul.mubr.msk.f32.gmra.mrb[74].mxu1 %vm565_vm0, %v22300_v25  ;;  %v14239_v25 = vld [vmem:[#allocation3 + $0x2f0] sm:$0xff] }
 0xda0   : > { %18425 = vmatprep.mubr.msk.f32.mxu1 %vm565_vm0, %v22304_v48  ;;  %v14240_v48 = vld [vmem:[#allocation3 + $0x308] sm:$0xff] }
 0xda3   : > { %18426 = vmatmul.mubr.msk.f32.gmra.mrb[76].mxu1 %vm565_vm0, %v22308_v1  ;;  %v14539_v1 = vld [vmem:[#allocation16 + $0x30] sm:$0xff] }
 0xda4   : > { %18428 = vmatprep.mubr.msk.f32.mxu1 %vm565_vm0, %v23038_v7 }
 0xda7   : > { %18429 = vmatmul.mubr.msk.f32.gmra.mrb[78].mxu1 %vm565_vm0, %v23039_v28  ;;  %v19293_v28 = vld [vmem:[#allocation18] ss:$0 sm:$0xff] }
 0xda8   : > { %18433 = vmatprep.mubr.msk.f32.mxu1 %vm565_vm0, %v22499_v30  ;;  %v14241_v30 = vld [vmem:[#allocation3 + $0x320] sm:$0xff] }
 0xdab   : > { %18434 = vmatmul.mubr.msk.f32.vlgmr.msra.gmra.mrb[72].mxu1 %vm565_vm0, %v22503_v19  ;;  %v14242_v19 = vld [vmem:[#allocation3 + $0x338] sm:$0xff] }
 0xdac   : > { %18446 = vmatpush3.msra.mxu1 %v14247_v47  ;;  %18436 = vmatprep.mubr.msk.f32.mxu1 %vm565_vm0, %v22507_v5  ;;  %v14243_v5 = vld [vmem:[#allocation3 + $0x350] sm:$0xff] }
 0xdad   : > { %18459 = vmatprep.subr.mxu1 %v14393_v36 }
 0xdaf   : > { %18437 = vmatmul.mubr.msk.f32.gmra.mrb[74].mxu1 %vm565_vm0, %v22513_v11  ;;  %v14244_v11 = vld [vmem:[#allocation3 + $0x368] sm:$0xff] }
 0xdb0   : > { %18439 = vmatprep.mubr.msk.f32.mxu1 %vm565_vm0, %v22517_v17  ;;  %v14245_v17 = vld [vmem:[#allocation3 + $0x380] sm:$0xff] }
 0xdb3   : > { %18440 = vmatmul.mubr.msk.f32.gmra.mrb[76].mxu1 %vm565_vm0, %v22521_v49  ;;  %v14246_v49 = vld [vmem:[#allocation3 + $0x398] sm:$0xff] }
 0xdb4   : > { %18442 = vmatprep.mubr.msk.f32.mxu1 %vm565_vm0, %v22525_v41  ;;  %v14385_v41 = vld [vmem:[#allocation3 + $0x201] sm:$0xff] }
 0xdb7   : > { %18443 = vmatmul.mubr.msk.f32.gmra.mrb[78].mxu1 %vm565_vm0, %v14100_v52 }
 0xdb8   : > { %18447 = vmatprep.mubr.msk.f32.mxu1 %vm565_vm0, %v14239_v25 }
 0xdbb   : > { %18448 = vmatmul.mubr.msk.f32.vlgmr.msra.gmra.mrb[72].mxu1 %vm565_vm0, %v14240_v48 }
 0xdbc   : > { %18460 = vmatpush3.msra.mxu1 %v14393_v36  ;;  %18450 = vmatprep.mubr.msk.f32.mxu1 %vm565_vm0, %v14241_v30 }
 0xdbd   : > { %18473 = vmatprep.subr.mxu1 %v14539_v1 }
 0xdbf   : > { %18451 = vmatmul.mubr.msk.f32.gmra.mrb[74].mxu1 %vm565_vm0, %v14242_v19 }
 0xdc0   : > { %18453 = vmatprep.mubr.msk.f32.mxu1 %vm565_vm0, %v14243_v5 }
 0xdc3   : > { %18454 = vmatmul.mubr.msk.f32.gmra.mrb[76].mxu1 %vm565_vm0, %v14244_v11 }
 0xdc4   : > { %18456 = vmatprep.mubr.msk.f32.mxu1 %vm565_vm0, %v14245_v17 }
 0xdc7   : > { %18457 = vmatmul.mubr.msk.f32.gmra.mrb[78].mxu1 %vm565_vm0, %v14246_v49 }
 0xdc8   : > { %18461 = vmatprep.mubr.msk.f32.mxu1 %vm565_vm0, %v14385_v41 }
 0xdcb   : > { %18462 = vmatmul.mubr.msk.f32.vlgmr.msra.gmra.mrb[72].mxu1 %vm565_vm0, %v14386_v40 }
 0xdcc   : > { %18474 = vmatpush3.msra.mxu1 %v14539_v1  ;;  %18464 = vmatprep.mubr.msk.f32.mxu1 %vm565_vm0, %v14387_v23 }
 0xdcd   : > { %18487 = vmatprep.subr.mxu1 %v14685_v4 }
 0xdcf   : > { %18465 = vmatmul.mubr.msk.f32.gmra.mrb[74].mxu1 %vm565_vm0, %v14388_v18 }
 0xdd0   : > { %18467 = vmatprep.mubr.msk.f32.mxu1 %vm565_vm0, %v14389_v31 }
 0xdd3   : > { %18468 = vmatmul.mubr.msk.f32.gmra.mrb[76].mxu1 %vm565_vm0, %v14390_v60 }
 0xdd4   : > { %18470 = vmatprep.mubr.msk.f32.mxu1 %vm565_vm0, %v14391_v54 }
 0xdd7   : > { %18471 = vmatmul.mubr.msk.f32.gmra.mrb[78].mxu1 %vm565_vm0, %v23040_v39 }
 0xdd8   : > { %18475 = vmatprep.mubr.msk.f32.mxu1 %vm565_vm0, %v22683_v3 }
 0xddb   : > { %18476 = vmatmul.mubr.msk.f32.vlgmr.msra.gmra.mrb[72].mxu1 %vm565_vm0, %v22687_v24 }
 0xddc   : > { %18488 = vmatpush3.msra.mxu1 %v14685_v4  ;;  %18478 = vmatprep.mubr.msk.f32.mxu1 %vm565_vm0, %v22691_v26 }
 0xddd   : > { %18501 = vmatprep.subr.mxu1 %v14831_v0 }
 0xddf   : > { %18479 = vmatmul.mubr.msk.f32.gmra.mrb[74].mxu1 %vm565_vm0, %v22695_v63  ;;  %v16200_v63 = vld [vmem:[%s20635_s2 + $0xb0] sm:$0xff] }
 0xde0   : > { %18481 = vmatprep.mubr.msk.f32.mxu1 %vm565_vm0, %v22699_v8 }
 0xde3   : > { %18482 = vmatmul.mubr.msk.f32.gmra.mrb[76].mxu1 %vm565_vm0, %v22703_v45 }
 0xde4   : > { %18484 = vmatprep.mubr.msk.f32.mxu1 %vm565_vm0, %v22707_v58 }
 0xde7   : > { %18485 = vmatmul.mubr.msk.f32.gmra.mrb[78].mxu1 %vm565_vm0, %v22582_v13  ;;  %v14823_v13 = vld [vmem:[#allocation3 + $0x39] sm:$0xff] }
 0xde8   : > { %18489 = vmatprep.mubr.msk.f32.mxu1 %vm565_vm0, %v22654_v16 }
 0xdeb   : > { %18490 = vmatmul.mubr.msk.f32.vlgmr.msra.gmra.mrb[72].mxu1 %vm565_vm0, %v22658_v51  ;;  %v16199_v51 = vld [vmem:[%s20635_s2 + $0xa8] sm:$0xff] }
 0xdec   : > { %18502 = vmatpush3.msra.mxu1 %v14831_v0  ;;  %18492 = vmatprep.mubr.msk.f32.mxu1 %vm565_vm0, %v22662_v21 }
 0xdef   : > { %18493 = vmatmul.mubr.msk.f32.gmra.mrb[74].mxu1 %vm565_vm0, %v22666_v59 }
 0xdf0   : > { %18495 = vmatprep.mubr.msk.f32.mxu1 %vm565_vm0, %v22670_v22  ;;  %v16198_v22 = vld [vmem:[%s20635_s2 + $0xa0] sm:$0xff] }
 0xdf3   : > { %18496 = vmatmul.mubr.msk.f32.gmra.mrb[76].mxu1 %vm565_vm0, %v22674_v42 }
 0xdf4   : > { %18498 = vmatprep.mubr.msk.f32.mxu1 %vm565_vm0, %v22678_v44 }
 0xdf7   : > { %18499 = vmatmul.mubr.msk.f32.gmra.mrb[78].mxu1 %vm565_vm0, %v22601_v32  ;;  %v14829_v32 = vld [vmem:[#allocation3 + $0xc9] sm:$0xff] }
 0xdf8   : > { %18503 = vmatprep.mubr.msk.f32.mxu1 %vm565_vm0, %v14823_v13 }
 0xdfb   : > { %18504 = vmatmul.mubr.msk.f32.vlgmr.msra.gmra.mrb[72].mxu1 %vm565_vm0, %v14824_v50 }
 0xdfc   : > { %18506 = vmatprep.mubr.msk.f32.mxu1 %vm565_vm0, %v14825_v62  ;;  %v16291_v62 = vld [vmem:[%s20635_s2 + $0xc8] sm:$0xff] }
 0xdff   : > { %18507 = vmatmul.mubr.msk.f32.gmra.mrb[74].mxu1 %vm565_vm0, %v14826_v43 }
 0xe00   : > { %18509 = vmatprep.mubr.msk.f32.mxu1 %vm565_vm0, %v14827_v12 }
 0xe03   : > { %18510 = vmatmul.mubr.msk.f32.gmra.mrb[76].mxu1 %vm565_vm0, %v14828_v61  ;;  %v16290_v61 = vld [vmem:[%s20635_s2 + $0xc0] sm:$0xff] }
 0xe04   : > { %18512 = vmatprep.mubr.msk.f32.mxu1 %vm565_vm0, %v14829_v32 }
 0xe07   : > { %18513 = vmatmul.mubr.msk.f32.gmra.mrb[78].mxu1 %vm565_vm0, %v14830_v10 }
 0xe3e   : > { %v18379_v29 = vpop.f32.mrb[64].mxu1 }
 0xe3f   : > { %v13648_v46 = vadd.f32 %v18379_v29, %v16195_v20  ;;  %v13608_v34 = vpop.f32.mrb[65].mxu1 }
 0xe40   : > { %v13647_v35 = vadd.f32 %v16194_v33, %v13608_v34 }
 0xe41   : > { %v13656_v38 = vadd.f32 %v22375_v27, %v13648_v46  ;;  %v16293_v46 = vld [vmem:[%s20635_s2 + $0xd8] sm:$0xff] }
 0xe42   : > { %v13655_v56 = vadd.f32 %v22375_v27, %v13647_v35  ;;  %v18382_v2 = vpop.f32.mrb[66].mxu1  ;;  %v16292_v35 = vld [vmem:[%s20635_s2 + $0xd0] sm:$0xff] }
 0xe43   : > { %16211 = vst.msk [vmem:[%s20635_s2 + $0x88] sm:$0xff] %vm565_vm0, %v13656_v38  ;;  %v13650_v57 = vadd.f32 %v18382_v2, %v16197_v53  ;;  %v13618_v14 = vpop.f32.mrb[67].mxu1 }
 0xe44   : > { %16210 = vst.msk [vmem:[%s20635_s2 + $0x80] sm:$0xff] %vm565_vm0, %v13655_v56  ;;  %v13649_v15 = vadd.f32 %v16196_v9, %v13618_v14 }
 0xe45   : > { %v13658_v16 = vadd.f32 %v22375_v27, %v13650_v57  ;;  %v16295_v57 = vld [vmem:[%s20635_s2 + $0xe8] sm:$0xff] }
 0xe46   : > { %v13657_v55 = vadd.f32 %v22375_v27, %v13649_v15  ;;  %v18385_v21 = vpop.f32.mrb[68].mxu1  ;;  %v16294_v15 = vld [vmem:[%s20635_s2 + $0xe0] sm:$0xff] }
 0xe47   : > { %16213 = vst.msk [vmem:[%s20635_s2 + $0x98] sm:$0xff] %vm565_vm0, %v13658_v16  ;;  %v13652_v59 = vadd.f32 %v18385_v21, %v16199_v51  ;;  %v13628_v42 = vpop.f32.mrb[69].mxu1 }
 0xe48   : > { %16212 = vst.msk [vmem:[%s20635_s2 + $0x90] sm:$0xff] %vm565_vm0, %v13657_v55  ;;  %v13651_v44 = vadd.f32 %v16198_v22, %v13628_v42 }
 0xe49   : > { %v13660_v37 = vadd.f32 %v22375_v27, %v13652_v59  ;;  %v16297_v59 = vld [vmem:[%s20635_s2 + $0xf8] sm:$0xff] }
 0xe4a   : > { %v13659_v3 = vadd.f32 %v22375_v27, %v13651_v44  ;;  %v18388_v24 = vpop.f32.mrb[70].mxu1  ;;  %v16296_v44 = vld [vmem:[%s20635_s2 + $0xf0] sm:$0xff] }
 0xe4b   : > { %16215 = vst.msk [vmem:[%s20635_s2 + $0xa8] sm:$0xff] %vm565_vm0, %v13660_v37  ;;  %v13654_v26 = vadd.f32 %v18388_v24, %v16201_v6  ;;  %v13638_v8 = vpop.f32.mrb[71].mxu1 }
 0xe4c   : > { %16214 = vst.msk [vmem:[%s20635_s2 + $0xa0] sm:$0xff] %vm565_vm0, %v13659_v3  ;;  %v13653_v45 = vadd.f32 %v16200_v63, %v13638_v8 }
 0xe4d   : > { %v13662_v58 = vadd.f32 %v22375_v27, %v13654_v26 }
 0xe4e   : > { %v13661_v47 = vadd.f32 %v22375_v27, %v13653_v45 }
 0xe4f   : > { %16217 = vst.msk [vmem:[%s20635_s2 + $0xb8] sm:$0xff] %vm565_vm0, %v13662_v58 }
 0xe50   : > { %16216 = vst.msk [vmem:[%s20635_s2 + $0xb0] sm:$0xff] %vm565_vm0, %v13661_v47 }
 0xece   : > { %v18505_v7 = vpop.f32.mrb[72].mxu1 }
 0xecf   : > { %v14970_v36 = vadd.f32 %v19293_v28, %v18505_v7  ;;  %v14922_v52 = vpop.f32.mrb[73].mxu1 }
 0xed0   : > { %v14969_v25 = vadd.f32 %v19293_v28, %v14922_v52 }
 0xed1   : > { %v14978_v30 = vmax.f32 %v14970_v36, 0.0 }
 0xed2   : > { %v14977_v48 = vmax.f32 %v14969_v25, 0.0  ;;  %v18508_v1 = vpop.f32.mrb[74].mxu1 }
 0xed3   : > { %v14972_v19 = vadd.f32 %v19293_v28, %v18508_v1  ;;  %v14932_v5 = vpop.f32.mrb[75].mxu1 }
 0xed4   : > { %v14971_v11 = vadd.f32 %v19293_v28, %v14932_v5  ;;  %18517 = vmatprep.mubr.msk.f32.mxu0 %vm565_vm0, %v14977_v48 }
 0xed5   : > { %18518 = vmatmul.mubr.msk.f32.vlgmr.msra.gmra.mrb[72].mxu0 %vm565_vm0, %v14978_v30  ;;  %v14980_v41 = vmax.f32 %v14972_v19, 0.0 }
 0xed6   : > { %v14979_v17 = vmax.f32 %v14971_v11, 0.0  ;;  %v18511_v49 = vpop.f32.mrb[76].mxu1 }
 0xed7   : > { %v14974_v40 = vadd.f32 %v19293_v28, %v18511_v49  ;;  %v14942_v4 = vpop.f32.mrb[77].mxu1 }
 0xed8   : > { %v14973_v23 = vadd.f32 %v19293_v28, %v14942_v4  ;;  %18520 = vmatprep.mubr.msk.f32.mxu0 %vm565_vm0, %v14979_v17 }
 0xed9   : > { %18521 = vmatmul.mubr.msk.f32.gmra.mrb[74].mxu0 %vm565_vm0, %v14980_v41  ;;  %v14982_v60 = vmax.f32 %v14974_v40, 0.0 }
 0xeda   : > { %v14981_v18 = vmax.f32 %v14973_v23, 0.0  ;;  %v18514_v31 = vpop.f32.mrb[78].mxu1 }
 0xedb   : > { %v14976_v54 = vadd.f32 %v19293_v28, %v18514_v31  ;;  %v14952_v39 = vpop.f32.mrb[79].mxu1 }
 0xedc   : > { %v14975_v0 = vadd.f32 %v19293_v28, %v14952_v39  ;;  %18523 = vmatprep.mubr.msk.f32.mxu0 %vm565_vm0, %v14981_v18 }
 0xedd   : > { %18524 = vmatmul.mubr.msk.f32.gmra.mrb[76].mxu0 %vm565_vm0, %v14982_v60  ;;  %v14984_v50 = vmax.f32 %v14976_v54, 0.0 }
 0xede   : > { %v14983_v13 = vmax.f32 %v14975_v0, 0.0 }
 0xee0   : > { %18526 = vmatprep.mubr.msk.f32.mxu0 %vm565_vm0, %v14983_v13 }
 0xee1   : > { %18527 = vmatmul.mubr.msk.f32.gmra.mrb[78].mxu0 %vm565_vm0, %v14984_v50 }
 0xfa8   : > { %v18519_v43 = vpop.f32.mrb[72].mxu0 }
 0xfa9   : > { %v15123_v12 = vadd.f32 %v18519_v43, %v16291_v62  ;;  %v15083_v32 = vpop.f32.mrb[73].mxu0 }
 0xfaa   : > { %v15122_v10 = vadd.f32 %v16290_v61, %v15083_v32 }
 0xfab   : > { %v15131_v20 = vadd.f32 %v22375_v27, %v15123_v12 }
 0xfac   : > { %v15130_v29 = vadd.f32 %v22375_v27, %v15122_v10  ;;  %v18522_v33 = vpop.f32.mrb[74].mxu0 }
 0xfad   : > { %16307 = vst.msk [vmem:[%s20635_s2 + $0xc8] sm:$0xff] %vm565_vm0, %v15131_v20  ;;  %v15125_v34 = vadd.f32 %v18522_v33, %v16293_v46  ;;  %v15093_v38 = vpop.f32.mrb[75].mxu0 }
 0xfae   : > { %16306 = vst.msk [vmem:[%s20635_s2 + $0xc0] sm:$0xff] %vm565_vm0, %v15130_v29  ;;  %v15124_v56 = vadd.f32 %v16292_v35, %v15093_v38 }
 0xfaf   : > { %v15133_v53 = vadd.f32 %v22375_v27, %v15125_v34 }
 0xfb0   : > { %v15132_v2 = vadd.f32 %v22375_v27, %v15124_v56  ;;  %v18525_v9 = vpop.f32.mrb[76].mxu0 }
 0xfb1   : > { %16309 = vst.msk [vmem:[%s20635_s2 + $0xd8] sm:$0xff] %vm565_vm0, %v15133_v53  ;;  %v15127_v14 = vadd.f32 %v18525_v9, %v16295_v57  ;;  %v15103_v16 = vpop.f32.mrb[77].mxu0 }
 0xfb2   : > { %16308 = vst.msk [vmem:[%s20635_s2 + $0xd0] sm:$0xff] %vm565_vm0, %v15132_v2  ;;  %v15126_v55 = vadd.f32 %v16294_v15, %v15103_v16 }
 0xfb3   : > { %v15135_v51 = vadd.f32 %v22375_v27, %v15127_v14 }
 0xfb4   : > { %v15134_v21 = vadd.f32 %v22375_v27, %v15126_v55  ;;  %v18528_v22 = vpop.f32.mrb[78].mxu0 }
 0xfb5   : > { %16311 = vst.msk [vmem:[%s20635_s2 + $0xe8] sm:$0xff] %vm565_vm0, %v15135_v51  ;;  %v15129_v42 = vadd.f32 %v18528_v22, %v16297_v59  ;;  %v15113_v37 = vpop.f32.mrb[79].mxu0 }
 0xfb6   : > { %16310 = vst.msk [vmem:[%s20635_s2 + $0xe0] sm:$0xff] %vm565_vm0, %v15134_v21  ;;  %v15128_v3 = vadd.f32 %v16296_v44, %v15113_v37 }
 0xfb7   : > { %v15137_v6 = vadd.f32 %v22375_v27, %v15129_v42 }
 0xfb8   : > { %v15136_v24 = vadd.f32 %v22375_v27, %v15128_v3 }
 0xfb9   : > { %16313 = vst.msk [vmem:[%s20635_s2 + $0xf8] sm:$0xff] %vm565_vm0, %v15137_v6 }
 0xfba   : > { %16312 = vst.msk [vmem:[%s20635_s2 + $0xf0] sm:$0xff] %vm565_vm0, %v15136_v24 }
 0xfbb   : > { %19617 = shalt.err (!%p19614_p3)
}
 0xfbc   : > { %s19618_s1 = scalar_lea.hbm %s22871_s0, 4096  ;;  %s19622_s25 = scalar_lea.hbm %s23041_s30, 8192 }
 0xfbd   : > { %p19619_p0 = scmp.ne.s32.totalorder %s22871_s0, %s19618_s1  ;;  %p19623_p5 = scmp.lt.u32.totalorder %s22871_s0, %s23041_s30 }
 0xfbe   : > { %p19624_p10 = scmp.lt.u32.totalorder %s19622_s25, %s19618_s1  ;;  %p19626_p11 = scmp.lt.u32.totalorder %s19618_s1, %s22871_s0 }
 0xfbf   : > { %p19620_p2 = pnand %p19619_p0, %p23042_p12 }
 0xfc0   : > { %p19625_p1 = por %p19624_p10, %p19623_p5 }
 0xfc1   : > { %p19621_p6 = pneg %p19620_p2 }
 0xfc2   : > { %p19627_p13 = por %p19626_p11, %p19625_p1 }
 0xfc4   : > { %p19628_p8 = pnand %p19627_p13, %p19621_p6 }
 0xfc6   : > { %19631 = shalt.err (!%p19628_p8)
}
 0xfc7   : > { %s19709_s12 = smov 128   ;;  %s19710_s21 = smov 8  }
 0xfc8   : > { %19179 = dma.vmem_to_hbm [thread:$0]  (%p23042_p12), %s22873_s22, 4096, %s22871_s0, %s15147_s23, %s19709_s12, %s19709_s12, %s19710_s21  }
 0xfc9 PF: > { %s15175_s28 = sand.u32 1, %s19678_s17   ;;  %p23043_p7 = scmp.ne.s32.totalorder %s22977_s11, 0 }
 0xfca   : > { %p23044_p9 = scmp.ge.s32.totalorder %s19690_s20, 2  ;;  %s15176_s1 = scalar_lea.sflag [#allocation6], %s15175_s28 }
 0xfcc   : > { %p19217_p4 = pnand %p23044_p9, %p23043_p7 }
 0xfce   : > { %19673 = dma.done.wait (!%p19217_p4), %s15176_s1, 4096  }
 0xfcf   : > { %19675 = vsyncadd (!%p19217_p4), %s15176_s1, 4294963200  ;;  %p29_p3 = scmp.ge.s32.totalorder %s20021_s27, 4   ;;  %s23045_s17 = smov %s19682_s18 }
 0xfd0   : > { %s23046_s18 = smov %s19686_s19  ;;  %s23047_s19 = smov %s20032_s29 }
 0xfd1   : > { %s23048_s20 = smov %s20021_s27  ;;  %31 = sbr.rel (!%p29_p3) target bundleno = 15 (0xf), region = 195 }
 0xfd8   :  { %15181 = vsyncpa [#allocation5], 1 }
 0xfd9   :  { %15183 = vsyncpa [#allocation5 + $0x1], 1 }
 0xfda   :  { %15184 = vsyncpa [#allocation8], 1 }
 0xfdb   :  { %15185 = vsyncpa [#allocation11], 1 }
 0xfdc   :  { %15186 = vsyncpa [#allocation14], 1 }
 0xfdd   :  { %15187 = vsyncpa [#allocation17], 1 }
 0xfde   :  { %15188 = vsyncpa [#allocation20], 1 }
 0xfdf   :  { %15189 = vsyncpa [#allocation6], 1 }
 0xfe0   :  { %15191 = vsyncpa [#allocation6 + $0x1], 1 }

</bundles_post_ra>
